<compile_context>
chip_gen: v6e
topology: v6e:2x2x1
jax: 0.10.0
libtpu: 0.0.40
codegen_flags: <defaults>
</compile_context>

<pallas_src>
import functools

import jax
import jax.numpy as jnp
from jax.experimental import pallas as pl
from jax.experimental.pallas import tpu as pltpu


# ----------------------------------------------------------------------------
# Pallas kernels
# ----------------------------------------------------------------------------

def _conv_epilogue(acc, bias, o_ref, *, bn, H, W, pool, write_halo):
    """Shared conv epilogue: bias + ReLU (+ 2x2 maxpool) + single full store."""
    cop = acc.shape[-1]
    # BN scale is already folded into the weight columns; only bias + ReLU here.
    out = jnp.maximum(acc + bias, 0.0)                       # (bn*H*W, Cop) f32
    res = out.astype(o_ref.dtype).reshape(bn, H, W, cop)     # cast once, then pool in bf16
    if pool:
        # 2x2 maxpool via reshape + max (stays on the VPU max slot; no
        # size-1 slice/concat loops).
        res = res.reshape(bn, H, W // 2, 2, cop).max(axis=3)
        res = res.reshape(bn, H // 2, 2, W // 2, cop).max(axis=2)
    if write_halo:
        # Build the zero halo in registers so the store is ONE aligned
        # full-tile write (next conv layer then needs no XLA pad).
        res = jnp.pad(res, ((0, 0), (1, 1), (1, 1), (0, 0)))
    o_ref[...] = res


def _conv0_kernel(x_ref, w_ref, b_ref, o_ref, *, H, W, pool, write_halo):
    """Layer-0 conv on a pre-packed im2col input.

    x_ref: (bn, H, W, K0p)  bf16, K0p = round_up(9*cin, 128) (packed taps)
    w_ref: (K0p, Cop)       bf16, BN scale folded in
    b_ref: (1, Cop)         f32
    o_ref: (bn, Ho[+2], Wo[+2], Cop) bf16
    """
    bn, _, _, kp = x_ref.shape
    patch = x_ref[...].reshape(bn * H * W, kp)
    acc = jnp.dot(patch, w_ref[...], preferred_element_type=jnp.float32)
    _conv_epilogue(acc, b_ref[...], o_ref, bn=bn, H=H, W=W,
                   pool=pool, write_halo=write_halo)


def _conv_kernel(x_ref, w_ref, b_ref, o_ref, *, H, W, pool, write_halo):
    """Fused 3x3 conv (stride 1) + folded-BN bias + ReLU (+ 2x2 maxpool).

    x_ref: (bn, H+2, W+2, Cp)   bf16, zero halo, channel-padded to 128 lanes
    w_ref: (3, 3*Cp, Cop)       bf16, rows ordered (kw, kh, cin), BN scale folded
    b_ref: (1, Cop)             f32
    o_ref: (bn, Ho[+2], Wo[+2], Cop) bf16
    """
    bn = x_ref.shape[0]
    cp = x_ref.shape[3]
    cop = o_ref.shape[3]
    M = bn * H * W

    # Taps grouped per kw: one sublane-shifted slab per group, 3 accumulating
    # MXU dots with K = 3*Cp (>= 256 keeps v6e/v7x MXU fed) instead of one
    # 9*Cp-wide patch materialization.
    acc = jnp.zeros((M, cop), jnp.float32)
    for kw in range(3):
        slab = x_ref[:, :, kw:kw + W, :]                       # (bn, H+2, W, Cp)
        grp = jnp.concatenate(
            [slab[:, kh:kh + H] for kh in range(3)], axis=-1)  # (bn, H, W, 3*Cp)
        acc = acc + jnp.dot(grp.reshape(M, 3 * cp), w_ref[kw],
                            preferred_element_type=jnp.float32)

    _conv_epilogue(acc, b_ref[...], o_ref, bn=bn, H=H, W=W,
                   pool=pool, write_halo=write_halo)


def _fc_head_kernel(x_ref, w1_ref, b1_ref, w2_ref, b2_ref, w3_ref, b3_ref,
                    o_ref, acc_ref):
    """Whole FC head in one kernel: K-blocked FC1 + bias/ReLU + FC2 + FC3.

    Grid axis 0 blocks FC1's contraction dim; FC2/FC3 weights stay resident.
    Dropout(p=0.5) after FC1/FC2 is identity at inference.
    """
    k = pl.program_id(0)

    @pl.when(k == 0)
    def _init():
        acc_ref[...] = jnp.zeros_like(acc_ref)

    acc_ref[...] += jnp.dot(x_ref[...], w1_ref[...],
                            preferred_element_type=jnp.float32)

    @pl.when(k == pl.num_programs(0) - 1)
    def _finalize():
        h1 = jnp.maximum(acc_ref[...] + b1_ref[...], 0.0).astype(jnp.bfloat16)
        h2 = jnp.dot(h1, w2_ref[...],
                     preferred_element_type=jnp.float32) + b2_ref[...]
        h2 = jnp.maximum(h2, 0.0).astype(jnp.bfloat16)
        out = jnp.dot(h2, w3_ref[...],
                      preferred_element_type=jnp.float32) + b3_ref[...]
        o_ref[...] = out.astype(o_ref.dtype)


# ----------------------------------------------------------------------------
# Wrappers (BlockSpecs / grids)
# ----------------------------------------------------------------------------

_VMEM_LIMIT = 32 * 1024 * 1024   # explicit scoped-VMEM limit (safe on v5e/v6e/v7x)


def conv_block(x, layer, *, packed):
    """One fused conv+BN+ReLU(+pool) layer. grid=(N,) per-image, parallel so
    the v7x megacore shards the batch; v5e/v6e run it as a cheap serial loop."""
    w, bias = layer["w"], layer["bias"]
    pool, write_halo = layer["pool"], layer["write_halo"]
    n = x.shape[0]
    cop = w.shape[-1]

    if packed:
        _, H, W, kp = x.shape
        in_block = (1, H, W, kp)
        kernel = functools.partial(_conv0_kernel, H=H, W=W,
                                   pool=pool, write_halo=write_halo)
        w_spec = pl.BlockSpec(w.shape, lambda i: (0, 0))
    else:
        _, hp2, wp2, cp = x.shape
        H, W = hp2 - 2, wp2 - 2
        in_block = (1, hp2, wp2, cp)
        kernel = functools.partial(_conv_kernel, H=H, W=W,
                                   pool=pool, write_halo=write_halo)
        w_spec = pl.BlockSpec(w.shape, lambda i: (0, 0, 0))

    if pool:
        # TODO(synk): PyTorch MaxPool2d(2,2) floors odd spatial sizes; the fused
        #             pool assumes even H/W (true for standard VGG configs).
        assert H % 2 == 0 and W % 2 == 0
    ho, wo = (H // 2, W // 2) if pool else (H, W)
    out_h, out_w = (ho + 2, wo + 2) if write_halo else (ho, wo)

    return pl.pallas_call(
        kernel,
        out_shape=jax.ShapeDtypeStruct((n, out_h, out_w, cop), jnp.bfloat16),
        grid=(n,),
        in_specs=[
            pl.BlockSpec(in_block, lambda i: (i, 0, 0, 0)),
            w_spec,
            pl.BlockSpec((1, cop), lambda i: (0, 0)),
        ],
        out_specs=pl.BlockSpec((1, out_h, out_w, cop), lambda i: (i, 0, 0, 0)),
        compiler_params=pltpu.CompilerParams(
            dimension_semantics=("parallel",),
            vmem_limit_bytes=_VMEM_LIMIT),
    )(x, w, bias)


def fc_head(x, fc):
    """Fused FC1/ReLU/FC2/ReLU/FC3 head; FC1's K is grid-blocked."""
    n, K1 = x.shape
    hidden = fc["w2"].shape[0]
    ncp = fc["w3"].shape[1]
    tk = 512 if K1 % 512 == 0 else 128     # K1 is always a multiple of 128
    return pl.pallas_call(
        _fc_head_kernel,
        out_shape=jax.ShapeDtypeStruct((n, ncp), jnp.float32),
        grid=(K1 // tk,),
        in_specs=[
            pl.BlockSpec((n, tk), lambda k: (0, k)),
            pl.BlockSpec((tk, hidden), lambda k: (k, 0)),
            pl.BlockSpec((1, hidden), lambda k: (0, 0)),
            pl.BlockSpec((hidden, hidden), lambda k: (0, 0)),
            pl.BlockSpec((1, hidden), lambda k: (0, 0)),
            pl.BlockSpec((hidden, ncp), lambda k: (0, 0)),
            pl.BlockSpec((1, ncp), lambda k: (0, 0)),
        ],
        out_specs=pl.BlockSpec((n, ncp), lambda k: (0, 0)),
        scratch_shapes=[pltpu.VMEM((n, hidden), jnp.float32)],
        compiler_params=pltpu.CompilerParams(
            dimension_semantics=("arbitrary",),
            vmem_limit_bytes=_VMEM_LIMIT),
    )(x, fc["w1"], fc["b1"], fc["w2"], fc["b2"], fc["w3"], fc["b3"])


# ----------------------------------------------------------------------------
# Parameter construction (deterministic, synthetic)
# ----------------------------------------------------------------------------

def _cpad(c):
    return max(128, ((c + 127) // 128) * 128)


def init_vgg_params(key, in_channels, num_classes, architecture, hidden, spatial):
    assert hidden % 128 == 0, "hidden width must be a multiple of 128 lanes"
    eps = 1e-5
    keys = iter(jax.random.split(key, 128))

    # Fuse each MaxPool into the preceding conv layer.
    convs = []
    i = 0
    while i < len(architecture):
        item = architecture[i]
        if item == "M":
            # TODO(synk): a MaxPool not directly preceded by a conv has no fused kernel here.
            raise NotImplementedError("'M' must follow a conv layer")
        cout = int(item)
        pool = (i + 1 < len(architecture)) and architecture[i + 1] == "M"
        convs.append((cout, pool))
        i += 2 if pool else 1

    k0_pad = max(128, ((9 * in_channels + 127) // 128) * 128)
    params = {"conv": [], "num_classes": num_classes, "k0_pad": k0_pad}

    c, s = in_channels, spatial
    for li, (cout, pool) in enumerate(convs):
        cp_out = _cpad(cout)
        w = jax.random.normal(next(keys), (3, 3, c, cout), jnp.float32) \
            * (1.0 / (3.0 * (c ** 0.5)))
        conv_b = 0.01 * jax.random.normal(next(keys), (cout,), jnp.float32)
        gamma = 1.0 + 0.1 * jax.random.normal(next(keys), (cout,), jnp.float32)
        beta = 0.1 * jax.random.normal(next(keys), (cout,), jnp.float32)
        running_mean = jnp.zeros((cout,), jnp.float32)
        running_var = jnp.ones((cout,), jnp.float32)
        scale = gamma / jnp.sqrt(running_var + eps)
        bias = (conv_b - running_mean) * scale + beta

        # Fold the eval-BN scale into the conv weight columns (epilogue = bias+ReLU).
        w_scaled = w * scale[None, None, None, :]

        if li == 0:
            # Packed layer-0 weight: rows ordered (kh, kw, cin) with NO
            # inter-tap channel padding -> K = 9*cin rounded to one lane tile.
            w2d = jnp.zeros((k0_pad, cp_out), jnp.float32)
            w2d = w2d.at[:9 * c, :cout].set(w_scaled.reshape(9 * c, cout))
            w_packed = w2d.astype(jnp.bfloat16)
        else:
            cp_in = _cpad(c)
            w_p = jnp.zeros((3, 3, cp_in, cp_out), jnp.float32)
            w_p = w_p.at[:, :, :c, :cout].set(w_scaled)
            # (kw, kh, cin) row ordering to match the per-kw tap grouping in the kernel.
            w_packed = jnp.transpose(w_p, (1, 0, 2, 3)) \
                .reshape(3, 3 * cp_in, cp_out).astype(jnp.bfloat16)

        bias_p = jnp.zeros((1, cp_out), jnp.float32).at[0, :cout].set(bias)
        write_halo = (li != len(convs) - 1)   # last conv stores compact (no halo)
        params["conv"].append({"w": w_packed, "bias": bias_p,
                               "pool": pool, "write_halo": write_halo})
        c = cout
        if pool:
            s //= 2

    cf_pad = _cpad(c)
    flat_real = c * s * s
    dims = [flat_real, hidden, hidden, num_classes]
    fc_raw = []
    for j in range(3):
        fan_in, fan_out = dims[j], dims[j + 1]
        w = jax.random.normal(next(keys), (fan_in, fan_out), jnp.float32) \
            / (fan_in ** 0.5)
        b = 0.01 * jax.random.normal(next(keys), (fan_out,), jnp.float32)
        fc_raw.append((w, b))

    # FC1: fold the PyTorch NCHW flatten plus the NHWC channel padding into the
    # weight.  The last conv writes a compact (halo-free) tile, so K = s*s*Cpad.
    w1, b1 = fc_raw[0]
    w1_src = w1.reshape(c, s, s, hidden)                  # rows indexed (c, h, w)
    w1_4d = jnp.zeros((s, s, cf_pad, hidden), jnp.float32)
    w1_4d = w1_4d.at[:, :, :c, :].set(jnp.transpose(w1_src, (1, 2, 0, 3)))
    w1_fold = w1_4d.reshape(s * s * cf_pad, hidden)

    w2, b2 = fc_raw[1]
    w3, b3 = fc_raw[2]
    ncp = _cpad(num_classes)
    w3_p = jnp.zeros((hidden, ncp), jnp.float32).at[:, :num_classes].set(w3)
    b3_p = jnp.zeros((1, ncp), jnp.float32).at[0, :num_classes].set(b3)

    params["fc"] = {
        "w1": w1_fold.astype(jnp.bfloat16), "b1": b1.reshape(1, hidden),
        "w2": w2.astype(jnp.bfloat16),      "b2": b2.reshape(1, hidden),
        "w3": w3_p.astype(jnp.bfloat16),    "b3": b3_p,
    }
    return params


# ----------------------------------------------------------------------------
# Forward pass (mirrors VGG.forward)
# ----------------------------------------------------------------------------

def vgg_forward(x_nchw, params):
    n, cin, H, W = x_nchw.shape
    k0 = params["k0_pad"]

    # One-time boundary prep (XLA): NCHW -> NHWC, zero halo, and layer-0
    # im2col packing of (kh, kw, cin) into a single 128-lane contraction tile
    # (avoids padding cin to 128 before the 9x tap expansion).
    x = jnp.transpose(x_nchw, (0, 2, 3, 1))
    xp = jnp.pad(x, ((0, 0), (1, 1), (1, 1), (0, 0)))
    taps = [xp[:, kh:kh + H, kw:kw + W, :] for kh in range(3) for kw in range(3)]
    x0 = jnp.concatenate(taps, axis=-1)                       # (N, H, W, 9*cin)
    x0 = jnp.pad(x0, ((0, 0), (0, 0), (0, 0), (0, k0 - 9 * cin)))
    x0 = x0.astype(jnp.bfloat16)

    act = x0
    for li, layer in enumerate(params["conv"]):
        act = conv_block(act, layer, packed=(li == 0))

    # PyTorch's x.reshape(N, -1) permutation is folded into the FC1 weight;
    # the last conv output is compact (no halo), so this is a plain reshape.
    act = act.reshape(act.shape[0], -1)

    # FC1/ReLU/Dropout, FC2/ReLU/Dropout, FC3 — one fused pallas_call.
    logits = fc_head(act, params["fc"])
    return logits[:, :params["num_classes"]]


if __name__ == "__main__":
    key = jax.random.PRNGKey(0)
    kx, kp = jax.random.split(key)

    in_channels = 4
    num_classes = 10
    spatial = 16
    architecture = [8, 8, "M", 16, "M"]   # small VGG-style config
    hidden = 128                          # scaled-down stand-in for 4096

    x = jax.random.normal(kx, (2, in_channels, spatial, spatial), jnp.float32)
    params = init_vgg_params(kp, in_channels, num_classes, architecture,
                             hidden=hidden, spatial=spatial)

    fwd = jax.jit(lambda inp: vgg_forward(inp, params))
    out = jax.block_until_ready(fwd(x))
    assert out.shape == (2, num_classes), out.shape
    assert out.dtype == jnp.float32
    print("KERNEL_OK")
</pallas_src>

<mosaic_0001>
module attributes {stable_mosaic.version = 11 : i64} {
  func.func @_conv0_kernel(%arg0: i32, %arg1: memref<1x16x16x128xbf16, #tpu.memory_space<vmem>>, %arg2: memref<128x128xbf16, #tpu.memory_space<vmem>>, %arg3: memref<1x128xf32, #tpu.memory_space<vmem>>, %arg4: memref<1x18x18x128xbf16, #tpu.memory_space<vmem>>) attributes {dimension_semantics = [#tpu.dimension_semantics<parallel>], iteration_bounds = array<i64: 2>, scalar_prefetch = 0 : i64, scratch_operands = 0 : i64, tpu.core_type = #tpu.core_type<tc>, window_params = [{transform_indices = @transform_0, window_bounds = array<i64: 1, 16, 16, 128>}, {pipeline_mode = #tpu.pipeline_mode<synchronous>, transform_indices = @transform_1, window_bounds = array<i64: 128, 128>}, {pipeline_mode = #tpu.pipeline_mode<synchronous>, transform_indices = @transform_2, window_bounds = array<i64: 1, 128>}, {transform_indices = @transform_3, window_bounds = array<i64: 1, 18, 18, 128>}]} {
    %c0 = arith.constant 0 : index
    %c0_0 = arith.constant 0 : index
    %c0_1 = arith.constant 0 : index
    %c0_2 = arith.constant 0 : index
    %0 = vector.load %arg1[%c0, %c0_0, %c0_1, %c0_2] : memref<1x16x16x128xbf16, #tpu.memory_space<vmem>>, vector<1x16x16x128xbf16>
    %1 = vector.shape_cast %0 : vector<1x16x16x128xbf16> to vector<256x128xbf16>
    %c0_3 = arith.constant 0 : index
    %c0_4 = arith.constant 0 : index
    %2 = vector.load %arg2[%c0_3, %c0_4] : memref<128x128xbf16, #tpu.memory_space<vmem>>, vector<128x128xbf16>
    %cst = arith.constant dense<0.000000e+00> : vector<256x128xf32>
    %3 = tpu.matmul %1, %2, %cst {dimension_numbers = #tpu.dot_dimension_numbers<[1], [0], [0], [1], [0, 0, 1, 1], [], []>} : vector<256x128xbf16>, vector<128x128xbf16>, vector<256x128xf32> -> vector<256x128xf32>
    %c0_5 = arith.constant 0 : index
    %c0_6 = arith.constant 0 : index
    %4 = vector.load %arg3[%c0_5, %c0_6] : memref<1x128xf32, #tpu.memory_space<vmem>>, vector<1x128xf32>
    %5 = vector.broadcast %4 : vector<1x128xf32> to vector<256x128xf32>
    %6 = arith.addf %3, %5 : vector<256x128xf32>
    %cst_7 = arith.constant 0.000000e+00 : f32
    %7 = vector.broadcast %cst_7 : f32 to vector<256x128xf32>
    %8 = arith.maximumf %6, %7 : vector<256x128xf32>
    %9 = arith.truncf %8 : vector<256x128xf32> to vector<256x128xbf16>
    %10 = vector.shape_cast %9 : vector<256x128xbf16> to vector<1x16x16x128xbf16>
    %c0_i32 = arith.constant 0 : i32
    %11 = arith.sitofp %c0_i32 : i32 to bf16
    %12 = vector.broadcast %11 : bf16 to vector<1x1x16x128xbf16>
    %13 = tpu.concatenate %12, %10 in 1 : vector<1x1x16x128xbf16>, vector<1x16x16x128xbf16> -> vector<1x17x16x128xbf16>
    %14 = vector.broadcast %11 : bf16 to vector<1x1x16x128xbf16>
    %15 = tpu.concatenate %13, %14 in 1 : vector<1x17x16x128xbf16>, vector<1x1x16x128xbf16> -> vector<1x18x16x128xbf16>
    %16 = vector.broadcast %11 : bf16 to vector<1x18x1x128xbf16>
    %17 = tpu.concatenate %16, %15 in 2 : vector<1x18x1x128xbf16>, vector<1x18x16x128xbf16> -> vector<1x18x17x128xbf16>
    %18 = vector.broadcast %11 : bf16 to vector<1x18x1x128xbf16>
    %19 = tpu.concatenate %17, %18 in 2 : vector<1x18x17x128xbf16>, vector<1x18x1x128xbf16> -> vector<1x18x18x128xbf16>
    %c0_8 = arith.constant 0 : index
    %c0_9 = arith.constant 0 : index
    %c0_10 = arith.constant 0 : index
    %c0_11 = arith.constant 0 : index
    %20 = vector.load %arg4[%c0_8, %c0_9, %c0_10, %c0_11] : memref<1x18x18x128xbf16, #tpu.memory_space<vmem>>, vector<1x18x18x128xbf16>
    tpu.vector_store %arg4[%c0_8, %c0_9, %c0_10, %c0_11], %19 {strides = array<i32>} : memref<1x18x18x128xbf16, #tpu.memory_space<vmem>>, vector<1x18x18x128xbf16>,
    return
  }
  func.func @transform_0(%arg0: i32) -> (i32, i32, i32, i32) {
    %c0_i32 = arith.constant 0 : i32
    %c0_i32_0 = arith.constant 0 : i32
    %c0_i32_1 = arith.constant 0 : i32
    %c0_i32_2 = arith.constant 0 : i32
    return %arg0, %c0_i32, %c0_i32_0, %c0_i32_1 : i32, i32, i32, i32
  }
  func.func @transform_1(%arg0: i32) -> (i32, i32) {
    %c0_i32 = arith.constant 0 : i32
    %c0_i32_0 = arith.constant 0 : i32
    %c0_i32_1 = arith.constant 0 : i32
    return %c0_i32, %c0_i32_0 : i32, i32
  }
  func.func @transform_2(%arg0: i32) -> (i32, i32) {
    %c0_i32 = arith.constant 0 : i32
    %c0_i32_0 = arith.constant 0 : i32
    %c0_i32_1 = arith.constant 0 : i32
    return %c0_i32, %c0_i32_0 : i32, i32
  }
  func.func @transform_3(%arg0: i32) -> (i32, i32, i32, i32) {
    %c0_i32 = arith.constant 0 : i32
    %c0_i32_0 = arith.constant 0 : i32
    %c0_i32_1 = arith.constant 0 : i32
    %c0_i32_2 = arith.constant 0 : i32
    return %arg0, %c0_i32, %c0_i32_0, %c0_i32_1 : i32, i32, i32, i32
  }
}

module attributes {stable_mosaic.version = 11 : i64} {
  func.func @_conv_kernel(%arg0: i32, %arg1: memref<1x10x10x128xbf16, #tpu.memory_space<vmem>>, %arg2: memref<3x384x128xbf16, #tpu.memory_space<vmem>>, %arg3: memref<1x128xf32, #tpu.memory_space<vmem>>, %arg4: memref<1x4x4x128xbf16, #tpu.memory_space<vmem>>) attributes {dimension_semantics = [#tpu.dimension_semantics<parallel>], iteration_bounds = array<i64: 2>, scalar_prefetch = 0 : i64, scratch_operands = 0 : i64, tpu.core_type = #tpu.core_type<tc>, window_params = [{transform_indices = @transform_0, window_bounds = array<i64: 1, 10, 10, 128>}, {pipeline_mode = #tpu.pipeline_mode<synchronous>, transform_indices = @transform_1, window_bounds = array<i64: 3, 384, 128>}, {pipeline_mode = #tpu.pipeline_mode<synchronous>, transform_indices = @transform_2, window_bounds = array<i64: 1, 128>}, {transform_indices = @transform_3, window_bounds = array<i64: 1, 4, 4, 128>}]} {
    %cst = arith.constant 0.000000e+00 : f32
    %0 = vector.broadcast %cst : f32 to vector<64x128xf32>
    %c0 = arith.constant 0 : index
    %c0_0 = arith.constant 0 : index
    %c0_1 = arith.constant 0 : index
    %c0_2 = arith.constant 0 : index
    %1 = vector.load %arg1[%c0, %c0_0, %c0_1, %c0_2] : memref<1x10x10x128xbf16, #tpu.memory_space<vmem>>, vector<1x10x8x128xbf16>
    %2 = vector.extract_strided_slice %1 {offsets = [0, 0, 0, 0], sizes = [1, 8, 8, 128], strides = [1, 1, 1, 1]} : vector<1x10x8x128xbf16> to vector<1x8x8x128xbf16>
    %3 = vector.extract_strided_slice %1 {offsets = [0, 1, 0, 0], sizes = [1, 8, 8, 128], strides = [1, 1, 1, 1]} : vector<1x10x8x128xbf16> to vector<1x8x8x128xbf16>
    %4 = vector.extract_strided_slice %1 {offsets = [0, 2, 0, 0], sizes = [1, 8, 8, 128], strides = [1, 1, 1, 1]} : vector<1x10x8x128xbf16> to vector<1x8x8x128xbf16>
    %5 = tpu.concatenate %2, %3, %4 in 3 : vector<1x8x8x128xbf16>, vector<1x8x8x128xbf16>, vector<1x8x8x128xbf16> -> vector<1x8x8x384xbf16>
    %6 = vector.shape_cast %5 : vector<1x8x8x384xbf16> to vector<64x384xbf16>
    %c0_3 = arith.constant 0 : index
    %c0_4 = arith.constant 0 : index
    %c0_5 = arith.constant 0 : index
    %7 = vector.load %arg2[%c0_3, %c0_4, %c0_5] : memref<3x384x128xbf16, #tpu.memory_space<vmem>>, vector<1x384x128xbf16>
    %8 = vector.shape_cast %7 : vector<1x384x128xbf16> to vector<384x128xbf16>
    %cst_6 = arith.constant dense<0.000000e+00> : vector<64x128xf32>
    %9 = tpu.matmul %6, %8, %cst_6 {dimension_numbers = #tpu.dot_dimension_numbers<[1], [0], [0], [1], [0, 0, 1, 1], [], []>} : vector<64x384xbf16>, vector<384x128xbf16>, vector<64x128xf32> -> vector<64x128xf32>
    %10 = arith.addf %0, %9 : vector<64x128xf32>
    %c0_7 = arith.constant 0 : index
    %c0_8 = arith.constant 0 : index
    %c1 = arith.constant 1 : index
    %c0_9 = arith.constant 0 : index
    %11 = vector.load %arg1[%c0_7, %c0_8, %c1, %c0_9] : memref<1x10x10x128xbf16, #tpu.memory_space<vmem>>, vector<1x10x8x128xbf16>
    %12 = vector.extract_strided_slice %11 {offsets = [0, 0, 0, 0], sizes = [1, 8, 8, 128], strides = [1, 1, 1, 1]} : vector<1x10x8x128xbf16> to vector<1x8x8x128xbf16>
    %13 = vector.extract_strided_slice %11 {offsets = [0, 1, 0, 0], sizes = [1, 8, 8, 128], strides = [1, 1, 1, 1]} : vector<1x10x8x128xbf16> to vector<1x8x8x128xbf16>
    %14 = vector.extract_strided_slice %11 {offsets = [0, 2, 0, 0], sizes = [1, 8, 8, 128], strides = [1, 1, 1, 1]} : vector<1x10x8x128xbf16> to vector<1x8x8x128xbf16>
    %15 = tpu.concatenate %12, %13, %14 in 3 : vector<1x8x8x128xbf16>, vector<1x8x8x128xbf16>, vector<1x8x8x128xbf16> -> vector<1x8x8x384xbf16>
    %16 = vector.shape_cast %15 : vector<1x8x8x384xbf16> to vector<64x384xbf16>
    %c1_10 = arith.constant 1 : index
    %c0_11 = arith.constant 0 : index
    %c0_12 = arith.constant 0 : index
    %17 = vector.load %arg2[%c1_10, %c0_11, %c0_12] : memref<3x384x128xbf16, #tpu.memory_space<vmem>>, vector<1x384x128xbf16>
    %18 = vector.shape_cast %17 : vector<1x384x128xbf16> to vector<384x128xbf16>
    %cst_13 = arith.constant dense<0.000000e+00> : vector<64x128xf32>
    %19 = tpu.matmul %16, %18, %cst_13 {dimension_numbers = #tpu.dot_dimension_numbers<[1], [0], [0], [1], [0, 0, 1, 1], [], []>} : vector<64x384xbf16>, vector<384x128xbf16>, vector<64x128xf32> -> vector<64x128xf32>
    %20 = arith.addf %10, %19 : vector<64x128xf32>
    %c0_14 = arith.constant 0 : index
    %c0_15 = arith.constant 0 : index
    %c2 = arith.constant 2 : index
    %c0_16 = arith.constant 0 : index
    %21 = vector.load %arg1[%c0_14, %c0_15, %c2, %c0_16] : memref<1x10x10x128xbf16, #tpu.memory_space<vmem>>, vector<1x10x8x128xbf16>
    %22 = vector.extract_strided_slice %21 {offsets = [0, 0, 0, 0], sizes = [1, 8, 8, 128], strides = [1, 1, 1, 1]} : vector<1x10x8x128xbf16> to vector<1x8x8x128xbf16>
    %23 = vector.extract_strided_slice %21 {offsets = [0, 1, 0, 0], sizes = [1, 8, 8, 128], strides = [1, 1, 1, 1]} : vector<1x10x8x128xbf16> to vector<1x8x8x128xbf16>
    %24 = vector.extract_strided_slice %21 {offsets = [0, 2, 0, 0], sizes = [1, 8, 8, 128], strides = [1, 1, 1, 1]} : vector<1x10x8x128xbf16> to vector<1x8x8x128xbf16>
    %25 = tpu.concatenate %22, %23, %24 in 3 : vector<1x8x8x128xbf16>, vector<1x8x8x128xbf16>, vector<1x8x8x128xbf16> -> vector<1x8x8x384xbf16>
    %26 = vector.shape_cast %25 : vector<1x8x8x384xbf16> to vector<64x384xbf16>
    %c2_17 = arith.constant 2 : index
    %c0_18 = arith.constant 0 : index
    %c0_19 = arith.constant 0 : index
    %27 = vector.load %arg2[%c2_17, %c0_18, %c0_19] : memref<3x384x128xbf16, #tpu.memory_space<vmem>>, vector<1x384x128xbf16>
    %28 = vector.shape_cast %27 : vector<1x384x128xbf16> to vector<384x128xbf16>
    %cst_20 = arith.constant dense<0.000000e+00> : vector<64x128xf32>
    %29 = tpu.matmul %26, %28, %cst_20 {dimension_numbers = #tpu.dot_dimension_numbers<[1], [0], [0], [1], [0, 0, 1, 1], [], []>} : vector<64x384xbf16>, vector<384x128xbf16>, vector<64x128xf32> -> vector<64x128xf32>
    %30 = arith.addf %20, %29 : vector<64x128xf32>
    %c0_21 = arith.constant 0 : index
    %c0_22 = arith.constant 0 : index
    %31 = vector.load %arg3[%c0_21, %c0_22] : memref<1x128xf32, #tpu.memory_space<vmem>>, vector<1x128xf32>
    %32 = vector.broadcast %31 : vector<1x128xf32> to vector<64x128xf32>
    %33 = arith.addf %30, %32 : vector<64x128xf32>
    %cst_23 = arith.constant 0.000000e+00 : f32
    %34 = vector.broadcast %cst_23 : f32 to vector<64x128xf32>
    %35 = arith.maximumf %33, %34 : vector<64x128xf32>
    %36 = arith.truncf %35 : vector<64x128xf32> to vector<64x128xbf16>
    %37 = vector.shape_cast %36 : vector<64x128xbf16> to vector<1x8x8x128xbf16>
    %38 = vector.shape_cast %37 : vector<1x8x8x128xbf16> to vector<1x8x4x2x128xbf16>
    %cst_24 = arith.constant dense<0xFF80> : vector<1x8x4x128xbf16>
    %39 = vector.multi_reduction <maximumf>, %38, %cst_24 [3] : vector<1x8x4x2x128xbf16> to vector<1x8x4x128xbf16>
    %40 = vector.shape_cast %39 : vector<1x8x4x128xbf16> to vector<1x4x2x4x128xbf16>
    %cst_25 = arith.constant dense<0xFF80> : vector<1x4x4x128xbf16>
    %41 = vector.multi_reduction <maximumf>, %40, %cst_25 [2] : vector<1x4x2x4x128xbf16> to vector<1x4x4x128xbf16>
    %c0_26 = arith.constant 0 : index
    %c0_27 = arith.constant 0 : index
    %c0_28 = arith.constant 0 : index
    %c0_29 = arith.constant 0 : index
    %42 = vector.load %arg4[%c0_26, %c0_27, %c0_28, %c0_29] : memref<1x4x4x128xbf16, #tpu.memory_space<vmem>>, vector<1x4x4x128xbf16>
    tpu.vector_store %arg4[%c0_26, %c0_27, %c0_28, %c0_29], %41 {strides = array<i32>} : memref<1x4x4x128xbf16, #tpu.memory_space<vmem>>, vector<1x4x4x128xbf16>,
    return
  }
  func.func @transform_0(%arg0: i32) -> (i32, i32, i32, i32) {
    %c0_i32 = arith.constant 0 : i32
    %c0_i32_0 = arith.constant 0 : i32
    %c0_i32_1 = arith.constant 0 : i32
    %c0_i32_2 = arith.constant 0 : i32
    return %arg0, %c0_i32, %c0_i32_0, %c0_i32_1 : i32, i32, i32, i32
  }
  func.func @transform_1(%arg0: i32) -> (i32, i32, i32) {
    %c0_i32 = arith.constant 0 : i32
    %c0_i32_0 = arith.constant 0 : i32
    %c0_i32_1 = arith.constant 0 : i32
    %c0_i32_2 = arith.constant 0 : i32
    return %c0_i32, %c0_i32_0, %c0_i32_1 : i32, i32, i32
  }
  func.func @transform_2(%arg0: i32) -> (i32, i32) {
    %c0_i32 = arith.constant 0 : i32
    %c0_i32_0 = arith.constant 0 : i32
    %c0_i32_1 = arith.constant 0 : i32
    return %c0_i32, %c0_i32_0 : i32, i32
  }
  func.func @transform_3(%arg0: i32) -> (i32, i32, i32, i32) {
    %c0_i32 = arith.constant 0 : i32
    %c0_i32_0 = arith.constant 0 : i32
    %c0_i32_1 = arith.constant 0 : i32
    %c0_i32_2 = arith.constant 0 : i32
    return %arg0, %c0_i32, %c0_i32_0, %c0_i32_1 : i32, i32, i32, i32
  }
}

module attributes {stable_mosaic.version = 11 : i64} {
  func.func @_conv_kernel(%arg0: i32, %arg1: memref<1x18x18x128xbf16, #tpu.memory_space<vmem>>, %arg2: memref<3x384x128xbf16, #tpu.memory_space<vmem>>, %arg3: memref<1x128xf32, #tpu.memory_space<vmem>>, %arg4: memref<1x10x10x128xbf16, #tpu.memory_space<vmem>>) attributes {dimension_semantics = [#tpu.dimension_semantics<parallel>], iteration_bounds = array<i64: 2>, scalar_prefetch = 0 : i64, scratch_operands = 0 : i64, tpu.core_type = #tpu.core_type<tc>, window_params = [{transform_indices = @transform_0, window_bounds = array<i64: 1, 18, 18, 128>}, {pipeline_mode = #tpu.pipeline_mode<synchronous>, transform_indices = @transform_1, window_bounds = array<i64: 3, 384, 128>}, {pipeline_mode = #tpu.pipeline_mode<synchronous>, transform_indices = @transform_2, window_bounds = array<i64: 1, 128>}, {transform_indices = @transform_3, window_bounds = array<i64: 1, 10, 10, 128>}]} {
    %cst = arith.constant 0.000000e+00 : f32
    %0 = vector.broadcast %cst : f32 to vector<256x128xf32>
    %c0 = arith.constant 0 : index
    %c0_0 = arith.constant 0 : index
    %c0_1 = arith.constant 0 : index
    %c0_2 = arith.constant 0 : index
    %1 = vector.load %arg1[%c0, %c0_0, %c0_1, %c0_2] : memref<1x18x18x128xbf16, #tpu.memory_space<vmem>>, vector<1x18x16x128xbf16>
    %2 = vector.extract_strided_slice %1 {offsets = [0, 0, 0, 0], sizes = [1, 16, 16, 128], strides = [1, 1, 1, 1]} : vector<1x18x16x128xbf16> to vector<1x16x16x128xbf16>
    %3 = vector.extract_strided_slice %1 {offsets = [0, 1, 0, 0], sizes = [1, 16, 16, 128], strides = [1, 1, 1, 1]} : vector<1x18x16x128xbf16> to vector<1x16x16x128xbf16>
    %4 = vector.extract_strided_slice %1 {offsets = [0, 2, 0, 0], sizes = [1, 16, 16, 128], strides = [1, 1, 1, 1]} : vector<1x18x16x128xbf16> to vector<1x16x16x128xbf16>
    %5 = tpu.concatenate %2, %3, %4 in 3 : vector<1x16x16x128xbf16>, vector<1x16x16x128xbf16>, vector<1x16x16x128xbf16> -> vector<1x16x16x384xbf16>
    %6 = vector.shape_cast %5 : vector<1x16x16x384xbf16> to vector<256x384xbf16>
    %c0_3 = arith.constant 0 : index
    %c0_4 = arith.constant 0 : index
    %c0_5 = arith.constant 0 : index
    %7 = vector.load %arg2[%c0_3, %c0_4, %c0_5] : memref<3x384x128xbf16, #tpu.memory_space<vmem>>, vector<1x384x128xbf16>
    %8 = vector.shape_cast %7 : vector<1x384x128xbf16> to vector<384x128xbf16>
    %cst_6 = arith.constant dense<0.000000e+00> : vector<256x128xf32>
    %9 = tpu.matmul %6, %8, %cst_6 {dimension_numbers = #tpu.dot_dimension_numbers<[1], [0], [0], [1], [0, 0, 1, 1], [], []>} : vector<256x384xbf16>, vector<384x128xbf16>, vector<256x128xf32> -> vector<256x128xf32>
    %10 = arith.addf %0, %9 : vector<256x128xf32>
    %c0_7 = arith.constant 0 : index
    %c0_8 = arith.constant 0 : index
    %c1 = arith.constant 1 : index
    %c0_9 = arith.constant 0 : index
    %11 = vector.load %arg1[%c0_7, %c0_8, %c1, %c0_9] : memref<1x18x18x128xbf16, #tpu.memory_space<vmem>>, vector<1x18x16x128xbf16>
    %12 = vector.extract_strided_slice %11 {offsets = [0, 0, 0, 0], sizes = [1, 16, 16, 128], strides = [1, 1, 1, 1]} : vector<1x18x16x128xbf16> to vector<1x16x16x128xbf16>
    %13 = vector.extract_strided_slice %11 {offsets = [0, 1, 0, 0], sizes = [1, 16, 16, 128], strides = [1, 1, 1, 1]} : vector<1x18x16x128xbf16> to vector<1x16x16x128xbf16>
    %14 = vector.extract_strided_slice %11 {offsets = [0, 2, 0, 0], sizes = [1, 16, 16, 128], strides = [1, 1, 1, 1]} : vector<1x18x16x128xbf16> to vector<1x16x16x128xbf16>
    %15 = tpu.concatenate %12, %13, %14 in 3 : vector<1x16x16x128xbf16>, vector<1x16x16x128xbf16>, vector<1x16x16x128xbf16> -> vector<1x16x16x384xbf16>
    %16 = vector.shape_cast %15 : vector<1x16x16x384xbf16> to vector<256x384xbf16>
    %c1_10 = arith.constant 1 : index
    %c0_11 = arith.constant 0 : index
    %c0_12 = arith.constant 0 : index
    %17 = vector.load %arg2[%c1_10, %c0_11, %c0_12] : memref<3x384x128xbf16, #tpu.memory_space<vmem>>, vector<1x384x128xbf16>
    %18 = vector.shape_cast %17 : vector<1x384x128xbf16> to vector<384x128xbf16>
    %cst_13 = arith.constant dense<0.000000e+00> : vector<256x128xf32>
    %19 = tpu.matmul %16, %18, %cst_13 {dimension_numbers = #tpu.dot_dimension_numbers<[1], [0], [0], [1], [0, 0, 1, 1], [], []>} : vector<256x384xbf16>, vector<384x128xbf16>, vector<256x128xf32> -> vector<256x128xf32>
    %20 = arith.addf %10, %19 : vector<256x128xf32>
    %c0_14 = arith.constant 0 : index
    %c0_15 = arith.constant 0 : index
    %c2 = arith.constant 2 : index
    %c0_16 = arith.constant 0 : index
    %21 = vector.load %arg1[%c0_14, %c0_15, %c2, %c0_16] : memref<1x18x18x128xbf16, #tpu.memory_space<vmem>>, vector<1x18x16x128xbf16>
    %22 = vector.extract_strided_slice %21 {offsets = [0, 0, 0, 0], sizes = [1, 16, 16, 128], strides = [1, 1, 1, 1]} : vector<1x18x16x128xbf16> to vector<1x16x16x128xbf16>
    %23 = vector.extract_strided_slice %21 {offsets = [0, 1, 0, 0], sizes = [1, 16, 16, 128], strides = [1, 1, 1, 1]} : vector<1x18x16x128xbf16> to vector<1x16x16x128xbf16>
    %24 = vector.extract_strided_slice %21 {offsets = [0, 2, 0, 0], sizes = [1, 16, 16, 128], strides = [1, 1, 1, 1]} : vector<1x18x16x128xbf16> to vector<1x16x16x128xbf16>
    %25 = tpu.concatenate %22, %23, %24 in 3 : vector<1x16x16x128xbf16>, vector<1x16x16x128xbf16>, vector<1x16x16x128xbf16> -> vector<1x16x16x384xbf16>
    %26 = vector.shape_cast %25 : vector<1x16x16x384xbf16> to vector<256x384xbf16>
    %c2_17 = arith.constant 2 : index
    %c0_18 = arith.constant 0 : index
    %c0_19 = arith.constant 0 : index
    %27 = vector.load %arg2[%c2_17, %c0_18, %c0_19] : memref<3x384x128xbf16, #tpu.memory_space<vmem>>, vector<1x384x128xbf16>
    %28 = vector.shape_cast %27 : vector<1x384x128xbf16> to vector<384x128xbf16>
    %cst_20 = arith.constant dense<0.000000e+00> : vector<256x128xf32>
    %29 = tpu.matmul %26, %28, %cst_20 {dimension_numbers = #tpu.dot_dimension_numbers<[1], [0], [0], [1], [0, 0, 1, 1], [], []>} : vector<256x384xbf16>, vector<384x128xbf16>, vector<256x128xf32> -> vector<256x128xf32>
    %30 = arith.addf %20, %29 : vector<256x128xf32>
    %c0_21 = arith.constant 0 : index
    %c0_22 = arith.constant 0 : index
    %31 = vector.load %arg3[%c0_21, %c0_22] : memref<1x128xf32, #tpu.memory_space<vmem>>, vector<1x128xf32>
    %32 = vector.broadcast %31 : vector<1x128xf32> to vector<256x128xf32>
    %33 = arith.addf %30, %32 : vector<256x128xf32>
    %cst_23 = arith.constant 0.000000e+00 : f32
    %34 = vector.broadcast %cst_23 : f32 to vector<256x128xf32>
    %35 = arith.maximumf %33, %34 : vector<256x128xf32>
    %36 = arith.truncf %35 : vector<256x128xf32> to vector<256x128xbf16>
    %37 = vector.shape_cast %36 : vector<256x128xbf16> to vector<1x16x16x128xbf16>
    %38 = vector.shape_cast %37 : vector<1x16x16x128xbf16> to vector<1x16x8x2x128xbf16>
    %cst_24 = arith.constant dense<0xFF80> : vector<1x16x8x128xbf16>
    %39 = vector.multi_reduction <maximumf>, %38, %cst_24 [3] : vector<1x16x8x2x128xbf16> to vector<1x16x8x128xbf16>
    %40 = vector.shape_cast %39 : vector<1x16x8x128xbf16> to vector<1x8x2x8x128xbf16>
    %cst_25 = arith.constant dense<0xFF80> : vector<1x8x8x128xbf16>
    %41 = vector.multi_reduction <maximumf>, %40, %cst_25 [2] : vector<1x8x2x8x128xbf16> to vector<1x8x8x128xbf16>
    %c0_i32 = arith.constant 0 : i32
    %42 = arith.sitofp %c0_i32 : i32 to bf16
    %43 = vector.broadcast %42 : bf16 to vector<1x1x8x128xbf16>
    %44 = tpu.concatenate %43, %41 in 1 : vector<1x1x8x128xbf16>, vector<1x8x8x128xbf16> -> vector<1x9x8x128xbf16>
    %45 = vector.broadcast %42 : bf16 to vector<1x1x8x128xbf16>
    %46 = tpu.concatenate %44, %45 in 1 : vector<1x9x8x128xbf16>, vector<1x1x8x128xbf16> -> vector<1x10x8x128xbf16>
    %47 = vector.broadcast %42 : bf16 to vector<1x10x1x128xbf16>
    %48 = tpu.concatenate %47, %46 in 2 : vector<1x10x1x128xbf16>, vector<1x10x8x128xbf16> -> vector<1x10x9x128xbf16>
    %49 = vector.broadcast %42 : bf16 to vector<1x10x1x128xbf16>
    %50 = tpu.concatenate %48, %49 in 2 : vector<1x10x9x128xbf16>, vector<1x10x1x128xbf16> -> vector<1x10x10x128xbf16>
    %c0_26 = arith.constant 0 : index
    %c0_27 = arith.constant 0 : index
    %c0_28 = arith.constant 0 : index
    %c0_29 = arith.constant 0 : index
    %51 = vector.load %arg4[%c0_26, %c0_27, %c0_28, %c0_29] : memref<1x10x10x128xbf16, #tpu.memory_space<vmem>>, vector<1x10x10x128xbf16>
    tpu.vector_store %arg4[%c0_26, %c0_27, %c0_28, %c0_29], %50 {strides = array<i32>} : memref<1x10x10x128xbf16, #tpu.memory_space<vmem>>, vector<1x10x10x128xbf16>,
    return
  }
  func.func @transform_0(%arg0: i32) -> (i32, i32, i32, i32) {
    %c0_i32 = arith.constant 0 : i32
    %c0_i32_0 = arith.constant 0 : i32
    %c0_i32_1 = arith.constant 0 : i32
    %c0_i32_2 = arith.constant 0 : i32
    return %arg0, %c0_i32, %c0_i32_0, %c0_i32_1 : i32, i32, i32, i32
  }
  func.func @transform_1(%arg0: i32) -> (i32, i32, i32) {
    %c0_i32 = arith.constant 0 : i32
    %c0_i32_0 = arith.constant 0 : i32
    %c0_i32_1 = arith.constant 0 : i32
    %c0_i32_2 = arith.constant 0 : i32
    return %c0_i32, %c0_i32_0, %c0_i32_1 : i32, i32, i32
  }
  func.func @transform_2(%arg0: i32) -> (i32, i32) {
    %c0_i32 = arith.constant 0 : i32
    %c0_i32_0 = arith.constant 0 : i32
    %c0_i32_1 = arith.constant 0 : i32
    return %c0_i32, %c0_i32_0 : i32, i32
  }
  func.func @transform_3(%arg0: i32) -> (i32, i32, i32, i32) {
    %c0_i32 = arith.constant 0 : i32
    %c0_i32_0 = arith.constant 0 : i32
    %c0_i32_1 = arith.constant 0 : i32
    %c0_i32_2 = arith.constant 0 : i32
    return %arg0, %c0_i32, %c0_i32_0, %c0_i32_1 : i32, i32, i32, i32
  }
}

module attributes {stable_mosaic.version = 11 : i64} {
  func.func @_fc_head_kernel(%arg0: i32, %arg1: memref<2x512xbf16, #tpu.memory_space<vmem>>, %arg2: memref<512x128xbf16, #tpu.memory_space<vmem>>, %arg3: memref<1x128xf32, #tpu.memory_space<vmem>>, %arg4: memref<128x128xbf16, #tpu.memory_space<vmem>>, %arg5: memref<1x128xf32, #tpu.memory_space<vmem>>, %arg6: memref<128x128xbf16, #tpu.memory_space<vmem>>, %arg7: memref<1x128xf32, #tpu.memory_space<vmem>>, %arg8: memref<2x128xf32, #tpu.memory_space<vmem>>, %arg9: memref<2x128xf32, #tpu.memory_space<vmem>>) attributes {dimension_semantics = [#tpu.dimension_semantics<arbitrary>], iteration_bounds = array<i64: 4>, scalar_prefetch = 0 : i64, scratch_operands = 1 : i64, tpu.core_type = #tpu.core_type<tc>, window_params = [{transform_indices = @transform_0, window_bounds = array<i64: 2, 512>}, {transform_indices = @transform_1, window_bounds = array<i64: 512, 128>}, {pipeline_mode = #tpu.pipeline_mode<synchronous>, transform_indices = @transform_2, window_bounds = array<i64: 1, 128>}, {pipeline_mode = #tpu.pipeline_mode<synchronous>, transform_indices = @transform_3, window_bounds = array<i64: 128, 128>}, {pipeline_mode = #tpu.pipeline_mode<synchronous>, transform_indices = @transform_4, window_bounds = array<i64: 1, 128>}, {pipeline_mode = #tpu.pipeline_mode<synchronous>, transform_indices = @transform_5, window_bounds = array<i64: 128, 128>}, {pipeline_mode = #tpu.pipeline_mode<synchronous>, transform_indices = @transform_6, window_bounds = array<i64: 1, 128>}, {pipeline_mode = #tpu.pipeline_mode<synchronous>, transform_indices = @transform_7, window_bounds = array<i64: 2, 128>}]} {
    %c0_i32 = arith.constant 0 : i32
    %0 = arith.cmpi eq, %arg0, %c0_i32 : i32
    %1 = arith.extui %0 : i1 to i32
    %c0_i32_0 = arith.constant 0 : i32
    %2 = arith.cmpi ne, %1, %c0_i32_0 : i32
    scf.if %2 {
      %cst_9 = arith.constant 0.000000e+00 : f32
      %12 = vector.broadcast %cst_9 : f32 to vector<2x128xf32>
      %c0_10 = arith.constant 0 : index
      %c0_11 = arith.constant 0 : index
      %13 = vector.load %arg9[%c0_10, %c0_11] : memref<2x128xf32, #tpu.memory_space<vmem>>, vector<2x128xf32>
      tpu.vector_store %arg9[%c0_10, %c0_11], %12 {strides = array<i32>} : memref<2x128xf32, #tpu.memory_space<vmem>>, vector<2x128xf32>,
    } else {
    }
    %c0 = arith.constant 0 : index
    %c0_1 = arith.constant 0 : index
    %3 = vector.load %arg9[%c0, %c0_1] : memref<2x128xf32, #tpu.memory_space<vmem>>, vector<2x128xf32>
    %c0_2 = arith.constant 0 : index
    %c0_3 = arith.constant 0 : index
    %4 = vector.load %arg1[%c0_2, %c0_3] : memref<2x512xbf16, #tpu.memory_space<vmem>>, vector<2x512xbf16>
    %c0_4 = arith.constant 0 : index
    %c0_5 = arith.constant 0 : index
    %5 = vector.load %arg2[%c0_4, %c0_5] : memref<512x128xbf16, #tpu.memory_space<vmem>>, vector<512x128xbf16>
    %cst = arith.constant dense<0.000000e+00> : vector<2x128xf32>
    %6 = tpu.matmul %4, %5, %cst {dimension_numbers = #tpu.dot_dimension_numbers<[1], [0], [0], [1], [0, 0, 1, 1], [], []>} : vector<2x512xbf16>, vector<512x128xbf16>, vector<2x128xf32> -> vector<2x128xf32>
    %7 = arith.addf %3, %6 : vector<2x128xf32>
    %c0_6 = arith.constant 0 : index
    %c0_7 = arith.constant 0 : index
    %8 = vector.load %arg9[%c0_6, %c0_7] : memref<2x128xf32, #tpu.memory_space<vmem>>, vector<2x128xf32>
    tpu.vector_store %arg9[%c0_6, %c0_7], %7 {strides = array<i32>} : memref<2x128xf32, #tpu.memory_space<vmem>>, vector<2x128xf32>,
    %c3_i32 = arith.constant 3 : i32
    %9 = arith.cmpi eq, %arg0, %c3_i32 : i32
    %10 = arith.extui %9 : i1 to i32
    %c0_i32_8 = arith.constant 0 : i32
    %11 = arith.cmpi ne, %10, %c0_i32_8 : i32
    scf.if %11 {
      %c0_9 = arith.constant 0 : index
      %c0_10 = arith.constant 0 : index
      %12 = vector.load %arg9[%c0_9, %c0_10] : memref<2x128xf32, #tpu.memory_space<vmem>>, vector<2x128xf32>
      %c0_11 = arith.constant 0 : index
      %c0_12 = arith.constant 0 : index
      %13 = vector.load %arg3[%c0_11, %c0_12] : memref<1x128xf32, #tpu.memory_space<vmem>>, vector<1x128xf32>
      %14 = vector.broadcast %13 : vector<1x128xf32> to vector<2x128xf32>
      %15 = arith.addf %12, %14 : vector<2x128xf32>
      %cst_13 = arith.constant 0.000000e+00 : f32
      %16 = vector.broadcast %cst_13 : f32 to vector<2x128xf32>
      %17 = arith.maximumf %15, %16 : vector<2x128xf32>
      %18 = arith.truncf %17 : vector<2x128xf32> to vector<2x128xbf16>
      %c0_14 = arith.constant 0 : index
      %c0_15 = arith.constant 0 : index
      %19 = vector.load %arg4[%c0_14, %c0_15] : memref<128x128xbf16, #tpu.memory_space<vmem>>, vector<128x128xbf16>
      %cst_16 = arith.constant dense<0.000000e+00> : vector<2x128xf32>
      %20 = tpu.matmul %18, %19, %cst_16 {dimension_numbers = #tpu.dot_dimension_numbers<[1], [0], [0], [1], [0, 0, 1, 1], [], []>} : vector<2x128xbf16>, vector<128x128xbf16>, vector<2x128xf32> -> vector<2x128xf32>
      %c0_17 = arith.constant 0 : index
      %c0_18 = arith.constant 0 : index
      %21 = vector.load %arg5[%c0_17, %c0_18] : memref<1x128xf32, #tpu.memory_space<vmem>>, vector<1x128xf32>
      %22 = vector.broadcast %21 : vector<1x128xf32> to vector<2x128xf32>
      %23 = arith.addf %20, %22 : vector<2x128xf32>
      %cst_19 = arith.constant 0.000000e+00 : f32
      %24 = vector.broadcast %cst_19 : f32 to vector<2x128xf32>
      %25 = arith.maximumf %23, %24 : vector<2x128xf32>
      %26 = arith.truncf %25 : vector<2x128xf32> to vector<2x128xbf16>
      %c0_20 = arith.constant 0 : index
      %c0_21 = arith.constant 0 : index
      %27 = vector.load %arg6[%c0_20, %c0_21] : memref<128x128xbf16, #tpu.memory_space<vmem>>, vector<128x128xbf16>
      %cst_22 = arith.constant dense<0.000000e+00> : vector<2x128xf32>
      %28 = tpu.matmul %26, %27, %cst_22 {dimension_numbers = #tpu.dot_dimension_numbers<[1], [0], [0], [1], [0, 0, 1, 1], [], []>} : vector<2x128xbf16>, vector<128x128xbf16>, vector<2x128xf32> -> vector<2x128xf32>
      %c0_23 = arith.constant 0 : index
      %c0_24 = arith.constant 0 : index
      %29 = vector.load %arg7[%c0_23, %c0_24] : memref<1x128xf32, #tpu.memory_space<vmem>>, vector<1x128xf32>
      %30 = vector.broadcast %29 : vector<1x128xf32> to vector<2x128xf32>
      %31 = arith.addf %28, %30 : vector<2x128xf32>
      %c0_25 = arith.constant 0 : index
      %c0_26 = arith.constant 0 : index
      %32 = vector.load %arg8[%c0_25, %c0_26] : memref<2x128xf32, #tpu.memory_space<vmem>>, vector<2x128xf32>
      tpu.vector_store %arg8[%c0_25, %c0_26], %31 {strides = array<i32>} : memref<2x128xf32, #tpu.memory_space<vmem>>, vector<2x128xf32>,
    } else {
    }
    return
  }
  func.func @transform_0(%arg0: i32) -> (i32, i32) {
    %c0_i32 = arith.constant 0 : i32
    %c0_i32_0 = arith.constant 0 : i32
    return %c0_i32, %arg0 : i32, i32
  }
  func.func @transform_1(%arg0: i32) -> (i32, i32) {
    %c0_i32 = arith.constant 0 : i32
    %c0_i32_0 = arith.constant 0 : i32
    return %arg0, %c0_i32 : i32, i32
  }
  func.func @transform_2(%arg0: i32) -> (i32, i32) {
    %c0_i32 = arith.constant 0 : i32
    %c0_i32_0 = arith.constant 0 : i32
    %c0_i32_1 = arith.constant 0 : i32
    return %c0_i32, %c0_i32_0 : i32, i32
  }
  func.func @transform_3(%arg0: i32) -> (i32, i32) {
    %c0_i32 = arith.constant 0 : i32
    %c0_i32_0 = arith.constant 0 : i32
    %c0_i32_1 = arith.constant 0 : i32
    return %c0_i32, %c0_i32_0 : i32, i32
  }
  func.func @transform_4(%arg0: i32) -> (i32, i32) {
    %c0_i32 = arith.constant 0 : i32
    %c0_i32_0 = arith.constant 0 : i32
    %c0_i32_1 = arith.constant 0 : i32
    return %c0_i32, %c0_i32_0 : i32, i32
  }
  func.func @transform_5(%arg0: i32) -> (i32, i32) {
    %c0_i32 = arith.constant 0 : i32
    %c0_i32_0 = arith.constant 0 : i32
    %c0_i32_1 = arith.constant 0 : i32
    return %c0_i32, %c0_i32_0 : i32, i32
  }
  func.func @transform_6(%arg0: i32) -> (i32, i32) {
    %c0_i32 = arith.constant 0 : i32
    %c0_i32_0 = arith.constant 0 : i32
    %c0_i32_1 = arith.constant 0 : i32
    return %c0_i32, %c0_i32_0 : i32, i32
  }
  func.func @transform_7(%arg0: i32) -> (i32, i32) {
    %c0_i32 = arith.constant 0 : i32
    %c0_i32_0 = arith.constant 0 : i32
    %c0_i32_1 = arith.constant 0 : i32
    return %c0_i32, %c0_i32_0 : i32, i32
  }
}

</mosaic_0001>

<bundles_post_ra>
// kernel: _lambda_.4
= control target key start
LH: loop header
LB: loop body
LE: loop exit
PB: predicated region body
PF: predicated region fallthrough
CT: control target
= control target key end

     0   :  { %s1304_s12 = smov 0   ;;  %s1573_s0 = inlined_call_operand.vmem [shape: bf16[2,16,16,128], index: 0, kind: input, shape index: {}]   ;;  %s1574_s1 = inlined_call_operand.vmem [shape: bf16[128,128], index: 1, kind: input, shape index: {}]   ;;  %s1575_s2 = inlined_call_operand.vmem [shape: f32[1,128], index: 2, kind: input, shape index: {}]   ;;  %s1576_s3 = inlined_call_operand.vmem [shape: bf16[2,18,18,128], index: 3, kind: output, shape index: {}]  }
   0x1 LB: > { %s1066_s13 = sadd.s32 4294967295, %s1281_s12   ;;  %p1070_p0 = scmp.ge.s32.totalorder %s1281_s12, 1  ;;  %s1281_s12 = sphi %s1304_s12, %s13_s12  }
   0x2   : > { %p137_p1 = scmp.lt.s32.totalorder %s1281_s12, 3 }
   0x4   : > { %p138_p2 = pnand %p1070_p0, %p137_p1 }
   0x5   : > { %p161_p3 = scmp.lt.s32.totalorder (!%p138_p2), %s1066_s13, 1 }
   0x6   : > { %141 = sbr.rel (%p138_p2) target bundleno = 304 (0x130), region = 32 }
   0xb   : > { %v1251_v0 = vld [vmem:[%s1574_s1 + $0x38] sm:$0xff]   ;;  %v1252_v1 = vld [vmem:[%s1574_s1 + $0x30] sm:$0xff]   ;;  %s1580_s13 = smov (!%p161_p3, %s1066_s13), 1  ;;  %v1253_v2 = vld [vmem:[%s1574_s1 + $0x28] sm:$0xff]   ;;  %vm733_vm0 = vcmask 1040384   ;;  %v1283_v24 = vmov 0  }
   0xc   : > { %1177 = vmatprep.subr.bf16.mxu0 %v1251_v0  ;;  %1225 = vmatprep.subr.bf16.mxu1 %v1251_v0  ;;  %s1152_s20 = sshll.u32 %s1580_s13, 7  ;;  %v1254_v3 = vld [vmem:[%s1574_s1 + $0x20] sm:$0xff]   ;;  %v1255_v6 = vld [vmem:[%s1574_s1 + $0x18] sm:$0xff]   ;;  %v1256_v7 = vld [vmem:[%s1574_s1 + $0x10] sm:$0xff]   ;;  %vm734_vm1 = vsmask.f32 256 }
   0xd   : > { %1178 = vmatpush3.bf16.msra.mxu0 %v1251_v0  ;;  %1233 = vmatpush3.bf16.msra.mxu1 %v1251_v0  ;;  %s1327_s23 = scalar_lea.vmem %s1573_s0, %s1152_s20  ;;  %v1257_v8 = vld [vmem:[%s1574_s1 + $0x8] sm:$0xff]   ;;  %v1258_v9 = vld [vmem:[%s1574_s1] sm:$0xff]   ;;  %s1241_s7 = smul.u32 216, %s1580_s13  ;;  %v583_v25 = vrot.slane %v1283_v24, 7  ;;  %vm1361_vm2 = vmand %vm733_vm0, %vm734_vm1 }
   0xe   : > { %1179 = vmatprep.subr.bf16.mxu0 %v1252_v1  ;;  %1226 = vmatprep.subr.bf16.mxu1 %v1252_v1  ;;  %v1259_v4 = vld [vmem:[%s1327_s23] sm:$0xff]   ;;  %v1261_v10 = vld [vmem:[%s1327_s23 + $0x8] sm:$0xff]   ;;  %v1263_v12 = vld [vmem:[%s1327_s23 + $0x10] sm:$0xff]  }
   0xf   : > { %v1260_v5 = vld [vmem:[%s1327_s23 + $0x40] sm:$0xff]   ;;  %1193 = vmatprep.mubr.bf16.mxu0 %v1259_v4  ;;  %v1262_v11 = vld [vmem:[%s1327_s23 + $0x48] sm:$0xff]   ;;  %v1264_v13 = vld [vmem:[%s1327_s23 + $0x50] sm:$0xff]   ;;  %v736_v27 = vsel %vm1361_vm2, 0, %v583_v25  ;;  %v753_v28 = vsel %vm1361_vm2, %v583_v25, 0  ;;  %s1372_s10 = scalar_lea.vmem %s1576_s3, %s1241_s7 }
  0x10   : > { %1209 = vmatprep.mubr.bf16.mxu1 %v1260_v5  ;;  %v1265_v14 = vld [vmem:[%s1327_s23 + $0x18] sm:$0xff]   ;;  %v1267_v16 = vld [vmem:[%s1327_s23 + $0x20] sm:$0xff]   ;;  %v1269_v18 = vld [vmem:[%s1327_s23 + $0x28] sm:$0xff]   ;;  %v1099_v29 = vcombine.low %v736_v27, %v736_v27  ;;  %v1100_v30 = vcombine.high %v736_v27, %v736_v27  ;;  %v1101_v31 = vcombine.low %v753_v28, %v753_v28 }
  0x11   : > { %1180 = vmatpush3.bf16.msra.mxu0 %v1252_v1  ;;  %1234 = vmatpush3.bf16.msra.mxu1 %v1252_v1  ;;  %v1266_v15 = vld [vmem:[%s1327_s23 + $0x58] sm:$0xff]   ;;  %v1268_v17 = vld [vmem:[%s1327_s23 + $0x60] sm:$0xff]   ;;  %v1270_v19 = vld [vmem:[%s1327_s23 + $0x68] sm:$0xff]  }
  0x12   : > { %1181 = vmatprep.subr.bf16.mxu0 %v1253_v2  ;;  %1227 = vmatprep.subr.bf16.mxu1 %v1253_v2  ;;  %v1271_v20 = vld [vmem:[%s1327_s23 + $0x30] sm:$0xff]   ;;  %v1273_v22 = vld [vmem:[%s1327_s23 + $0x38] sm:$0xff]   ;;  %957 = vst [vmem:[%s1372_s10] sm:$0xf] %v1099_v29  ;;  %958 = vst [vmem:[%s1372_s10 + $0x4] sm:$0xf] %v1100_v30 }
  0x13   : > { %v1272_v21 = vld [vmem:[%s1327_s23 + $0x70] sm:$0xff]   ;;  %v1274_v23 = vld [vmem:[%s1327_s23 + $0x78] sm:$0xff]   ;;  %959 = vst [vmem:[%s1372_s10 + $0x8] sm:$0x1] %v1101_v31  ;;  %1008 = vst [vmem:[%s1372_s10 + $0xcc] sm:$0xf] %v1099_v29 }
  0x14   : > { %1009 = vst [vmem:[%s1372_s10 + $0xd0] sm:$0xf] %v1100_v30  ;;  %1010 = vst [vmem:[%s1372_s10 + $0xd4] sm:$0x1] %v1101_v31  ;;  %v1383_v32 = vld [vmem:[%s1575_s2] ss:$0 sm:$0xff] }
  0x15   : > { %1182 = vmatpush3.bf16.msra.mxu0 %v1253_v2  ;;  %1235 = vmatpush3.bf16.msra.mxu1 %v1253_v2 }
  0x16   : > { %1183 = vmatprep.subr.bf16.mxu0 %v1254_v3  ;;  %1228 = vmatprep.subr.bf16.mxu1 %v1254_v3 }
  0x19   : > { %1184 = vmatpush3.bf16.msra.mxu0 %v1254_v3  ;;  %1236 = vmatpush3.bf16.msra.mxu1 %v1254_v3 }
  0x1a   : > { %1185 = vmatprep.subr.bf16.mxu0 %v1255_v6  ;;  %1229 = vmatprep.subr.bf16.mxu1 %v1255_v6 }
  0x1d   : > { %1186 = vmatpush3.bf16.msra.mxu0 %v1255_v6  ;;  %1237 = vmatpush3.bf16.msra.mxu1 %v1255_v6 }
  0x1e   : > { %1187 = vmatprep.subr.bf16.mxu0 %v1256_v7  ;;  %1230 = vmatprep.subr.bf16.mxu1 %v1256_v7 }
  0x21   : > { %1188 = vmatpush3.bf16.msra.mxu0 %v1256_v7  ;;  %1238 = vmatpush3.bf16.msra.mxu1 %v1256_v7 }
  0x22   : > { %1189 = vmatprep.subr.bf16.mxu0 %v1257_v8  ;;  %1231 = vmatprep.subr.bf16.mxu1 %v1257_v8 }
  0x25   : > { %1190 = vmatpush3.bf16.msra.mxu0 %v1257_v8  ;;  %1239 = vmatpush3.bf16.msra.mxu1 %v1257_v8 }
  0x26   : > { %1191 = vmatprep.subr.bf16.mxu0 %v1258_v9  ;;  %1232 = vmatprep.subr.bf16.mxu1 %v1258_v9 }
  0x29   : > { %1192 = vmatpush3.bf16.msra.mxu0 %v1258_v9  ;;  %1240 = vmatpush3.bf16.msra.mxu1 %v1258_v9 }
  0x2c   : > { %1194 = vmatmul.mubr.bf16.vlgmr.msra.gmra.mxu0 %v1261_v10  ;;  %1210 = vmatmul.mubr.bf16.vlgmr.msra.gmra.mxu1 %v1262_v11 }
  0x2d   : > { %1197 = vmatprep.mubr.bf16.mxu0 %v1263_v12  ;;  %1213 = vmatprep.mubr.bf16.mxu1 %v1264_v13 }
  0x34   : > { %1198 = vmatmul.mubr.bf16.gmra.mxu0 %v1265_v14  ;;  %1214 = vmatmul.mubr.bf16.gmra.mxu1 %v1266_v15 }
  0x35   : > { %1201 = vmatprep.mubr.bf16.mxu0 %v1267_v16  ;;  %1217 = vmatprep.mubr.bf16.mxu1 %v1268_v17 }
  0x3c   : > { %1202 = vmatmul.mubr.bf16.gmra.mxu0 %v1269_v18  ;;  %1218 = vmatmul.mubr.bf16.gmra.mxu1 %v1270_v19 }
  0x3d   : > { %1205 = vmatprep.mubr.bf16.mxu0 %v1271_v20  ;;  %1221 = vmatprep.mubr.bf16.mxu1 %v1272_v21 }
  0x44   : > { %1206 = vmatmul.mubr.bf16.gmra.mxu0 %v1273_v22  ;;  %1222 = vmatmul.mubr.bf16.gmra.mxu1 %v1274_v23 }
  0xec   : > { %v1195_v33 = vpop.f32.mrf.mxu0  ;;  %v1211_v34 = vpop.f32.mrf.mxu1 }
  0xed   : > { %v414_v35 = vadd.f32 %v1195_v33, %v1383_v32  ;;  %v478_v36 = vadd.f32 %v1211_v34, %v1383_v32 }
  0xee   : > { %v405_v37 = vpop.f32.mrf.mxu0  ;;  %v469_v38 = vpop.f32.mrf.mxu1 }
  0xef   : > { %v534_v43 = vmax.f32 %v414_v35, 0.0  ;;  %v550_v44 = vmax.f32 %v478_v36, 0.0  ;;  %v406_v45 = vadd.f32 %v1383_v32, %v405_v37  ;;  %v470_v46 = vadd.f32 %v1383_v32, %v469_v38 }
  0xf0   : > { %v1196_v39 = vpop.f32.mrf.mxu0  ;;  %v1212_v40 = vpop.f32.mrf.mxu1 }
  0xf1   : > { %v417_v41 = vadd.f32 %v1196_v39, %v1383_v32  ;;  %v481_v42 = vadd.f32 %v1212_v40, %v1383_v32  ;;  %v532_v59 = vmax.f32 %v406_v45, 0.0  ;;  %v548_v60 = vmax.f32 %v470_v46, 0.0 }
  0xf2   : > { %v408_v47 = vpop.f32.mrf.mxu0  ;;  %v472_v48 = vpop.f32.mrf.mxu1 }
  0xf3   : > { %v535_v49 = vmax.f32 %v417_v41, 0.0  ;;  %v551_v50 = vmax.f32 %v481_v42, 0.0  ;;  %v409_v51 = vadd.f32 %v1383_v32, %v408_v47  ;;  %v473_v52 = vadd.f32 %v1383_v32, %v472_v48 }
  0xf4   : > { %v1199_v53 = vpop.f32.mrf.mxu0  ;;  %v1215_v54 = vpop.f32.mrf.mxu1 }
  0xf5   : > { %v565_v55 = vpack.c.bf16 %v535_v49, %v534_v43  ;;  %v573_v56 = vpack.c.bf16 %v551_v50, %v550_v44  ;;  %v533_v57 = vmax.f32 %v409_v51, 0.0  ;;  %v549_v58 = vmax.f32 %v473_v52, 0.0 }
  0xf6   : > { %v1394_v61 = vadd.f32 %v1199_v53, %v1383_v32  ;;  %v1397_v62 = vadd.f32 %v1215_v54, %v1383_v32  ;;  %v421_v63 = vpop.f32.mrf.mxu0  ;;  %v485_v0 = vpop.f32.mrf.mxu1 }
  0xf7   : > { %v595_v1 = vshrl.u32 %v565_v55, 16  ;;  %v598_v2 = vshll.u32 %v565_v55, 16  ;;  %v651_v3 = vshrl.u32 %v573_v56, 16  ;;  %v654_v4 = vshll.u32 %v573_v56, 16 }
  0xf8   : > { %v564_v5 = vpack.c.bf16 %v533_v57, %v532_v59  ;;  %v572_v6 = vpack.c.bf16 %v549_v58, %v548_v60  ;;  %v538_v7 = vmax.f32 %v1394_v61, 0.0  ;;  %v554_v8 = vmax.f32 %v1397_v62, 0.0  ;;  %v1200_v9 = vpop.f32.mrf.mxu0  ;;  %v1216_v10 = vpop.f32.mrf.mxu1 }
  0xf9   : > { %v597_v11 = vrot.slane %v595_v1, 7  ;;  %v653_v12 = vrot.slane %v651_v3, 7  ;;  %v1402_v13 = vadd.f32 %v1383_v32, %v421_v63  ;;  %v1405_v14 = vadd.f32 %v1383_v32, %v485_v0 }
  0xfa   : > { %v588_v15 = vshrl.u32 %v564_v5, 16  ;;  %v591_v16 = vshll.u32 %v564_v5, 16  ;;  %v644_v17 = vshrl.u32 %v572_v6, 16  ;;  %v647_v18 = vshll.u32 %v572_v6, 16  ;;  %v424_v19 = vpop.f32.mrf.mxu0  ;;  %v488_v20 = vpop.f32.mrf.mxu1 }
  0xfb   : > { %v600_v21 = vor.u32 %v598_v2, %v597_v11  ;;  %v755_v22 = vsel %vm1361_vm2, %v597_v11, 0  ;;  %v656_v23 = vor.u32 %v654_v4, %v653_v12  ;;  %v763_v24 = vsel %vm1361_vm2, %v653_v12, 0 }
  0xfc   : > { %v1107_v25 = vcombine.low %v755_v22, %v755_v22  ;;  %v1131_v27 = vcombine.low %v763_v24, %v763_v24  ;;  %v590_v28 = vrot.slane %v588_v15, 7  ;;  %v646_v29 = vrot.slane %v644_v17, 7  ;;  %v1203_v30 = vpop.f32.mrf.mxu0  ;;  %v1219_v31 = vpop.f32.mrf.mxu1 }
  0xfd   : > { %v738_v33 = vsel %vm1361_vm2, 0, %v600_v21  ;;  %v746_v34 = vsel %vm1361_vm2, 0, %v656_v23  ;;  %v536_v35 = vmax.f32 %v1402_v13, 0.0  ;;  %v552_v36 = vmax.f32 %v1405_v14, 0.0 }
  0xfe   : > { %v1105_v37 = vcombine.low %v738_v33, %v738_v33  ;;  %v1106_v38 = vcombine.high %v738_v33, %v738_v33  ;;  %965 = vst [vmem:[%s1372_s10 + $0x20] sm:$0x1] %v1107_v25  ;;  %v1129_v39 = vcombine.low %v746_v34, %v746_v34  ;;  %v1130_v40 = vcombine.high %v746_v34, %v746_v34  ;;  %v437_v45 = vpop.f32.mrf.mxu0  ;;  %v501_v46 = vpop.f32.mrf.mxu1 }
  0xff   : > { %989 = vst [vmem:[%s1372_s10 + $0x80] sm:$0x1] %v1131_v27  ;;  %v593_v41 = vor.u32 %v591_v16, %v590_v28  ;;  %v754_v42 = vsel %vm1361_vm2, %v590_v28, 0  ;;  %v649_v43 = vor.u32 %v647_v18, %v646_v29  ;;  %v762_v44 = vsel %vm1361_vm2, %v646_v29, 0 }
 0x100   : > { %963 = vst [vmem:[%s1372_s10 + $0x18] sm:$0xf] %v1105_v37  ;;  %964 = vst [vmem:[%s1372_s10 + $0x1c] sm:$0xf] %v1106_v38  ;;  %v1104_v47 = vcombine.low %v754_v42, %v754_v42  ;;  %v1128_v48 = vcombine.low %v762_v44, %v762_v44  ;;  %v433_v49 = vadd.f32 %v1200_v9, %v1383_v32  ;;  %v1204_v1 = vpop.f32.mrf.mxu0  ;;  %v1220_v2 = vpop.f32.mrf.mxu1 }
 0x101   : > { %987 = vst [vmem:[%s1372_s10 + $0x78] sm:$0xf] %v1129_v39  ;;  %988 = vst [vmem:[%s1372_s10 + $0x7c] sm:$0xf] %v1130_v40  ;;  %v497_v50 = vadd.f32 %v1216_v10, %v1383_v32  ;;  %v737_v51 = vsel %vm1361_vm2, 0, %v593_v41  ;;  %v745_v52 = vsel %vm1361_vm2, 0, %v649_v43  ;;  %v425_v53 = vadd.f32 %v1383_v32, %v424_v19 }
 0x102   : > { %v489_v54 = vadd.f32 %v1383_v32, %v488_v20  ;;  %v1102_v55 = vcombine.low %v737_v51, %v737_v51  ;;  %v1103_v56 = vcombine.high %v737_v51, %v737_v51  ;;  %962 = vst [vmem:[%s1372_s10 + $0x14] sm:$0x1] %v1104_v47  ;;  %v1126_v57 = vcombine.low %v745_v52, %v745_v52  ;;  %v440_v61 = vpop.f32.mrf.mxu0 }
 0x103   : > { %v1127_v58 = vcombine.high %v745_v52, %v745_v52  ;;  %986 = vst [vmem:[%s1372_s10 + $0x74] sm:$0x1] %v1128_v48  ;;  %v539_v59 = vmax.f32 %v433_v49, 0.0  ;;  %v555_v60 = vmax.f32 %v497_v50, 0.0  ;;  %v537_v63 = vmax.f32 %v425_v53, 0.0 }
 0x104   : > { %v553_v0 = vmax.f32 %v489_v54, 0.0  ;;  %960 = vst [vmem:[%s1372_s10 + $0xc] sm:$0xf] %v1102_v55  ;;  %961 = vst [vmem:[%s1372_s10 + $0x10] sm:$0xf] %v1103_v56  ;;  %v1442_v3 = vadd.f32 %v1203_v30, %v1383_v32  ;;  %v1445_v4 = vadd.f32 %v1219_v31, %v1383_v32  ;;  %v1448_v5 = vadd.f32 %v1383_v32, %v437_v45  ;;  %v1207_v44 = vpop.f32.mrf.mxu0 }
 0x105   : > { %984 = vst [vmem:[%s1372_s10 + $0x6c] sm:$0xf] %v1126_v57  ;;  %985 = vst [vmem:[%s1372_s10 + $0x70] sm:$0xf] %v1127_v58  ;;  %v567_v6 = vpack.c.bf16 %v539_v59, %v538_v7  ;;  %v575_v9 = vpack.c.bf16 %v555_v60, %v554_v8  ;;  %v566_v10 = vpack.c.bf16 %v537_v63, %v536_v35  ;;  %v504_v7 = vpop.f32.mrf.mxu1 }
 0x106   : > { %v574_v11 = vpack.c.bf16 %v553_v0, %v552_v36  ;;  %v542_v12 = vmax.f32 %v1442_v3, 0.0  ;;  %v558_v13 = vmax.f32 %v1445_v4, 0.0  ;;  %v540_v14 = vmax.f32 %v1448_v5, 0.0  ;;  %v453_v0 = vpop.f32.mrf.mxu0 }
 0x107   : > { %v1458_v15 = vadd.f32 %v1383_v32, %v501_v46  ;;  %v609_v16 = vshrl.u32 %v567_v6, 16  ;;  %v612_v17 = vshll.u32 %v567_v6, 16  ;;  %v665_v18 = vshrl.u32 %v575_v9, 16  ;;  %v1223_v57 = vpop.f32.mrf.mxu1 }
 0x108   : > { %v668_v19 = vshll.u32 %v575_v9, 16  ;;  %v602_v20 = vshrl.u32 %v566_v10, 16  ;;  %v605_v62 = vshll.u32 %v566_v10, 16  ;;  %v658_v8 = vshrl.u32 %v574_v11, 16 }
 0x109   : > { %v661_v21 = vshll.u32 %v574_v11, 16  ;;  %v611_v22 = vrot.slane %v609_v16, 7  ;;  %v667_v23 = vrot.slane %v665_v18, 7  ;;  %v449_v24 = vadd.f32 %v1204_v1, %v1383_v32 }
 0x10a   : > { %v513_v25 = vadd.f32 %v1220_v2, %v1383_v32  ;;  %v604_v27 = vrot.slane %v602_v20, 7  ;;  %v660_v28 = vrot.slane %v658_v8, 7  ;;  %v441_v29 = vadd.f32 %v1383_v32, %v440_v61  ;;  %v1208_v20 = vpop.f32.mrf.mxu0 }
 0x10b   : > { %v505_v30 = vadd.f32 %v1383_v32, %v504_v7  ;;  %v614_v31 = vor.u32 %v612_v17, %v611_v22  ;;  %v757_v33 = vsel %vm1361_vm2, %v611_v22, 0  ;;  %v670_v34 = vor.u32 %v668_v19, %v667_v23 }
 0x10c   : > { %v765_v35 = vsel %vm1361_vm2, %v667_v23, 0  ;;  %v1113_v36 = vcombine.low %v757_v33, %v757_v33  ;;  %v607_v38 = vor.u32 %v605_v62, %v604_v27  ;;  %v756_v39 = vsel %vm1361_vm2, %v604_v27, 0 }
 0x10d   : > { %v1137_v37 = vcombine.low %v765_v35, %v765_v35  ;;  %v740_v40 = vsel %vm1361_vm2, 0, %v614_v31  ;;  %v748_v41 = vsel %vm1361_vm2, 0, %v670_v34  ;;  %v1110_v42 = vcombine.low %v756_v39, %v756_v39 }
 0x10e   : > { %v663_v43 = vor.u32 %v661_v21, %v660_v28  ;;  %v1111_v45 = vcombine.low %v740_v40, %v740_v40  ;;  %v1112_v46 = vcombine.high %v740_v40, %v740_v40  ;;  %971 = vst [vmem:[%s1372_s10 + $0x38] sm:$0x1] %v1113_v36  ;;  %v1135_v47 = vcombine.low %v748_v41, %v748_v41 }
 0x10f   : > { %v1136_v48 = vcombine.high %v748_v41, %v748_v41  ;;  %995 = vst [vmem:[%s1372_s10 + $0x98] sm:$0x1] %v1137_v37  ;;  %v739_v49 = vsel %vm1361_vm2, 0, %v607_v38  ;;  %968 = vst [vmem:[%s1372_s10 + $0x2c] sm:$0x1] %v1110_v42  ;;  %v764_v51 = vsel %vm1361_vm2, %v660_v28, 0  ;;  %v1493_v3 = vadd.f32 %v1207_v44, %v1383_v32  ;;  %v456_v42 = vpop.f32.mrf.mxu0 }
 0x110   : > { %v747_v50 = vsel %vm1361_vm2, 0, %v663_v43  ;;  %v543_v52 = vmax.f32 %v449_v24, 0.0  ;;  %969 = vst [vmem:[%s1372_s10 + $0x30] sm:$0xf] %v1111_v45  ;;  %970 = vst [vmem:[%s1372_s10 + $0x34] sm:$0xf] %v1112_v46  ;;  %v1108_v53 = vcombine.low %v739_v49, %v739_v49  ;;  %v1109_v54 = vcombine.high %v739_v49, %v739_v49 }
 0x111   : > { %993 = vst [vmem:[%s1372_s10 + $0x90] sm:$0xf] %v1135_v47  ;;  %994 = vst [vmem:[%s1372_s10 + $0x94] sm:$0xf] %v1136_v48  ;;  %v1132_v55 = vcombine.low %v747_v50, %v747_v50  ;;  %v1133_v56 = vcombine.high %v747_v50, %v747_v50  ;;  %v1134_v58 = vcombine.low %v764_v51, %v764_v51  ;;  %v559_v60 = vmax.f32 %v513_v25, 0.0 }
 0x112   : > { %v569_v59 = vpack.c.bf16 %v543_v52, %v542_v12  ;;  %v541_v63 = vmax.f32 %v441_v29, 0.0  ;;  %966 = vst [vmem:[%s1372_s10 + $0x24] sm:$0xf] %v1108_v53  ;;  %967 = vst [vmem:[%s1372_s10 + $0x28] sm:$0xf] %v1109_v54  ;;  %v556_v1 = vmax.f32 %v1458_v15, 0.0  ;;  %v1501_v16 = vadd.f32 %v1223_v57, %v1383_v32  ;;  %v517_v15 = vpop.f32.mrf.mxu1 }
 0x113   : > { %990 = vst [vmem:[%s1372_s10 + $0x84] sm:$0xf] %v1132_v55  ;;  %991 = vst [vmem:[%s1372_s10 + $0x88] sm:$0xf] %v1133_v56  ;;  %v557_v2 = vmax.f32 %v505_v30, 0.0  ;;  %v577_v9 = vpack.c.bf16 %v559_v60, %v558_v13  ;;  %v1504_v17 = vadd.f32 %v1383_v32, %v453_v0  ;;  %v546_v7 = vmax.f32 %v1493_v3, 0.0 }
 0x114   : > { %992 = vst [vmem:[%s1372_s10 + $0x8c] sm:$0x1] %v1134_v58  ;;  %v623_v6 = vshrl.u32 %v569_v59, 16  ;;  %v568_v10 = vpack.c.bf16 %v541_v63, %v540_v14  ;;  %v626_v11 = vshll.u32 %v569_v59, 16  ;;  %v518_v25 = vadd.f32 %v1383_v32, %v517_v15  ;;  %v1224_v28 = vpop.f32.mrf.mxu1 }
 0x115   : > { %v576_v12 = vpack.c.bf16 %v557_v2, %v556_v1  ;;  %v679_v19 = vshrl.u32 %v577_v9, 16  ;;  %v682_v4 = vshll.u32 %v577_v9, 16  ;;  %v465_v27 = vadd.f32 %v1208_v20, %v1383_v32 }
 0x116   : > { %v625_v18 = vrot.slane %v623_v6, 7  ;;  %v616_v61 = vshrl.u32 %v568_v10, 16  ;;  %v619_v13 = vshll.u32 %v568_v10, 16  ;;  %v520_v47 = vpop.f32.mrf.mxu1  ;;  %v529_v51 = vadd.f32 %v1224_v28, %v1383_v32 }
 0x117   : > { %v672_v62 = vshrl.u32 %v576_v12, 16  ;;  %v675_v5 = vshll.u32 %v576_v12, 16  ;;  %v681_v21 = vrot.slane %v679_v19, 7  ;;  %v547_v50 = vmax.f32 %v465_v27, 0.0 }
 0x118   : > { %v628_v14 = vor.u32 %v626_v11, %v625_v18  ;;  %v759_v8 = vsel %vm1361_vm2, %v625_v18, 0  ;;  %v618_v22 = vrot.slane %v616_v61, 7  ;;  %v457_v55 = vadd.f32 %v1383_v32, %v456_v42 }
 0x119   : > { %v1119_v23 = vcombine.low %v759_v8, %v759_v8  ;;  %v674_v24 = vrot.slane %v672_v62, 7  ;;  %v684_v30 = vor.u32 %v682_v4, %v681_v21  ;;  %v767_v31 = vsel %vm1361_vm2, %v681_v21, 0 }
 0x11a   : > { %v742_v29 = vsel %vm1361_vm2, 0, %v628_v14  ;;  %v621_v33 = vor.u32 %v619_v13, %v618_v22  ;;  %v1143_v36 = vcombine.low %v767_v31, %v767_v31  ;;  %v758_v37 = vsel %vm1361_vm2, %v618_v22, 0 }
 0x11b   : > { %v1117_v34 = vcombine.low %v742_v29, %v742_v29  ;;  %v1118_v35 = vcombine.high %v742_v29, %v742_v29  ;;  %977 = vst [vmem:[%s1372_s10 + $0x50] sm:$0x1] %v1119_v23  ;;  %v750_v38 = vsel %vm1361_vm2, 0, %v684_v30  ;;  %v1116_v40 = vcombine.low %v758_v37, %v758_v37 }
 0x11c   : > { %v741_v39 = vsel %vm1361_vm2, 0, %v621_v33  ;;  %v677_v41 = vor.u32 %v675_v5, %v674_v24  ;;  %v1141_v43 = vcombine.low %v750_v38, %v750_v38  ;;  %v1142_v44 = vcombine.high %v750_v38, %v750_v38  ;;  %1001 = vst [vmem:[%s1372_s10 + $0xb0] sm:$0x1] %v1143_v36 }
 0x11d   : > { %975 = vst [vmem:[%s1372_s10 + $0x48] sm:$0xf] %v1117_v34  ;;  %976 = vst [vmem:[%s1372_s10 + $0x4c] sm:$0xf] %v1118_v35  ;;  %v1114_v45 = vcombine.low %v741_v39, %v741_v39  ;;  %v1115_v46 = vcombine.high %v741_v39, %v741_v39  ;;  %v766_v49 = vsel %vm1361_vm2, %v674_v24, 0  ;;  %v562_v56 = vmax.f32 %v1501_v16, 0.0 }
 0x11e   : > { %974 = vst [vmem:[%s1372_s10 + $0x44] sm:$0x1] %v1116_v40  ;;  %v749_v48 = vsel %vm1361_vm2, 0, %v677_v41  ;;  %999 = vst [vmem:[%s1372_s10 + $0xa8] sm:$0xf] %v1141_v43  ;;  %v1140_v54 = vcombine.low %v766_v49, %v766_v49  ;;  %v571_v57 = vpack.c.bf16 %v547_v50, %v546_v7  ;;  %v563_v58 = vmax.f32 %v529_v51, 0.0 }
 0x11f   : > { %1000 = vst [vmem:[%s1372_s10 + $0xac] sm:$0xf] %v1142_v44  ;;  %972 = vst [vmem:[%s1372_s10 + $0x3c] sm:$0xf] %v1114_v45  ;;  %v1138_v52 = vcombine.low %v749_v48, %v749_v48  ;;  %v1139_v53 = vcombine.high %v749_v48, %v749_v48  ;;  %v521_v59 = vadd.f32 %v1383_v32, %v520_v47  ;;  %v544_v60 = vmax.f32 %v1504_v17, 0.0 }
 0x120   : > { %973 = vst [vmem:[%s1372_s10 + $0x40] sm:$0xf] %v1115_v46  ;;  %998 = vst [vmem:[%s1372_s10 + $0xa4] sm:$0x1] %v1140_v54  ;;  %v545_v63 = vmax.f32 %v457_v55, 0.0  ;;  %v560_v0 = vmax.f32 %v518_v25, 0.0  ;;  %v579_v2 = vpack.c.bf16 %v563_v58, %v562_v56 }
 0x121   : > { %996 = vst [vmem:[%s1372_s10 + $0x9c] sm:$0xf] %v1138_v52  ;;  %997 = vst [vmem:[%s1372_s10 + $0xa0] sm:$0xf] %v1139_v53  ;;  %v637_v1 = vshrl.u32 %v571_v57, 16  ;;  %v561_v3 = vmax.f32 %v521_v59, 0.0 }
 0x122   : > { %v570_v6 = vpack.c.bf16 %v545_v63, %v544_v60  ;;  %v640_v10 = vshll.u32 %v571_v57, 16  ;;  %v693_v11 = vshrl.u32 %v579_v2, 16  ;;  %v696_v16 = vshll.u32 %v579_v2, 16 }
 0x123   : > { %v639_v9 = vrot.slane %v637_v1, 7  ;;  %v578_v12 = vpack.c.bf16 %v561_v3, %v560_v0 }
 0x124   : > { %v630_v15 = vshrl.u32 %v570_v6, 16  ;;  %v695_v19 = vrot.slane %v693_v11, 7  ;;  %v633_v20 = vshll.u32 %v570_v6, 16 }
 0x125   : > { %v642_v18 = vor.u32 %v640_v10, %v639_v9  ;;  %v761_v32 = vsel %vm1361_vm2, %v639_v9, 0  ;;  %v686_v61 = vshrl.u32 %v578_v12, 16  ;;  %v689_v4 = vshll.u32 %v578_v12, 16 }
 0x126   : > { %v1125_v17 = vcombine.low %v761_v32, %v761_v32  ;;  %v632_v7 = vrot.slane %v630_v15, 7  ;;  %v698_v62 = vor.u32 %v696_v16, %v695_v19  ;;  %v769_v5 = vsel %vm1361_vm2, %v695_v19, 0 }
 0x127   : > { %v744_v13 = vsel %vm1361_vm2, 0, %v642_v18  ;;  %v688_v14 = vrot.slane %v686_v61, 7  ;;  %v1149_v22 = vcombine.low %v769_v5, %v769_v5 }
 0x128   : > { %v1123_v8 = vcombine.low %v744_v13, %v744_v13  ;;  %v1124_v21 = vcombine.high %v744_v13, %v744_v13  ;;  %983 = vst [vmem:[%s1372_s10 + $0x68] sm:$0x1] %v1125_v17  ;;  %v635_v23 = vor.u32 %v633_v20, %v632_v7  ;;  %v752_v24 = vsel %vm1361_vm2, 0, %v698_v62 }
 0x129   : > { %v760_v25 = vsel %vm1361_vm2, %v632_v7, 0  ;;  %v691_v27 = vor.u32 %v689_v4, %v688_v14  ;;  %v768_v28 = vsel %vm1361_vm2, %v688_v14, 0  ;;  %v1147_v29 = vcombine.low %v752_v24, %v752_v24  ;;  %1007 = vst [vmem:[%s1372_s10 + $0xc8] sm:$0x1] %v1149_v22 }
 0x12a   : > { %981 = vst [vmem:[%s1372_s10 + $0x60] sm:$0xf] %v1123_v8  ;;  %982 = vst [vmem:[%s1372_s10 + $0x64] sm:$0xf] %v1124_v21  ;;  %v1148_v30 = vcombine.high %v752_v24, %v752_v24  ;;  %v743_v31 = vsel %vm1361_vm2, 0, %v635_v23  ;;  %v1122_v33 = vcombine.low %v760_v25, %v760_v25  ;;  %v1146_v37 = vcombine.low %v768_v28, %v768_v28 }
 0x12b   : > { %v1120_v34 = vcombine.low %v743_v31, %v743_v31  ;;  %v1121_v35 = vcombine.high %v743_v31, %v743_v31  ;;  %v751_v36 = vsel %vm1361_vm2, 0, %v691_v27  ;;  %1005 = vst [vmem:[%s1372_s10 + $0xc0] sm:$0xf] %v1147_v29 }
 0x12c   : > { %1006 = vst [vmem:[%s1372_s10 + $0xc4] sm:$0xf] %v1148_v30  ;;  %980 = vst [vmem:[%s1372_s10 + $0x5c] sm:$0x1] %v1122_v33  ;;  %v1144_v38 = vcombine.low %v751_v36, %v751_v36  ;;  %v1145_v39 = vcombine.high %v751_v36, %v751_v36 }
 0x12d   : > { %978 = vst [vmem:[%s1372_s10 + $0x54] sm:$0xf] %v1120_v34  ;;  %979 = vst [vmem:[%s1372_s10 + $0x58] sm:$0xf] %v1121_v35 }
 0x12e   : > { %1004 = vst [vmem:[%s1372_s10 + $0xbc] sm:$0x1] %v1146_v37  ;;  %1002 = vst [vmem:[%s1372_s10 + $0xb4] sm:$0xf] %v1144_v38 }
 0x12f   : > { %1003 = vst [vmem:[%s1372_s10 + $0xb8] sm:$0xf] %v1145_v39 }
 0x130 PF: > { %s13_s12 = sadd.s32 1, %s1281_s12  }
 0x131   : > { %p10_p4 = scmp.ge.s32.totalorder %s13_s12, 4  }
 0x133   :  { %12 = sbr.rel (!%p10_p4) target bundleno = 1 (0x1), region = 62 }

// kernel: _lambda_.7
= control target key start
LH: loop header
LB: loop body
LE: loop exit
PB: predicated region body
PF: predicated region fallthrough
CT: control target
= control target key end

     0   :  { %12 = vsyncpa [#allocation4], 0  ;;  %s1271_s24 = smov 0   ;;  %s1405_s0 = inlined_call_operand.vmem [shape: bf16[2,2048], index: 0, kind: input, shape index: {}]   ;;  %s1406_s1 = inlined_call_operand.vmem [shape: bf16[2048,128], index: 1, kind: input, shape index: {}]   ;;  %s1407_s2 = inlined_call_operand.vmem [shape: f32[1,128], index: 2, kind: input, shape index: {}]   ;;  %s1408_s3 = inlined_call_operand.vmem [shape: bf16[128,128], index: 3, kind: input, shape index: {}]   ;;  %s1409_s4 = inlined_call_operand.vmem [shape: f32[1,128], index: 4, kind: input, shape index: {}]   ;;  %s1410_s5 = inlined_call_operand.vmem [shape: bf16[128,128], index: 5, kind: input, shape index: {}]   ;;  %s1411_s6 = inlined_call_operand.vmem [shape: f32[1,128], index: 6, kind: input, shape index: {}]   ;;  %s1412_s7 = inlined_call_operand.hbm [shape: f32[2,128], index: 7, kind: output, shape index: {}]  }
   0x1 LB: > { %s1277_s25 = sadd.s32 4294967295, %s1224_s24   ;;  %p959_p0 = scmp.ge.s32.totalorder %s1224_s24, 1  ;;  %s1224_s24 = sphi %s1271_s24, %s18_s24  }
   0x2   : > { %p244_p1 = scmp.lt.s32.totalorder %s1224_s24, 5 }
   0x4   : > { %p245_p2 = pnand %p959_p0, %p244_p1 }
   0x5   : > { %s960_s26 = sshll.u32 (!%p245_p2), %s1277_s25, 2  ;;  %s961_s27 = sshll.u32 (!%p245_p2), %s1277_s25, 6 }
   0x6   : > { %248 = sbr.rel (%p245_p2) target bundleno = 703 (0x2bf), region = 48  ;;  %p276_p3 = scmp.lt.s32.totalorder (!%p245_p2), %s960_s26, 15 }
   0x7   : > { %p281_p4 = scmp.lt.s32.totalorder (!%p245_p2), %s961_s27, 255  ;;  %p963_p5 = scmp.ne.s32.totalorder (!%p245_p2), %s1277_s25, 0 }
   0xb   : > { %s1414_s26 = smov (!%p276_p3, %s960_s26), 15  ;;  %s1416_s27 = smov (!%p281_p4, %s961_s27), 255 }
   0xc   : > { %s278_s30 = scalar_lea.vmem %s1405_s0, %s1414_s26  ;;  %s962_s8 = sshll.u32 %s1416_s27, 2 }
   0xd   : > { %s1292_s11 = scalar_lea.vmem %s1406_s1, %s962_s8  ;;  %290 = sbr.rel (%p963_p5) target bundleno = 20 (0x14), region = 52 }
  0x12   : > { %v1226_v0 = vmov 0.0  }
  0x13   : > { %291 = vst [vmem:[#allocation2] sm:$0x3] %v1226_v0 }
  0x14 PF: > { %v1142_v1 = vld [vmem:[%s1292_s11 + $0x78] sm:$0xff]   ;;  %v1146_v5 = vld [vmem:[%s1292_s11 + $0x70] sm:$0xff]   ;;  %v1150_v9 = vld [vmem:[%s1292_s11 + $0x68] sm:$0xff]   ;;  %v370_v31 = vlaneseq  ;;  %v1227_v35 = vmov 1966171168   ;;  %p997_p6 = scmp.ne.s32.totalorder %s1277_s25, 3 }
  0x15   : > { %v1143_v2 = vld [vmem:[%s1292_s11 + $0xf8] sm:$0xff]   ;;  %1021 = vmatprep.subr.bf16.mxu0 %v1142_v1  ;;  %v1147_v6 = vld [vmem:[%s1292_s11 + $0xf0] sm:$0xff]   ;;  %v1151_v10 = vld [vmem:[%s1292_s11 + $0xe8] sm:$0xff]   ;;  %v368_v36 = vunpack.c.l.s4 %v1227_v35 }
  0x16   : > { %v1144_v3 = vld [vmem:[%s1292_s11 + $0x38] sm:$0xff]   ;;  %1043 = vmatprep.subr.bf16.mxu1 %v1143_v2  ;;  %v1148_v7 = vld [vmem:[%s1292_s11 + $0x30] sm:$0xff]   ;;  %v1152_v11 = vld [vmem:[%s1292_s11 + $0x28] sm:$0xff]   ;;  %v371_v37 = vshrl.u32 %v370_v31, 7 }
  0x17   : > { %v1145_v4 = vld [vmem:[%s1292_s11 + $0xb8] sm:$0xff]   ;;  %1022 = vmatpush3.bf16.msra.mxu0 %v1144_v3  ;;  %v1149_v8 = vld [vmem:[%s1292_s11 + $0xb0] sm:$0xff]   ;;  %v1153_v12 = vld [vmem:[%s1292_s11 + $0xa8] sm:$0xff]   ;;  %v369_v39 = vunpack.c.0.s8 %v368_v36 }
  0x18   : > { %1044 = vmatpush3.bf16.msra.mxu1 %v1145_v4  ;;  %1023 = vmatprep.subr.bf16.mxu0 %v1146_v5  ;;  %v1154_v13 = vld [vmem:[%s1292_s11 + $0x60] sm:$0xff]   ;;  %v1158_v17 = vld [vmem:[%s1292_s11 + $0x58] sm:$0xff]   ;;  %v1162_v21 = vld [vmem:[%s1292_s11 + $0x50] sm:$0xff]  }
  0x19   : > { %1045 = vmatprep.subr.bf16.mxu1 %v1147_v6  ;;  %v1155_v14 = vld [vmem:[%s1292_s11 + $0xe0] sm:$0xff]   ;;  %v1159_v18 = vld [vmem:[%s1292_s11 + $0xd8] sm:$0xff]   ;;  %v1163_v22 = vld [vmem:[%s1292_s11 + $0xd0] sm:$0xff]   ;;  %v372_v40 = vsub.s32 %v369_v39, %v371_v37 }
  0x1a   : > { %v1156_v15 = vld [vmem:[%s1292_s11 + $0x20] sm:$0xff]   ;;  %v1160_v19 = vld [vmem:[%s1292_s11 + $0x18] sm:$0xff]   ;;  %v1164_v23 = vld [vmem:[%s1292_s11 + $0x10] sm:$0xff]  }
  0x1b   : > { %1024 = vmatpush3.bf16.msra.mxu0 %v1148_v7  ;;  %v1157_v16 = vld [vmem:[%s1292_s11 + $0xa0] sm:$0xff]   ;;  %v1161_v20 = vld [vmem:[%s1292_s11 + $0x98] sm:$0xff]   ;;  %v1165_v24 = vld [vmem:[%s1292_s11 + $0x90] sm:$0xff]  }
  0x1c   : > { %1046 = vmatpush3.bf16.msra.mxu1 %v1149_v8  ;;  %1025 = vmatprep.subr.bf16.mxu0 %v1150_v9  ;;  %v1166_v25 = vld [vmem:[%s1292_s11 + $0x48] sm:$0xff]   ;;  %v1170_v29 = vld [vmem:[%s1292_s11 + $0x40] sm:$0xff]  }
  0x1d   : > { %1047 = vmatprep.subr.bf16.mxu1 %v1151_v10  ;;  %v1167_v26 = vld [vmem:[%s1292_s11 + $0xc8] sm:$0xff]   ;;  %v1171_v30 = vld [vmem:[%s1292_s11 + $0xc0] sm:$0xff]  }
  0x1e   : > { %v1168_v27 = vld [vmem:[%s1292_s11 + $0x8] sm:$0xff]   ;;  %v1172_v32 = vld [vmem:[%s1292_s11] sm:$0xff]  }
  0x1f   : > { %1026 = vmatpush3.bf16.msra.mxu0 %v1152_v11  ;;  %v1169_v28 = vld [vmem:[%s1292_s11 + $0x88] sm:$0xff]   ;;  %v1173_v33 = vld [vmem:[%s1292_s11 + $0x80] sm:$0xff]  }
  0x20   : > { %1048 = vmatpush3.bf16.msra.mxu1 %v1153_v12  ;;  %1027 = vmatprep.subr.bf16.mxu0 %v1154_v13  ;;  %v964_v34 = vld.sshfl [vmem:[%s278_s30] sm:$0x33 pattern:$0x75316420] }
  0x21   : > { %1049 = vmatprep.subr.bf16.mxu1 %v1155_v14  ;;  %v366_v38 = vcombine.high %v964_v34, %v964_v34  ;;  %v373_v42 = vrot.slane %v964_v34, %v372_v40  ;;  %v292_v52 = vld [vmem:[#allocation2] sm:$0x3] }
  0x23   : > { %1028 = vmatpush3.bf16.msra.mxu0 %v1156_v15  ;;  %v380_v41 = vrot.slane %v366_v38, %v372_v40  ;;  %v381_v44 = vcombine.high %v373_v42, %v373_v42 }
  0x24   : > { %1050 = vmatpush3.bf16.msra.mxu1 %v1157_v16  ;;  %1029 = vmatprep.subr.bf16.mxu0 %v1158_v17 }
  0x25   : > { %1051 = vmatprep.subr.bf16.mxu1 %v1159_v18  ;;  %611 = vmatprep.mubr.bf16.mxu0 %v380_v41  ;;  %v382_v43 = vcombine.high %v380_v41, %v380_v41 }
  0x27   : > { %1030 = vmatpush3.bf16.msra.mxu0 %v1160_v19  ;;  %651 = vmatprep.mubr.bf16.mxu1 %v382_v43 }
  0x28   : > { %1052 = vmatpush3.bf16.msra.mxu1 %v1161_v20  ;;  %1031 = vmatprep.subr.bf16.mxu0 %v1162_v21 }
  0x29   : > { %1053 = vmatprep.subr.bf16.mxu1 %v1163_v22 }
  0x2b   : > { %1032 = vmatpush3.bf16.msra.mxu0 %v1164_v23 }
  0x2c   : > { %1054 = vmatpush3.bf16.msra.mxu1 %v1165_v24  ;;  %1033 = vmatprep.subr.bf16.mxu0 %v1166_v25 }
  0x2d   : > { %1055 = vmatprep.subr.bf16.mxu1 %v1167_v26 }
  0x2f   : > { %1034 = vmatpush3.bf16.msra.mxu0 %v1168_v27 }
  0x30   : > { %1056 = vmatpush3.bf16.msra.mxu1 %v1169_v28  ;;  %1035 = vmatprep.subr.bf16.mxu0 %v1170_v29 }
  0x31   : > { %1057 = vmatprep.subr.bf16.mxu1 %v1171_v30 }
  0x33   : > { %1036 = vmatpush3.bf16.msra.mxu0 %v1172_v32 }
  0x34   : > { %1058 = vmatpush3.bf16.msra.mxu1 %v1173_v33 }
  0x36   : > { %612 = vmatmul.mubr.bf16.vlgmr.msra.gmra.mxu0 %v373_v42 }
  0x37   : > { %652 = vmatmul.mubr.bf16.vlgmr.msra.gmra.mxu1 %v381_v44 }
  0xf6   : > { %v1037_v45 = vpop.f32.mrf.mxu0 }
  0xf7   : > { %v1059_v46 = vpop.f32.mrf.mxu1 }
  0xf8   : > { %v1038_v47 = vpop.f32.mrf.mxu0 }
  0xf9   : > { %v1039_v48 = vadd.f32 %v1038_v47, %v1037_v45  ;;  %v1060_v49 = vpop.f32.mrf.mxu1 }
  0xfa   : > { %v1040_v50 = vpop.f32.mrf.mxu0  ;;  %v1061_v51 = vadd.f32 %v1060_v49, %v1059_v46 }
  0xfb   : > { %v1062_v53 = vpop.f32.mrf.mxu1 }
  0xfc   : > { %v1041_v54 = vpop.f32.mrf.mxu0  ;;  %v654_v55 = vadd.f32 %v1061_v51, %v1039_v48  ;;  %664 = sbr.rel (%p997_p6) target bundleno = 688 (0x2b0), region = 56 }
  0xfd   : > { %v1063_v56 = vpop.f32.mrf.mxu1 }
  0xfe   : > { %v659_v57 = vadd.f32 %v654_v55, %v292_v52 }
 0x100   : > { %660 = vst [vmem:[#allocation2] sm:$0x3] %v659_v57 }
 0x101   : > { %v1174_v58 = vld [vmem:[%s1408_s3 + $0x38] sm:$0xff]   ;;  %v1228_v59 = vmov 0.0   ;;  %v1175_v60 = vld [vmem:[%s1408_s3 + $0x30] sm:$0xff]   ;;  %vm1229_vm0 = vmmov 0   ;;  %v1176_v61 = vld [vmem:[%s1408_s3 + $0x28] sm:$0xff]  }
 0x102   : > { %1083 = vmatprep.subr.bf16.mxu0 %v1228_v59  ;;  %1103 = vmatprep.subr.bf16.mxu1 %v1228_v59  ;;  %v1182_v62 = vld [vmem:[%s1410_s5 + $0x38] sm:$0xff]   ;;  %v1177_v63 = vld [vmem:[%s1408_s3 + $0x20] sm:$0xff]   ;;  %v1183_v0 = vld [vmem:[%s1410_s5 + $0x30] sm:$0xff]  }
 0x103   : > { %1084 = vmatpush3.bf16.msra.mxu0 %v1174_v58  ;;  %1099 = vmatprep.mubr.msk.bf16.mxu0 %vm1229_vm0, %v1228_v59  ;;  %v1178_v1 = vld [vmem:[%s1408_s3 + $0x18] sm:$0xff]   ;;  %v1184_v2 = vld [vmem:[%s1410_s5 + $0x28] sm:$0xff]   ;;  %v1179_v3 = vld [vmem:[%s1408_s3 + $0x10] sm:$0xff]  }
 0x104   : > { %1085 = vmatprep.subr.bf16.mxu0 %v1228_v59  ;;  %1119 = vmatprep.mubr.msk.bf16.mxu1 %vm1229_vm0, %v1228_v59  ;;  %v998_v5 = vld [vmem:[%s1407_s2] ss:$0 sm:$0xff]  ;;  %v1180_v8 = vld [vmem:[%s1408_s3 + $0x8] sm:$0xff]   ;;  %v1186_v9 = vld [vmem:[%s1410_s5 + $0x18] sm:$0xff]  }
 0x105   : > { %1104 = vmatpush3.bf16.msra.mxu1 %v1182_v62  ;;  %v1185_v6 = vld [vmem:[%s1410_s5 + $0x20] sm:$0xff]   ;;  %v1187_v12 = vld [vmem:[%s1410_s5 + $0x10] sm:$0xff]   ;;  %v1188_v14 = vld [vmem:[%s1410_s5 + $0x8] sm:$0xff]  }
 0x106   : > { %1105 = vmatprep.subr.bf16.mxu1 %v1228_v59  ;;  %v1181_v11 = vld [vmem:[%s1408_s3] sm:$0xff]  }
 0x107   : > { %1086 = vmatpush3.bf16.msra.mxu0 %v1175_v60  ;;  %v665_v4 = vld [vmem:[#allocation2] sm:$0x3] }
 0x108   : > { %1087 = vmatprep.subr.bf16.mxu0 %v1228_v59  ;;  %v673_v7 = vadd.f32 %v998_v5, %v665_v4  ;;  %v1189_v15 = vld [vmem:[%s1410_s5] sm:$0xff]  }
 0x109   : > { %1106 = vmatpush3.bf16.msra.mxu1 %v1183_v0  ;;  %v999_v16 = vld [vmem:[%s1409_s4] ss:$0 sm:$0xff] }
 0x10a   : > { %1107 = vmatprep.subr.bf16.mxu1 %v1228_v59  ;;  %v674_v10 = vmax.f32 %v673_v7, 0.0  ;;  %v1008_v24 = vld [vmem:[%s1411_s6] ss:$0 sm:$0xff] }
 0x10b   : > { %1088 = vmatpush3.bf16.msra.mxu0 %v1176_v61 }
 0x10c   : > { %1089 = vmatprep.subr.bf16.mxu0 %v1228_v59  ;;  %v675_v13 = vpack.c.bf16 %v674_v10, %v674_v10 }
 0x10d   : > { %1108 = vmatpush3.bf16.msra.mxu1 %v1184_v2 }
 0x10e   : > { %1109 = vmatprep.subr.bf16.mxu1 %v1228_v59 }
 0x10f   : > { %1090 = vmatpush3.bf16.msra.mxu0 %v1177_v63 }
 0x110   : > { %1091 = vmatprep.subr.bf16.mxu0 %v1228_v59 }
 0x111   : > { %1110 = vmatpush3.bf16.msra.mxu1 %v1185_v6 }
 0x112   : > { %1111 = vmatprep.subr.bf16.mxu1 %v1228_v59 }
 0x113   : > { %1092 = vmatpush3.bf16.msra.mxu0 %v1178_v1 }
 0x114   : > { %1093 = vmatprep.subr.bf16.mxu0 %v1228_v59 }
 0x115   : > { %1112 = vmatpush3.bf16.msra.mxu1 %v1186_v9 }
 0x116   : > { %1113 = vmatprep.subr.bf16.mxu1 %v1228_v59 }
 0x117   : > { %1094 = vmatpush3.bf16.msra.mxu0 %v1179_v3 }
 0x118   : > { %1095 = vmatprep.subr.bf16.mxu0 %v1228_v59 }
 0x119   : > { %1114 = vmatpush3.bf16.msra.mxu1 %v1187_v12 }
 0x11a   : > { %1115 = vmatprep.subr.bf16.mxu1 %v1228_v59 }
 0x11b   : > { %1096 = vmatpush3.bf16.msra.mxu0 %v1180_v8 }
 0x11c   : > { %1097 = vmatprep.subr.bf16.mxu0 %v1228_v59 }
 0x11d   : > { %1116 = vmatpush3.bf16.msra.mxu1 %v1188_v14 }
 0x11e   : > { %1117 = vmatprep.subr.bf16.mxu1 %v1228_v59 }
 0x11f   : > { %1098 = vmatpush3.bf16.msra.mxu0 %v1181_v11 }
 0x121   : > { %1118 = vmatpush3.bf16.msra.mxu1 %v1189_v15 }
 0x122   : > { %1100 = vmatmul.mubr.bf16.vlgmr.msra.gmra.mxu0 %v675_v13 }
 0x1e2   : > { %v781_v17 = vpop.f32.mrf.mxu0 }
 0x1e3   : > { %v782_v18 = vadd.f32 %v999_v16, %v781_v17 }
 0x1e4   : > { %v1101_v19 = vpop.f32.mrf.mxu0 }
 0x1e5   : > { %v787_v20 = vmax.f32 %v782_v18, 0.0 }
 0x1e6   : > { %v784_v21 = vpop.f32.mrf.mxu0 }
 0x1e7   : > { %v788_v22 = vpack.c.bf16 %v787_v20, %v787_v20 }
 0x1e8   : > { %v1102_v23 = vpop.f32.mrf.mxu0 }
 0x1e9   : > { %1120 = vmatmul.mubr.bf16.vlgmr.msra.gmra.mxu1 %v788_v22 }
 0x2a9   : > { %v894_v25 = vpop.f32.mrf.mxu1 }
 0x2aa   : > { %v895_v26 = vadd.f32 %v1008_v24, %v894_v25 }
 0x2ab   : > { %v1121_v27 = vpop.f32.mrf.mxu1 }
 0x2ac   : > { %900 = vst [vmem:[#allocation3] sm:$0x3] %v895_v26 }
 0x2ad   : > { %v897_v28 = vpop.f32.mrf.mxu1 }
 0x2af   : > { %v1122_v29 = vpop.f32.mrf.mxu1 }
 0x2b0 PF: > { %p1127_p7 = scmp.eq.s32.totalorder %s1277_s25, 3  ;;  %s1230_s10 = smov [#allocation3]  }
 0x2b1   : > { %s908_s11 = sshll.u32 %s1230_s10, 4  ;;  %s909_s11 = int_to_ptr.vmem [resolvable:$true] %s908_s11 }
 0x2b2   : > { %s1190_s12 = scalar_lea.vmem %s909_s11, 32  ;;  %p1197_p11 = scmp.lt.s32.totalorder %s909_s11, %s909_s11 }
 0x2b3   : > { %p1191_p8 = scmp.ne.s32.totalorder %s909_s11, %s1190_s12  ;;  %p1198_p12 = scmp.lt.s32.totalorder %s1190_s12, %s1190_s12 }
 0x2b5   : > { %p1192_p9 = pnand %p1191_p8, %p1127_p7  ;;  %p1199_p13 = por %p1198_p12, %p1197_p11 }
 0x2b7   : > { %p1193_p10 = pneg %p1192_p9 }
 0x2b9   : > { %p1200_p0 = pnand %p1199_p13, %p1193_p10 }
 0x2bb   : > { %1203 = shalt.err (!%p1200_p0)
}
 0x2bc   : > { %1124 = dma.vmem_to_hbm [thread:$0]  (%p1127_p7), %s909_s11, 32, %s1412_s7, [#allocation4]  }
 0x2bd   : > { %1219 = dma.done.wait (%p1127_p7), [#allocation4], 32  }
 0x2be   : > { %1221 = vsyncadd (%p1127_p7), [#allocation4], 4294967264 }
 0x2bf PF: > { %s18_s24 = sadd.s32 1, %s1224_s24  }
 0x2c0   : > { %p15_p1 = scmp.ge.s32.totalorder %s18_s24, 6  }
 0x2c2   :  { %17 = sbr.rel (!%p15_p1) target bundleno = 1 (0x1), region = 86 }
 0x2c7   :  { %921 = vsyncpa [#allocation4], 1 }
 0x2c8   :  { %923 = vsyncpa [#allocation4 + $0x1], 1 }

// kernel: _lambda_.6
= control target key start
LH: loop header
LB: loop body
LE: loop exit
PB: predicated region body
PF: predicated region fallthrough
CT: control target
= control target key end

     0   :  { %s3393_s12 = smov 0   ;;  %s4163_s0 = inlined_call_operand.vmem [shape: bf16[2,10,10,128], index: 0, kind: input, shape index: {}]   ;;  %s4164_s1 = inlined_call_operand.vmem [shape: bf16[3,384,128], index: 1, kind: input, shape index: {}]   ;;  %s4165_s2 = inlined_call_operand.vmem [shape: f32[1,128], index: 2, kind: input, shape index: {}]   ;;  %s4166_s3 = inlined_call_operand.vmem [shape: bf16[2,4,4,128], index: 3, kind: output, shape index: {}]  }
   0x1 LB: > { %s2726_s13 = sadd.s32 4294967295, %s3369_s12   ;;  %p2730_p0 = scmp.ge.s32.totalorder %s3369_s12, 1  ;;  %s3369_s12 = sphi %s3393_s12, %s13_s12  }
   0x2   : > { %p137_p1 = scmp.lt.s32.totalorder %s3369_s12, 3 }
   0x4   : > { %p138_p2 = pnand %p2730_p0, %p137_p1 }
   0x5   : > { %p161_p3 = scmp.lt.s32.totalorder (!%p138_p2), %s2726_s13, 1 }
   0x6   : > { %141 = sbr.rel (%p138_p2) target bundleno = 479 (0x1df), region = 32 }
   0xb   : > { %v3242_v0 = vld [vmem:[%s4164_s1 + $0x138] sm:$0xff]   ;;  %v3245_v3 = vld [vmem:[%s4164_s1 + $0x130] sm:$0xff]   ;;  %v3248_v6 = vld [vmem:[%s4164_s1 + $0x128] sm:$0xff]   ;;  %s4172_s13 = smov (!%p161_p3, %s2726_s13), 1  ;;  %vm313_vm0 = vsmask.f32 3328 }
   0xc   : > { %v3243_v1 = vld [vmem:[%s4164_s1 + $0xf8] sm:$0xff]   ;;  %3003 = vmatprep.subr.bf16.mxu0 %v3242_v0  ;;  %v3246_v4 = vld [vmem:[%s4164_s1 + $0xf0] sm:$0xff]   ;;  %v3249_v7 = vld [vmem:[%s4164_s1 + $0xe8] sm:$0xff]   ;;  %s3231_s21 = smul.u32 80, %s4172_s13  ;;  %vm314_vm1 = vsmask.f32 7440 }
   0xd   : > { %v3244_v2 = vld [vmem:[%s4164_s1 + $0x178] sm:$0xff]   ;;  %3004 = vmatpush3.bf16.msra.mxu0 %v3243_v1  ;;  %v3247_v5 = vld [vmem:[%s4164_s1 + $0x170] sm:$0xff]   ;;  %v3250_v8 = vld [vmem:[%s4164_s1 + $0x168] sm:$0xff]   ;;  %vm1241_vm3 = vcmask 1042432   ;;  %vm1242_vm4 = vcmask 1046532   ;;  %vm1914_vm6 = vcmask 1040384  }
   0xe   : > { %3159 = vmatprep.subr.bf16.mxu1 %v3244_v2  ;;  %3005 = vmatprep.subr.bf16.mxu0 %v3245_v3  ;;  %v3251_v9 = vld [vmem:[%s4164_s1 + $0x120] sm:$0xff]   ;;  %v3254_v12 = vld [vmem:[%s4164_s1 + $0x118] sm:$0xff]   ;;  %v3257_v15 = vld [vmem:[%s4164_s1 + $0x110] sm:$0xff]   ;;  %s3471_s5 = scalar_lea.vmem %s4163_s0, %s3231_s21  ;;  %vm2605_vm7 = vcmask 1041409   ;;  %vm2608_vm8 = vcmask 1042434   ;;  %vm2611_vm9 = vcmask 1043459  }
   0xf   : > { %3160 = vmatpush3.bf16.msra.mxu1 %v3244_v2  ;;  %v3252_v10 = vld [vmem:[%s4164_s1 + $0xe0] sm:$0xff]   ;;  %v3256_v13 = vld [vmem:[%s4164_s1 + $0x158] sm:$0xff]   ;;  %v3259_v16 = vld [vmem:[%s4164_s1 + $0x150] sm:$0xff]   ;;  %s3002_s17 = sshll.u32 %s4172_s13, 3 }
  0x10   : > { %3161 = vmatprep.subr.bf16.mxu1 %v3247_v5  ;;  %v3253_v11 = vld [vmem:[%s4164_s1 + $0x160] sm:$0xff]   ;;  %v3255_v14 = vld [vmem:[%s4164_s1 + $0xd8] sm:$0xff]   ;;  %v3258_v17 = vld [vmem:[%s4164_s1 + $0xd0] sm:$0xff]   ;;  %s4062_s20 = scalar_lea.vmem %s4166_s3, %s3002_s17 }
  0x11   : > { %3006 = vmatpush3.bf16.msra.mxu0 %v3246_v4  ;;  %v3260_v18 = vld [vmem:[%s4164_s1 + $0x108] sm:$0xff]   ;;  %v3263_v21 = vld [vmem:[%s4164_s1 + $0x100] sm:$0xff]   ;;  %v175_v25 = vld [vmem:[%s3471_s5 + $0x10] sm:$0xf] }
  0x12   : > { %3007 = vmatprep.subr.bf16.mxu0 %v3248_v6  ;;  %v3261_v19 = vld [vmem:[%s4164_s1 + $0xc8] sm:$0xff]   ;;  %v3265_v22 = vld [vmem:[%s4164_s1 + $0x140] sm:$0xff]   ;;  %v3491_v29 = vld [vmem:[%s3471_s5 + $0x14] sm:$0x1]  ;;  %v2735_v32 = vcombine.low %v175_v25, %v175_v25 }
  0x13   : > { %3162 = vmatpush3.bf16.msra.mxu1 %v3247_v5  ;;  %v3262_v20 = vld [vmem:[%s4164_s1 + $0x148] sm:$0xff]   ;;  %v173_v23 = vld [vmem:[%s3471_s5] sm:$0xf]  ;;  %v251_v27 = vld [vmem:[%s3471_s5 + $0x4] sm:$0x1]  ;;  %v3514_v43 = vcombine.low %v3491_v29, %v3491_v29 }
  0x14   : > { %3163 = vmatprep.subr.bf16.mxu1 %v3250_v8  ;;  %v174_v24 = vld [vmem:[%s3471_s5 + $0x8] sm:$0xf]  ;;  %v3264_v26 = vld [vmem:[%s4164_s1 + $0xc0] sm:$0xff]   ;;  %v252_v28 = vld [vmem:[%s3471_s5 + $0xc] sm:$0x1]  ;;  %v331_v44 = vshrl.u32 %v2735_v32, 16 }
  0x15   : > { %3008 = vmatpush3.bf16.msra.mxu0 %v3249_v7  ;;  %v3493_v30 = vcombine.low %v173_v23, %v174_v24  ;;  %v3495_v31 = vcombine.low %v174_v24, %v175_v25  ;;  %v3497_v33 = vcombine.low %v251_v27, %v252_v28  ;;  %v3500_v34 = vcombine.low %v252_v28, %v3491_v29  ;;  %v3270_v41 = vld [vmem:[%s4164_s1 + $0x78] sm:$0xff]   ;;  %v177_v55 = vld [vmem:[%s3471_s5 + $0x20] sm:$0xf]  ;;  %vm3526_vm2 = vmor %vm313_vm0, %vm314_vm1 }
  0x16   : > { %3009 = vmatprep.subr.bf16.mxu0 %v3251_v9  ;;  %v176_v42 = vld [vmem:[%s3471_s5 + $0x18] sm:$0xf]  ;;  %v3517_v50 = vld [vmem:[%s3471_s5 + $0x1c] sm:$0x1]  ;;  %v333_v58 = vrot.slane %v331_v44, 4  ;;  %v334_v59 = vshll.u32 %v2735_v32, 16  ;;  %vm3833_vm5 = vmor %vm1241_vm3, %vm1242_vm4 }
  0x17   : > { %3164 = vmatpush3.bf16.msra.mxu1 %v3250_v8  ;;  %v317_v35 = vshrl.u32 %v3493_v30, 16  ;;  %v320_v36 = vshll.u32 %v3493_v30, 16  ;;  %v345_v37 = vshrl.u32 %v3495_v31, 16  ;;  %v348_v38 = vshll.u32 %v3495_v31, 16  ;;  %v3532_v62 = vld [vmem:[%s3471_s5 + $0x28] sm:$0xf] }
  0x18   : > { %3165 = vmatprep.subr.bf16.mxu1 %v3253_v11  ;;  %v326_v39 = vshll.u32 %v3497_v33, 16  ;;  %v354_v40 = vshll.u32 %v3500_v34, 16  ;;  %v2739_v51 = vcombine.low %v176_v42, %v176_v42  ;;  %v3522_v56 = vcombine.low %v3517_v50, %v3517_v50  ;;  %v3535_v63 = vld [vmem:[%s3471_s5 + $0x24] sm:$0x1]  ;;  %v3539_v4 = vld [vmem:[%s3471_s5 + $0x2c] sm:$0x1] }
  0x19   : > { %3010 = vmatpush3.bf16.msra.mxu0 %v3252_v10  ;;  %v319_v45 = vrot.slane %v317_v35, 4  ;;  %v322_v46 = vrot.slane %v320_v36, 5  ;;  %v347_v47 = vrot.slane %v345_v37, 4  ;;  %v350_v48 = vrot.slane %v348_v38, 5  ;;  %v3546_v9 = vld [vmem:[%s4164_s1 + $0xb8] sm:$0xff]   ;;  %v3284_v23 = vld [vmem:[%s4164_s1 + $0x70] sm:$0xff]  }
  0x1a   : > { %3011 = vmatprep.subr.bf16.mxu0 %v3254_v12  ;;  %v328_v49 = vrot.slane %v326_v39, 5  ;;  %v356_v54 = vrot.slane %v354_v40, 5  ;;  %v340_v60 = vshll.u32 %v3514_v43, 16  ;;  %v359_v61 = vshrl.u32 %v2739_v51, 16  ;;  %v3327_v57 = vld [vmem:[%s4164_s1 + $0x230] sm:$0xff]  }
  0x1b   : > { %3166 = vmatpush3.bf16.msra.mxu1 %v3253_v11  ;;  %v323_v52 = vor.u32 %v322_v46, %v319_v45  ;;  %v351_v53 = vor.u32 %v350_v48, %v347_v47  ;;  %v362_v2 = vshll.u32 %v2739_v51, 16  ;;  %v368_v3 = vshll.u32 %v3522_v56, 16 }
  0x1c   : > { %3167 = vmatprep.subr.bf16.mxu1 %v3256_v13  ;;  %v3541_v5 = vcombine.low %v175_v25, %v176_v42  ;;  %v336_v6 = vrot.slane %v334_v59, 5  ;;  %v361_v7 = vrot.slane %v359_v61, 4  ;;  %v2743_v8 = vcombine.low %v177_v55, %v177_v55 }
  0x1d   : > { %3012 = vmatpush3.bf16.msra.mxu0 %v3255_v14  ;;  %v324_v0 = vrot.slane %v323_v52, 4  ;;  %v352_v1 = vrot.slane %v351_v53, 4  ;;  %v342_v12 = vrot.slane %v340_v60, 5  ;;  %v3571_v37 = vcombine.low %v176_v42, %v177_v55  ;;  %v3289_v42 = vld [vmem:[%s4164_s1 + $0x68] sm:$0xff]  }
  0x1e   : > { %3013 = vmatprep.subr.bf16.mxu0 %v3257_v15  ;;  %v387_v25 = vshrl.u32 %v2743_v8, 16  ;;  %v3290_v53 = vld [vmem:[%s4164_s1 + $0x28] sm:$0xff]   ;;  %v3595_v59 = vcombine.low %v3517_v50, %v3535_v63  ;;  %v373_v60 = vshrl.u32 %v3541_v5, 16 }
  0x1f   : > { %3168 = vmatpush3.bf16.msra.mxu1 %v3256_v13  ;;  %v329_v10 = vsel %vm3526_vm2, %v324_v0, %v328_v49  ;;  %v357_v11 = vsel %vm3526_vm2, %v352_v1, %v356_v54  ;;  %v364_v13 = vrot.slane %v362_v2, 5  ;;  %v3584_v49 = vcombine.low %v177_v55, %v3532_v62  ;;  %v3292_v55 = vld [vmem:[%s4164_s1 + $0x60] sm:$0xff]  }
  0x20   : > { %3169 = vmatprep.subr.bf16.mxu1 %v3259_v16  ;;  %v2814_v14 = vcombine.low %v329_v10, %v357_v11  ;;  %v2815_v15 = vcombine.high %v329_v10, %v357_v11  ;;  %v389_v39 = vrot.slane %v387_v25, 4  ;;  %v376_v0 = vshll.u32 %v3541_v5, 16  ;;  %v3623_v25 = vld [vmem:[%s3471_s5 + $0x34] sm:$0x1] }
  0x21   : > { %3014 = vmatpush3.bf16.msra.mxu0 %v3258_v17  ;;  %v3277_v17 = vld [vmem:[%s4164_s1 + $0x38] sm:$0xff]   ;;  %v401_v1 = vshrl.u32 %v3571_v37, 16 }
  0x22   : > { %3015 = vmatprep.subr.bf16.mxu0 %v3260_v18  ;;  %v3557_v18 = vcombine.low %v3535_v63, %v3535_v63  ;;  %813 = vmatprep.mubr.bf16.mxu0 %v2815_v15  ;;  %v378_v10 = vrot.slane %v376_v0, 5 }
  0x23   : > { %3170 = vmatpush3.bf16.msra.mxu1 %v3259_v16  ;;  %v337_v16 = vor.u32 %v336_v6, %v333_v58  ;;  %v3591_v58 = vcombine.low %v3491_v29, %v3517_v50  ;;  %v404_v29 = vshll.u32 %v3571_v37, 16  ;;  %v410_v6 = vshll.u32 %v3595_v59, 16 }
  0x24   : > { %3171 = vmatprep.subr.bf16.mxu1 %v3262_v20  ;;  %v396_v27 = vshll.u32 %v3557_v18, 16  ;;  %v403_v11 = vrot.slane %v401_v1, 4 }
  0x25   : > { %3016 = vmatpush3.bf16.msra.mxu0 %v3261_v19  ;;  %v365_v19 = vor.u32 %v364_v13, %v361_v7  ;;  %v338_v24 = vrot.slane %v337_v16, 4  ;;  %v382_v50 = vshll.u32 %v3591_v58, 16  ;;  %v412_v15 = vrot.slane %v410_v6, 5 }
  0x26   : > { %3017 = vmatprep.subr.bf16.mxu0 %v3263_v21  ;;  %v2747_v21 = vcombine.low %v3532_v62, %v3532_v62  ;;  %v398_v45 = vrot.slane %v396_v27, 5  ;;  %v3615_v16 = vcombine.low %v3535_v63, %v3539_v4  ;;  %v432_v63 = vshll.u32 %v3584_v49, 16 }
  0x27   : > { %3172 = vmatpush3.bf16.msra.mxu1 %v3262_v20  ;;  %v370_v20 = vrot.slane %v368_v3, 5  ;;  %v366_v28 = vrot.slane %v365_v19, 4  ;;  %v343_v38 = vsel %vm3526_vm2, %v338_v24, %v342_v12  ;;  %v375_v3 = vrot.slane %v373_v60, 4  ;;  %v3304_v60 = vld [vmem:[%s4164_s1 + $0x18] sm:$0xff]  }
  0x28   : > { %3173 = vmatprep.subr.bf16.mxu1 %v3265_v22  ;;  %v415_v32 = vshrl.u32 %v2747_v21, 16  ;;  %v418_v35 = vshll.u32 %v2747_v21, 16  ;;  %v406_v12 = vrot.slane %v404_v29, 5  ;;  %v3293_v21 = vld [vmem:[%s4164_s1 + $0x20] sm:$0xff]   ;;  %v429_v24 = vshrl.u32 %v3584_v49, 16 }
  0x29   : > { %3018 = vmatpush3.bf16.msra.mxu0 %v3264_v26  ;;  %v390_v26 = vshll.u32 %v2743_v8, 16  ;;  %v371_v44 = vsel %vm3526_vm2, %v366_v28, %v370_v20  ;;  %v3286_v8 = vld [vmem:[%s4164_s1 + $0xb0] sm:$0xff]   ;;  %v379_v19 = vor.u32 %v378_v10, %v375_v3  ;;  %v438_v27 = vshll.u32 %v3615_v16, 16  ;;  %v3674_v3 = vld [vmem:[%s3471_s5 + $0x44] sm:$0x1] }
  0x2a   : > { %3055 = vmatprep.subr.bf16.mxu0 %v3270_v41  ;;  %v3285_v41 = vld [vmem:[%s4164_s1 + $0x30] sm:$0xff]   ;;  %v417_v46 = vrot.slane %v415_v32, 4  ;;  %v420_v47 = vrot.slane %v418_v35, 5  ;;  %v2816_v48 = vcombine.low %v343_v38, %v371_v44  ;;  %v407_v20 = vor.u32 %v406_v12, %v403_v11  ;;  %v3680_v11 = vld [vmem:[%s3471_s5 + $0x48] sm:$0xf] }
  0x2b   : > { %3174 = vmatpush3.bf16.msra.mxu1 %v3265_v22  ;;  %v3564_v22 = vcombine.low %v3539_v4, %v3539_v4  ;;  %v392_v40 = vrot.slane %v390_v26, 5  ;;  %v380_v32 = vrot.slane %v379_v19, 4  ;;  %v431_v38 = vrot.slane %v429_v24, 4  ;;  %v3310_v12 = vld [vmem:[%s4164_s1 + $0x50] sm:$0xff]  }
  0x2c   : > { %3183 = vmatprep.subr.bf16.mxu1 %v3546_v9  ;;  %814 = vmatmul.mubr.bf16.vlgmr.msra.gmra.mxu0 %v2814_v14  ;;  %v421_v54 = vor.u32 %v420_v47, %v417_v46  ;;  %v384_v14 = vrot.slane %v382_v50, 5  ;;  %v408_v35 = vrot.slane %v407_v20, 4  ;;  %v3291_v47 = vld [vmem:[%s4164_s1 + $0xa8] sm:$0xff]   ;;  %v3311_v24 = vld [vmem:[%s4164_s1 + $0x10] sm:$0xff]  }
  0x2d   : > { %v424_v36 = vshll.u32 %v3564_v22, 16  ;;  %3056 = vmatpush3.bf16.msra.mxu0 %v3277_v17  ;;  %v393_v51 = vor.u32 %v392_v40, %v389_v39  ;;  %3175 = vmatprep.mubr.bf16.mxu1 %v2816_v48  ;;  %v3298_v39 = vld [vmem:[%s4164_s1 + $0x58] sm:$0xff]   ;;  %v440_v40 = vrot.slane %v438_v27, 5  ;;  %v3656_v48 = vcombine.low %v3623_v25, %v3623_v25 }
  0x2e   : > { %3057 = vmatprep.subr.bf16.mxu0 %v3284_v23  ;;  %v422_v2 = vrot.slane %v421_v54, 4  ;;  %v179_v23 = vld [vmem:[%s3471_s5 + $0x30] sm:$0xf]  ;;  %v413_v46 = vsel %vm3526_vm2, %v408_v35, %v412_v15 }
  0x2f   : > { %v426_v52 = vrot.slane %v424_v36, 5  ;;  %v394_v61 = vrot.slane %v393_v51, 4  ;;  %v3626_v26 = vcombine.low %v3532_v62, %v179_v23  ;;  %v2751_v28 = vcombine.low %v179_v23, %v179_v23 }
  0x30   : > { %v3632_v36 = vcombine.low %v3539_v4, %v3623_v25  ;;  %v434_v62 = vrot.slane %v432_v63, 5  ;;  %v385_v4 = vsel %vm3526_vm2, %v380_v32, %v384_v14  ;;  %v452_v14 = vshll.u32 %v3656_v48, 16 }
  0x31   : > { %3058 = vmatpush3.bf16.msra.mxu0 %v3285_v41  ;;  %v399_v7 = vsel %vm3526_vm2, %v394_v61, %v398_v45  ;;  %v427_v13 = vsel %vm3526_vm2, %v422_v2, %v426_v52  ;;  %v457_v41 = vshrl.u32 %v3626_v26, 16  ;;  %v460_v44 = vshll.u32 %v3626_v26, 16  ;;  %v3641_v45 = vld [vmem:[%s3471_s5 + $0x38] sm:$0xf]  ;;  %v3671_v2 = vld [vmem:[%s3471_s5 + $0x40] sm:$0xf] }
  0x32   : > { %3059 = vmatprep.subr.bf16.mxu0 %v3289_v42  ;;  %v2819_v17 = vcombine.low %v399_v7, %v427_v13  ;;  %v3652_v42 = vld [vmem:[%s3471_s5 + $0x3c] sm:$0x1]  ;;  %v2818_v51 = vcombine.high %v385_v4, %v413_v46  ;;  %v2817_v52 = vcombine.low %v385_v4, %v413_v46  ;;  %v2755_v1 = vcombine.low %v3641_v45, %v3641_v45 }
  0x33   : > { %v459_v54 = vrot.slane %v457_v41, 4  ;;  %v462_v61 = vrot.slane %v460_v44, 5  ;;  %v3668_v29 = vcombine.low %v3652_v42, %v3652_v42  ;;  %v3677_v6 = vcombine.low %v179_v23, %v3641_v45 }
  0x34   : > { %3176 = vmatmul.mubr.bf16.vlgmr.msra.gmra.mxu1 %v2819_v17  ;;  %821 = vmatprep.mubr.bf16.mxu0 %v2818_v51  ;;  %v443_v7 = vshrl.u32 %v2751_v28, 16  ;;  %v446_v10 = vshll.u32 %v2751_v28, 16  ;;  %v471_v15 = vshrl.u32 %v2755_v1, 16  ;;  %v474_v17 = vshll.u32 %v2755_v1, 16 }
  0x35   : > { %3060 = vmatpush3.bf16.msra.mxu0 %v3290_v53  ;;  %3184 = vmatpush3.bf16.msra.mxu1 %v3546_v9  ;;  %v466_v9 = vshll.u32 %v3632_v36, 16  ;;  %v435_v53 = vor.u32 %v434_v62, %v431_v38  ;;  %v463_v13 = vor.u32 %v462_v61, %v459_v54  ;;  %v480_v23 = vshll.u32 %v3668_v29, 16 }
  0x36   : > { %3061 = vmatprep.subr.bf16.mxu0 %v3292_v55  ;;  %3185 = vmatprep.subr.bf16.mxu1 %v3286_v8  ;;  %v3294_v55 = vld [vmem:[%s4164_s1 + $0xa0] sm:$0xff]   ;;  %v445_v20 = vrot.slane %v443_v7, 4  ;;  %v454_v27 = vrot.slane %v452_v14, 5  ;;  %v473_v28 = vrot.slane %v471_v15, 4  ;;  %v476_v32 = vrot.slane %v474_v17, 5 }
  0x37   : > { %v468_v0 = vrot.slane %v466_v9, 5  ;;  %v436_v50 = vrot.slane %v435_v53, 4  ;;  %822 = vmatmul.mubr.bf16.gmra.mxu0 %v2817_v52  ;;  %v464_v63 = vrot.slane %v463_v13, 4  ;;  %v482_v38 = vrot.slane %v480_v23, 5 }
  0x38   : > { %v3699_v62 = vcombine.low %v3674_v3, %v3674_v3  ;;  %v477_v44 = vor.u32 %v476_v32, %v473_v28  ;;  %v2763_v4 = vcombine.low %v3680_v11, %v3680_v11  ;;  %v3729_v23 = vcombine.low %v3641_v45, %v3671_v2 }
  0x39   : > { %3062 = vmatpush3.bf16.msra.mxu0 %v3293_v21  ;;  %3186 = vmatpush3.bf16.msra.mxu1 %v3286_v8  ;;  %v3687_v8 = vld [vmem:[%s3471_s5 + $0x4c] ss:$0 sps:$4 sm:$0x11]   ;;  %v441_v19 = vsel %vm3526_vm2, %v436_v50, %v440_v40  ;;  %v448_v21 = vrot.slane %v446_v10, 5  ;;  %v3309_v40 = vld [vmem:[%s4164_s1 + $0x98] sm:$0xff]   ;;  %v469_v41 = vsel %vm3526_vm2, %v464_v63, %v468_v0  ;;  %v485_v28 = vshrl.u32 %v3677_v6, 16 }
  0x3a   : > { %3063 = vmatprep.subr.bf16.mxu0 %v3298_v39  ;;  %3187 = vmatprep.subr.bf16.mxu1 %v3291_v47  ;;  %v2759_v39 = vcombine.low %v3671_v2, %v3671_v2  ;;  %v536_v46 = vshll.u32 %v3687_v8, 16  ;;  %v2821_v9 = vcombine.high %v441_v19, %v469_v41  ;;  %v2820_v51 = vcombine.low %v441_v19, %v469_v41 }
  0x3b   : > { %v449_v35 = vor.u32 %v448_v21, %v445_v20  ;;  %v478_v54 = vrot.slane %v477_v44, 4  ;;  %v508_v61 = vshll.u32 %v3699_v62, 16  ;;  %v527_v0 = vshrl.u32 %v2763_v4, 16 }
  0x3c   : > { %v499_v53 = vshrl.u32 %v2759_v39, 16  ;;  %829 = vmatprep.mubr.bf16.mxu0 %v2821_v9  ;;  %v530_v7 = vshll.u32 %v2763_v4, 16  ;;  %v538_v10 = vrot.slane %v536_v46, 5  ;;  %v3725_v21 = vcombine.low %v3623_v25, %v3652_v42  ;;  %v3318_v25 = vld [vmem:[%s4164_s1 + $0x88] sm:$0xff]  }
  0x3d   : > { %3064 = vmatpush3.bf16.msra.mxu0 %v3304_v60  ;;  %3188 = vmatpush3.bf16.msra.mxu1 %v3291_v47  ;;  %v3316_v47 = vld [vmem:[%s4164_s1 + $0x48] sm:$0xff]   ;;  %v450_v52 = vrot.slane %v449_v35, 4  ;;  %v502_v60 = vshll.u32 %v2759_v39, 16  ;;  %v483_v13 = vsel %vm3526_vm2, %v478_v54, %v482_v38  ;;  %v510_v15 = vrot.slane %v508_v61, 5  ;;  %v3322_v61 = vld [vmem:[%s4164_s1 + $0x1f8] sm:$0xff]  }
  0x3e   : > { %3065 = vmatprep.subr.bf16.mxu0 %v3310_v12  ;;  %3189 = vmatprep.subr.bf16.mxu1 %v3294_v55  ;;  %v501_v50 = vrot.slane %v499_v53, 4  ;;  %v3317_v12 = vld [vmem:[%s4164_s1 + $0x8] sm:$0xff]   ;;  %v529_v17 = vrot.slane %v527_v0, 4  ;;  %v532_v20 = vrot.slane %v530_v7, 5  ;;  %v488_v32 = vshll.u32 %v3677_v6, 16 }
  0x3f   : > { %v455_v1 = vsel %vm3526_vm2, %v450_v52, %v454_v27  ;;  %830 = vmatmul.mubr.bf16.gmra.mxu0 %v2820_v51  ;;  %v504_v14 = vrot.slane %v502_v60, 5  ;;  %v3736_v27 = vcombine.low %v3652_v42, %v3674_v3  ;;  %v494_v35 = vshll.u32 %v3725_v21, 16  ;;  %v3320_v42 = vld [vmem:[%s4164_s1] sm:$0xff]  }
  0x40   : > { %v2822_v19 = vcombine.low %v455_v1, %v483_v13  ;;  %v533_v45 = vor.u32 %v532_v20, %v529_v17  ;;  %v513_v38 = vshrl.u32 %v3729_v23, 16  ;;  %v516_v39 = vshll.u32 %v3729_v23, 16  ;;  %v3323_v17 = vld [vmem:[%s4164_s1 + $0x1b8] sm:$0xff]  }
  0x41   : > { %3066 = vmatpush3.bf16.msra.mxu0 %v3311_v24  ;;  %3190 = vmatpush3.bf16.msra.mxu1 %v3294_v55  ;;  %v3312_v55 = vld [vmem:[%s4164_s1 + $0x90] sm:$0xff]   ;;  %v3319_v24 = vld [vmem:[%s4164_s1 + $0x40] sm:$0xff]   ;;  %v505_v63 = vor.u32 %v504_v14, %v501_v50  ;;  %v487_v41 = vrot.slane %v485_v28, 4  ;;  %v490_v44 = vrot.slane %v488_v32, 5  ;;  %v522_v4 = vshll.u32 %v3736_v27, 16 }
  0x42   : > { %3067 = vmatprep.subr.bf16.mxu0 %v3316_v47  ;;  %3191 = vmatprep.subr.bf16.mxu1 %v3309_v40  ;;  %v534_v46 = vrot.slane %v533_v45, 4  ;;  %v515_v47 = vrot.slane %v513_v38, 4  ;;  %v496_v52 = vrot.slane %v494_v35, 5  ;;  %v3321_v50 = vld [vmem:[%s4164_s1 + $0x80] sm:$0xff]   ;;  %v1266_v20 = vrot.slane %v3557_v18, 5  ;;  %v3340_v35 = vld [vmem:[%s4164_s1 + $0x210] sm:$0xff]  }
  0x43   : > { %3179 = vmatprep.mubr.bf16.mxu1 %v2822_v19  ;;  %v506_v3 = vrot.slane %v505_v63, 4  ;;  %v491_v51 = vor.u32 %v490_v44, %v487_v41  ;;  %v524_v60 = vrot.slane %v522_v4, 5  ;;  %v2850_v19 = vcombine.low %v3671_v2, %v3680_v11  ;;  %v3333_v2 = vld [vmem:[%s4164_s1 + $0x220] sm:$0xff]   ;;  %v3328_v11 = vld [vmem:[%s4164_s1 + $0x1e8] sm:$0xff]   ;;  %v1198_v44 = vld [vmem:[%s3471_s5 + $0x18] sm:$0xe] }
  0x44   : > { %v539_v53 = vsel %vm3526_vm2, %v534_v46, %v538_v10  ;;  %v1274_v63 = vrot.slane %v3564_v22, 5  ;;  %v1254_v28 = vrot.slane %v3500_v34, 5  ;;  %v1250_v32 = vrot.slane %v3514_v43, 5  ;;  %v3336_v43 = vld [vmem:[%s4164_s1 + $0x218] sm:$0xff]   ;;  %v1195_v38 = vld [vmem:[%s3471_s5] sm:$0xe] }
  0x45   : > { %3068 = vmatpush3.bf16.msra.mxu0 %v3317_v12  ;;  %3192 = vmatpush3.bf16.msra.mxu1 %v3309_v40  ;;  %v518_v40 = vrot.slane %v516_v39, 5  ;;  %v511_v9 = vsel %vm3526_vm2, %v506_v3, %v510_v15  ;;  %v492_v1 = vrot.slane %v491_v51, 4  ;;  %v3324_v15 = vld [vmem:[%s4164_s1 + $0x238] sm:$0xff]   ;;  %v1262_v34 = vrot.slane %v3591_v58, 5  ;;  %v1196_v39 = vld [vmem:[%s3471_s5 + $0x8] sm:$0xe] }
  0x46   : > { %3193 = vmatprep.subr.bf16.mxu1 %v3312_v55  ;;  %3069 = vmatprep.subr.bf16.mxu0 %v3319_v24  ;;  %v2825_v0 = vcombine.low %v511_v9, %v539_v53  ;;  %v3326_v24 = vld [vmem:[%s4164_s1 + $0x1b0] sm:$0xff]   ;;  %v1270_v45 = vrot.slane %v3595_v59, 5  ;;  %v1278_v58 = vrot.slane %v3615_v16, 5  ;;  %v2875_v3 = vcombine.low %v1195_v38, %v1196_v39  ;;  %v1199_v46 = vld [vmem:[%s3471_s5 + $0x20] sm:$0xe] }
  0x47   : > { %v519_v54 = vor.u32 %v518_v40, %v515_v47  ;;  %v497_v10 = vsel %vm3526_vm2, %v492_v1, %v496_v52  ;;  %v1200_v47 = vld [vmem:[%s3471_s5 + $0x28] sm:$0xe]  ;;  %v3334_v40 = vld [vmem:[%s4164_s1 + $0x1d8] sm:$0xff]   ;;  %v2878_v9 = vcombine.low %v1198_v44, %v1198_v44  ;;  %v1286_v52 = vrot.slane %v3632_v36, 5  ;;  %v3339_v22 = vld [vmem:[%s4164_s1 + $0x190] sm:$0xff]  }
  0x48   : > { %3180 = vmatmul.mubr.bf16.gmra.mxu1 %v2825_v0  ;;  %v2882_v51 = vcombine.low %v1200_v47, %v1200_v47  ;;  %v2891_v53 = vrot.slane %v2875_v3, 9  ;;  %v3344_v16 = vld [vmem:[%s4164_s1 + $0x1c0] sm:$0xff]  }
  0x49   : > { %3070 = vmatpush3.bf16.msra.mxu0 %v3320_v42  ;;  %3194 = vmatpush3.bf16.msra.mxu1 %v3312_v55  ;;  %v520_v7 = vrot.slane %v519_v54, 4  ;;  %v3325_v55 = vld [vmem:[%s4164_s1 + $0x1f0] sm:$0xff]   ;;  %v2894_v0 = vrot.slane %v2878_v9, 9 }
  0x4a   : > { %3195 = vmatprep.subr.bf16.mxu1 %v3318_v25  ;;  %3107 = vmatprep.subr.bf16.mxu0 %v3322_v61  ;;  %v1197_v42 = vld [vmem:[%s3471_s5 + $0x10] sm:$0xe] }
  0x4b   : > { %v525_v12 = vsel %vm3526_vm2, %v520_v7, %v524_v60  ;;  %3199 = vmatprep.mubr.bf16.mxu1 %v3541_v5  ;;  %v2877_v41 = vcombine.low %v1196_v39, %v1197_v42  ;;  %v2876_v4 = vcombine.low %v1197_v42, %v1197_v42  ;;  %v2879_v61 = vcombine.low %v1197_v42, %v1198_v44 }
  0x4c   : > { %v2824_v13 = vcombine.high %v497_v10, %v525_v12  ;;  %v2823_v14 = vcombine.low %v497_v10, %v525_v12  ;;  %v2881_v7 = vcombine.low %v1198_v44, %v1199_v46  ;;  %v3335_v10 = vld [vmem:[%s4164_s1 + $0x198] sm:$0xff]   ;;  %v3342_v44 = vld [vmem:[%s4164_s1 + $0x188] sm:$0xff]  }
  0x4d   : > { %3196 = vmatpush3.bf16.msra.mxu1 %v3318_v25  ;;  %v1258_v25 = vrot.slane %v3522_v56, 5  ;;  %v3332_v56 = vld [vmem:[%s4164_s1 + $0x1a0] sm:$0xff]   ;;  %v2893_v54 = vrot.slane %v2877_v41, 9  ;;  %v2892_v60 = vrot.slane %v2876_v4, 9 }
  0x4e   : > { %3197 = vmatprep.subr.bf16.mxu1 %v3321_v50  ;;  %837 = vmatprep.mubr.bf16.mxu0 %v2824_v13  ;;  %v3360_v41 = vld [vmem:[%s3471_s5 + $0x48] ss:$0 sps:$4 sm:$0xee]  }
  0x4f   : > { %838 = vmatmul.mubr.bf16.gmra.mxu0 %v2823_v14  ;;  %v3847_v12 = vsel %vm3833_vm5, %v2893_v54, %v1254_v28  ;;  %v1251_v13 = vsel %vm3833_vm5, %v2892_v60, %v1250_v32  ;;  %v2895_v14 = vrot.slane %v2879_v61, 9  ;;  %v2897_v32 = vrot.slane %v2881_v7, 9 }
  0x50   : > { %1097 = vmatprep.mubr.bf16.mxu0 %v3495_v31  ;;  %v3330_v31 = vld [vmem:[%s4164_s1 + $0x228] sm:$0xff]  }
  0x51   : > { %3198 = vmatpush3.bf16.msra.mxu1 %v3321_v50  ;;  %v2898_v50 = vrot.slane %v2882_v51, 9  ;;  %v3879_v28 = vsel %vm3833_vm5, %v2895_v14, %v1262_v34  ;;  %v1290_v34 = vrot.slane %v3668_v29, 5  ;;  %v2906_v51 = vrot.slane %v3360_v41, 9 }
  0x52   : > { %3207 = vmatprep.subr.bf16.mxu1 %v3324_v15 }
  0x54   : > { %3200 = vmatmul.mubr.bf16.vlgmr.msra.gmra.mxu1 %v3584_v49 }
  0x55   : > { %3208 = vmatpush3.bf16.msra.mxu1 %v3324_v15  ;;  %3203 = vmatprep.mubr.bf16.mxu1 %v3677_v6  ;;  %v3852_v15 = vld [vmem:[%s3471_s5 + $0x30] sm:$0xe] }
  0x56   : > { %3209 = vmatprep.subr.bf16.mxu1 %v3327_v57 }
  0x57   : > { %1098 = vmatmul.mubr.bf16.vlgmr.msra.gmra.mxu0 %v3493_v30  ;;  %v1246_v30 = vrot.slane %v3497_v33, 5  ;;  %v3331_v33 = vld [vmem:[%s4164_s1 + $0x1e0] sm:$0xff]  }
  0x58   : > { %3108 = vmatpush3.bf16.msra.mxu0 %v3323_v17  ;;  %1105 = vmatprep.mubr.bf16.mxu0 %v3571_v37  ;;  %v3329_v37 = vld [vmem:[%s4164_s1 + $0x1a8] sm:$0xff]  }
  0x59   : > { %3210 = vmatpush3.bf16.msra.mxu1 %v3327_v57  ;;  %3109 = vmatprep.subr.bf16.mxu0 %v3325_v55  ;;  %v3843_v36 = vsel %vm3833_vm5, %v2891_v53, %v1246_v30  ;;  %v3338_v57 = vld [vmem:[%s4164_s1 + $0x1d0] sm:$0xff]   ;;  %v3343_v17 = vld [vmem:[%s4164_s1 + $0x208] sm:$0xff]   ;;  %v1275_v30 = vsel %vm3833_vm5, %v2898_v50, %v1274_v63  ;;  %v3346_v63 = vld [vmem:[%s4164_s1 + $0x200] sm:$0xff]   ;;  %v1302_v50 = vrot.slane %v3736_v27, 5 }
  0x5a   : > { %3211 = vmatprep.subr.bf16.mxu1 %v3330_v31  ;;  %v2955_v55 = vcombine.low %v3843_v36, %v3847_v12  ;;  %v3345_v53 = vld [vmem:[%s4164_s1 + $0x180] sm:$0xff]  }
  0x5c   : > { %3204 = vmatmul.mubr.bf16.gmra.mxu1 %v2850_v19  ;;  %3110 = vmatpush3.bf16.msra.mxu0 %v3326_v24  ;;  %v1259_v19 = vsel %vm3833_vm5, %v2894_v0, %v1258_v25  ;;  %v1282_v25 = vrot.slane %v3656_v48, 5  ;;  %v1294_v0 = vrot.slane %v3725_v21, 5 }
  0x5d   : > { %3212 = vmatpush3.bf16.msra.mxu1 %v3330_v31  ;;  %3111 = vmatprep.subr.bf16.mxu0 %v3328_v11  ;;  %v2956_v31 = vcombine.high %v3843_v36, %v3847_v12  ;;  %v2957_v11 = vcombine.low %v1251_v13, %v1259_v19 }
  0x5e   : > { %3213 = vmatprep.subr.bf16.mxu1 %v3333_v2 }
  0x5f   : > { %1106 = vmatmul.mubr.bf16.gmra.mxu0 %v3541_v5  ;;  %3223 = vmatprep.mubr.bf16.mxu1 %v2957_v11 }
  0x60   : > { %3112 = vmatpush3.bf16.msra.mxu0 %v3329_v37  ;;  %1113 = vmatprep.mubr.bf16.mxu0 %v3626_v26  ;;  %v2880_v26 = vcombine.low %v1199_v46, %v1199_v46  ;;  %v2883_v37 = vcombine.low %v1199_v46, %v1200_v47 }
  0x61   : > { %3214 = vmatpush3.bf16.msra.mxu1 %v3333_v2  ;;  %3113 = vmatprep.subr.bf16.mxu0 %v3331_v33  ;;  %v3871_v2 = vld [vmem:[%s3471_s5 + $0x38] sm:$0xe]  ;;  %v2884_v33 = vcombine.low %v3852_v15, %v3852_v15 }
  0x62   : > { %3215 = vmatprep.subr.bf16.mxu1 %v3336_v43  ;;  %v2896_v1 = vrot.slane %v2880_v26, 9  ;;  %v2886_v48 = vcombine.low %v3871_v2, %v3871_v2 }
  0x63   : > { %v2900_v38 = vrot.slane %v2884_v33, 9 }
  0x64   : > { %3114 = vmatpush3.bf16.msra.mxu0 %v3332_v56  ;;  %v1267_v24 = vsel %vm3833_vm5, %v2896_v1, %v1266_v20  ;;  %v2885_v20 = vcombine.low %v1200_v47, %v3852_v15  ;;  %v2899_v56 = vrot.slane %v2883_v37, 9  ;;  %v2902_v39 = vrot.slane %v2886_v48, 9 }
  0x65   : > { %3216 = vmatpush3.bf16.msra.mxu1 %v3336_v43  ;;  %3115 = vmatprep.subr.bf16.mxu0 %v3334_v40  ;;  %v2960_v18 = vcombine.low %v1267_v24, %v1275_v30  ;;  %v1203_v43 = vld [vmem:[%s3471_s5 + $0x40] sm:$0xe]  ;;  %v1283_v47 = vsel %vm3833_vm5, %v2900_v38, %v1282_v25  ;;  %v1298_v40 = vrot.slane %v3699_v62, 5 }
  0x66   : > { %3217 = vmatprep.subr.bf16.mxu1 %v3340_v35  ;;  %v1279_v29 = vsel %vm3833_vm5, %v2899_v56, %v1278_v58  ;;  %v2888_v3 = vcombine.low %v1203_v43, %v1203_v43  ;;  %v1291_v58 = vsel %vm3833_vm5, %v2902_v39, %v1290_v34  ;;  %v2889_v60 = vcombine.low %v3871_v2, %v1203_v43 }
  0x67   : > { %1114 = vmatmul.mubr.bf16.gmra.mxu0 %v3584_v49  ;;  %v1271_v49 = vsel %vm3833_vm5, %v2897_v32, %v1270_v45  ;;  %v2963_v9 = vcombine.low %v1283_v47, %v1291_v58 }
  0x68   : > { %3116 = vmatpush3.bf16.msra.mxu0 %v3335_v10  ;;  %1121 = vmatprep.mubr.bf16.mxu0 %v3729_v23  ;;  %v3341_v23 = vld [vmem:[%s4164_s1 + $0x1c8] sm:$0xff]   ;;  %v2959_v59 = vcombine.high %v3879_v28, %v1271_v49  ;;  %v2958_v45 = vcombine.low %v3879_v28, %v1271_v49  ;;  %v2904_v26 = vrot.slane %v2888_v3, 9  ;;  %v2905_v1 = vrot.slane %v2889_v60, 9 }
  0x69   : > { %3218 = vmatpush3.bf16.msra.mxu1 %v3340_v35  ;;  %3117 = vmatprep.subr.bf16.mxu0 %v3338_v57  ;;  %v2901_v35 = vrot.slane %v2885_v20, 9 }
  0x6a   : > { %3219 = vmatprep.subr.bf16.mxu1 %v3343_v17  ;;  %v1299_v62 = vsel %vm3833_vm5, %v2904_v26, %v1298_v40  ;;  %v1303_v10 = vsel %vm3833_vm5, %v2905_v1, %v1302_v50 }
  0x6b   : > { %v1287_v42 = vsel %vm3833_vm5, %v2901_v35, %v1286_v52  ;;  %v1306_v52 = vrot.slane %v3687_v8, 5  ;;  %v2887_v8 = vcombine.low %v3852_v15, %v3871_v2 }
  0x6c   : > { %3118 = vmatpush3.bf16.msra.mxu0 %v3339_v22  ;;  %v2962_v4 = vcombine.high %v1279_v29, %v1287_v42  ;;  %v2961_v46 = vcombine.low %v1279_v29, %v1287_v42 }
  0x6d   : > { %3220 = vmatpush3.bf16.msra.mxu1 %v3343_v17  ;;  %3119 = vmatprep.subr.bf16.mxu0 %v3341_v23  ;;  %v2903_v61 = vrot.slane %v2887_v8, 9 }
  0x6e   : > { %3221 = vmatprep.subr.bf16.mxu1 %v3346_v63 }
  0x6f   : > { %1122 = vmatmul.mubr.bf16.gmra.mxu0 %v3677_v6  ;;  %v1307_v6 = vsel %vm3833_vm5, %v2906_v51, %v1306_v52  ;;  %v1295_v7 = vsel %vm3833_vm5, %v2903_v61, %v1294_v0 }
  0x70   : > { %3120 = vmatpush3.bf16.msra.mxu0 %v3342_v44  ;;  %1581 = vmatprep.mubr.bf16.mxu0 %v2956_v31  ;;  %v2966_v54 = vcombine.low %v1299_v62, %v1307_v6  ;;  %v2965_v36 = vcombine.high %v1295_v7, %v1303_v10  ;;  %v2964_v12 = vcombine.low %v1295_v7, %v1303_v10 }
  0x71   : > { %3222 = vmatpush3.bf16.msra.mxu1 %v3346_v63  ;;  %3121 = vmatprep.subr.bf16.mxu0 %v3344_v16 }
  0x74   : > { %3224 = vmatmul.mubr.bf16.vlgmr.msra.gmra.mxu1 %v2960_v18  ;;  %3122 = vmatpush3.bf16.msra.mxu0 %v3345_v53 }
  0x75   : > { %3227 = vmatprep.mubr.bf16.mxu1 %v2963_v9 }
  0x77   : > { %1582 = vmatmul.mubr.bf16.vlgmr.msra.gmra.mxu0 %v2955_v55 }
  0x78   : > { %1589 = vmatprep.mubr.bf16.mxu0 %v2959_v59 }
  0x7c   : > { %3228 = vmatmul.mubr.bf16.gmra.mxu1 %v2966_v54 }
  0x7f   : > { %1590 = vmatmul.mubr.bf16.gmra.mxu0 %v2958_v45 }
  0x80   : > { %1597 = vmatprep.mubr.bf16.mxu0 %v2962_v4 }
  0x87   : > { %1598 = vmatmul.mubr.bf16.gmra.mxu0 %v2961_v46 }
  0x88   : > { %1605 = vmatprep.mubr.bf16.mxu0 %v2965_v36 }
  0x8f   : > { %1606 = vmatmul.mubr.bf16.gmra.mxu0 %v2964_v12 }
  0xec   : > { %v3019_v13 = vpop.f32.mrf.mxu0 }
  0xee   : > { %v3020_v14 = vpop.f32.mrf.mxu0 }
  0xef   : > { %v3945_v15 = vadd.f32 %v3020_v14, %v3019_v13 }
  0xf0   : > { %v3947_v21 = vpop.f32.mrf.mxu0 }
  0xf2   : > { %v3949_v27 = vpop.f32.mrf.mxu0 }
  0xf4   : > { %v3177_v57 = vpop.f32.mrf.mxu1 }
  0xf6   : > { %v3951_v19 = vpop.f32.mrf.mxu1 }
  0xf7   : > { %v3025_v17 = vpop.f32.mrf.mxu0 }
  0xf8   : > { %v3178_v30 = vpop.f32.mrf.mxu1 }
  0xf9   : > { %v3026_v55 = vpop.f32.mrf.mxu0 }
  0xfa   : > { %v3027_v31 = vadd.f32 %v3026_v55, %v3025_v17  ;;  %v883_v63 = vpop.f32.mrf.mxu1 }
  0xfb   : > { %v3028_v5 = vpop.f32.mrf.mxu0 }
  0xfc   : > { %v3953_v24 = vadd.f32 %v3177_v57, %v3027_v31 }
  0xfd   : > { %v3029_v2 = vpop.f32.mrf.mxu0 }
  0xfe   : > { %v3030_v11 = vadd.f32 %v3029_v2, %v3028_v5 }
  0xff   : > { %v3031_v28 = vpop.f32.mrf.mxu0 }
 0x100   : > { %v3955_v32 = vadd.f32 %v3178_v30, %v3030_v11  ;;  %v881_v11 = vadd.f32 %v3945_v15, %v3951_v19  ;;  %v3024_v30 = vadd.f32 %v3949_v27, %v3947_v21  ;;  %v3371_v27 = vmov 1966171168  }
 0x101   : > { %v3032_v18 = vpop.f32.mrf.mxu0 }
 0x102   : > { %v3033_v37 = vadd.f32 %v3032_v18, %v3031_v28 }
 0x103   : > { %v3034_v20 = vpop.f32.mrf.mxu0 }
 0x105   : > { %v3035_v25 = vpop.f32.mrf.mxu0 }
 0x106   : > { %v3036_v22 = vadd.f32 %v3035_v25, %v3034_v20 }
 0x108   : > { %v3181_v49 = vpop.f32.mrf.mxu1 }
 0x10a   : > { %v896_v33 = vpop.f32.mrf.mxu1 }
 0x10b   : > { %v897_v48 = vadd.f32 %v3033_v37, %v896_v33 }
 0x10c   : > { %v3182_v34 = vpop.f32.mrf.mxu1 }
 0x10e   : > { %v899_v23 = vpop.f32.mrf.mxu1 }
 0x10f   : > { %v3037_v43 = vpop.f32.mrf.mxu0  ;;  %v900_v59 = vadd.f32 %v3036_v22, %v899_v23 }
 0x111   : > { %v3038_v45 = vpop.f32.mrf.mxu0 }
 0x112   : > { %v3039_v56 = vadd.f32 %v3038_v45, %v3037_v43 }
 0x113   : > { %v3040_v35 = vpop.f32.mrf.mxu0 }
 0x114   : > { %v905_v38 = vadd.f32 %v3181_v49, %v3039_v56  ;;  %v3957_v29 = vpop.f32.mrf.mxu1 }
 0x115   : > { %v3041_v39 = vpop.f32.mrf.mxu0 }
 0x116   : > { %v3042_v42 = vadd.f32 %v3041_v39, %v3040_v35  ;;  %v1164_v4 = vpop.f32.mrf.mxu1  ;;  %v1720_v35 = vunpack.c.l.s4 %v3371_v27 }
 0x117   : > { %v3071_v3 = vpop.f32.mrf.mxu0 }
 0x118   : > { %v908_v41 = vadd.f32 %v3182_v34, %v3042_v42  ;;  %v3959_v16 = vpop.f32.mrf.mxu1 }
 0x119   : > { %v3072_v44 = vpop.f32.mrf.mxu0 }
 0x11a   : > { %v1167_v9 = vpop.f32.mrf.mxu1  ;;  %v3073_v55 = vadd.f32 %v3072_v44, %v3071_v3  ;;  %v3976_v3 = vld [vmem:[%s4165_s2] ss:$0 sm:$0xff] }
 0x11b   : > { %v3074_v46 = vpop.f32.mrf.mxu0 }
 0x11c   : > { %v3205_v51 = vpop.f32.mrf.mxu1  ;;  %v1100_v25 = vadd.f32 %v3073_v55, %v881_v11 }
 0x11d   : > { %v3075_v47 = vpop.f32.mrf.mxu0 }
 0x11e   : > { %v1180_v62 = vpop.f32.mrf.mxu1  ;;  %v3076_v20 = vadd.f32 %v3075_v47, %v3074_v46  ;;  %v1721_v47 = vunpack.c.0.s8 %v1720_v35 }
 0x11f   : > { %v3077_v58 = vpop.f32.mrf.mxu0 }
 0x120   : > { %v3206_v60 = vpop.f32.mrf.mxu1 }
 0x121   : > { %v3078_v40 = vpop.f32.mrf.mxu0 }
 0x122   : > { %v1183_v10 = vpop.f32.mrf.mxu1  ;;  %v3079_v45 = vadd.f32 %v3078_v40, %v3077_v58 }
 0x123   : > { %v3080_v26 = vpop.f32.mrf.mxu0 }
 0x125   : > { %v3081_v52 = vpop.f32.mrf.mxu0 }
 0x127   : > { %v3083_v53 = vpop.f32.mrf.mxu0 }
 0x129   : > { %v3084_v6 = vpop.f32.mrf.mxu0 }
 0x12a   : > { %v3085_v54 = vadd.f32 %v3084_v6, %v3083_v53 }
 0x12b   : > { %v3086_v8 = vpop.f32.mrf.mxu0 }
 0x12c   : > { %v1116_v61 = vadd.f32 %v3085_v54, %v897_v48  ;;  %v884_v48 = vadd.f32 %v3024_v30, %v883_v63 }
 0x12d   : > { %v3087_v0 = vpop.f32.mrf.mxu0 }
 0x12e   : > { %v3088_v1 = vadd.f32 %v3087_v0, %v3086_v8  ;;  %v3961_v50 = vadd.f32 %v1180_v62, %v1116_v61  ;;  %v1103_v15 = vadd.f32 %v3076_v20, %v884_v48 }
 0x12f   : > { %v3089_v7 = vpop.f32.mrf.mxu0 }
 0x130   : > { %v1119_v36 = vadd.f32 %v3088_v1, %v900_v59  ;;  %v1165_v59 = vadd.f32 %v1164_v4, %v1100_v25  ;;  %v1168_v44 = vadd.f32 %v1167_v9, %v1103_v15  ;;  %v3082_v4 = vadd.f32 %v3081_v52, %v3080_v26 }
 0x131   : > { %v3090_v12 = vpop.f32.mrf.mxu0 }
 0x132   : > { %v3091_v13 = vadd.f32 %v3090_v12, %v3089_v7  ;;  %v3963_v14 = vadd.f32 %v1183_v10, %v1119_v36  ;;  %v1111_v8 = vadd.f32 %v3082_v4, %v3955_v32 }
 0x133   : > { %v3092_v17 = vpop.f32.mrf.mxu0 }
 0x134   : > { %v3225_v57 = vpop.f32.mrf.mxu1  ;;  %v1124_v31 = vadd.f32 %v3091_v13, %v905_v38  ;;  %v1722_v38 = vlaneseq  ;;  %v1176_v13 = vadd.f32 %v3959_v16, %v1111_v8 }
 0x135   : > { %v3093_v5 = vpop.f32.mrf.mxu0 }
 0x136   : > { %v1648_v2 = vpop.f32.mrf.mxu1  ;;  %v3969_v28 = vadd.f32 %v3205_v51, %v1124_v31  ;;  %v3094_v18 = vadd.f32 %v3093_v5, %v3092_v17  ;;  %v1723_v58 = vshrl.u32 %v1722_v38, 7 }
 0x137   : > { %v3123_v37 = vpop.f32.mrf.mxu0 }
 0x138   : > { %v1127_v22 = vadd.f32 %v3094_v18, %v908_v41  ;;  %v3226_v33 = vpop.f32.mrf.mxu1  ;;  %v1108_v41 = vadd.f32 %v3079_v45, %v3953_v24  ;;  %v3983_v0 = vsub.s32 %v1721_v47, %v1723_v58  ;;  %v3372_v24 = vmov 1983009808  }
 0x139   : > { %v3124_v49 = vpop.f32.mrf.mxu0  ;;  %v2365_v9 = vunpack.c.l.s4 %v3372_v24 }
 0x13a   : > { %v3971_v34 = vadd.f32 %v3206_v60, %v1127_v22  ;;  %v3125_v43 = vadd.f32 %v3124_v49, %v3123_v37  ;;  %v1651_v21 = vpop.f32.mrf.mxu1  ;;  %v1173_v54 = vadd.f32 %v3957_v29, %v1108_v41 }
 0x13b   : > { %v3126_v23 = vpop.f32.mrf.mxu0  ;;  %v2366_v55 = vunpack.c.0.s8 %v2365_v9 }
 0x13c   : > { %v1649_v19 = vadd.f32 %v3125_v43, %v1648_v2  ;;  %v3985_v12 = vpop.f32.mrf.mxu1 }
 0x13d   : > { %v3127_v56 = vpop.f32.mrf.mxu0  ;;  %v3995_v22 = vsub.s32 %v2366_v55, %v1723_v58 }
 0x13e   : > { %v1679_v39 = vadd.f32 %v1649_v19, %v1165_v59  ;;  %v3128_v42 = vadd.f32 %v3127_v56, %v3126_v23  ;;  %v1664_v18 = vpop.f32.mrf.mxu1 }
 0x13f   : > { %v3129_v63 = vpop.f32.mrf.mxu0 }
 0x140   : > { %v1652_v46 = vadd.f32 %v3128_v42, %v1651_v21  ;;  %v1694_v51 = vadd.f32 %v3976_v3, %v1679_v39 }
 0x141   : > { %v3130_v40 = vpop.f32.mrf.mxu0 }
 0x142   : > { %v1680_v53 = vadd.f32 %v1652_v46, %v1168_v44  ;;  %v3131_v62 = vadd.f32 %v3130_v40, %v3129_v63  ;;  %v1702_v52 = vmax.f32 %v1694_v51, 0.0 }
 0x143   : > { %v3132_v6 = vpop.f32.mrf.mxu0 }
 0x144   : > { %v1695_v60 = vadd.f32 %v3976_v3, %v1680_v53  ;;  %v1657_v61 = vadd.f32 %v3225_v57, %v3131_v62 }
 0x145   : > { %v3133_v26 = vpop.f32.mrf.mxu0 }
 0x146   : > { %v1703_v1 = vmax.f32 %v1695_v60, 0.0  ;;  %v1681_v7 = vadd.f32 %v1657_v61, %v1173_v54  ;;  %v3134_v10 = vadd.f32 %v3133_v26, %v3132_v6 }
 0x147   : > { %v3135_v36 = vpop.f32.mrf.mxu0 }
 0x148   : > { %v1710_v29 = vpack.c.bf16 %v1703_v1, %v1702_v52  ;;  %v2992_v17 = vpack.c.bf16 %v1703_v1, %v1703_v1  ;;  %v1660_v32 = vadd.f32 %v3226_v33, %v3134_v10  ;;  %v3989_v57 = vadd.f32 %v3976_v3, %v1681_v7 }
 0x149   : > { %v3136_v31 = vpop.f32.mrf.mxu0 }
 0x14a   : > { %v1725_v5 = vrot.slane %v1710_v29, %v3983_v0  ;;  %v1732_v2 = vrot.slane %v2992_v17, %v3983_v0  ;;  %v1682_v11 = vadd.f32 %v1660_v32, %v1176_v13  ;;  %v3137_v30 = vadd.f32 %v3136_v31, %v3135_v36 }
 0x14b   : > { %v1704_v49 = vmax.f32 %v3989_v57, 0.0 }
 0x14c   : > { %v1733_v37 = vcombine.high %v1725_v5, %v1725_v5  ;;  %v1734_v20 = vcombine.high %v1732_v2, %v1732_v2  ;;  %v1741_v16 = vrot.slane %v1725_v5, %v3983_v0  ;;  %v1748_v25 = vrot.slane %v1732_v2, %v3983_v0 }
 0x14d   : > { %v1697_v33 = vadd.f32 %v3976_v3, %v1682_v11  ;;  %v4001_v59 = vadd.f32 %v3137_v30, %v1664_v18 }
 0x14e   : > { %v1755_v48 = vrot.slane %v1733_v37, %v3983_v0  ;;  %v1762_v43 = vrot.slane %v1734_v20, %v3983_v0  ;;  %v1763_v23 = vcombine.high %v1741_v16, %v1741_v16  ;;  %v1764_v45 = vcombine.high %v1748_v25, %v1748_v25 }
 0x14f   : > { %v1917_v15 = vsel %vm1914_vm6, %v1741_v16, 4286644096  ;;  %v1969_v19 = vsel %vm1914_vm6, %v1748_v25, 4286644096  ;;  %v4005_v56 = vmax.f32 %v1697_v33, 0.0 }
 0x150   : > { %v1765_v21 = vcombine.high %v1755_v48, %v1755_v48  ;;  %v1766_v27 = vcombine.high %v1762_v43, %v1762_v43  ;;  %v1919_v35 = vunpack.i.l.bf16 %v1917_v15  ;;  %v1920_v38 = vunpack.i.h.bf16 %v1917_v15 }
 0x151   : > { %v1930_v39 = vsel %vm1914_vm6, %v1755_v48, 4286644096  ;;  %v1943_v42 = vsel %vm1914_vm6, %v1763_v23, 4286644096  ;;  %v1971_v63 = vunpack.i.l.bf16 %v1969_v19  ;;  %v1972_v41 = vunpack.i.h.bf16 %v1969_v19 }
 0x152   : > { %v1921_v44 = vmax.f32 %v1919_v35, %v1920_v38  ;;  %v1932_v4 = vunpack.i.l.bf16 %v1930_v39  ;;  %v1933_v46 = vunpack.i.h.bf16 %v1930_v39  ;;  %v1945_v47 = vunpack.i.l.bf16 %v1943_v42 }
 0x153   : > { %v1946_v58 = vunpack.i.h.bf16 %v1943_v42  ;;  %v1956_v40 = vsel %vm1914_vm6, %v1765_v21, 4286644096  ;;  %v1973_v51 = vmax.f32 %v1971_v63, %v1972_v41  ;;  %v1982_v53 = vsel %vm1914_vm6, %v1762_v43, 4286644096 }
 0x154   : > { %v1922_v62 = vrot.slane %v1921_v44, 4  ;;  %v1934_v6 = vmax.f32 %v1932_v4, %v1933_v46  ;;  %v1958_v54 = vunpack.i.l.bf16 %v1956_v40  ;;  %v1959_v8 = vunpack.i.h.bf16 %v1956_v40 }
 0x155   : > { %v1947_v60 = vmax.f32 %v1945_v47, %v1946_v58  ;;  %v1974_v61 = vrot.slane %v1973_v51, 4  ;;  %v1984_v24 = vunpack.i.l.bf16 %v1982_v53  ;;  %v1985_v9 = vunpack.i.h.bf16 %v1982_v53 }
 0x156   : > { %v1923_v26 = vmax.f32 %v1921_v44, %v1922_v62  ;;  %v1935_v52 = vrot.slane %v1934_v6, 4  ;;  %v1960_v1 = vmax.f32 %v1958_v54, %v1959_v8  ;;  %v1995_v7 = vsel %vm1914_vm6, %v1764_v45, 4286644096 }
 0x157   : > { %v1948_v10 = vrot.slane %v1947_v60, 4  ;;  %v1975_v36 = vmax.f32 %v1973_v51, %v1974_v61  ;;  %v1986_v13 = vmax.f32 %v1984_v24, %v1985_v9  ;;  %v1997_v29 = vunpack.i.l.bf16 %v1995_v7 }
 0x158   : > { %v1924_v17 = vrot.slane %v1923_v26, 2  ;;  %v1936_v32 = vmax.f32 %v1934_v6, %v1935_v52  ;;  %v1961_v55 = vrot.slane %v1960_v1, 4  ;;  %v1998_v31 = vunpack.i.h.bf16 %v1995_v7 }
 0x159   : > { %v1949_v5 = vmax.f32 %v1947_v60, %v1948_v10  ;;  %v1976_v2 = vrot.slane %v1975_v36, 2  ;;  %v1987_v11 = vrot.slane %v1986_v13, 4  ;;  %v2008_v30 = vsel %vm1914_vm6, %v1766_v27, 4286644096 }
 0x15a   : > { %v1925_v18 = vmax.f32 %v1923_v26, %v1924_v17  ;;  %v1937_v37 = vrot.slane %v1936_v32, 2  ;;  %v1962_v20 = vmax.f32 %v1960_v1, %v1961_v55  ;;  %v1999_v16 = vmax.f32 %v1997_v29, %v1998_v31 }
 0x15b   : > { %v1950_v25 = vrot.slane %v1949_v5, 2  ;;  %v1977_v33 = vmax.f32 %v1975_v36, %v1976_v2  ;;  %v1988_v48 = vmax.f32 %v1986_v13, %v1987_v11  ;;  %v2010_v43 = vunpack.i.l.bf16 %v2008_v30 }
 0x15c   : > { %v1926_v23 = vrot.slane %v1925_v18, 1  ;;  %v1938_v45 = vmax.f32 %v1936_v32, %v1937_v37  ;;  %v1963_v15 = vrot.slane %v1962_v20, 2  ;;  %v2000_v19 = vrot.slane %v1999_v16, 4 }
 0x15d   : > { %v1951_v21 = vmax.f32 %v1949_v5, %v1950_v25  ;;  %v1978_v35 = vrot.slane %v1977_v33, 1  ;;  %v1989_v38 = vrot.slane %v1988_v48, 2  ;;  %v2011_v39 = vunpack.i.h.bf16 %v2008_v30 }
 0x15e   : > { %v1927_v42 = vmax.f32 %v1925_v18, %v1926_v23  ;;  %v1939_v63 = vrot.slane %v1938_v45, 1  ;;  %v1964_v41 = vmax.f32 %v1962_v20, %v1963_v15  ;;  %v2001_v27 = vmax.f32 %v1999_v16, %v2000_v19 }
 0x15f   : > { %v1952_v44 = vrot.slane %v1951_v21, 1  ;;  %v1979_v4 = vmax.f32 %v1977_v33, %v1978_v35  ;;  %v1990_v46 = vmax.f32 %v1988_v48, %v1989_v38  ;;  %v2012_v47 = vmax.f32 %v2010_v43, %v2011_v39  ;;  %v4039_v38 = vpop.f32.mrf.mxu0 }
 0x160   : > { %v1928_v58 = vpack.i.bf16 %v1927_v42, %v1927_v42  ;;  %v1940_v40 = vmax.f32 %v1938_v45, %v1939_v63  ;;  %v1965_v51 = vrot.slane %v1964_v41, 1  ;;  %v2002_v53 = vrot.slane %v2001_v27, 2 }
 0x161   : > { %v1953_v62 = vmax.f32 %v1951_v21, %v1952_v44  ;;  %v1980_v6 = vpack.i.bf16 %v1979_v4, %v1979_v4  ;;  %v1991_v54 = vrot.slane %v1990_v46, 1  ;;  %v2013_v8 = vrot.slane %v2012_v47, 4 }
 0x162   : > { %v1941_v60 = vpack.i.bf16 %v1940_v40, %v1940_v40  ;;  %v2003_v61 = vmax.f32 %v2001_v27, %v2002_v53  ;;  %v1711_v24 = vpack.c.bf16 %v4005_v56, %v1704_v49  ;;  %v1966_v9 = vmax.f32 %v1964_v41, %v1965_v51 }
 0x163   : > { %v1992_v26 = vmax.f32 %v1990_v46, %v1991_v54  ;;  %v2014_v52 = vmax.f32 %v2012_v47, %v2013_v8  ;;  %v2332_v1 = vmax.bf16 %v1980_v6, %v1928_v58  ;;  %v2993_v10 = vpack.c.bf16 %v4005_v56, %v4005_v56  ;;  %v4047_v8 = vpop.f32.mrf.mxu0 }
 0x164   : > { %v2004_v7 = vrot.slane %v2003_v61, 1  ;;  %v1774_v36 = vrot.slane %v1711_v24, %v3983_v0  ;;  %v1683_v13 = vadd.f32 %v4001_v59, %v3961_v50  ;;  %v1954_v29 = vpack.i.bf16 %v1953_v62, %v1953_v62 }
 0x165   : > { %v1993_v17 = vpack.i.bf16 %v1992_v26, %v1992_v26  ;;  %v2015_v32 = vrot.slane %v2014_v52, 2  ;;  %v2370_v57 = vrot.slane %v2332_v1, %v3995_v22  ;;  %v1781_v49 = vrot.slane %v2993_v10, %v3983_v0 }
 0x166   : > { %v2005_v55 = vmax.f32 %v2003_v61, %v2004_v7  ;;  %v1782_v31 = vcombine.high %v1774_v36, %v1774_v36  ;;  %v1790_v5 = vrot.slane %v1774_v36, %v3983_v0  ;;  %v1967_v2 = vpack.i.bf16 %v1966_v9, %v1966_v9 }
 0x167   : > { %v2016_v11 = vmax.f32 %v2014_v52, %v2015_v32  ;;  %v2333_v56 = vmax.bf16 %v1993_v17, %v1941_v60  ;;  %v2482_v30 = vrot.slane %v2370_v57, %v3995_v22  ;;  %v1783_v37 = vcombine.high %v1781_v49, %v1781_v49 }
 0x168   : > { %v2006_v18 = vpack.i.bf16 %v2005_v55, %v2005_v55  ;;  %v4026_v50 = vrot.slane %v1781_v49, %v3983_v0  ;;  %v1804_v59 = vrot.slane %v1782_v31, %v3983_v0  ;;  %v4031_v33 = vadd.f32 %v3976_v3, %v1683_v13  ;;  %v3141_v49 = vpop.f32.mrf.mxu0 }
 0x169   : > { %v2017_v20 = vrot.slane %v2016_v11, 1  ;;  %v2377_v16 = vrot.slane %v2333_v56, %v3995_v22  ;;  %v2588_v25 = vunpack.c.l.b16 %v2482_v30  ;;  %v4034_v43 = vrot.slane %v1783_v37, %v3983_v0 }
 0x16a   : > { %v2334_v48 = vmax.bf16 %v2006_v18, %v1954_v29  ;;  %v1812_v23 = vcombine.high %v1790_v5, %v1790_v5  ;;  %v1814_v45 = vcombine.high %v1804_v59, %v1804_v59  ;;  %v2021_v21 = vsel %vm1914_vm6, %v1790_v5, 4286644096 }
 0x16b   : > { %v2018_v15 = vmax.f32 %v2016_v11, %v2017_v20  ;;  %v2489_v19 = vrot.slane %v2377_v16, %v3995_v22  ;;  %v2034_v35 = vsel %vm1914_vm6, %v1804_v59, 4286644096  ;;  %v1813_v42 = vcombine.high %v4026_v50, %v4026_v50 }
 0x16c   : > { %v2384_v39 = vrot.slane %v2334_v48, %v3995_v22  ;;  %v2023_v63 = vunpack.i.l.bf16 %v2021_v21  ;;  %v2024_v41 = vunpack.i.h.bf16 %v2021_v21  ;;  %v2036_v4 = vunpack.i.l.bf16 %v2034_v35 }
 0x16d   : > { %v2019_v27 = vpack.i.bf16 %v2018_v15, %v2018_v15  ;;  %v2589_v44 = vunpack.c.l.b16 %v2489_v19  ;;  %v2037_v46 = vunpack.i.h.bf16 %v2034_v35  ;;  %v2047_v40 = vsel %vm1914_vm6, %v1812_v23, 4286644096  ;;  %v3142_v15 = vpop.f32.mrf.mxu0 }
 0x16e   : > { %v2496_v47 = vrot.slane %v2384_v39, %v3995_v22  ;;  %v2025_v58 = vmax.f32 %v2023_v63, %v2024_v41  ;;  %v2060_v51 = vsel %vm1914_vm6, %v1814_v45, 4286644096  ;;  %v2049_v54 = vunpack.i.l.bf16 %v2047_v40 }
 0x16f   : > { %v2335_v53 = vmax.bf16 %v2019_v27, %v1967_v2  ;;  %v2604_v62 = vrot.slane %v2589_v44, 7  ;;  %v2038_v6 = vmax.f32 %v2036_v4, %v2037_v46  ;;  %v2050_v24 = vunpack.i.h.bf16 %v2047_v40 }
 0x170   : > { %v2590_v60 = vunpack.c.l.b16 %v2496_v47  ;;  %v2026_v61 = vrot.slane %v2025_v58, 4  ;;  %v2062_v9 = vunpack.i.l.bf16 %v2060_v51  ;;  %v2063_v7 = vunpack.i.h.bf16 %v2060_v51 }
 0x171   : > { %v2391_v26 = vrot.slane %v2335_v53, %v3995_v22  ;;  %v2606_v52 = vsel %vm2605_vm7, %v2604_v62, %v2588_v25  ;;  %v2039_v1 = vrot.slane %v2038_v6, 4  ;;  %v2051_v13 = vmax.f32 %v2049_v54, %v2050_v24  ;;  %v3144_v53 = vpop.f32.mrf.mxu0 }
 0x172   : > { %v2607_v10 = vrot.slane %v2590_v60, 6  ;;  %v2027_v36 = vmax.f32 %v2025_v58, %v2026_v61  ;;  %v2073_v29 = vsel %vm1914_vm6, %v4026_v50, 4286644096  ;;  %v2064_v57 = vmax.f32 %v2062_v9, %v2063_v7  ;;  %v3230_v58 = vpop.f32.mrf.mxu1 }
 0x173   : > { %v2503_v17 = vrot.slane %v2391_v26, %v3995_v22  ;;  %v2040_v32 = vmax.f32 %v2038_v6, %v2039_v1  ;;  %v2075_v55 = vunpack.i.l.bf16 %v2073_v29  ;;  %v2052_v2 = vrot.slane %v2051_v13, 4 }
 0x174   : > { %v2609_v31 = vsel %vm2608_vm8, %v2607_v10, %v2606_v52  ;;  %v2028_v5 = vrot.slane %v2027_v36, 2  ;;  %v2076_v11 = vunpack.i.h.bf16 %v2073_v29  ;;  %v2065_v18 = vrot.slane %v2064_v57, 4  ;;  %v1667_v7 = vpop.f32.mrf.mxu1 }
 0x175   : > { %v2591_v56 = vunpack.c.l.b16 %v2503_v17  ;;  %v2041_v30 = vrot.slane %v2040_v32, 2  ;;  %v2086_v37 = vsel %vm1914_vm6, %v4034_v43, 4286644096  ;;  %v2053_v50 = vmax.f32 %v2051_v13, %v2052_v2  ;;  %v3145_v17 = vpop.f32.mrf.mxu0 }
 0x176   : > { %v2029_v59 = vmax.f32 %v2027_v36, %v2028_v5  ;;  %v2077_v20 = vmax.f32 %v2075_v55, %v2076_v11  ;;  %v2088_v16 = vunpack.i.l.bf16 %v2086_v37  ;;  %v2066_v23 = vmax.f32 %v2064_v57, %v2065_v18 }
 0x177   : > { %v2610_v25 = vrot.slane %v2591_v56, 5  ;;  %v2042_v48 = vmax.f32 %v2040_v32, %v2041_v30  ;;  %v2089_v45 = vunpack.i.h.bf16 %v2086_v37  ;;  %v2054_v21 = vrot.slane %v2053_v50, 2 }
 0x178   : > { %v2030_v19 = vrot.slane %v2029_v59, 1  ;;  %v2078_v35 = vrot.slane %v2077_v20, 4  ;;  %v2099_v39 = vsel %vm1914_vm6, %v1813_v42, 4286644096  ;;  %v1815_v41 = vcombine.high %v4034_v43, %v4034_v43 }
 0x179   : > { %v2612_v63 = vsel %vm2611_vm9, %v2610_v25, %v2609_v31  ;;  %v2067_v27 = vrot.slane %v2066_v23, 2  ;;  %v2090_v44 = vmax.f32 %v2088_v16, %v2089_v45  ;;  %v2043_v46 = vrot.slane %v2042_v48, 1 }
 0x17a   : > { %v2631_v4 = vpack.c.b16 %v2612_v63, %v2612_v63  ;;  %v2079_v47 = vmax.f32 %v2077_v20, %v2078_v35  ;;  %v2055_v40 = vmax.f32 %v2053_v50, %v2054_v21  ;;  %v2101_v42 = vunpack.i.l.bf16 %v2099_v39 }
 0x17b   : > { %v2091_v51 = vrot.slane %v2090_v44, 4  ;;  %v2031_v62 = vmax.f32 %v2029_v59, %v2030_v19  ;;  %v2102_v54 = vunpack.i.h.bf16 %v2099_v39  ;;  %v2068_v60 = vmax.f32 %v2066_v23, %v2067_v27 }
 0x17c   : > { %2996 = vst.sshfl [vmem:[%s4062_s20] sm:$0x3 pattern:$0x76325410] %v2631_v4  ;;  %v2080_v6 = vrot.slane %v2079_v47, 2  ;;  %v2112_v24 = vsel %vm1914_vm6, %v1815_v41, 4286644096  ;;  %v2044_v9 = vmax.f32 %v2042_v48, %v2043_v46  ;;  %v3140_v29 = vadd.f32 %v4047_v8, %v4039_v38 }
 0x17d   : > { %v2092_v61 = vmax.f32 %v2090_v44, %v2091_v51  ;;  %v1706_v43 = vmax.f32 %v4031_v33, 0.0  ;;  %v2103_v52 = vmax.f32 %v2101_v42, %v2102_v54  ;;  %v2114_v1 = vunpack.i.l.bf16 %v2112_v24 }
 0x17e   : > { %v2081_v26 = vmax.f32 %v2079_v47, %v2080_v6  ;;  %v2056_v10 = vrot.slane %v2055_v40, 1  ;;  %v2115_v13 = vunpack.i.h.bf16 %v2112_v24  ;;  %v2032_v32 = vpack.i.bf16 %v2031_v62, %v2031_v62 }
 0x17f   : > { %v2093_v36 = vrot.slane %v2092_v61, 2  ;;  %v2104_v55 = vrot.slane %v2103_v52, 4  ;;  %v3143_v31 = vadd.f32 %v3142_v15, %v3141_v49  ;;  %v2069_v5 = vrot.slane %v2068_v60, 1 }
 0x180   : > { %v2082_v57 = vrot.slane %v2081_v26, 1  ;;  %v2116_v11 = vmax.f32 %v2114_v1, %v2115_v13  ;;  %v1668_v33 = vadd.f32 %v3140_v29, %v1667_v7  ;;  %v3146_v37 = vadd.f32 %v3145_v17, %v3144_v53 }
 0x181   : > { %v2094_v2 = vmax.f32 %v2092_v61, %v2093_v36  ;;  %v2105_v30 = vmax.f32 %v2103_v52, %v2104_v55  ;;  %v1673_v18 = vadd.f32 %v3985_v12, %v3143_v31  ;;  %v2057_v59 = vmax.f32 %v2055_v40, %v2056_v10 }
 0x182   : > { %v2083_v56 = vmax.f32 %v2081_v26, %v2082_v57  ;;  %v2117_v20 = vrot.slane %v2116_v11, 4  ;;  %v1684_v16 = vadd.f32 %v1668_v33, %v3963_v14  ;;  %v1676_v48 = vadd.f32 %v3230_v58, %v3146_v37 }
 0x183   : > { %v2095_v50 = vrot.slane %v2094_v2, 1  ;;  %v2106_v8 = vrot.slane %v2105_v30, 2  ;;  %v1685_v25 = vadd.f32 %v1673_v18, %v3969_v28  ;;  %v2045_v49 = vpack.i.bf16 %v2044_v9, %v2044_v9 }
 0x184   : > { %v2084_v38 = vpack.i.bf16 %v2083_v56, %v2083_v56  ;;  %v2118_v45 = vmax.f32 %v2116_v11, %v2117_v20  ;;  %v1699_v15 = vadd.f32 %v3976_v3, %v1684_v16  ;;  %v1686_v35 = vadd.f32 %v1676_v48, %v3971_v34 }
 0x185   : > { %v2096_v23 = vmax.f32 %v2094_v2, %v2095_v50  ;;  %v2107_v19 = vmax.f32 %v2105_v30, %v2106_v8  ;;  %v1700_v12 = vadd.f32 %v3976_v3, %v1685_v25  ;;  %v2070_v39 = vmax.f32 %v2068_v60, %v2069_v5 }
 0x186   : > { %v2336_v21 = vmax.bf16 %v2084_v38, %v2032_v32  ;;  %v2119_v41 = vrot.slane %v2118_v45, 2  ;;  %v1707_v14 = vmax.f32 %v1699_v15, 0.0  ;;  %v2058_v27 = vpack.i.bf16 %v2057_v59, %v2057_v59 }
 0x187   : > { %v2097_v63 = vpack.i.bf16 %v2096_v23, %v2096_v23  ;;  %v2108_v44 = vrot.slane %v2107_v19, 1  ;;  %v1701_v4 = vadd.f32 %v3976_v3, %v1686_v35  ;;  %v1708_v53 = vmax.f32 %v1700_v12, 0.0 }
 0x188   : > { %v2398_v28 = vrot.slane %v2336_v21, %v3995_v22  ;;  %v2120_v46 = vmax.f32 %v2118_v45, %v2119_v41  ;;  %v1712_v58 = vpack.c.bf16 %v1707_v14, %v1706_v43  ;;  %v2994_v40 = vpack.c.bf16 %v1707_v14, %v1707_v14 }
 0x189   : > { %v2337_v47 = vmax.bf16 %v2097_v63, %v2045_v49  ;;  %v2109_v51 = vmax.f32 %v2107_v19, %v2108_v44  ;;  %v4081_v62 = vmax.f32 %v1701_v4, 0.0  ;;  %v2071_v61 = vpack.i.bf16 %v2070_v39, %v2070_v39 }
 0x18a   : > { %v2510_v42 = vrot.slane %v2398_v28, %v3995_v22  ;;  %v2121_v34 = vrot.slane %v2120_v46, 1  ;;  %v1823_v54 = vrot.slane %v1712_v58, %v3983_v0  ;;  %v1830_v60 = vrot.slane %v2994_v40, %v3983_v0 }
 0x18b   : > { %v2405_v6 = vrot.slane %v2337_v47, %v3995_v22  ;;  %v2110_v24 = vpack.i.bf16 %v2109_v51, %v2109_v51  ;;  %v4087_v3 = vpack.c.bf16 %v4081_v62, %v1708_v53 }
 0x18c   : > { %v2122_v43 = vmax.f32 %v2120_v46, %v2121_v34  ;;  %v1831_v26 = vcombine.high %v1823_v54, %v1823_v54  ;;  %v1832_v52 = vcombine.high %v1830_v60, %v1830_v60  ;;  %v2592_v7 = vunpack.c.l.b16 %v2510_v42 }
 0x18d   : > { %v2517_v9 = vrot.slane %v2405_v6, %v3995_v22  ;;  %v2338_v1 = vmax.bf16 %v2110_v24, %v2058_v27  ;;  %v1839_v10 = vrot.slane %v1823_v54, %v3983_v0  ;;  %v1846_v36 = vrot.slane %v1830_v60, %v3983_v0 }
 0x18e   : > { %v2123_v13 = vpack.i.bf16 %v2122_v43, %v2122_v43  ;;  %v1853_v17 = vrot.slane %v1831_v26, %v3983_v0  ;;  %v4094_v32 = vrot.slane %v1832_v52, %v3983_v0 }
 0x18f   : > { %v2593_v29 = vunpack.c.l.b16 %v2517_v9  ;;  %v2412_v57 = vrot.slane %v2338_v1, %v3995_v22  ;;  %v1861_v55 = vcombine.high %v1839_v10, %v1839_v10  ;;  %v1862_v31 = vcombine.high %v1846_v36, %v1846_v36 }
 0x190   : > { %v2125_v5 = vsel %vm1914_vm6, %v1839_v10, 4286644096  ;;  %v2339_v2 = vmax.bf16 %v2123_v13, %v2071_v61  ;;  %v1863_v33 = vcombine.high %v1853_v17, %v1853_v17  ;;  %v1864_v56 = vcombine.high %v4094_v32, %v4094_v32 }
 0x191   : > { %v2613_v11 = vrot.slane %v2593_v29, 7  ;;  %v2524_v30 = vrot.slane %v2412_v57, %v3995_v22  ;;  %v2127_v18 = vunpack.i.l.bf16 %v2125_v5  ;;  %v2128_v37 = vunpack.i.h.bf16 %v2125_v5 }
 0x192   : > { %v2138_v59 = vsel %vm1914_vm6, %v1853_v17, 4286644096  ;;  %v2419_v50 = vrot.slane %v2339_v2, %v3995_v22  ;;  %v2151_v48 = vsel %vm1914_vm6, %v1861_v55, 4286644096  ;;  %v2164_v49 = vsel %vm1914_vm6, %v1863_v33, 4286644096 }
 0x193   : > { %v2614_v20 = vsel %vm2605_vm7, %v2613_v11, %v2592_v7  ;;  %v2140_v16 = vunpack.i.l.bf16 %v2138_v59  ;;  %v2141_v38 = vunpack.i.h.bf16 %v2138_v59  ;;  %v2594_v8 = vunpack.c.l.b16 %v2524_v30 }
 0x194   : > { %v2129_v25 = vmax.f32 %v2127_v18, %v2128_v37  ;;  %v2531_v23 = vrot.slane %v2419_v50, %v3995_v22  ;;  %v2153_v15 = vunpack.i.l.bf16 %v2151_v48  ;;  %v2154_v19 = vunpack.i.h.bf16 %v2151_v48 }
 0x195   : > { %v2142_v45 = vmax.f32 %v2140_v16, %v2141_v38  ;;  %v2615_v21 = vrot.slane %v2594_v8, 6  ;;  %v2166_v35 = vunpack.i.l.bf16 %v2164_v49  ;;  %v2167_v39 = vunpack.i.h.bf16 %v2164_v49 }
 0x196   : > { %v2130_v12 = vrot.slane %v2129_v25, 4  ;;  %v2595_v63 = vunpack.c.l.b16 %v2531_v23  ;;  %v2155_v14 = vmax.f32 %v2153_v15, %v2154_v19  ;;  %v2177_v27 = vsel %vm1914_vm6, %v1846_v36, 4286644096 }
 0x197   : > { %v2143_v41 = vrot.slane %v2142_v45, 4  ;;  %v2616_v44 = vsel %vm2608_vm8, %v2615_v21, %v2614_v20  ;;  %v2168_v4 = vmax.f32 %v2166_v35, %v2167_v39  ;;  %v2179_v46 = vunpack.i.l.bf16 %v2177_v27 }
 0x198   : > { %v2131_v28 = vmax.f32 %v2129_v25, %v2130_v12  ;;  %v2617_v47 = vrot.slane %v2595_v63, 5  ;;  %v2156_v40 = vrot.slane %v2155_v14, 4  ;;  %v2180_v51 = vunpack.i.h.bf16 %v2177_v27 }
 0x199   : > { %v2144_v58 = vmax.f32 %v2142_v45, %v2143_v41  ;;  %v2169_v53 = vrot.slane %v2168_v4, 4  ;;  %v2190_v34 = vsel %vm1914_vm6, %v4094_v32, 4286644096  ;;  %v2203_v6 = vsel %vm1914_vm6, %v1862_v31, 4286644096 }
 0x19a   : > { %v2132_v42 = vrot.slane %v2131_v28, 2  ;;  %v2618_v54 = vsel %vm2611_vm9, %v2617_v47, %v2616_v44  ;;  %v2157_v61 = vmax.f32 %v2155_v14, %v2156_v40  ;;  %v2181_v24 = vmax.f32 %v2179_v46, %v2180_v51 }
 0x19b   : > { %v2145_v60 = vrot.slane %v2144_v58, 2  ;;  %v2632_v43 = vpack.c.b16 %v2618_v54, %v2618_v54  ;;  %v2170_v26 = vmax.f32 %v2168_v4, %v2169_v53  ;;  %v2192_v52 = vunpack.i.l.bf16 %v2190_v34 }
 0x19c   : > { %v2133_v9 = vmax.f32 %v2131_v28, %v2132_v42  ;;  %v2158_v7 = vrot.slane %v2157_v61, 2  ;;  %v2182_v10 = vrot.slane %v2181_v24, 4  ;;  %v2193_v36 = vunpack.i.h.bf16 %v2190_v34 }
 0x19d   : > { %v2146_v1 = vmax.f32 %v2144_v58, %v2145_v60  ;;  %2997 = vst.sshfl [vmem:[%s4062_s20 + $0x2] sm:$0x3 pattern:$0x76325410] %v2632_v43  ;;  %v2171_v29 = vrot.slane %v2170_v26, 2  ;;  %v2205_v17 = vunpack.i.l.bf16 %v2203_v6  ;;  %v2206_v32 = vunpack.i.h.bf16 %v2203_v6 }
 0x19e   : > { %v2134_v13 = vrot.slane %v2133_v9, 1  ;;  %v2159_v55 = vmax.f32 %v2157_v61, %v2158_v7  ;;  %v2183_v31 = vmax.f32 %v2181_v24, %v2182_v10  ;;  %v2194_v5 = vmax.f32 %v2192_v52, %v2193_v36 }
 0x19f   : > { %v2147_v57 = vrot.slane %v2146_v1, 1  ;;  %v2172_v2 = vmax.f32 %v2170_v26, %v2171_v29  ;;  %v2207_v11 = vmax.f32 %v2205_v17, %v2206_v32  ;;  %v2216_v33 = vsel %vm1914_vm6, %v1864_v56, 4286644096 }
 0x1a0   : > { %v2160_v30 = vrot.slane %v2159_v55, 1  ;;  %v2184_v18 = vrot.slane %v2183_v31, 2  ;;  %v2195_v37 = vrot.slane %v2194_v5, 4  ;;  %v1872_v59 = vrot.slane %v4087_v3, %v3983_v0 }
 0x1a1   : > { %v2135_v50 = vmax.f32 %v2133_v9, %v2134_v13  ;;  %v2173_v20 = vrot.slane %v2172_v2, 1  ;;  %v2208_v16 = vrot.slane %v2207_v11, 4  ;;  %v2218_v38 = vunpack.i.l.bf16 %v2216_v33 }
 0x1a2   : > { %v2148_v8 = vmax.f32 %v2146_v1, %v2147_v57  ;;  %v2185_v25 = vmax.f32 %v2183_v31, %v2184_v18  ;;  %v2196_v48 = vmax.f32 %v2194_v5, %v2195_v37  ;;  %v2161_v49 = vmax.f32 %v2159_v55, %v2160_v30 }
 0x1a3   : > { %v2209_v23 = vmax.f32 %v2207_v11, %v2208_v16  ;;  %v2219_v45 = vunpack.i.h.bf16 %v2216_v33  ;;  %v2995_v15 = vpack.c.bf16 %v4081_v62, %v4081_v62  ;;  %v4119_v56 = vmax.f32 %v2172_v2, %v2173_v20 }
 0x1a4   : > { %v2186_v19 = vrot.slane %v2185_v25, 1  ;;  %v2197_v21 = vrot.slane %v2196_v48, 2  ;;  %v1880_v12 = vcombine.high %v1872_v59, %v1872_v59  ;;  %v2136_v35 = vpack.i.bf16 %v2135_v50, %v2135_v50 }
 0x1a5   : > { %v2210_v3 = vrot.slane %v2209_v23, 2  ;;  %v2220_v39 = vmax.f32 %v2218_v38, %v2219_v45  ;;  %v2149_v63 = vpack.i.bf16 %v2148_v8, %v2148_v8  ;;  %v1888_v27 = vrot.slane %v1872_v59, %v3983_v0 }
 0x1a6   : > { %v2187_v41 = vmax.f32 %v2185_v25, %v2186_v19  ;;  %v2198_v14 = vmax.f32 %v2196_v48, %v2197_v21  ;;  %v1879_v4 = vrot.slane %v2995_v15, %v3983_v0  ;;  %v1902_v46 = vrot.slane %v1880_v12, %v3983_v0 }
 0x1a7   : > { %v2211_v44 = vmax.f32 %v2209_v23, %v2210_v3  ;;  %v2221_v28 = vrot.slane %v2220_v39, 4  ;;  %v2162_v62 = vpack.i.bf16 %v2161_v49, %v2161_v49  ;;  %v2175_v47 = vpack.i.bf16 %v4119_v56, %v4119_v56 }
 0x1a8   : > { %v2188_v58 = vpack.i.bf16 %v2187_v41, %v2187_v41  ;;  %v2199_v40 = vrot.slane %v2198_v14, 1  ;;  %v1910_v53 = vcombine.high %v1888_v27, %v1888_v27  ;;  %v1912_v34 = vcombine.high %v1902_v46, %v1902_v46 }
 0x1a9   : > { %v2212_v51 = vrot.slane %v2211_v44, 1  ;;  %v2222_v42 = vmax.f32 %v2220_v39, %v2221_v28  ;;  %v2229_v60 = vsel %vm1914_vm6, %v1888_v27, 4286644096  ;;  %v2242_v61 = vsel %vm1914_vm6, %v1902_v46, 4286644096 }
 0x1aa   : > { %v2200_v6 = vmax.f32 %v2198_v14, %v2199_v40  ;;  %v2340_v54 = vmax.bf16 %v2188_v58, %v2136_v35  ;;  %v2231_v9 = vunpack.i.l.bf16 %v2229_v60  ;;  %v2232_v26 = vunpack.i.h.bf16 %v2229_v60 }
 0x1ab   : > { %v2213_v24 = vmax.f32 %v2211_v44, %v2212_v51  ;;  %v2223_v43 = vrot.slane %v2222_v42, 2  ;;  %v2244_v7 = vunpack.i.l.bf16 %v2242_v61  ;;  %v2245_v10 = vunpack.i.h.bf16 %v2242_v61 }
 0x1ac   : > { %v2201_v52 = vpack.i.bf16 %v2200_v6, %v2200_v6  ;;  %v2426_v1 = vrot.slane %v2340_v54, %v3995_v22  ;;  %v2233_v29 = vmax.f32 %v2231_v9, %v2232_v26  ;;  %v2255_v17 = vsel %vm1914_vm6, %v1910_v53, 4286644096 }
 0x1ad   : > { %v2214_v36 = vpack.i.bf16 %v2213_v24, %v2213_v24  ;;  %v2224_v13 = vmax.f32 %v2222_v42, %v2223_v43  ;;  %v1881_v57 = vcombine.high %v1879_v4, %v1879_v4  ;;  %v2246_v55 = vmax.f32 %v2244_v7, %v2245_v10 }
 0x1ae   : > { %v2341_v32 = vmax.bf16 %v2201_v52, %v2149_v63  ;;  %v2257_v31 = vunpack.i.l.bf16 %v2255_v17  ;;  %v2234_v11 = vrot.slane %v2233_v29, 4  ;;  %v2258_v33 = vunpack.i.h.bf16 %v2255_v17 }
 0x1af   : > { %v2225_v5 = vrot.slane %v2224_v13, 1  ;;  %v2342_v2 = vmax.bf16 %v2214_v36, %v2162_v62  ;;  %v1895_v18 = vrot.slane %v1879_v4, %v3983_v0  ;;  %v2247_v37 = vrot.slane %v2246_v55, 4 }
 0x1b0   : > { %v2433_v30 = vrot.slane %v2341_v32, %v3995_v22  ;;  %v2268_v59 = vsel %vm1914_vm6, %v1912_v34, 4286644096  ;;  %v2538_v16 = vrot.slane %v2426_v1, %v3995_v22  ;;  %v2259_v38 = vmax.f32 %v2257_v31, %v2258_v33 }
 0x1b1   : > { %v2226_v50 = vmax.f32 %v2224_v13, %v2225_v5  ;;  %v2440_v20 = vrot.slane %v2342_v2, %v3995_v22  ;;  %v2235_v25 = vmax.f32 %v2233_v29, %v2234_v11  ;;  %v2270_v48 = vunpack.i.l.bf16 %v2268_v59 }
 0x1b2   : > { %v2545_v8 = vrot.slane %v2433_v30, %v3995_v22  ;;  %v2271_v49 = vunpack.i.h.bf16 %v2268_v59  ;;  %v2248_v56 = vmax.f32 %v2246_v55, %v2247_v37  ;;  %v2281_v21 = vsel %vm1914_vm6, %v1895_v18, 4286644096 }
 0x1b3   : > { %v2227_v23 = vpack.i.bf16 %v2226_v50, %v2226_v50  ;;  %v2552_v45 = vrot.slane %v2440_v20, %v3995_v22  ;;  %v1909_v3 = vrot.slane %v1881_v57, %v3983_v0  ;;  %v2260_v39 = vrot.slane %v2259_v38, 4 }
 0x1b4   : > { %v2597_v15 = vunpack.c.l.b16 %v2545_v8  ;;  %v2272_v19 = vmax.f32 %v2270_v48, %v2271_v49  ;;  %v2596_v63 = vunpack.c.l.b16 %v2538_v16  ;;  %v2236_v14 = vrot.slane %v2235_v25, 2 }
 0x1b5   : > { %v2343_v12 = vmax.bf16 %v2227_v23, %v2175_v47  ;;  %v2598_v35 = vunpack.c.l.b16 %v2552_v45  ;;  %v2283_v27 = vunpack.i.l.bf16 %v2281_v21  ;;  %v1911_v62 = vcombine.high %v1895_v18, %v1895_v18 }
 0x1b6   : > { %v2619_v41 = vrot.slane %v2597_v15, 7  ;;  %v2273_v4 = vrot.slane %v2272_v19, 4  ;;  %v2249_v58 = vrot.slane %v2248_v56, 2  ;;  %v2284_v40 = vunpack.i.h.bf16 %v2281_v21 }
 0x1b7   : > { %v2447_v44 = vrot.slane %v2343_v12, %v3995_v22  ;;  %v2621_v28 = vrot.slane %v2598_v35, 6  ;;  %v1913_v42 = vcombine.high %v1909_v3, %v1909_v3  ;;  %v2261_v0 = vmax.f32 %v2259_v38, %v2260_v39 }
 0x1b8   : > { %v2620_v46 = vsel %vm2605_vm7, %v2619_v41, %v2596_v63  ;;  %v2237_v53 = vmax.f32 %v2235_v25, %v2236_v14  ;;  %v2285_v34 = vmax.f32 %v2283_v27, %v2284_v40  ;;  %v2294_v6 = vsel %vm1914_vm6, %v1909_v3, 4286644096 }
 0x1b9   : > { %v2559_v51 = vrot.slane %v2447_v44, %v3995_v22  ;;  %v2622_v47 = vsel %vm2608_vm8, %v2621_v28, %v2620_v46  ;;  %v2274_v60 = vmax.f32 %v2272_v19, %v2273_v4  ;;  %v2296_v61 = vunpack.i.l.bf16 %v2294_v6 }
 0x1ba   : > { %v2250_v24 = vmax.f32 %v2248_v56, %v2249_v58  ;;  %v2286_v43 = vrot.slane %v2285_v34, 4  ;;  %v2297_v9 = vunpack.i.h.bf16 %v2294_v6  ;;  %v2262_v52 = vrot.slane %v2261_v0, 2 }
 0x1bb   : > { %v2599_v54 = vunpack.c.l.b16 %v2559_v51  ;;  %v2307_v1 = vsel %vm1914_vm6, %v1911_v62, 4286644096  ;;  %v2320_v7 = vsel %vm1914_vm6, %v1913_v42, 4286644096  ;;  %v2238_v10 = vrot.slane %v2237_v53, 1 }
 0x1bc   : > { %v2287_v36 = vmax.f32 %v2285_v34, %v2286_v43  ;;  %v2298_v13 = vmax.f32 %v2296_v61, %v2297_v9  ;;  %v2309_v29 = vunpack.i.l.bf16 %v2307_v1  ;;  %v2275_v32 = vrot.slane %v2274_v60, 2 }
 0x1bd   : > { %v2623_v26 = vrot.slane %v2599_v54, 5  ;;  %v2310_v57 = vunpack.i.h.bf16 %v2307_v1  ;;  %v2322_v55 = vunpack.i.l.bf16 %v2320_v7  ;;  %v2263_v11 = vmax.f32 %v2261_v0, %v2262_v52 }
 0x1be   : > { %v2288_v5 = vrot.slane %v2287_v36, 2  ;;  %v2299_v2 = vrot.slane %v2298_v13, 4  ;;  %v2323_v30 = vunpack.i.h.bf16 %v2320_v7  ;;  %v2239_v18 = vmax.f32 %v2237_v53, %v2238_v10 }
 0x1bf   : > { %v2624_v17 = vsel %vm2611_vm9, %v2623_v26, %v2622_v47  ;;  %v2311_v33 = vmax.f32 %v2309_v29, %v2310_v57  ;;  %v2251_v37 = vrot.slane %v2250_v24, 1  ;;  %v2276_v20 = vmax.f32 %v2274_v60, %v2275_v32 }
 0x1c0   : > { %v2633_v31 = vpack.c.b16 %v2624_v17, %v2624_v17  ;;  %v2289_v59 = vmax.f32 %v2287_v36, %v2288_v5  ;;  %v2300_v50 = vmax.f32 %v2298_v13, %v2299_v2  ;;  %v2324_v38 = vmax.f32 %v2322_v55, %v2323_v30 }
 0x1c1   : > { %v2312_v16 = vrot.slane %v2311_v33, 4  ;;  %v2264_v48 = vrot.slane %v2263_v11, 1  ;;  %v2240_v45 = vpack.i.bf16 %v2239_v18, %v2239_v18  ;;  %v2252_v15 = vmax.f32 %v2250_v24, %v2251_v37 }
 0x1c2   : > { %2998 = vst.sshfl [vmem:[%s4062_s20 + $0x4] sm:$0x3 pattern:$0x76325410] %v2633_v31  ;;  %v2290_v8 = vrot.slane %v2289_v59, 1  ;;  %v2301_v25 = vrot.slane %v2300_v50, 2 }
 0x1c3   : > { %v2313_v49 = vmax.f32 %v2311_v33, %v2312_v16  ;;  %v2325_v23 = vrot.slane %v2324_v38, 4  ;;  %v2277_v21 = vrot.slane %v2276_v20, 1  ;;  %v2265_v63 = vmax.f32 %v2263_v11, %v2264_v48 }
 0x1c4   : > { %v2291_v56 = vmax.f32 %v2289_v59, %v2290_v8  ;;  %v2302_v19 = vmax.f32 %v2300_v50, %v2301_v25  ;;  %v2253_v27 = vpack.i.bf16 %v2252_v15, %v2252_v15 }
 0x1c5   : > { %v2314_v12 = vrot.slane %v2313_v49, 2  ;;  %v2326_v35 = vmax.f32 %v2324_v38, %v2325_v23  ;;  %v2278_v4 = vmax.f32 %v2276_v20, %v2277_v21  ;;  %v2266_v40 = vpack.i.bf16 %v2265_v63, %v2265_v63 }
 0x1c6   : > { %v2292_v3 = vpack.i.bf16 %v2291_v56, %v2291_v56  ;;  %v2303_v39 = vrot.slane %v2302_v19, 1 }
 0x1c7   : > { %v2315_v41 = vmax.f32 %v2313_v49, %v2314_v12  ;;  %v2327_v14 = vrot.slane %v2326_v35, 2  ;;  %v2279_v53 = vpack.i.bf16 %v2278_v4, %v2278_v4 }
 0x1c8   : > { %v2304_v44 = vmax.f32 %v2302_v19, %v2303_v39  ;;  %v2344_v28 = vmax.bf16 %v2292_v3, %v2240_v45 }
 0x1c9   : > { %v2316_v46 = vrot.slane %v2315_v41, 1  ;;  %v2328_v62 = vmax.f32 %v2326_v35, %v2327_v14 }
 0x1ca   : > { %v2305_v58 = vpack.i.bf16 %v2304_v44, %v2304_v44  ;;  %v2454_v0 = vrot.slane %v2344_v28, %v3995_v22 }
 0x1cb   : > { %v2317_v51 = vmax.f32 %v2315_v41, %v2316_v46  ;;  %v2329_v47 = vrot.slane %v2328_v62, 1 }
 0x1cc   : > { %v2345_v42 = vmax.bf16 %v2305_v58, %v2253_v27  ;;  %v2566_v24 = vrot.slane %v2454_v0, %v3995_v22 }
 0x1cd   : > { %v2318_v34 = vpack.i.bf16 %v2317_v51, %v2317_v51  ;;  %v2330_v6 = vmax.f32 %v2328_v62, %v2329_v47 }
 0x1ce   : > { %v2461_v54 = vrot.slane %v2345_v42, %v3995_v22  ;;  %v2600_v10 = vunpack.c.l.b16 %v2566_v24 }
 0x1cf   : > { %v2331_v60 = vpack.i.bf16 %v2330_v6, %v2330_v6  ;;  %v2346_v61 = vmax.bf16 %v2318_v34, %v2266_v40 }
 0x1d0   : > { %v2573_v43 = vrot.slane %v2461_v54, %v3995_v22 }
 0x1d1   : > { %v2347_v9 = vmax.bf16 %v2331_v60, %v2279_v53  ;;  %v2468_v26 = vrot.slane %v2346_v61, %v3995_v22 }
 0x1d2   : > { %v2601_v52 = vunpack.c.l.b16 %v2573_v43 }
 0x1d3   : > { %v2475_v1 = vrot.slane %v2347_v9, %v3995_v22  ;;  %v2580_v7 = vrot.slane %v2468_v26, %v3995_v22 }
 0x1d4   : > { %v2625_v36 = vrot.slane %v2601_v52, 7 }
 0x1d5   : > { %v2587_v13 = vrot.slane %v2475_v1, %v3995_v22  ;;  %v2602_v29 = vunpack.c.l.b16 %v2580_v7 }
 0x1d6   : > { %v2626_v17 = vsel %vm2605_vm7, %v2625_v36, %v2600_v10 }
 0x1d7   : > { %v2603_v32 = vunpack.c.l.b16 %v2587_v13  ;;  %v2627_v57 = vrot.slane %v2602_v29, 6 }
 0x1d9   : > { %v2628_v55 = vsel %vm2608_vm8, %v2627_v57, %v2626_v17  ;;  %v2629_v31 = vrot.slane %v2603_v32, 5 }
 0x1db   : > { %v2630_v5 = vsel %vm2611_vm9, %v2629_v31, %v2628_v55 }
 0x1dc   : > { %v2634_v2 = vpack.c.b16 %v2630_v5, %v2630_v5 }
 0x1de   : > { %2999 = vst.sshfl [vmem:[%s4062_s20 + $0x6] sm:$0x3 pattern:$0x76325410] %v2634_v2 }
 0x1df PF: > { %s13_s12 = sadd.s32 1, %s3369_s12  }
 0x1e0   : > { %p10_p4 = scmp.ge.s32.totalorder %s13_s12, 4  }
 0x1e2   :  { %12 = sbr.rel (!%p10_p4) target bundleno = 1 (0x1), region = 64 }

// kernel: _lambda_.5
= control target key start
LH: loop header
LB: loop body
LE: loop exit
PB: predicated region body
PF: predicated region fallthrough
CT: control target
= control target key end

     0   :  { %s6416_s12 = smov 0   ;;  %s8551_s0 = inlined_call_operand.vmem [shape: bf16[2,18,18,128], index: 0, kind: input, shape index: {}]   ;;  %s8552_s1 = inlined_call_operand.vmem [shape: bf16[3,384,128], index: 1, kind: input, shape index: {}]   ;;  %s8553_s2 = inlined_call_operand.vmem [shape: f32[1,128], index: 2, kind: input, shape index: {}]   ;;  %s8554_s3 = inlined_call_operand.vmem [shape: bf16[2,10,10,128], index: 3, kind: output, shape index: {}]  }
   0x1 LB: > { %s5395_s13 = sadd.s32 4294967295, %s6392_s12   ;;  %p5399_p0 = scmp.ge.s32.totalorder %s6392_s12, 1  ;;  %s6392_s12 = sphi %s6416_s12, %s13_s12  }
   0x2   : > { %p137_p1 = scmp.lt.s32.totalorder %s6392_s12, 3 }
   0x4   : > { %p138_p2 = pnand %p5399_p0, %p137_p1 }
   0x6   : > { %141 = sbr.rel (%p138_p2) target bundleno = 1000 (0x3e8), region = 32 }
   0xb   : > { %v6241_v0 = vld [vmem:[%s8552_s1 + $0x138] sm:$0xff]   ;;  %p161_p3 = scmp.lt.s32.totalorder %s5395_s13, 1  ;;  %v6243_v2 = vld [vmem:[%s8552_s1 + $0x130] sm:$0xff]   ;;  %v6245_v4 = vld [vmem:[%s8552_s1 + $0x128] sm:$0xff]   ;;  %vm437_vm0 = vsmask.f32 7424 }
   0xc   : > { %v6242_v1 = vld [vmem:[%s8552_s1 + $0xf8] sm:$0xff]   ;;  %5661 = vmatprep.subr.bf16.mxu0 %v6241_v0  ;;  %6213 = vmatprep.subr.bf16.mxu1 %v6241_v0  ;;  %v6244_v3 = vld [vmem:[%s8552_s1 + $0xf0] sm:$0xff]   ;;  %v6246_v5 = vld [vmem:[%s8552_s1 + $0xe8] sm:$0xff]   ;;  %vm1725_vm1 = vcmask 1046528   ;;  %vm3232_vm2 = vcmask 1040384   ;;  %vm5245_vm5 = vcmask 1044480  }
   0xd   : > { %5662 = vmatpush3.bf16.msra.mxu0 %v6242_v1  ;;  %6221 = vmatpush3.bf16.msra.mxu1 %v6242_v1  ;;  %s8637_s13 = smov (!%p161_p3, %s5395_s13), 1  ;;  %v6247_v6 = vld [vmem:[%s8552_s1 + $0x120] sm:$0xff]   ;;  %v6249_v8 = vld [vmem:[%s8552_s1 + $0x118] sm:$0xff]   ;;  %v6251_v10 = vld [vmem:[%s8552_s1 + $0x110] sm:$0xff]   ;;  %vm5234_vm3 = vsmask.f32 256 }
   0xe   : > { %5663 = vmatprep.subr.bf16.mxu0 %v6243_v2  ;;  %6214 = vmatprep.subr.bf16.mxu1 %v6243_v2  ;;  %s6229_s28 = smul.u32 216, %s8637_s13  ;;  %v6248_v7 = vld [vmem:[%s8552_s1 + $0xe0] sm:$0xff]   ;;  %v6250_v9 = vld [vmem:[%s8552_s1 + $0xd8] sm:$0xff]   ;;  %v6252_v13 = vld [vmem:[%s8552_s1 + $0xd0] sm:$0xff]   ;;  %vm5246_vm6 = vsmask.f32 4352 }
   0xf   : > { %v6253_v16 = vld [vmem:[%s8552_s1 + $0x108] sm:$0xff]   ;;  %v6255_v32 = vld [vmem:[%s8552_s1 + $0x100] sm:$0xff]   ;;  %v6265_v55 = vld [vmem:[%s8552_s1 + $0x178] sm:$0xff]   ;;  %vm5090_vm8 = vcmask 1041409   ;;  %vm5092_vm9 = vcmask 1042434   ;;  %vm5094_vm10 = vcmask 1043459  }
  0x10   : > { %s6457_s8 = scalar_lea.vmem %s8551_s0, %s6229_s28  ;;  %v6254_v26 = vld [vmem:[%s8552_s1 + $0xc8] sm:$0xff]   ;;  %v6256_v49 = vld [vmem:[%s8552_s1 + $0xc0] sm:$0xff]   ;;  %v6266_v58 = vld [vmem:[%s8552_s1 + $0xb8] sm:$0xff]   ;;  %vm5096_vm11 = vcmask 1044484   ;;  %vm5098_vm12 = vcmask 1045509   ;;  %vm5100_vm13 = vcmask 1046534  }
  0x11   : > { %5664 = vmatpush3.bf16.msra.mxu0 %v6244_v3  ;;  %6222 = vmatpush3.bf16.msra.mxu1 %v6244_v3  ;;  %v175_v11 = vld [vmem:[%s6457_s8 + $0xc] sm:$0xf]  ;;  %v176_v12 = vld [vmem:[%s6457_s8 + $0x10] sm:$0xf]  ;;  %v199_v17 = vld [vmem:[%s6457_s8 + $0x9c] sm:$0xf] }
  0x12   : > { %5665 = vmatprep.subr.bf16.mxu0 %v6245_v4  ;;  %6215 = vmatprep.subr.bf16.mxu1 %v6245_v4  ;;  %v6470_v14 = vcombine.low %v175_v11, %v176_v12  ;;  %v6258_v15 = vld [vmem:[%s6457_s8 + $0x14] ss:$0 sps:$4 sm:$0x11]   ;;  %v200_v18 = vld [vmem:[%s6457_s8 + $0xa0] sm:$0xf]  ;;  %vm7308_vm4 = vmand %vm3232_vm2, %vm5234_vm3  ;;  %vm5102_vm14 = vcmask 1047559  }
  0x13   : > { %v458_v21 = vshll.u32 %v6258_v15, 16  ;;  %v6480_v22 = vcombine.low %v199_v17, %v200_v18  ;;  %v6260_v23 = vld [vmem:[%s6457_s8 + $0xa4] ss:$0 sps:$4 sm:$0x11]   ;;  %v173_v24 = vld [vmem:[%s6457_s8] sm:$0xf]  ;;  %vm7320_vm7 = vmand %vm5245_vm5, %vm5246_vm6 }
  0x14   : > { %v451_v19 = vshrl.u32 %v6470_v14, 16  ;;  %v453_v20 = vshll.u32 %v6470_v14, 16  ;;  %v174_v25 = vld [vmem:[%s6457_s8 + $0x4] sm:$0xf]  ;;  %v197_v31 = vld [vmem:[%s6457_s8 + $0x90] sm:$0xf] }
  0x15   : > { %5666 = vmatpush3.bf16.msra.mxu0 %v6246_v5  ;;  %6223 = vmatpush3.bf16.msra.mxu1 %v6246_v5  ;;  %v460_v28 = vrot.slane %v458_v21, 1  ;;  %v595_v29 = vshrl.u32 %v6480_v22, 16  ;;  %v597_v30 = vshll.u32 %v6480_v22, 16  ;;  %v602_v33 = vshll.u32 %v6260_v23, 16  ;;  %v198_v36 = vld [vmem:[%s6457_s8 + $0x94] sm:$0xf] }
  0x16   : > { %5667 = vmatprep.subr.bf16.mxu0 %v6247_v6  ;;  %6216 = vmatprep.subr.bf16.mxu1 %v6247_v6  ;;  %v455_v27 = vrot.slane %v453_v20, 1  ;;  %v6494_v34 = vcombine.low %v173_v24, %v174_v25  ;;  %v6262_v35 = vld [vmem:[%s6457_s8 + $0x8] ss:$0 sps:$4 sm:$0x11]   ;;  %v6498_v39 = vcombine.low %v197_v31, %v198_v36  ;;  %v177_v59 = vld [vmem:[%s6457_s8 + $0x18] sm:$0xf] }
  0x17   : > { %v599_v38 = vrot.slane %v597_v30, 1  ;;  %v6264_v40 = vld [vmem:[%s6457_s8 + $0x98] ss:$0 sps:$4 sm:$0x11]   ;;  %v604_v41 = vrot.slane %v602_v33, 1  ;;  %v446_v44 = vshll.u32 %v6262_v35, 16 }
  0x18   : > { %v456_v37 = vor.u32 %v455_v27, %v451_v19  ;;  %v439_v42 = vshrl.u32 %v6494_v34, 16  ;;  %v441_v43 = vshll.u32 %v6494_v34, 16  ;;  %v583_v47 = vshrl.u32 %v6498_v39, 16  ;;  %v178_v60 = vld [vmem:[%s6457_s8 + $0x1c] sm:$0xf]  ;;  %v6267_v1 = vld [vmem:[%s8552_s1 + $0x170] sm:$0xff]  }
  0x19   : > { %5668 = vmatpush3.bf16.msra.mxu0 %v6248_v7  ;;  %6224 = vmatpush3.bf16.msra.mxu1 %v6248_v7  ;;  %v600_v46 = vor.u32 %v599_v38, %v595_v29  ;;  %v585_v48 = vshll.u32 %v6498_v39, 16  ;;  %v448_v51 = vrot.slane %v446_v44, 1  ;;  %v590_v52 = vshll.u32 %v6264_v40, 16  ;;  %v6269_v63 = vld [vmem:[%s6457_s8 + $0x20] ss:$0 sps:$4 sm:$0x11]  }
  0x1a   : > { %5669 = vmatprep.subr.bf16.mxu0 %v6249_v8  ;;  %6217 = vmatprep.subr.bf16.mxu1 %v6249_v8  ;;  %v6504_v45 = vsel %vm437_vm0, %v456_v37, %v460_v28  ;;  %v443_v50 = vrot.slane %v441_v43, 1  ;;  %v6524_v62 = vcombine.low %v177_v59, %v178_v60  ;;  %v201_v2 = vld [vmem:[%s6457_s8 + $0xa8] sm:$0xf]  ;;  %v202_v3 = vld [vmem:[%s6457_s8 + $0xac] sm:$0xf]  ;;  %v470_v7 = vshll.u32 %v6269_v63, 16 }
  0x1b   : > { %897 = vmatprep.mubr.bf16.mxu0 %v6504_v45  ;;  %v6513_v53 = vsel %vm437_vm0, %v600_v46, %v604_v41  ;;  %v587_v54 = vrot.slane %v585_v48, 1  ;;  %v592_v57 = vrot.slane %v590_v52, 1  ;;  %v6271_v8 = vld [vmem:[%s6457_s8 + $0xb0] ss:$0 sps:$4 sm:$0x11]   ;;  %v6272_v19 = vld [vmem:[%s8552_s1 + $0x168] sm:$0xff]  }
  0x1c   : > { %v444_v56 = vor.u32 %v443_v50, %v439_v42  ;;  %993 = vmatprep.mubr.bf16.mxu1 %v6513_v53  ;;  %v463_v5 = vshrl.u32 %v6524_v62, 16  ;;  %v465_v6 = vshll.u32 %v6524_v62, 16  ;;  %v472_v11 = vrot.slane %v470_v7, 1  ;;  %v179_v20 = vld [vmem:[%s6457_s8 + $0x24] sm:$0xf]  ;;  %v6279_v48 = vld [vmem:[%s8552_s1 + $0x158] sm:$0xff]  }
  0x1d   : > { %5670 = vmatpush3.bf16.msra.mxu0 %v6250_v9  ;;  %6225 = vmatpush3.bf16.msra.mxu1 %v6250_v9  ;;  %v588_v61 = vor.u32 %v587_v54, %v583_v47  ;;  %v6539_v9 = vcombine.low %v201_v2, %v202_v3  ;;  %v614_v12 = vshll.u32 %v6271_v8, 16  ;;  %v6552_v21 = vld [vmem:[%s6457_s8 + $0x28] sm:$0xf]  ;;  %v6558_v25 = vld [vmem:[%s6457_s8 + $0x2c] ss:$0 sps:$4 sm:$0x11]  }
  0x1e   : > { %5671 = vmatprep.subr.bf16.mxu0 %v6251_v10  ;;  %6218 = vmatprep.subr.bf16.mxu1 %v6251_v10  ;;  %v449_v0 = vsel %vm437_vm0, %v444_v56, %v448_v51  ;;  %v467_v10 = vrot.slane %v465_v6, 1  ;;  %v6555_v24 = vcombine.low %v179_v20, %v6552_v21  ;;  %v203_v27 = vld [vmem:[%s6457_s8 + $0xb4] sm:$0xf]  ;;  %v204_v28 = vld [vmem:[%s6457_s8 + $0xb8] sm:$0xf]  ;;  %v6273_v37 = vld [vmem:[%s8552_s1 + $0x160] sm:$0xff]  }
  0x1f   : > { %v6534_v4 = vsel %vm437_vm0, %v588_v61, %v592_v57  ;;  %v607_v15 = vshrl.u32 %v6539_v9, 16  ;;  %v616_v18 = vrot.slane %v614_v12, 1  ;;  %v6278_v33 = vld [vmem:[%s6457_s8 + $0xbc] ss:$0 sps:$4 sm:$0x11]   ;;  %v6570_v35 = vcombine.low %v203_v27, %v204_v28  ;;  %v6286_v59 = vld [vmem:[%s8552_s1 + $0xa8] sm:$0xff]  }
  0x20   : > { %v468_v17 = vor.u32 %v467_v10, %v463_v5  ;;  %v475_v30 = vshrl.u32 %v6555_v24, 16  ;;  %v477_v31 = vshll.u32 %v6555_v24, 16  ;;  %v626_v41 = vshll.u32 %v6278_v33, 16  ;;  %v181_v44 = vld [vmem:[%s6457_s8 + $0x30] sm:$0xf]  ;;  %v6292_v28 = vld [vmem:[%s8552_s1 + $0xa0] sm:$0xff]  }
  0x21   : > { %5672 = vmatpush3.bf16.msra.mxu0 %v6252_v13  ;;  %6226 = vmatpush3.bf16.msra.mxu1 %v6252_v13  ;;  %v6274_v13 = vld [vmem:[%s8552_s1 + $0xb0] sm:$0xff]   ;;  %v619_v42 = vshrl.u32 %v6570_v35, 16  ;;  %v621_v43 = vshll.u32 %v6570_v35, 16  ;;  %v6594_v50 = vld [vmem:[%s6457_s8 + $0x38] ss:$0 sps:$4 sm:$0x11]  }
  0x22   : > { %5673 = vmatprep.subr.bf16.mxu0 %v6253_v16  ;;  %6219 = vmatprep.subr.bf16.mxu1 %v6253_v16  ;;  %v609_v16 = vshll.u32 %v6539_v9, 16  ;;  %v479_v38 = vrot.slane %v477_v31, 1  ;;  %v6583_v46 = vld [vmem:[%s6457_s8 + $0x34] sm:$0xf]  ;;  %v628_v52 = vrot.slane %v626_v41, 1 }
  0x23   : > { %v623_v51 = vrot.slane %v621_v43, 1  ;;  %v205_v54 = vld [vmem:[%s6457_s8 + $0xc0] sm:$0xf]  ;;  %v6284_v63 = vld [vmem:[%s6457_s8 + $0xc8] ss:$0 sps:$4 sm:$0x11]  }
  0x24   : > { %v611_v23 = vrot.slane %v609_v16, 1  ;;  %v480_v47 = vor.u32 %v479_v38, %v475_v30  ;;  %v6280_v3 = vld [vmem:[%s8552_s1 + $0x150] sm:$0xff]   ;;  %v638_v7 = vshll.u32 %v6284_v63, 16  ;;  %v183_v10 = vld [vmem:[%s6457_s8 + $0x3c] sm:$0xf]  ;;  %v6285_v16 = vld [vmem:[%s8552_s1 + $0x148] sm:$0xff]  }
  0x25   : > { %5674 = vmatpush3.bf16.msra.mxu0 %v6254_v26  ;;  %6227 = vmatpush3.bf16.msra.mxu1 %v6254_v26  ;;  %v6561_v26 = vsel %vm437_vm0, %v468_v17, %v472_v11  ;;  %v624_v60 = vor.u32 %v623_v51, %v619_v42  ;;  %v185_v30 = vld [vmem:[%s6457_s8 + $0x48] sm:$0xf]  ;;  %v6650_v31 = vld [vmem:[%s6457_s8 + $0x4c] sm:$0xf]  ;;  %v6287_v38 = vld [vmem:[%s8552_s1 + $0x140] sm:$0xff]  }
  0x26   : > { %5675 = vmatprep.subr.bf16.mxu0 %v6255_v32  ;;  %6220 = vmatprep.subr.bf16.mxu1 %v6255_v32  ;;  %v612_v29 = vor.u32 %v611_v23, %v607_v15  ;;  %v482_v32 = vshll.u32 %v6558_v25, 16  ;;  %v640_v12 = vrot.slane %v638_v7, 1  ;;  %v189_v63 = vld [vmem:[%s6457_s8 + $0x60] sm:$0xf] }
  0x27   : > { %v6612_v2 = vsel %vm437_vm0, %v624_v60, %v628_v52 }
  0x28   : > { %v6573_v36 = vsel %vm437_vm0, %v612_v29, %v616_v18  ;;  %v484_v40 = vrot.slane %v482_v32, 1  ;;  %v6636_v18 = vld [vmem:[%s6457_s8 + $0x44] ss:$0 sps:$4 sm:$0x11]  }
  0x29   : > { %5676 = vmatpush3.bf16.msra.mxu0 %v6256_v49  ;;  %6228 = vmatpush3.bf16.msra.mxu1 %v6256_v49  ;;  %v6591_v49 = vcombine.low %v181_v44, %v6583_v46  ;;  %v506_v27 = vshll.u32 %v6636_v18, 16 }
  0x2a   : > { %6069 = vmatprep.subr.bf16.mxu1 %v6265_v55  ;;  %6117 = vmatprep.subr.bf16.mxu0 %v6266_v58 }
  0x2b   : > { %v487_v56 = vshrl.u32 %v6591_v49, 16  ;;  %v489_v57 = vshll.u32 %v6591_v49, 16  ;;  %v508_v33 = vrot.slane %v506_v27, 1 }
  0x2c   : > { %898 = vmatmul.mubr.bf16.vlgmr.msra.gmra.mxu0 %v449_v0  ;;  %994 = vmatmul.mubr.bf16.vlgmr.msra.gmra.mxu1 %v6534_v4 }
  0x2d   : > { %6070 = vmatpush3.bf16.msra.mxu1 %v6265_v55  ;;  %6118 = vmatpush3.bf16.msra.mxu0 %v6266_v58  ;;  %v206_v55 = vld [vmem:[%s6457_s8 + $0xc4] sm:$0xf]  ;;  %v494_v58 = vshll.u32 %v6594_v50, 16  ;;  %v491_v0 = vrot.slane %v489_v57, 1  ;;  %v6290_v57 = vld [vmem:[%s8552_s1 + $0x78] sm:$0xff]  }
  0x2e   : > { %6071 = vmatprep.subr.bf16.mxu1 %v6267_v1  ;;  %6119 = vmatprep.subr.bf16.mxu0 %v6274_v13  ;;  %v6608_v61 = vcombine.low %v205_v54, %v206_v55  ;;  %v6676_v55 = vld [vmem:[%s6457_s8 + $0x5c] ss:$0 sps:$4 sm:$0x11]  }
  0x2f   : > { %905 = vmatprep.mubr.bf16.mxu0 %v6561_v26  ;;  %1001 = vmatprep.mubr.bf16.mxu1 %v6573_v36  ;;  %v492_v8 = vor.u32 %v491_v0, %v487_v56  ;;  %v6299_v56 = vld [vmem:[%s8552_s1 + $0x98] sm:$0xff]   ;;  %v530_v7 = vshll.u32 %v6676_v55, 16 }
  0x30   : > { %v631_v5 = vshrl.u32 %v6608_v61, 16  ;;  %v633_v6 = vshll.u32 %v6608_v61, 16  ;;  %v6291_v0 = vld [vmem:[%s8552_s1 + $0x38] sm:$0xff]  }
  0x31   : > { %6072 = vmatpush3.bf16.msra.mxu1 %v6267_v1  ;;  %6120 = vmatpush3.bf16.msra.mxu0 %v6274_v13  ;;  %v496_v1 = vrot.slane %v494_v58, 1  ;;  %v6622_v13 = vld [vmem:[%s6457_s8 + $0x40] sm:$0xf]  ;;  %v532_v27 = vrot.slane %v530_v7, 1 }
  0x32   : > { %6073 = vmatprep.subr.bf16.mxu1 %v6272_v19  ;;  %6121 = vmatprep.subr.bf16.mxu0 %v6286_v59  ;;  %v635_v11 = vrot.slane %v633_v6, 1  ;;  %v6633_v17 = vcombine.low %v183_v10, %v6622_v13  ;;  %v6296_v10 = vld [vmem:[%s8552_s1 + $0x30] sm:$0xff]  }
  0x33   : > { %v6627_v15 = vsel %vm437_vm0, %v492_v8, %v496_v1  ;;  %v6692_v1 = vld [vmem:[%s6457_s8 + $0x64] sm:$0xf] }
  0x34   : > { %906 = vmatmul.mubr.bf16.gmra.mxu0 %v6504_v45  ;;  %1002 = vmatmul.mubr.bf16.gmra.mxu1 %v6513_v53  ;;  %v6599_v45 = vsel %vm437_vm0, %v480_v47, %v484_v40  ;;  %v499_v20 = vshrl.u32 %v6633_v17, 16  ;;  %v501_v23 = vshll.u32 %v6633_v17, 16  ;;  %v6660_v40 = vld [vmem:[%s6457_s8 + $0x50] ss:$0 sps:$4 sm:$0x11]   ;;  %v6702_v8 = vcombine.low %v189_v63, %v6692_v1  ;;  %v6313_v63 = vld [vmem:[%s8552_s1 + $0x58] sm:$0xff]  }
  0x35   : > { %6074 = vmatpush3.bf16.msra.mxu1 %v6272_v19  ;;  %913 = vmatprep.mubr.bf16.mxu0 %v6599_v45  ;;  %v636_v19 = vor.u32 %v635_v11, %v631_v5  ;;  %v518_v44 = vshll.u32 %v6660_v40, 16  ;;  %v187_v47 = vld [vmem:[%s6457_s8 + $0x54] sm:$0xf] }
  0x36   : > { %6075 = vmatprep.subr.bf16.mxu1 %v6273_v37  ;;  %6122 = vmatpush3.bf16.msra.mxu0 %v6286_v59  ;;  %v503_v32 = vrot.slane %v501_v23, 1  ;;  %v6295_v5 = vld [vmem:[%s8552_s1 + $0x70] sm:$0xff]  }
  0x37   : > { %1009 = vmatprep.mubr.bf16.mxu1 %v6612_v2  ;;  %v6646_v29 = vsel %vm437_vm0, %v636_v19, %v640_v12  ;;  %6123 = vmatprep.subr.bf16.mxu0 %v6292_v28  ;;  %v520_v59 = vrot.slane %v518_v44, 1  ;;  %v6308_v11 = vld [vmem:[%s8552_s1 + $0x90] sm:$0xff]   ;;  %v191_v12 = vld [vmem:[%s6457_s8 + $0x6c] sm:$0xf] }
  0x38   : > { %v504_v41 = vor.u32 %v503_v32, %v499_v20  ;;  %v6300_v19 = vld [vmem:[%s8552_s1 + $0x68] sm:$0xff]   ;;  %v6730_v32 = vld [vmem:[%s6457_s8 + $0x7c] sm:$0xf] }
  0x39   : > { %6076 = vmatpush3.bf16.msra.mxu1 %v6273_v37  ;;  %v6654_v37 = vcombine.low %v185_v30, %v6650_v31  ;;  %v6721_v20 = vld [vmem:[%s6457_s8 + $0x68] ss:$0 sps:$4 sm:$0x11]   ;;  %v193_v30 = vld [vmem:[%s6457_s8 + $0x78] sm:$0xf] }
  0x3a   : > { %6077 = vmatprep.subr.bf16.mxu1 %v6279_v48  ;;  %6124 = vmatpush3.bf16.msra.mxu0 %v6292_v28  ;;  %v509_v51 = vsel %vm437_vm0, %v504_v41, %v508_v33  ;;  %v535_v33 = vshrl.u32 %v6702_v8, 16  ;;  %v6744_v44 = vcombine.low %v193_v30, %v6730_v32  ;;  %v6316_v30 = vld [vmem:[%s8552_s1 + $0x50] sm:$0xff]  }
  0x3b   : > { %v511_v42 = vshrl.u32 %v6654_v37, 16  ;;  %v513_v43 = vshll.u32 %v6654_v37, 16  ;;  %6125 = vmatprep.subr.bf16.mxu0 %v6299_v56 }
  0x3c   : > { %914 = vmatmul.mubr.bf16.gmra.mxu0 %v6561_v26  ;;  %1010 = vmatmul.mubr.bf16.gmra.mxu1 %v6573_v36 }
  0x3d   : > { %6078 = vmatpush3.bf16.msra.mxu1 %v6279_v48  ;;  %921 = vmatprep.mubr.bf16.mxu0 %v6627_v15  ;;  %v6667_v48 = vld [vmem:[%s6457_s8 + $0x58] sm:$0xf]  ;;  %v515_v52 = vrot.slane %v513_v43, 1  ;;  %v542_v43 = vshll.u32 %v6721_v20, 16 }
  0x3e   : > { %6079 = vmatprep.subr.bf16.mxu1 %v6280_v3  ;;  %1017 = vmatprep.mubr.bf16.mxu1 %v6646_v29  ;;  %v6673_v54 = vcombine.low %v187_v47, %v6667_v48  ;;  %v6747_v47 = vld [vmem:[%s6457_s8 + $0x74] ss:$0 sps:$4 sm:$0x11]  }
  0x3f   : > { %v516_v58 = vor.u32 %v515_v52, %v511_v42  ;;  %6126 = vmatpush3.bf16.msra.mxu0 %v6299_v56  ;;  %v6306_v56 = vld [vmem:[%s8552_s1 + $0x60] sm:$0xff]  }
  0x40   : > { %v525_v60 = vshll.u32 %v6673_v54, 16  ;;  %6127 = vmatprep.subr.bf16.mxu0 %v6308_v11 }
  0x41   : > { %6080 = vmatpush3.bf16.msra.mxu1 %v6280_v3  ;;  %v6695_v3 = vsel %vm437_vm0, %v516_v58, %v520_v59  ;;  %v6757_v58 = vld [vmem:[%s6457_s8 + $0x80] ss:$0 sps:$4 sm:$0x11]   ;;  %v195_v59 = vld [vmem:[%s6457_s8 + $0x84] sm:$0xf] }
  0x42   : > { %6081 = vmatprep.subr.bf16.mxu1 %v6285_v16  ;;  %v527_v6 = vrot.slane %v525_v60, 1  ;;  %v6763_v60 = vld [vmem:[%s6457_s8 + $0x88] sm:$0xf] }
  0x43   : > { %6128 = vmatpush3.bf16.msra.mxu0 %v6308_v11  ;;  %v6773_v11 = vcombine.low %v195_v59, %v6763_v60 }
  0x44   : > { %922 = vmatmul.mubr.bf16.gmra.mxu0 %v6599_v45  ;;  %1018 = vmatmul.mubr.bf16.gmra.mxu1 %v6612_v2 }
  0x45   : > { %6082 = vmatpush3.bf16.msra.mxu1 %v6285_v16  ;;  %929 = vmatprep.mubr.bf16.mxu0 %v509_v51  ;;  %v6714_v16 = vld [vmem:[%s6457_s8 + $0x70] sm:$0xf] }
  0x46   : > { %6083 = vmatprep.subr.bf16.mxu1 %v6287_v38  ;;  %6085 = vmatprep.mubr.bf16.mxu1 %v6561_v26  ;;  %v523_v26 = vshrl.u32 %v6673_v54, 16  ;;  %v6726_v28 = vcombine.low %v191_v12, %v6714_v16  ;;  %v6314_v12 = vld [vmem:[%s8552_s1 + $0x18] sm:$0xff]  }
  0x48   : > { %v528_v23 = vor.u32 %v527_v6, %v523_v26  ;;  %v549_v52 = vshll.u32 %v6726_v28, 16  ;;  %v561_v26 = vshll.u32 %v6744_v44, 16  ;;  %v554_v6 = vshll.u32 %v6747_v47, 16 }
  0x49   : > { %6084 = vmatpush3.bf16.msra.mxu1 %v6287_v38  ;;  %v6315_v38 = vld [vmem:[%s8552_s1 + $0x88] sm:$0xff]  }
  0x4a   : > { %5797 = vmatprep.subr.bf16.mxu1 %v6290_v57  ;;  %v6740_v41 = vsel %vm437_vm0, %v528_v23, %v532_v27  ;;  %6129 = vmatprep.subr.bf16.mxu0 %v6315_v38  ;;  %v6307_v57 = vld [vmem:[%s8552_s1 + $0x20] sm:$0xff]   ;;  %v551_v7 = vrot.slane %v549_v52, 1  ;;  %v563_v23 = vrot.slane %v561_v26, 1  ;;  %v566_v27 = vshll.u32 %v6757_v58, 16 }
  0x4b   : > { %6130 = vmatpush3.bf16.msra.mxu0 %v6315_v38  ;;  %v573_v38 = vshll.u32 %v6773_v11, 16 }
  0x4c   : > { %930 = vmatmul.mubr.bf16.gmra.mxu0 %v6627_v15  ;;  %6086 = vmatmul.mubr.bf16.vlgmr.msra.gmra.mxu1 %v6599_v45  ;;  %v537_v45 = vshll.u32 %v6702_v8, 16  ;;  %v568_v52 = vrot.slane %v566_v27, 1 }
  0x4d   : > { %5798 = vmatpush3.bf16.msra.mxu1 %v6291_v0  ;;  %937 = vmatprep.mubr.bf16.mxu0 %v6695_v3 }
  0x4e   : > { %6089 = vmatprep.mubr.bf16.mxu1 %v6627_v15  ;;  %5799 = vmatprep.subr.bf16.mxu1 %v6295_v5  ;;  %v6301_v15 = vld [vmem:[%s8552_s1 + $0x28] sm:$0xff]   ;;  %v539_v42 = vrot.slane %v537_v45, 1  ;;  %v547_v5 = vshrl.u32 %v6726_v28, 16  ;;  %v556_v45 = vrot.slane %v554_v6, 1  ;;  %v6323_v6 = vld [vmem:[%s8552_s1 + $0x40] sm:$0xff]  }
  0x50   : > { %v540_v0 = vor.u32 %v539_v42, %v535_v33  ;;  %v6789_v33 = vld [vmem:[%s6457_s8 + $0x8c] ss:$0 sps:$4 sm:$0x11]   ;;  %v552_v42 = vor.u32 %v551_v7, %v547_v5 }
  0x51   : > { %5800 = vmatpush3.bf16.msra.mxu1 %v6296_v10  ;;  %v559_v10 = vshrl.u32 %v6744_v44, 16  ;;  %v578_v59 = vshll.u32 %v6789_v33, 16  ;;  %v6319_v5 = vld [vmem:[%s8552_s1 + $0x8] sm:$0xff]  }
  0x52   : > { %5801 = vmatprep.subr.bf16.mxu1 %v6300_v19 }
  0x54   : > { %938 = vmatmul.mubr.bf16.gmra.mxu0 %v509_v51  ;;  %6090 = vmatmul.mubr.bf16.gmra.mxu1 %v509_v51  ;;  %v544_v51 = vrot.slane %v542_v43, 1  ;;  %v564_v43 = vor.u32 %v563_v23, %v559_v10  ;;  %v580_v10 = vrot.slane %v578_v59, 1  ;;  %v6327_v23 = vld [vmem:[%s8552_s1 + $0x238] sm:$0xff]  }
  0x55   : > { %945 = vmatprep.mubr.bf16.mxu0 %v6740_v41  ;;  %6093 = vmatprep.mubr.bf16.mxu1 %v6695_v3 }
  0x56   : > { %5802 = vmatpush3.bf16.msra.mxu1 %v6301_v15  ;;  %v545_v19 = vsel %vm437_vm0, %v540_v0, %v544_v51  ;;  %v6320_v15 = vld [vmem:[%s8552_s1 + $0x80] sm:$0xff]   ;;  %v571_v0 = vshrl.u32 %v6773_v11, 16  ;;  %v575_v51 = vrot.slane %v573_v38, 1  ;;  %v569_v26 = vsel %vm437_vm0, %v564_v43, %v568_v52 }
  0x57   : > { %5803 = vmatprep.subr.bf16.mxu1 %v6306_v56  ;;  %v6317_v56 = vld [vmem:[%s8552_s1 + $0x10] sm:$0xff]   ;;  %6131 = vmatprep.subr.bf16.mxu0 %v6320_v15 }
  0x58   : > { %6132 = vmatpush3.bf16.msra.mxu0 %v6320_v15  ;;  %v576_v7 = vor.u32 %v575_v51, %v571_v0  ;;  %v6828_v15 = vld [vmem:[%s6457_s8 + $0xd4] ss:$0 sps:$4 sm:$0x11]  }
  0x59   : > { %v650_v52 = vshll.u32 %v6828_v15, 16 }
  0x5a   : > { %5804 = vmatpush3.bf16.msra.mxu1 %v6307_v57  ;;  %v6325_v57 = vld [vmem:[%s8552_s1 + $0x1f8] sm:$0xff]   ;;  %v581_v27 = vsel %vm437_vm0, %v576_v7, %v580_v10  ;;  %v1662_v10 = vld [vmem:[%s6457_s8 + $0x6c] sm:$0xe] }
  0x5b   : > { %5805 = vmatprep.subr.bf16.mxu1 %v6313_v63  ;;  %v557_v63 = vsel %vm437_vm0, %v552_v42, %v556_v45  ;;  %5933 = vmatprep.subr.bf16.mxu0 %v6325_v57  ;;  %v6822_v45 = vld [vmem:[%s6457_s8 + $0xd0] sm:$0xf]  ;;  %v1658_v42 = vld [vmem:[%s6457_s8 + $0x3c] sm:$0xe]  ;;  %v1742_v57 = vrot.slane %v6636_v18, 1  ;;  %v652_v18 = vrot.slane %v650_v52, 1 }
  0x5c   : > { %946 = vmatmul.mubr.bf16.gmra.mxu0 %v6695_v3  ;;  %6094 = vmatmul.mubr.bf16.gmra.mxu1 %v6740_v41  ;;  %v6318_v3 = vld [vmem:[%s8552_s1 + $0x48] sm:$0xff]   ;;  %v1757_v52 = vrot.slane %v6757_v58, 1  ;;  %v6334_v58 = vld [vmem:[%s8552_s1 + $0x1a0] sm:$0xff]  }
  0x5d   : > { %953 = vmatprep.mubr.bf16.mxu0 %v545_v19  ;;  %6097 = vmatprep.mubr.bf16.mxu1 %v545_v19 }
  0x5e   : > { %5806 = vmatpush3.bf16.msra.mxu1 %v6314_v12  ;;  %v6324_v12 = vld [vmem:[%s8552_s1] sm:$0xff]  }
  0x5f   : > { %5807 = vmatprep.subr.bf16.mxu1 %v6316_v30 }
  0x62   : > { %5808 = vmatpush3.bf16.msra.mxu1 %v6317_v56  ;;  %v1659_v56 = vld [vmem:[%s6457_s8 + $0x48] sm:$0xe] }
  0x63   : > { %5809 = vmatprep.subr.bf16.mxu1 %v6318_v3  ;;  %v5539_v3 = vcombine.low %v1658_v42, %v6622_v13  ;;  %v5540_v59 = vcombine.low %v1659_v56, %v6650_v31  ;;  %v6330_v42 = vld [vmem:[%s8552_s1 + $0x1e8] sm:$0xff]  }
  0x64   : > { %954 = vmatmul.mubr.bf16.gmra.mxu0 %v6740_v41  ;;  %6098 = vmatmul.mubr.bf16.gmra.mxu1 %v557_v63  ;;  %v207_v41 = vld [vmem:[%s6457_s8 + $0xcc] sm:$0xf] }
  0x65   : > { %961 = vmatprep.mubr.bf16.mxu0 %v557_v63  ;;  %6101 = vmatprep.mubr.bf16.mxu1 %v569_v26  ;;  %v6825_v30 = vcombine.low %v207_v41, %v6822_v45  ;;  %v1741_v51 = vrot.slane %v5539_v3, 1  ;;  %v6331_v56 = vld [vmem:[%s8552_s1 + $0x1a8] sm:$0xff]  }
  0x66   : > { %5810 = vmatpush3.bf16.msra.mxu1 %v6319_v5  ;;  %v1744_v5 = vrot.slane %v5540_v59, 1  ;;  %v6335_v59 = vld [vmem:[%s8552_s1 + $0x1d8] sm:$0xff]  }
  0x67   : > { %5811 = vmatprep.subr.bf16.mxu1 %v6323_v6  ;;  %v645_v38 = vshll.u32 %v6825_v30, 16  ;;  %v6848_v31 = vsel %vm1725_vm1, %v1741_v51, %v1742_v57  ;;  %v6342_v57 = vld [vmem:[%s8552_s1 + $0x220] sm:$0xff]   ;;  %v6340_v51 = vld [vmem:[%s8552_s1 + $0x1c8] sm:$0xff]  }
  0x69   : > { %v647_v43 = vrot.slane %v645_v38, 1 }
  0x6a   : > { %5812 = vmatpush3.bf16.msra.mxu1 %v6324_v12  ;;  %v5543_v12 = vcombine.low %v1662_v10, %v6714_v16  ;;  %v6329_v16 = vld [vmem:[%s8552_s1 + $0x1b0] sm:$0xff]   ;;  %v6369_v10 = vld [vmem:[%s6457_s8 + $0x4] sm:$0xf] }
  0x6b   : > { %6165 = vmatprep.subr.bf16.mxu1 %v6327_v23 }
  0x6c   : > { %962 = vmatmul.mubr.bf16.gmra.mxu0 %v545_v19  ;;  %6102 = vmatmul.mubr.bf16.gmra.mxu1 %v581_v27  ;;  %v643_v19 = vshrl.u32 %v6825_v30, 16  ;;  %v1753_v41 = vrot.slane %v5543_v12, 1 }
  0x6d   : > { %969 = vmatprep.mubr.bf16.mxu0 %v569_v26  ;;  %6105 = vmatprep.mubr.bf16.mxu1 %v6534_v4 }
  0x6e   : > { %v648_v13 = vor.u32 %v647_v43, %v643_v19  ;;  %v6332_v19 = vld [vmem:[%s8552_s1 + $0x230] sm:$0xff]  }
  0x74   : > { %970 = vmatmul.mubr.bf16.gmra.mxu0 %v557_v63  ;;  %6106 = vmatmul.mubr.bf16.gmra.mxu1 %v6513_v53  ;;  %v1745_v53 = vrot.slane %v6660_v40, 1  ;;  %v1660_v63 = vld [vmem:[%s6457_s8 + $0x54] sm:$0xe] }
  0x75   : > { %977 = vmatprep.mubr.bf16.mxu0 %v581_v27  ;;  %6109 = vmatprep.mubr.bf16.mxu1 %v6573_v36  ;;  %v5541_v0 = vcombine.low %v1660_v63, %v6667_v48  ;;  %v1748_v36 = vrot.slane %v6676_v55, 1  ;;  %v1661_v48 = vld [vmem:[%s6457_s8 + $0x60] sm:$0xe]  ;;  %v6338_v63 = vld [vmem:[%s8552_s1 + $0x1d0] sm:$0xff]  }
  0x76   : > { %v6851_v40 = vsel %vm1725_vm1, %v1744_v5, %v1745_v53  ;;  %v6336_v53 = vld [vmem:[%s8552_s1 + $0x198] sm:$0xff]   ;;  %v6341_v5 = vld [vmem:[%s8552_s1 + $0x188] sm:$0xff]  }
  0x77   : > { %v1747_v6 = vrot.slane %v5541_v0, 1  ;;  %v6350_v0 = vld [vmem:[%s8552_s1 + $0x210] sm:$0xff]  }
  0x79   : > { %v6855_v55 = vsel %vm1725_vm1, %v1747_v6, %v1748_v36  ;;  %v6339_v36 = vld [vmem:[%s8552_s1 + $0x190] sm:$0xff]   ;;  %v6343_v6 = vld [vmem:[%s8552_s1 + $0x1c0] sm:$0xff]  }
  0x7c   : > { %978 = vmatmul.mubr.bf16.gmra.mxu0 %v569_v26  ;;  %6110 = vmatmul.mubr.bf16.gmra.mxu1 %v6612_v2  ;;  %v5542_v2 = vcombine.low %v1661_v48, %v6692_v1  ;;  %v1754_v1 = vrot.slane %v6747_v47, 1  ;;  %v1663_v47 = vld [vmem:[%s6457_s8 + $0x78] sm:$0xe] }
  0x7d   : > { %985 = vmatprep.mubr.bf16.mxu0 %v6534_v4  ;;  %6113 = vmatprep.mubr.bf16.mxu1 %v6646_v29  ;;  %v1751_v4 = vrot.slane %v6721_v20, 1  ;;  %v653_v29 = vsel %vm437_vm0, %v648_v13, %v652_v18  ;;  %v6326_v20 = vld [vmem:[%s8552_s1 + $0x1b8] sm:$0xff]   ;;  %v5544_v43 = vcombine.low %v1663_v47, %v6730_v32  ;;  %v6333_v32 = vld [vmem:[%s8552_s1 + $0x1e0] sm:$0xff]  }
  0x7e   : > { %v1750_v26 = vrot.slane %v5542_v2, 1  ;;  %v6872_v38 = vsel %vm1725_vm1, %v1753_v41, %v1754_v1  ;;  %v6356_v13 = vld [vmem:[%s8552_s1 + $0x200] sm:$0xff]   ;;  %v6368_v2 = vld [vmem:[%s6457_s8 + $0x14] ss:$0 sps:$4 sm:$0x11]  }
  0x7f   : > { %v6344_v18 = vld [vmem:[%s8552_s1 + $0x180] sm:$0xff]   ;;  %v6370_v1 = vld [vmem:[%s6457_s8 + $0x1c] sm:$0xf] }
  0x80   : > { %v6861_v7 = vsel %vm1725_vm1, %v1750_v26, %v1751_v4  ;;  %v1730_v26 = vrot.slane %v6368_v2, 1  ;;  %v1653_v4 = vld [vmem:[%s6457_s8] sm:$0xe]  ;;  %v6372_v47 = vld [vmem:[%s6457_s8 + $0x20] ss:$0 sps:$4 sm:$0x11]  }
  0x81   : > { %v5534_v12 = vcombine.low %v1653_v4, %v6369_v10 }
  0x84   : > { %986 = vmatmul.mubr.bf16.gmra.mxu0 %v581_v27  ;;  %6114 = vmatmul.mubr.bf16.gmra.mxu1 %v653_v29  ;;  %v6328_v27 = vld [vmem:[%s8552_s1 + $0x1f0] sm:$0xff]   ;;  %v1655_v29 = vld [vmem:[%s6457_s8 + $0x18] sm:$0xe] }
  0x85   : > { %1363 = vmatprep.mubr.bf16.mxu1 %v6470_v14  ;;  %6133 = vmatprep.mubr.bf16.mxu0 %v6524_v62 }
  0x8c   : > { %1364 = vmatmul.mubr.bf16.vlgmr.msra.gmra.mxu1 %v6494_v34  ;;  %6134 = vmatmul.mubr.bf16.vlgmr.msra.gmra.mxu0 %v6555_v24  ;;  %v6337_v34 = vld [vmem:[%s8552_s1 + $0x228] sm:$0xff]  }
  0x8d   : > { %5934 = vmatpush3.bf16.msra.mxu0 %v6326_v20  ;;  %6166 = vmatpush3.bf16.msra.mxu1 %v6327_v23  ;;  %v1756_v23 = vrot.slane %v5544_v43, 1  ;;  %v1726_v20 = vrot.slane %v5534_v12, 1 }
  0x8e   : > { %1371 = vmatprep.mubr.bf16.mxu1 %v6524_v62  ;;  %6137 = vmatprep.mubr.bf16.mxu0 %v6591_v49 }
  0x8f   : > { %5935 = vmatprep.subr.bf16.mxu0 %v6328_v27  ;;  %6167 = vmatprep.subr.bf16.mxu1 %v6332_v19  ;;  %v6900_v3 = vsel %vm1725_vm1, %v1756_v23, %v1757_v52  ;;  %v6371_v27 = vld [vmem:[%s6457_s8 + $0x8] ss:$0 sps:$4 sm:$0x11]   ;;  %v1736_v52 = vrot.slane %v6558_v25, 1 }
  0x91   : > { %5936 = vmatpush3.bf16.msra.mxu0 %v6329_v16  ;;  %6168 = vmatpush3.bf16.msra.mxu1 %v6332_v19  ;;  %v1727_v19 = vrot.slane %v6371_v27, 1 }
  0x92   : > { %5937 = vmatprep.subr.bf16.mxu0 %v6330_v42  ;;  %6169 = vmatprep.subr.bf16.mxu1 %v6337_v34  ;;  %v1733_v42 = vrot.slane %v6372_v47, 1 }
  0x93   : > { %v1728_v43 = vsel %vm1725_vm1, %v1726_v20, %v1727_v19 }
  0x94   : > { %1372 = vmatmul.mubr.bf16.gmra.mxu1 %v6470_v14  ;;  %6138 = vmatmul.mubr.bf16.gmra.mxu0 %v6633_v17  ;;  %v6347_v14 = vld [vmem:[%s8552_s1 + $0x218] sm:$0xff]  }
  0x95   : > { %1379 = vmatprep.mubr.bf16.mxu1 %v6555_v24  ;;  %6141 = vmatprep.mubr.bf16.mxu0 %v6654_v37 }
  0x96   : > { %5938 = vmatpush3.bf16.msra.mxu0 %v6331_v56  ;;  %6170 = vmatpush3.bf16.msra.mxu1 %v6337_v34  ;;  %v1656_v34 = vld [vmem:[%s6457_s8 + $0x24] sm:$0xe]  ;;  %v1657_v56 = vld [vmem:[%s6457_s8 + $0x30] sm:$0xe] }
  0x97   : > { %5939 = vmatprep.subr.bf16.mxu0 %v6333_v32  ;;  %6171 = vmatprep.subr.bf16.mxu1 %v6342_v57 }
  0x9a   : > { %5940 = vmatpush3.bf16.msra.mxu0 %v6334_v58  ;;  %6172 = vmatpush3.bf16.msra.mxu1 %v6342_v57  ;;  %v5538_v57 = vcombine.low %v1657_v56, %v6583_v46 }
  0x9b   : > { %5941 = vmatprep.subr.bf16.mxu0 %v6335_v59  ;;  %6173 = vmatprep.subr.bf16.mxu1 %v6347_v14 }
  0x9c   : > { %1380 = vmatmul.mubr.bf16.gmra.mxu1 %v6524_v62  ;;  %6142 = vmatmul.mubr.bf16.gmra.mxu0 %v6673_v54  ;;  %v6353_v62 = vld [vmem:[%s8552_s1 + $0x208] sm:$0xff]  }
  0x9d   : > { %1387 = vmatprep.mubr.bf16.mxu1 %v6591_v49  ;;  %6145 = vmatprep.mubr.bf16.mxu0 %v6702_v8 }
  0x9e   : > { %5942 = vmatpush3.bf16.msra.mxu0 %v6336_v53  ;;  %6174 = vmatpush3.bf16.msra.mxu1 %v6347_v14 }
  0x9f   : > { %5943 = vmatprep.subr.bf16.mxu0 %v6338_v63  ;;  %6175 = vmatprep.subr.bf16.mxu1 %v6350_v0 }
  0xa2   : > { %5944 = vmatpush3.bf16.msra.mxu0 %v6339_v36  ;;  %6176 = vmatpush3.bf16.msra.mxu1 %v6350_v0 }
  0xa3   : > { %5945 = vmatprep.subr.bf16.mxu0 %v6340_v51  ;;  %6177 = vmatprep.subr.bf16.mxu1 %v6353_v62 }
  0xa4   : > { %1388 = vmatmul.mubr.bf16.gmra.mxu1 %v6555_v24  ;;  %6146 = vmatmul.mubr.bf16.gmra.mxu0 %v6726_v28  ;;  %v1654_v24 = vld [vmem:[%s6457_s8 + $0xc] sm:$0xe] }
  0xa5   : > { %1395 = vmatprep.mubr.bf16.mxu1 %v6633_v17  ;;  %6149 = vmatprep.mubr.bf16.mxu0 %v6744_v44 }
  0xa6   : > { %5946 = vmatpush3.bf16.msra.mxu0 %v6341_v5  ;;  %6178 = vmatpush3.bf16.msra.mxu1 %v6353_v62 }
  0xa7   : > { %5947 = vmatprep.subr.bf16.mxu0 %v6343_v6  ;;  %6179 = vmatprep.subr.bf16.mxu1 %v6356_v13 }
  0xaa   : > { %5948 = vmatpush3.bf16.msra.mxu0 %v6344_v18  ;;  %6180 = vmatpush3.bf16.msra.mxu1 %v6356_v13 }
  0xac   : > { %1396 = vmatmul.mubr.bf16.gmra.mxu1 %v6591_v49  ;;  %6150 = vmatmul.mubr.bf16.gmra.mxu0 %v6773_v11  ;;  %v6367_v49 = vld [vmem:[%s6457_s8 + $0x10] sm:$0xf] }
  0xad   : > { %1403 = vmatprep.mubr.bf16.mxu1 %v6654_v37  ;;  %6153 = vmatprep.mubr.bf16.mxu0 %v6498_v39  ;;  %v5535_v48 = vcombine.low %v1654_v24, %v6367_v49 }
  0xb4   : > { %1404 = vmatmul.mubr.bf16.gmra.mxu1 %v6633_v17  ;;  %6154 = vmatmul.mubr.bf16.gmra.mxu0 %v6480_v22  ;;  %v1729_v17 = vrot.slane %v5535_v48, 1 }
  0xb5   : > { %1411 = vmatprep.mubr.bf16.mxu1 %v6673_v54  ;;  %6157 = vmatprep.mubr.bf16.mxu0 %v6539_v9 }
  0xb6   : > { %v1731_v41 = vsel %vm1725_vm1, %v1729_v17, %v1730_v26 }
  0xbc   : > { %1412 = vmatmul.mubr.bf16.gmra.mxu1 %v6654_v37  ;;  %6158 = vmatmul.mubr.bf16.gmra.mxu0 %v6570_v35  ;;  %v5536_v37 = vcombine.low %v1655_v29, %v6370_v1 }
  0xbd   : > { %1419 = vmatprep.mubr.bf16.mxu1 %v6702_v8  ;;  %6161 = vmatprep.mubr.bf16.mxu0 %v6608_v61 }
  0xbe   : > { %v1732_v16 = vrot.slane %v5536_v37, 1 }
  0xc0   : > { %v6987_v23 = vsel %vm1725_vm1, %v1732_v16, %v1733_v42 }
  0xc4   : > { %1420 = vmatmul.mubr.bf16.gmra.mxu1 %v6673_v54  ;;  %6162 = vmatmul.mubr.bf16.gmra.mxu0 %v6825_v30  ;;  %v5537_v54 = vcombine.low %v1656_v34, %v6552_v21  ;;  %v1738_v21 = vrot.slane %v5538_v57, 1 }
  0xc5   : > { %1427 = vmatprep.mubr.bf16.mxu1 %v6726_v28  ;;  %2023 = vmatprep.mubr.bf16.mxu0 %v1731_v41 }
  0xc6   : > { %v1735_v30 = vrot.slane %v5537_v54, 1 }
  0xc8   : > { %v6996_v32 = vsel %vm1725_vm1, %v1735_v30, %v1736_v52 }
  0xcc   : > { %1428 = vmatmul.mubr.bf16.gmra.mxu1 %v6702_v8  ;;  %2024 = vmatmul.mubr.bf16.vlgmr.msra.gmra.mxu0 %v1728_v43  ;;  %v1739_v8 = vrot.slane %v6594_v50, 1  ;;  %v1664_v43 = vld [vmem:[%s6457_s8 + $0x84] sm:$0xe] }
  0xcd   : > { %1435 = vmatprep.mubr.bf16.mxu1 %v6744_v44  ;;  %2031 = vmatprep.mubr.bf16.mxu0 %v6987_v23  ;;  %v5545_v57 = vcombine.low %v1664_v43, %v6763_v60 }
  0xce   : > { %v7004_v58 = vsel %vm1725_vm1, %v1738_v21, %v1739_v8 }
  0xcf   : > { %v1759_v60 = vrot.slane %v5545_v57, 1  ;;  %v6376_v57 = vld [vmem:[%s6457_s8 + $0xa4] ss:$0 sps:$4 sm:$0x11]  }
  0xd4   : > { %1436 = vmatmul.mubr.bf16.gmra.mxu1 %v6726_v28  ;;  %2032 = vmatmul.mubr.bf16.gmra.mxu0 %v1731_v41 }
  0xd5   : > { %1443 = vmatprep.mubr.bf16.mxu1 %v6773_v11  ;;  %2039 = vmatprep.mubr.bf16.mxu0 %v6996_v32 }
  0xdc   : > { %1444 = vmatmul.mubr.bf16.gmra.mxu1 %v6744_v44  ;;  %2040 = vmatmul.mubr.bf16.gmra.mxu0 %v6987_v23 }
  0xdd   : > { %1451 = vmatprep.mubr.bf16.mxu1 %v6498_v39  ;;  %2047 = vmatprep.mubr.bf16.mxu0 %v7004_v58 }
  0xe4   : > { %1452 = vmatmul.mubr.bf16.gmra.mxu1 %v6773_v11  ;;  %2048 = vmatmul.mubr.bf16.gmra.mxu0 %v6996_v32 }
  0xe5   : > { %1459 = vmatprep.mubr.bf16.mxu1 %v6480_v22  ;;  %2055 = vmatprep.mubr.bf16.mxu0 %v6848_v31 }
  0xec   : > { %v5677_v25 = vpop.f32.mrf.mxu0  ;;  %v5749_v46 = vpop.f32.mrf.mxu1  ;;  %1460 = vmatmul.mubr.bf16.gmra.mxu1 %v6498_v39  ;;  %2056 = vmatmul.mubr.bf16.gmra.mxu0 %v7004_v58 }
  0xed   : > { %1467 = vmatprep.mubr.bf16.mxu1 %v6539_v9  ;;  %2063 = vmatprep.mubr.bf16.mxu0 %v6851_v40 }
  0xee   : > { %v5678_v50 = vpop.f32.mrf.mxu0  ;;  %v5750_v28 = vpop.f32.mrf.mxu1 }
  0xef   : > { %v7018_v44 = vadd.f32 %v5678_v50, %v5677_v25  ;;  %v7020_v11 = vadd.f32 %v5750_v28, %v5749_v46  ;;  %v1760_v28 = vrot.slane %v6789_v33, 1 }
  0xf0   : > { %v5680_v59 = vpop.f32.mrf.mxu0  ;;  %v5752_v14 = vpop.f32.mrf.mxu1 }
  0xf2   : > { %v5681_v53 = vpop.f32.mrf.mxu0  ;;  %v5753_v63 = vpop.f32.mrf.mxu1 }
  0xf3   : > { %v7022_v0 = vadd.f32 %v5681_v53, %v5680_v59  ;;  %v7024_v36 = vadd.f32 %v5753_v63, %v5752_v14  ;;  %v1665_v53 = vld [vmem:[%s6457_s8 + $0x90] sm:$0xe] }
  0xf4   : > { %v5683_v39 = vpop.f32.mrf.mxu0  ;;  %v5755_v51 = vpop.f32.mrf.mxu1  ;;  %1468 = vmatmul.mubr.bf16.gmra.mxu1 %v6480_v22  ;;  %2064 = vmatmul.mubr.bf16.gmra.mxu0 %v6848_v31 }
  0xf5   : > { %1475 = vmatprep.mubr.bf16.mxu1 %v6570_v35  ;;  %2071 = vmatprep.mubr.bf16.mxu0 %v6855_v55 }
  0xf6   : > { %v5684_v62 = vpop.f32.mrf.mxu0  ;;  %v5756_v5 = vpop.f32.mrf.mxu1 }
  0xf7   : > { %v5685_v6 = vadd.f32 %v5684_v62, %v5683_v39  ;;  %v7030_v13 = vadd.f32 %v5756_v5, %v5755_v51  ;;  %v7070_v5 = vsel %vm1725_vm1, %v1759_v60, %v1760_v28 }
  0xf8   : > { %v5686_v18 = vpop.f32.mrf.mxu0  ;;  %v5758_v24 = vpop.f32.mrf.mxu1 }
  0xfa   : > { %v5687_v49 = vpop.f32.mrf.mxu0  ;;  %v5759_v48 = vpop.f32.mrf.mxu1 }
  0xfb   : > { %v5688_v17 = vadd.f32 %v5687_v49, %v5686_v18  ;;  %v7032_v2 = vadd.f32 %v5759_v48, %v5758_v24 }
  0xfc   : > { %v5689_v26 = vpop.f32.mrf.mxu0  ;;  %v5761_v22 = vpop.f32.mrf.mxu1  ;;  %1476 = vmatmul.mubr.bf16.gmra.mxu1 %v6539_v9  ;;  %2072 = vmatmul.mubr.bf16.gmra.mxu0 %v6851_v40 }
  0xfd   : > { %1483 = vmatprep.mubr.bf16.mxu1 %v6608_v61  ;;  %2079 = vmatprep.mubr.bf16.mxu0 %v6861_v7 }
  0xfe   : > { %v5690_v4 = vpop.f32.mrf.mxu0  ;;  %v5762_v29 = vpop.f32.mrf.mxu1 }
  0xff   : > { %v7038_v10 = vadd.f32 %v5690_v4, %v5689_v26  ;;  %v7040_v12 = vadd.f32 %v5762_v29, %v5761_v22  ;;  %v6374_v22 = vld [vmem:[%s6457_s8 + $0x98] ss:$0 sps:$4 sm:$0x11]  }
 0x100   : > { %v5692_v41 = vpop.f32.mrf.mxu0  ;;  %v5764_v1 = vpop.f32.mrf.mxu1  ;;  %v1763_v4 = vrot.slane %v6374_v22, 1 }
 0x102   : > { %v5693_v37 = vpop.f32.mrf.mxu0  ;;  %v5765_v20 = vpop.f32.mrf.mxu1 }
 0x103   : > { %v7042_v27 = vadd.f32 %v5693_v37, %v5692_v41  ;;  %v7044_v9 = vadd.f32 %v5765_v20, %v5764_v1  ;;  %v1666_v41 = vld [vmem:[%s6457_s8 + $0x9c] sm:$0xe] }
 0x104   : > { %v5695_v19 = vpop.f32.mrf.mxu0  ;;  %v5767_v16 = vpop.f32.mrf.mxu1  ;;  %1484 = vmatmul.mubr.bf16.gmra.mxu1 %v6570_v35  ;;  %2080 = vmatmul.mubr.bf16.gmra.mxu0 %v6855_v55 }
 0x105   : > { %2087 = vmatprep.mubr.bf16.mxu0 %v6872_v38  ;;  %6181 = vmatprep.mubr.bf16.mxu1 %v6987_v23 }
 0x106   : > { %v5696_v61 = vpop.f32.mrf.mxu0  ;;  %v5768_v47 = vpop.f32.mrf.mxu1 }
 0x107   : > { %v5697_v42 = vadd.f32 %v5696_v61, %v5695_v19  ;;  %v7050_v34 = vadd.f32 %v5768_v47, %v5767_v16 }
 0x108   : > { %v5698_v54 = vpop.f32.mrf.mxu0  ;;  %v5770_v30 = vpop.f32.mrf.mxu1 }
 0x10a   : > { %v5699_v52 = vpop.f32.mrf.mxu0  ;;  %v5771_v56 = vpop.f32.mrf.mxu1 }
 0x10b   : > { %v5700_v35 = vadd.f32 %v5699_v52, %v5698_v54  ;;  %v7054_v21 = vadd.f32 %v5771_v56, %v5770_v30 }
 0x10c   : > { %v5701_v8 = vpop.f32.mrf.mxu0  ;;  %v6087_v25 = vpop.f32.mrf.mxu1  ;;  %2088 = vmatmul.mubr.bf16.gmra.mxu0 %v6861_v7  ;;  %6182 = vmatmul.mubr.bf16.vlgmr.msra.gmra.mxu1 %v6996_v32 }
 0x10d   : > { %v7058_v23 = vadd.f32 %v6087_v25, %v5685_v6  ;;  %2095 = vmatprep.mubr.bf16.mxu0 %v6900_v3  ;;  %6185 = vmatprep.mubr.bf16.mxu1 %v7004_v58  ;;  %v6373_v58 = vld [vmem:[%s6457_s8 + $0x94] sm:$0xf]  ;;  %v1667_v25 = vld [vmem:[%s6457_s8 + $0xa8] sm:$0xe] }
 0x10e   : > { %v5702_v46 = vpop.f32.mrf.mxu0  ;;  %v1060_v50 = vpop.f32.mrf.mxu1  ;;  %v5546_v6 = vcombine.low %v1665_v53, %v6373_v58 }
 0x10f   : > { %v5703_v59 = vadd.f32 %v5702_v46, %v5701_v8  ;;  %v7064_v14 = vadd.f32 %v7018_v44, %v1060_v50 }
 0x110   : > { %v5704_v63 = vpop.f32.mrf.mxu0  ;;  %v6088_v39 = vpop.f32.mrf.mxu1  ;;  %v1762_v26 = vrot.slane %v5546_v6, 1 }
 0x111   : > { %v7067_v32 = vadd.f32 %v6088_v39, %v5688_v17 }
 0x112   : > { %v5705_v51 = vpop.f32.mrf.mxu0  ;;  %v1063_v62 = vpop.f32.mrf.mxu1  ;;  %v1764_v16 = vsel %vm1725_vm1, %v1762_v26, %v1763_v4 }
 0x113   : > { %v5706_v18 = vadd.f32 %v5705_v51, %v5704_v63  ;;  %v7074_v33 = vadd.f32 %v7022_v0, %v1063_v62  ;;  %v6377_v63 = vld [vmem:[%s6457_s8 + $0xac] sm:$0xf] }
 0x114   : > { %v5707_v44 = vpop.f32.mrf.mxu0  ;;  %v6091_v24 = vpop.f32.mrf.mxu1  ;;  %2096 = vmatmul.mubr.bf16.gmra.mxu0 %v6872_v38  ;;  %6186 = vmatmul.mubr.bf16.gmra.mxu1 %v6848_v31 }
 0x115   : > { %v7078_v49 = vadd.f32 %v6091_v24, %v5697_v42  ;;  %2103 = vmatprep.mubr.bf16.mxu0 %v7070_v5  ;;  %6189 = vmatprep.mubr.bf16.mxu1 %v6851_v40  ;;  %v6375_v40 = vld [vmem:[%s6457_s8 + $0xa0] sm:$0xf]  ;;  %v6378_v24 = vld [vmem:[%s6457_s8 + $0xb0] ss:$0 sps:$4 sm:$0x11]  }
 0x116   : > { %v5708_v48 = vpop.f32.mrf.mxu0  ;;  %v1076_v17 = vpop.f32.mrf.mxu1  ;;  %v5547_v61 = vcombine.low %v1666_v41, %v6375_v40 }
 0x117   : > { %v5709_v0 = vadd.f32 %v5708_v48, %v5707_v44  ;;  %v7084_v29 = vadd.f32 %v7038_v10, %v1076_v17  ;;  %v1769_v48 = vrot.slane %v6378_v24, 1 }
 0x118   : > { %v5710_v1 = vpop.f32.mrf.mxu0  ;;  %v6092_v37 = vpop.f32.mrf.mxu1  ;;  %v1765_v56 = vrot.slane %v5547_v61, 1 }
 0x119   : > { %v7087_v31 = vadd.f32 %v6092_v37, %v5700_v35  ;;  %v1766_v35 = vrot.slane %v6376_v57, 1  ;;  %v6379_v37 = vld [vmem:[%s6457_s8 + $0xb8] sm:$0xf] }
 0x11a   : > { %v5711_v20 = vpop.f32.mrf.mxu0  ;;  %v1079_v19 = vpop.f32.mrf.mxu1 }
 0x11b   : > { %v5712_v47 = vadd.f32 %v5711_v20, %v5710_v1  ;;  %v7092_v42 = vadd.f32 %v7042_v27, %v1079_v19  ;;  %v1767_v53 = vsel %vm1725_vm1, %v1765_v56, %v1766_v35  ;;  %v1669_v35 = vld [vmem:[%s6457_s8 + $0xc0] sm:$0xe] }
 0x11c   : > { %v5713_v43 = vpop.f32.mrf.mxu0  ;;  %v6095_v10 = vpop.f32.mrf.mxu1  ;;  %2104 = vmatmul.mubr.bf16.gmra.mxu0 %v6900_v3  ;;  %6190 = vmatmul.mubr.bf16.gmra.mxu1 %v6855_v55 }
 0x11d   : > { %v7096_v54 = vadd.f32 %v6095_v10, %v5709_v0  ;;  %2111 = vmatprep.mubr.bf16.mxu0 %v1764_v16  ;;  %6193 = vmatprep.mubr.bf16.mxu1 %v6861_v7  ;;  %v5548_v7 = vcombine.low %v1667_v25, %v6377_v63 }
 0x11e   : > { %v5714_v30 = vpop.f32.mrf.mxu0  ;;  %v1092_v52 = vpop.f32.mrf.mxu1 }
 0x11f   : > { %v5715_v8 = vadd.f32 %v5714_v30, %v5713_v43  ;;  %v7100_v27 = vadd.f32 %v5703_v59, %v1092_v52  ;;  %v1768_v44 = vrot.slane %v5548_v7, 1  ;;  %v6380_v52 = vld [vmem:[%s6457_s8 + $0xbc] ss:$0 sps:$4 sm:$0x11]  }
 0x120   : > { %v5716_v46 = vpop.f32.mrf.mxu0  ;;  %v6096_v50 = vpop.f32.mrf.mxu1  ;;  %v1772_v56 = vrot.slane %v6380_v52, 1 }
 0x121   : > { %v7103_v60 = vadd.f32 %v6096_v50, %v5712_v47 }
 0x122   : > { %v5717_v55 = vpop.f32.mrf.mxu0  ;;  %v1095_v28 = vpop.f32.mrf.mxu1 }
 0x123   : > { %v5718_v39 = vadd.f32 %v5717_v55, %v5716_v46  ;;  %v7107_v51 = vadd.f32 %v5706_v18, %v1095_v28  ;;  %v1668_v18 = vld [vmem:[%s6457_s8 + $0xb4] sm:$0xe]  ;;  %v6381_v28 = vld [vmem:[%s6457_s8 + $0xc4] sm:$0xf] }
 0x124   : > { %v5719_v62 = vpop.f32.mrf.mxu0  ;;  %v6099_v58 = vpop.f32.mrf.mxu1  ;;  %2112 = vmatmul.mubr.bf16.gmra.mxu0 %v7070_v5  ;;  %6194 = vmatmul.mubr.bf16.gmra.mxu1 %v6872_v38  ;;  %v1770_v38 = vsel %vm1725_vm1, %v1768_v44, %v1769_v48  ;;  %v5550_v63 = vcombine.low %v1669_v35, %v6381_v28  ;;  %v6382_v44 = vld [vmem:[%s6457_s8 + $0xc8] ss:$0 sps:$4 sm:$0x11]   ;;  %v1670_v48 = vld [vmem:[%s6457_s8 + $0xcc] sm:$0xe]  ;;  %s6230_s8 = smul.u32 80, %s8637_s13 }
 0x125   : > { %2119 = vmatprep.mubr.bf16.mxu0 %v1767_v53  ;;  %6197 = vmatprep.mubr.bf16.mxu1 %v6900_v3  ;;  %v5549_v3 = vcombine.low %v1668_v18, %v6379_v37  ;;  %v1775_v24 = vrot.slane %v6382_v44, 1 }
 0x126   : > { %v5720_v59 = vpop.f32.mrf.mxu0  ;;  %v1108_v6 = vpop.f32.mrf.mxu1  ;;  %s7334_s18 = scalar_lea.vmem %s8554_s3, %s6230_s8 }
 0x127   : > { %v5721_v17 = vadd.f32 %v5720_v59, %v5719_v62  ;;  %v7113_v26 = vadd.f32 %v5715_v8, %v1108_v6  ;;  %v1771_v30 = vrot.slane %v5549_v3, 1  ;;  %v1774_v6 = vrot.slane %v5550_v63, 1 }
 0x128   : > { %v5722_v22 = vpop.f32.mrf.mxu0  ;;  %v6100_v4 = vpop.f32.mrf.mxu1 }
 0x129   : > { %v7116_v0 = vadd.f32 %v6099_v58, %v5721_v17 }
 0x12a   : > { %v5723_v41 = vpop.f32.mrf.mxu0  ;;  %v1111_v1 = vpop.f32.mrf.mxu1 }
 0x12b   : > { %v5724_v20 = vadd.f32 %v5723_v41, %v5722_v22  ;;  %v7120_v19 = vadd.f32 %v5718_v39, %v1111_v1  ;;  %v5551_v41 = vcombine.low %v1670_v48, %v6822_v45 }
 0x12c   : > { %v5725_v40 = vpop.f32.mrf.mxu0  ;;  %v6103_v61 = vpop.f32.mrf.mxu1  ;;  %2120 = vmatmul.mubr.bf16.gmra.mxu0 %v1764_v16  ;;  %6198 = vmatmul.mubr.bf16.gmra.mxu1 %v7070_v5  ;;  %v1773_v5 = vsel %vm1725_vm1, %v1771_v30, %v1772_v56  ;;  %v1778_v30 = vrot.slane %v6828_v15, 1 }
 0x12d   : > { %v7123_v47 = vadd.f32 %v6100_v4, %v5724_v20  ;;  %2127 = vmatprep.mubr.bf16.mxu0 %v1770_v38  ;;  %6201 = vmatprep.mubr.bf16.mxu1 %v1764_v16 }
 0x12e   : > { %v5726_v43 = vpop.f32.mrf.mxu0  ;;  %v1124_v10 = vpop.f32.mrf.mxu1 }
 0x12f   : > { %v5727_v57 = vadd.f32 %v5726_v43, %v5725_v40 }
 0x130   : > { %v5728_v8 = vpop.f32.mrf.mxu0  ;;  %v6104_v25 = vpop.f32.mrf.mxu1 }
 0x131   : > { %v7127_v46 = vadd.f32 %v5727_v57, %v1124_v10 }
 0x132   : > { %v5729_v50 = vpop.f32.mrf.mxu0  ;;  %v1127_v55 = vpop.f32.mrf.mxu1 }
 0x133   : > { %v5730_v16 = vadd.f32 %v5729_v50, %v5728_v8 }
 0x134   : > { %v5731_v7 = vpop.f32.mrf.mxu0  ;;  %v6107_v39 = vpop.f32.mrf.mxu1  ;;  %2128 = vmatmul.mubr.bf16.gmra.mxu0 %v1767_v53  ;;  %6202 = vmatmul.mubr.bf16.gmra.mxu1 %v1767_v53  ;;  %v1776_v53 = vsel %vm1725_vm1, %v1774_v6, %v1775_v24 }
 0x135   : > { %v7131_v62 = vadd.f32 %v5730_v16, %v1127_v55  ;;  %2135 = vmatprep.mubr.bf16.mxu0 %v1773_v5  ;;  %6205 = vmatprep.mubr.bf16.mxu1 %v1770_v38 }
 0x136   : > { %v5732_v58 = vpop.f32.mrf.mxu0  ;;  %v1140_v59 = vpop.f32.mrf.mxu1 }
 0x137   : > { %v5733_v17 = vadd.f32 %v5732_v58, %v5731_v7 }
 0x138   : > { %v5734_v18 = vpop.f32.mrf.mxu0  ;;  %v6108_v22 = vpop.f32.mrf.mxu1 }
 0x139   : > { %v7135_v4 = vadd.f32 %v6103_v61, %v5733_v17  ;;  %v1777_v61 = vrot.slane %v5551_v41, 1 }
 0x13a   : > { %v5735_v1 = vpop.f32.mrf.mxu0  ;;  %v1143_v37 = vpop.f32.mrf.mxu1 }
 0x13b   : > { %v5736_v3 = vadd.f32 %v5735_v1, %v5734_v18 }
 0x13c   : > { %v5737_v20 = vpop.f32.mrf.mxu0  ;;  %v6111_v40 = vpop.f32.mrf.mxu1  ;;  %2136 = vmatmul.mubr.bf16.gmra.mxu0 %v1770_v38  ;;  %6206 = vmatmul.mubr.bf16.gmra.mxu1 %v1773_v5 }
 0x13d   : > { %v7139_v43 = vadd.f32 %v6104_v25, %v5736_v3  ;;  %v7142_v10 = vadd.f32 %v6111_v40, %v7030_v13  ;;  %2143 = vmatprep.mubr.bf16.mxu0 %v1776_v53  ;;  %6209 = vmatprep.mubr.bf16.mxu1 %v1776_v53  ;;  %v1779_v13 = vsel %vm1725_vm1, %v1777_v61, %v1778_v30 }
 0x13e   : > { %v5738_v45 = vpop.f32.mrf.mxu0  ;;  %v1156_v52 = vpop.f32.mrf.mxu1 }
 0x13f   : > { %v5739_v56 = vadd.f32 %v5738_v45, %v5737_v20  ;;  %v7146_v57 = vadd.f32 %v7020_v11, %v1156_v52 }
 0x140   : > { %v5740_v35 = vpop.f32.mrf.mxu0  ;;  %v6112_v8 = vpop.f32.mrf.mxu1 }
 0x141   : > { %v7148_v38 = vadd.f32 %v5739_v56, %v1140_v59  ;;  %v7151_v25 = vadd.f32 %v6112_v8, %v7032_v2 }
 0x142   : > { %v5741_v50 = vpop.f32.mrf.mxu0  ;;  %v1159_v55 = vpop.f32.mrf.mxu1 }
 0x143   : > { %v5742_v28 = vadd.f32 %v5741_v50, %v5740_v35  ;;  %v7155_v15 = vadd.f32 %v7024_v36, %v1159_v55 }
 0x144   : > { %v5743_v63 = vpop.f32.mrf.mxu0  ;;  %v6115_v16 = vpop.f32.mrf.mxu1  ;;  %2144 = vmatmul.mubr.bf16.gmra.mxu0 %v1773_v5  ;;  %6210 = vmatmul.mubr.bf16.gmra.mxu1 %v1779_v13 }
 0x145   : > { %v7157_v11 = vadd.f32 %v5742_v28, %v1143_v37  ;;  %v7160_v7 = vadd.f32 %v6115_v16, %v7050_v34 }
 0x146   : > { %v5744_v58 = vpop.f32.mrf.mxu0  ;;  %v1172_v2 = vpop.f32.mrf.mxu1 }
 0x147   : > { %v5745_v59 = vadd.f32 %v5744_v58, %v5743_v63  ;;  %v7163_v6 = vadd.f32 %v7040_v12, %v1172_v2 }
 0x148   : > { %v5746_v44 = vpop.f32.mrf.mxu0  ;;  %v6116_v24 = vpop.f32.mrf.mxu1 }
 0x149   : > { %v7165_v48 = vadd.f32 %v6107_v39, %v5745_v59  ;;  %v7168_v36 = vadd.f32 %v6116_v24, %v7054_v21 }
 0x14a   : > { %v5747_v5 = vpop.f32.mrf.mxu0  ;;  %v1175_v17 = vpop.f32.mrf.mxu1 }
 0x14b   : > { %v5748_v18 = vadd.f32 %v5747_v5, %v5746_v44  ;;  %v7171_v41 = vadd.f32 %v7044_v9, %v1175_v17 }
 0x14c   : > { %v5813_v34 = vpop.f32.mrf.mxu1  ;;  %v6135_v1 = vpop.f32.mrf.mxu0 }
 0x14d   : > { %v7173_v37 = vadd.f32 %v6108_v22, %v5748_v18 }
 0x14e   : > { %v5814_v53 = vpop.f32.mrf.mxu1  ;;  %v1526_v12 = vpop.f32.mrf.mxu0 }
 0x14f   : > { %v5815_v3 = vadd.f32 %v5814_v53, %v5813_v34 }
 0x150   : > { %v5816_v20 = vpop.f32.mrf.mxu1  ;;  %v6136_v40 = vpop.f32.mrf.mxu0 }
 0x151   : > { %v1366_v39 = vadd.f32 %v5815_v3, %v7064_v14 }
 0x152   : > { %v5817_v61 = vpop.f32.mrf.mxu1  ;;  %v1529_v21 = vpop.f32.mrf.mxu0 }
 0x153   : > { %v7176_v30 = vadd.f32 %v1526_v12, %v1366_v39  ;;  %v5818_v45 = vadd.f32 %v5817_v61, %v5816_v20 }
 0x154   : > { %v5819_v52 = vpop.f32.mrf.mxu1  ;;  %v6139_v56 = vpop.f32.mrf.mxu0 }
 0x155   : > { %v1369_v9 = vadd.f32 %v5818_v45, %v7074_v33 }
 0x156   : > { %v5820_v35 = vpop.f32.mrf.mxu1  ;;  %v1542_v8 = vpop.f32.mrf.mxu0 }
 0x157   : > { %v7179_v22 = vadd.f32 %v1529_v21, %v1369_v9  ;;  %v5821_v13 = vadd.f32 %v5820_v35, %v5819_v52 }
 0x158   : > { %v5822_v50 = vpop.f32.mrf.mxu1  ;;  %v6140_v55 = vpop.f32.mrf.mxu0 }
 0x159   : > { %v1374_v28 = vadd.f32 %v5821_v13, %v7058_v23 }
 0x15a   : > { %v5823_v63 = vpop.f32.mrf.mxu1  ;;  %v1545_v14 = vpop.f32.mrf.mxu0 }
 0x15b   : > { %v5824_v16 = vadd.f32 %v5823_v63, %v5822_v50  ;;  %v7182_v58 = vadd.f32 %v6135_v1, %v1374_v28 }
 0x15c   : > { %v5825_v2 = vpop.f32.mrf.mxu1  ;;  %v6143_v59 = vpop.f32.mrf.mxu0 }
 0x15d   : > { %v1377_v44 = vadd.f32 %v5824_v16, %v7067_v32 }
 0x15e   : > { %v5826_v24 = vpop.f32.mrf.mxu1  ;;  %v1558_v33 = vpop.f32.mrf.mxu0 }
 0x15f   : > { %v5827_v5 = vadd.f32 %v5826_v24, %v5825_v2  ;;  %v7185_v17 = vadd.f32 %v6136_v40, %v1377_v44 }
 0x160   : > { %v5828_v18 = vpop.f32.mrf.mxu1  ;;  %v6144_v34 = vpop.f32.mrf.mxu0 }
 0x161   : > { %v1382_v53 = vadd.f32 %v5827_v5, %v7084_v29 }
 0x162   : > { %v5829_v12 = vpop.f32.mrf.mxu1  ;;  %v1561_v23 = vpop.f32.mrf.mxu0 }
 0x163   : > { %v5830_v3 = vadd.f32 %v5829_v12, %v5828_v18  ;;  %v7188_v20 = vadd.f32 %v1542_v8, %v1382_v53 }
 0x164   : > { %v5831_v1 = vpop.f32.mrf.mxu1  ;;  %v7190_v39 = vpop.f32.mrf.mxu0 }
 0x165   : > { %v1385_v61 = vadd.f32 %v5830_v3, %v7092_v42 }
 0x166   : > { %v5832_v32 = vpop.f32.mrf.mxu1  ;;  %v7193_v21 = vpop.f32.mrf.mxu0 }
 0x167   : > { %v5833_v45 = vadd.f32 %v5832_v32, %v5831_v1  ;;  %v7195_v40 = vadd.f32 %v1545_v14, %v1385_v61 }
 0x168   : > { %v5834_v52 = vpop.f32.mrf.mxu1  ;;  %v7197_v9 = vpop.f32.mrf.mxu0 }
 0x169   : > { %v1390_v29 = vadd.f32 %v5833_v45, %v7078_v49 }
 0x16a   : > { %v5835_v35 = vpop.f32.mrf.mxu1  ;;  %v7200_v13 = vpop.f32.mrf.mxu0 }
 0x16b   : > { %v5836_v8 = vadd.f32 %v5835_v35, %v5834_v52  ;;  %v7202_v50 = vadd.f32 %v6139_v56, %v1390_v29 }
 0x16c   : > { %v5837_v28 = vpop.f32.mrf.mxu1  ;;  %v7204_v63 = vpop.f32.mrf.mxu0 }
 0x16d   : > { %8555 = vst [vmem:[#allocation2_spill] sm:$0xff] %v7204_v63  ;;  %v1393_v42 = vadd.f32 %v5836_v8, %v7087_v31 }
 0x16e   : > { %v5838_v16 = vpop.f32.mrf.mxu1  ;;  %v7207_v2 = vpop.f32.mrf.mxu0 }
 0x16f   : > { %8556 = vst [vmem:[#allocation3_spill] sm:$0xff] %v7207_v2  ;;  %v5839_v14 = vadd.f32 %v5838_v16, %v5837_v28  ;;  %v7209_v44 = vadd.f32 %v6140_v55, %v1393_v42 }
 0x170   : > { %v5840_v24 = vpop.f32.mrf.mxu1  ;;  %v7211_v5 = vpop.f32.mrf.mxu0 }
 0x171   : > { %8557 = vst [vmem:[#allocation4_spill] sm:$0xff] %v7211_v5  ;;  %v1398_v49 = vadd.f32 %v5839_v14, %v7100_v27 }
 0x172   : > { %v5841_v18 = vpop.f32.mrf.mxu1  ;;  %v7214_v53 = vpop.f32.mrf.mxu0 }
 0x173   : > { %8558 = vst [vmem:[#allocation5_spill] sm:$0xff] %v7214_v53  ;;  %v5842_v56 = vadd.f32 %v5841_v18, %v5840_v24  ;;  %v7216_v12 = vadd.f32 %v1558_v33, %v1398_v49 }
 0x174   : > { %v5843_v3 = vpop.f32.mrf.mxu1  ;;  %v7218_v1 = vpop.f32.mrf.mxu0 }
 0x175   : > { %8559 = vst [vmem:[#allocation6_spill] sm:$0xff] %v7216_v12  ;;  %8560 = vst [vmem:[#allocation7_spill] sm:$0xff] %v7218_v1  ;;  %v1401_v31 = vadd.f32 %v5842_v56, %v7107_v51 }
 0x176   : > { %v5844_v61 = vpop.f32.mrf.mxu1  ;;  %v7221_v32 = vpop.f32.mrf.mxu0 }
 0x177   : > { %8561 = vst [vmem:[#allocation8_spill] sm:$0xff] %v7221_v32  ;;  %v5845_v55 = vadd.f32 %v5844_v61, %v5843_v3  ;;  %v7223_v45 = vadd.f32 %v1561_v23, %v1401_v31 }
 0x178   : > { %v5846_v52 = vpop.f32.mrf.mxu1  ;;  %v7225_v29 = vpop.f32.mrf.mxu0 }
 0x179   : > { %8562 = vst [vmem:[#allocation9_spill] sm:$0xff] %v7223_v45  ;;  %8563 = vst [vmem:[#allocation10_spill] sm:$0xff] %v7225_v29  ;;  %v1406_v27 = vadd.f32 %v5845_v55, %v7096_v54  ;;  %v6395_v45 = vmov 1966171168  }
 0x17a   : > { %v5847_v35 = vpop.f32.mrf.mxu1  ;;  %v7228_v8 = vpop.f32.mrf.mxu0 }
 0x17b   : > { %8564 = vst [vmem:[#allocation11_spill] sm:$0xff] %v7228_v8  ;;  %v5848_v33 = vadd.f32 %v5847_v35, %v5846_v52  ;;  %v7230_v28 = vadd.f32 %v6143_v59, %v1406_v27 }
 0x17c   : > { %v5849_v42 = vpop.f32.mrf.mxu1  ;;  %v7232_v16 = vpop.f32.mrf.mxu0 }
 0x17d   : > { %8565 = vst [vmem:[#allocation12_spill] sm:$0xff] %v7232_v16  ;;  %v1409_v51 = vadd.f32 %v5848_v33, %v7103_v60 }
 0x17e   : > { %v5850_v14 = vpop.f32.mrf.mxu1  ;;  %v7235_v24 = vpop.f32.mrf.mxu0 }
 0x17f   : > { %8566 = vst [vmem:[#allocation13_spill] sm:$0xff] %v7235_v24  ;;  %v5851_v23 = vadd.f32 %v5850_v14, %v5849_v42  ;;  %v7237_v49 = vadd.f32 %v6144_v34, %v1409_v51 }
 0x180   : > { %v5852_v18 = vpop.f32.mrf.mxu1  ;;  %v7239_v56 = vpop.f32.mrf.mxu0 }
 0x181   : > { %8567 = vst [vmem:[#allocation14_spill] sm:$0xff] %v7237_v49  ;;  %8568 = vst [vmem:[#allocation15_spill] sm:$0xff] %v7239_v56  ;;  %v1414_v54 = vadd.f32 %v5851_v23, %v7113_v26  ;;  %v2450_v49 = vunpack.c.l.s4 %v6395_v45 }
 0x182   : > { %v5853_v3 = vpop.f32.mrf.mxu1  ;;  %v7242_v31 = vpop.f32.mrf.mxu0 }
 0x183   : > { %8569 = vst [vmem:[#allocation16_spill] sm:$0xff] %v7242_v31  ;;  %v5854_v59 = vadd.f32 %v5853_v3, %v5852_v18 }
 0x184   : > { %v5855_v61 = vpop.f32.mrf.mxu1  ;;  %v7244_v55 = vpop.f32.mrf.mxu0 }
 0x185   : > { %v7247_v60 = vadd.f32 %v5854_v59, %v7120_v19 }
 0x186   : > { %v5856_v52 = vpop.f32.mrf.mxu1  ;;  %v7249_v27 = vpop.f32.mrf.mxu0 }
 0x187   : > { %8570 = vst [vmem:[#allocation17_spill] sm:$0xff] %v7249_v27  ;;  %v5857_v34 = vadd.f32 %v5856_v52, %v5855_v61 }
 0x188   : > { %v5858_v35 = vpop.f32.mrf.mxu1  ;;  %v7251_v33 = vpop.f32.mrf.mxu0 }
 0x189   : > { %v1422_v42 = vadd.f32 %v5857_v34, %v7116_v0 }
 0x18a   : > { %v5859_v26 = vpop.f32.mrf.mxu1  ;;  %v7254_v51 = vpop.f32.mrf.mxu0 }
 0x18b   : > { %8571 = vst [vmem:[#allocation18_spill] sm:$0xff] %v7254_v51  ;;  %v5860_v14 = vadd.f32 %v5859_v26, %v5858_v35  ;;  %v7269_v35 = vadd.f32 %v7193_v21, %v1414_v54 }
 0x18c   : > { %v5861_v23 = vpop.f32.mrf.mxu1  ;;  %v7256_v18 = vpop.f32.mrf.mxu0 }
 0x18d   : > { %v1425_v3 = vadd.f32 %v5860_v14, %v7123_v47  ;;  %8573 = vst [vmem:[#allocation20_spill] sm:$0xff] %v7269_v35 }
 0x18e   : > { %v5862_v19 = vpop.f32.mrf.mxu1  ;;  %v7259_v59 = vpop.f32.mrf.mxu0 }
 0x18f   : > { %v5863_v31 = vadd.f32 %v5862_v19, %v5861_v23  ;;  %v7296_v8 = vadd.f32 %v7197_v9, %v1425_v3 }
 0x190   : > { %v5864_v27 = vpop.f32.mrf.mxu1  ;;  %v7261_v61 = vpop.f32.mrf.mxu0 }
 0x191   : > { %v7264_v52 = vadd.f32 %v5863_v31, %v7127_v46  ;;  %8578 = vst [vmem:[#allocation25_spill] sm:$0xff] %v7296_v8 }
 0x192   : > { %v5865_v0 = vpop.f32.mrf.mxu1  ;;  %v7266_v34 = vpop.f32.mrf.mxu0 }
 0x193   : > { %8572 = vst [vmem:[#allocation19_spill] sm:$0xff] %v7264_v52  ;;  %v5866_v26 = vadd.f32 %v5865_v0, %v5864_v27 }
 0x194   : > { %v5867_v51 = vpop.f32.mrf.mxu1  ;;  %v7271_v56 = vpop.f32.mrf.mxu0 }
 0x195   : > { %v7274_v47 = vadd.f32 %v5866_v26, %v7131_v62  ;;  %v7288_v62 = vadd.f32 %v7190_v39, %v1422_v42 }
 0x196   : > { %v5868_v14 = vpop.f32.mrf.mxu1  ;;  %v7276_v23 = vpop.f32.mrf.mxu0 }
 0x197   : > { %8574 = vst [vmem:[#allocation21_spill] sm:$0xff] %v7274_v47  ;;  %v5869_v19 = vadd.f32 %v5868_v14, %v5867_v51  ;;  %8576 = vst [vmem:[#allocation23_spill] sm:$0xff] %v7288_v62 }
 0x198   : > { %v5870_v24 = vpop.f32.mrf.mxu1  ;;  %v7278_v46 = vpop.f32.mrf.mxu0 }
 0x199   : > { %v7281_v31 = vadd.f32 %v5869_v19, %v7135_v4 }
 0x19a   : > { %v5871_v16 = vpop.f32.mrf.mxu1  ;;  %v7283_v21 = vpop.f32.mrf.mxu0 }
 0x19b   : > { %8575 = vst [vmem:[#allocation22_spill] sm:$0xff] %v7281_v31  ;;  %v5872_v54 = vadd.f32 %v5871_v16, %v5870_v24  ;;  %v6394_v24 = vmov 0  }
 0x19c   : > { %v5873_v27 = vpop.f32.mrf.mxu1  ;;  %v7285_v0 = vpop.f32.mrf.mxu0  ;;  %v5164_v39 = vrot.slane %v6394_v24, 7 }
 0x19d   : > { %v7291_v26 = vadd.f32 %v5872_v54, %v7139_v43 }
 0x19e   : > { %v5874_v51 = vpop.f32.mrf.mxu1  ;;  %v7293_v14 = vpop.f32.mrf.mxu0 }
 0x19f   : > { %8577 = vst [vmem:[#allocation24_spill] sm:$0xff] %v7291_v26  ;;  %v5875_v4 = vadd.f32 %v5874_v51, %v5873_v27 }
 0x1a0   : > { %v5876_v19 = vpop.f32.mrf.mxu1  ;;  %v7298_v29 = vpop.f32.mrf.mxu0 }
 0x1a1   : > { %v7301_v16 = vadd.f32 %v5875_v4, %v7148_v38  ;;  %v5236_v38 = vsel %vm7308_vm4, 0, %v5164_v39 }
 0x1a2   : > { %v5877_v42 = vpop.f32.mrf.mxu1  ;;  %v7303_v32 = vpop.f32.mrf.mxu0  ;;  %v5248_v24 = vsel %vm7320_vm7, %v5236_v38, 0 }
 0x1a3   : > { %8579 = vst [vmem:[#allocation26_spill] sm:$0xff] %v7301_v16  ;;  %v5878_v43 = vadd.f32 %v5877_v42, %v5876_v19 }
 0x1a4   : > { %v5879_v54 = vpop.f32.mrf.mxu1  ;;  %v7305_v1 = vpop.f32.mrf.mxu0 }
 0x1a5   : > { %v7313_v3 = vadd.f32 %v5878_v43, %v7157_v11  ;;  %v5641_v43 = vcombine.low %v5248_v24, %v5248_v24 }
 0x1a6   : > { %v5880_v27 = vpop.f32.mrf.mxu1  ;;  %v7318_v51 = vpop.f32.mrf.mxu0 }
 0x1a7   : > { %8582 = vst [vmem:[#allocation27_spill] sm:$0xff] %v7313_v3  ;;  %v5881_v19 = vadd.f32 %v5880_v27, %v5879_v54  ;;  %v5642_v3 = vcombine.high %v5248_v24, %v5248_v24  ;;  %5320 = vst [vmem:[%s7334_s18] sm:$0xf] %v5641_v43 }
 0x1a8   : > { %v5882_v42 = vpop.f32.mrf.mxu1  ;;  %v7326_v11 = vpop.f32.mrf.mxu0  ;;  %5338 = vst [vmem:[%s7334_s18 + $0x48] sm:$0xf] %v5641_v43 }
 0x1a9   : > { %v7329_v39 = vadd.f32 %v5881_v19, %v7165_v48  ;;  %5321 = vst [vmem:[%s7334_s18 + $0x4] sm:$0x1] %v5642_v3  ;;  %5339 = vst [vmem:[%s7334_s18 + $0x4c] sm:$0x1] %v5642_v3 }
 0x1aa   : > { %v5883_v54 = vpop.f32.mrf.mxu1  ;;  %v7336_v27 = vpop.f32.mrf.mxu0 }
 0x1ab   : > { %8585 = vst [vmem:[#allocation28_spill] sm:$0xff] %v7329_v39  ;;  %v5884_v38 = vadd.f32 %v5883_v54, %v5882_v42 }
 0x1ac   : > { %v5885_v24 = vpop.f32.mrf.mxu1  ;;  %v7342_v48 = vpop.f32.mrf.mxu0 }
 0x1ad   : > { %v7345_v19 = vadd.f32 %v5884_v38, %v7173_v37 }
 0x1ae   : > { %v5886_v16 = vpop.f32.mrf.mxu1  ;;  %v7347_v39 = vpop.f32.mrf.mxu0 }
 0x1af   : > { %8586 = vst [vmem:[#allocation29_spill] sm:$0xff] %v7345_v19  ;;  %v5887_v53 = vadd.f32 %v5886_v16, %v5885_v24 }
 0x1b0   : > { %v5888_v47 = vpop.f32.mrf.mxu1  ;;  %v7349_v5 = vpop.f32.mrf.mxu0 }
 0x1b1   : > { %v7352_v26 = vadd.f32 %v5887_v53, %v7146_v57 }
 0x1b2   : > { %v5889_v2 = vpop.f32.mrf.mxu1  ;;  %v7354_v43 = vpop.f32.mrf.mxu0 }
 0x1b3   : > { %8587 = vst [vmem:[#allocation30_spill] sm:$0xff] %v7352_v26  ;;  %v5890_v3 = vadd.f32 %v5889_v2, %v5888_v47 }
 0x1b4   : > { %v5891_v42 = vpop.f32.mrf.mxu1  ;;  %v7356_v54 = vpop.f32.mrf.mxu0 }
 0x1b5   : > { %v7359_v37 = vadd.f32 %v5890_v3, %v7155_v15 }
 0x1b6   : > { %v5892_v38 = vpop.f32.mrf.mxu1  ;;  %v7361_v19 = vpop.f32.mrf.mxu0 }
 0x1b7   : > { %8588 = vst [vmem:[#allocation31_spill] sm:$0xff] %v7359_v37  ;;  %v5893_v16 = vadd.f32 %v5892_v38, %v5891_v42 }
 0x1b8   : > { %v5894_v24 = vpop.f32.mrf.mxu1  ;;  %v7363_v52 = vpop.f32.mrf.mxu0 }
 0x1b9   : > { %v7366_v57 = vadd.f32 %v5893_v16, %v7142_v10 }
 0x1ba   : > { %v5895_v53 = vpop.f32.mrf.mxu1  ;;  %v7368_v26 = vpop.f32.mrf.mxu0 }
 0x1bb   : > { %8589 = vst [vmem:[#allocation32_spill] sm:$0xff] %v7366_v57  ;;  %v5896_v2 = vadd.f32 %v5895_v53, %v5894_v24 }
 0x1bc   : > { %v5897_v47 = vpop.f32.mrf.mxu1  ;;  %v7370_v63 = vpop.f32.mrf.mxu0 }
 0x1bd   : > { %v7373_v15 = vadd.f32 %v5896_v2, %v7151_v25 }
 0x1be   : > { %v5898_v3 = vpop.f32.mrf.mxu1  ;;  %v7375_v37 = vpop.f32.mrf.mxu0 }
 0x1bf   : > { %8590 = vst [vmem:[#allocation33_spill] sm:$0xff] %v7373_v15  ;;  %v5899_v42 = vadd.f32 %v5898_v3, %v5897_v47 }
 0x1c0   : > { %v5900_v38 = vpop.f32.mrf.mxu1  ;;  %v5988_v31 = vpop.f32.mrf.mxu0 }
 0x1c1   : > { %v7378_v8 = vadd.f32 %v5899_v42, %v7163_v6  ;;  %v5957_v6 = vadd.f32 %v7276_v23, %v7271_v56  ;;  %v7397_v56 = vld [vmem:[%s8553_s2] ss:$0 sm:$0xff] }
 0x1c2   : > { %v5901_v10 = vpop.f32.mrf.mxu1  ;;  %v5989_v16 = vpop.f32.mrf.mxu0 }
 0x1c3   : > { %8591 = vst [vmem:[#allocation34_spill] sm:$0xff] %v7378_v8  ;;  %v5902_v57 = vadd.f32 %v5901_v10, %v5900_v38  ;;  %v2452_v38 = vlaneseq }
 0x1c4   : > { %v5903_v35 = vpop.f32.mrf.mxu1  ;;  %v5991_v53 = vpop.f32.mrf.mxu0 }
 0x1c5   : > { %v7381_v24 = vadd.f32 %v5902_v57, %v7171_v41  ;;  %v5951_v41 = vadd.f32 %v7259_v59, %v7256_v18  ;;  %v2453_v12 = vshrl.u32 %v2452_v38, 7 }
 0x1c6   : > { %v5904_v62 = vpop.f32.mrf.mxu1  ;;  %v5992_v47 = vpop.f32.mrf.mxu0 }
 0x1c7   : > { %8592 = vst [vmem:[#allocation35_spill] sm:$0xff] %v7381_v24  ;;  %v5905_v25 = vadd.f32 %v5904_v62, %v5903_v35 }
 0x1c8   : > { %v5906_v2 = vpop.f32.mrf.mxu1  ;;  %v5994_v57 = vpop.f32.mrf.mxu0 }
 0x1c9   : > { %v7384_v15 = vadd.f32 %v5905_v25, %v7160_v7  ;;  %v2451_v7 = vunpack.c.0.s8 %v2450_v49  ;;  %v5960_v25 = vadd.f32 %v7283_v21, %v7278_v46  ;;  %v5954_v49 = vadd.f32 %v7266_v34, %v7261_v61 }
 0x1ca   : > { %v5907_v3 = vpop.f32.mrf.mxu1  ;;  %v5995_v18 = vpop.f32.mrf.mxu0  ;;  %v5969_v46 = vadd.f32 %v7318_v51, %v7305_v1  ;;  %v7418_v1 = vadd.f32 %v7347_v39, %v7342_v48 }
 0x1cb   : > { %v5908_v42 = vadd.f32 %v5907_v3, %v5906_v2  ;;  %v5963_v3 = vadd.f32 %v7293_v14, %v7285_v0  ;;  %v7424_v0 = vadd.f32 %v7354_v43, %v7349_v5  ;;  %v7438_v5 = vadd.f32 %v7368_v26, %v7363_v52 }
 0x1cc   : > { %v6183_v10 = vpop.f32.mrf.mxu1  ;;  %v5997_v51 = vpop.f32.mrf.mxu0  ;;  %v7444_v43 = vadd.f32 %v5989_v16, %v5988_v31  ;;  %v7457_v31 = vadd.f32 %v5995_v18, %v5994_v57 }
 0x1cd   : > { %v1489_v35 = vadd.f32 %v5908_v42, %v7168_v36  ;;  %v2195_v62 = vadd.f32 %v6183_v10, %v5957_v6 }
 0x1ce   : > { %v2186_v24 = vpop.f32.mrf.mxu1 }
 0x1cf   : > { %v2315_v45 = vadd.f32 %v2195_v62, %v7182_v58  ;;  %v2187_v8 = vadd.f32 %v5951_v41, %v2186_v24  ;;  %v7406_v24 = vsub.s32 %v2451_v7, %v2453_v12 }
 0x1d0   : > { %v6184_v23 = vpop.f32.mrf.mxu1 }
 0x1d1   : > { %v2313_v59 = vadd.f32 %v2187_v8, %v7176_v30  ;;  %v2198_v36 = vadd.f32 %v6184_v23, %v5960_v25  ;;  %v2354_v58 = vadd.f32 %v7397_v56, %v2315_v45  ;;  %v7412_v30 = vadd.f32 %v7303_v32, %v7298_v29 }
 0x1d2   : > { %v2189_v2 = vpop.f32.mrf.mxu1  ;;  %v5972_v8 = vadd.f32 %v7336_v27, %v7326_v11  ;;  %v7428_v32 = vadd.f32 %v7361_v19, %v7356_v54  ;;  %v7433_v11 = vadd.f32 %v7200_v13, %v7247_v60  ;;  %v7442_v19 = vadd.f32 %v7375_v37, %v7370_v63  ;;  %v5998_v60 = vpop.f32.mrf.mxu0 }
 0x1d3   : > { %v2316_v21 = vadd.f32 %v2198_v36, %v7185_v17  ;;  %v2190_v61 = vadd.f32 %v5954_v49, %v2189_v2  ;;  %v2352_v17 = vadd.f32 %v7397_v56, %v2313_v59  ;;  %v2386_v39 = vmax.f32 %v2354_v58, 0.0 }
 0x1d4   : > { %v6187_v34 = vpop.f32.mrf.mxu1  ;;  %v7447_v13 = vadd.f32 %v5992_v47, %v5991_v53  ;;  %v7455_v63 = vadd.f32 %v7244_v55, %v7384_v15  ;;  %v7462_v53 = vadd.f32 %v7251_v33, %v1489_v35  ;;  %v7464_v47 = vadd.f32 %v5998_v60, %v5997_v51 }
 0x1d5   : > { %v2355_v12 = vadd.f32 %v7397_v56, %v2316_v21  ;;  %v2211_v6 = vadd.f32 %v6187_v34, %v5969_v46  ;;  %v2314_v29 = vadd.f32 %v2190_v61, %v7179_v22  ;;  %v2384_v38 = vmax.f32 %v2352_v17, 0.0 }
 0x1d6   : > { %v2202_v14 = vpop.f32.mrf.mxu1 }
 0x1d7   : > { %v2387_v27 = vmax.f32 %v2355_v12, 0.0  ;;  %v2319_v48 = vadd.f32 %v2211_v6, %v7202_v50  ;;  %v2203_v42 = vadd.f32 %v5963_v3, %v2202_v14  ;;  %v2353_v22 = vadd.f32 %v7397_v56, %v2314_v29 }
 0x1d8   : > { %v6188_v54 = vpop.f32.mrf.mxu1 }
 0x1d9   : > { %v2417_v10 = vpack.c.bf16 %v2387_v27, %v2386_v39  ;;  %v5626_v50 = vpack.c.bf16 %v2387_v27, %v2387_v27  ;;  %v2385_v41 = vmax.f32 %v2353_v22, 0.0  ;;  %v7450_v62 = vadd.f32 %v7397_v56, %v2319_v48 }
 0x1da   : > { %v2317_v52 = vadd.f32 %v2203_v42, %v7188_v20  ;;  %v2214_v26 = vadd.f32 %v6188_v54, %v5972_v8 }
 0x1db   : > { %v2504_v37 = vrot.slane %v2417_v10, %v7406_v24  ;;  %v2511_v16 = vrot.slane %v5626_v50, %v7406_v24  ;;  %v2416_v7 = vpack.c.bf16 %v2385_v41, %v2384_v38  ;;  %v5625_v25 = vpack.c.bf16 %v2385_v41, %v2385_v41 }
 0x1dc   : > { %v7473_v18 = vadd.f32 %v7397_v56, %v2317_v52  ;;  %v7476_v33 = vadd.f32 %v2214_v26, %v7209_v44 }
 0x1dd   : > { %v2512_v45 = vcombine.high %v2504_v37, %v2504_v37  ;;  %v2513_v20 = vcombine.high %v2511_v16, %v2511_v16  ;;  %v2520_v23 = vrot.slane %v2504_v37, %v7406_v24  ;;  %v2527_v55 = vrot.slane %v2511_v16, %v7406_v24 }
 0x1de   : > { %v7469_v15 = vrot.slane %v2416_v7, %v7406_v24  ;;  %v7481_v49 = vrot.slane %v5625_v25, %v7406_v24 }
 0x1df   : > { %v2534_v35 = vrot.slane %v2512_v45, %v7406_v24  ;;  %v2541_v59 = vrot.slane %v2513_v20, %v7406_v24  ;;  %v2542_v36 = vcombine.high %v2520_v23, %v2520_v23  ;;  %v2543_v2 = vcombine.high %v2527_v55, %v2527_v55 }
 0x1e0   : > { %v3339_v46 = vsel %vm3232_vm2, %v2520_v23, 4286644096  ;;  %v3391_v58 = vsel %vm3232_vm2, %v2527_v55, 4286644096  ;;  %v2463_v21 = vcombine.high %v7469_v15, %v7469_v15 }
 0x1e1   : > { %v2544_v3 = vcombine.high %v2534_v35, %v2534_v35  ;;  %v2545_v8 = vcombine.high %v2541_v59, %v2541_v59  ;;  %v3341_v44 = vunpack.i.l.bf16 %v3339_v46  ;;  %v3342_v61 = vunpack.i.h.bf16 %v3339_v46 }
 0x1e2   : > { %v3352_v34 = vsel %vm3232_vm2, %v2534_v35, 4286644096  ;;  %v3365_v51 = vsel %vm3232_vm2, %v2542_v36, 4286644096  ;;  %v3393_v17 = vunpack.i.l.bf16 %v3391_v58  ;;  %v3394_v12 = vunpack.i.h.bf16 %v3391_v58 }
 0x1e3   : > { %v3343_v6 = vmax.f32 %v3341_v44, %v3342_v61  ;;  %v3354_v29 = vunpack.i.l.bf16 %v3352_v34  ;;  %v3355_v14 = vunpack.i.h.bf16 %v3352_v34  ;;  %v3367_v39 = vunpack.i.l.bf16 %v3365_v51 }
 0x1e4   : > { %v3368_v27 = vunpack.i.h.bf16 %v3365_v51  ;;  %v3378_v48 = vsel %vm3232_vm2, %v2544_v3, 4286644096  ;;  %v3395_v42 = vmax.f32 %v3393_v17, %v3394_v12  ;;  %v3404_v22 = vsel %vm3232_vm2, %v2541_v59, 4286644096 }
 0x1e5   : > { %v3344_v54 = vrot.slane %v3343_v6, 4  ;;  %v3356_v60 = vmax.f32 %v3354_v29, %v3355_v14  ;;  %v3380_v38 = vunpack.i.l.bf16 %v3378_v48  ;;  %v3381_v10 = vunpack.i.h.bf16 %v3378_v48 }
 0x1e6   : > { %v3369_v50 = vmax.f32 %v3367_v39, %v3368_v27  ;;  %v3396_v41 = vrot.slane %v3395_v42, 4  ;;  %v3406_v52 = vunpack.i.l.bf16 %v3404_v22  ;;  %v3407_v26 = vunpack.i.h.bf16 %v3404_v22 }
 0x1e7   : > { %v3345_v37 = vmax.f32 %v3343_v6, %v3344_v54  ;;  %v3357_v16 = vrot.slane %v3356_v60, 4  ;;  %v3382_v7 = vmax.f32 %v3380_v38, %v3381_v10  ;;  %v3417_v25 = vsel %vm3232_vm2, %v2543_v2, 4286644096 }
 0x1e8   : > { %v3370_v45 = vrot.slane %v3369_v50, 4  ;;  %v3397_v20 = vmax.f32 %v3395_v42, %v3396_v41  ;;  %v3408_v23 = vmax.f32 %v3406_v52, %v3407_v26  ;;  %v3419_v55 = vunpack.i.l.bf16 %v3417_v25 }
 0x1e9   : > { %v3346_v35 = vrot.slane %v3345_v37, 2  ;;  %v3358_v36 = vmax.f32 %v3356_v60, %v3357_v16  ;;  %v3383_v59 = vrot.slane %v3382_v7, 4  ;;  %v3420_v46 = vunpack.i.h.bf16 %v3417_v25 }
 0x1ea   : > { %v3371_v58 = vmax.f32 %v3369_v50, %v3370_v45  ;;  %v3398_v3 = vrot.slane %v3397_v20, 2  ;;  %v3409_v44 = vrot.slane %v3408_v23, 4  ;;  %v3430_v61 = vsel %vm3232_vm2, %v2545_v8, 4286644096 }
 0x1eb   : > { %v3347_v34 = vmax.f32 %v3345_v37, %v3346_v35  ;;  %v3359_v51 = vrot.slane %v3358_v36, 2  ;;  %v3384_v17 = vmax.f32 %v3382_v7, %v3383_v59  ;;  %v3421_v12 = vmax.f32 %v3419_v55, %v3420_v46 }
 0x1ec   : > { %v3372_v6 = vrot.slane %v3371_v58, 2  ;;  %v3399_v29 = vmax.f32 %v3397_v20, %v3398_v3  ;;  %v3410_v2 = vmax.f32 %v3408_v23, %v3409_v44  ;;  %v3432_v14 = vunpack.i.l.bf16 %v3430_v61 }
 0x1ed   : > { %v3348_v39 = vrot.slane %v3347_v34, 1  ;;  %v3360_v27 = vmax.f32 %v3358_v36, %v3359_v51  ;;  %v3385_v48 = vrot.slane %v3384_v17, 2  ;;  %v3422_v42 = vrot.slane %v3421_v12, 4 }
 0x1ee   : > { %v3373_v22 = vmax.f32 %v3371_v58, %v3372_v6  ;;  %v3400_v54 = vrot.slane %v3399_v29, 1  ;;  %v3411_v60 = vrot.slane %v3410_v2, 2  ;;  %v3433_v38 = vunpack.i.h.bf16 %v3430_v61 }
 0x1ef   : > { %v7493_v10 = vmax.f32 %v3347_v34, %v3348_v39  ;;  %v3361_v50 = vrot.slane %v3360_v27, 1  ;;  %v3386_v8 = vmax.f32 %v3384_v17, %v3385_v48  ;;  %v3423_v41 = vmax.f32 %v3421_v12, %v3422_v42 }
 0x1f0   : > { %v3374_v52 = vrot.slane %v3373_v22, 1  ;;  %v7495_v26 = vmax.f32 %v3399_v29, %v3400_v54  ;;  %v3412_v37 = vmax.f32 %v3410_v2, %v3411_v60  ;;  %v3434_v16 = vmax.f32 %v3432_v14, %v3433_v38 }
 0x1f1   : > { %v7497_v7 = vmax.f32 %v3360_v27, %v3361_v50  ;;  %v3387_v25 = vrot.slane %v3386_v8, 1  ;;  %v3424_v45 = vrot.slane %v3423_v41, 2  ;;  %v2464_v20 = vcombine.high %v7481_v49, %v7481_v49 }
 0x1f2   : > { %v7501_v23 = vmax.f32 %v3373_v22, %v3374_v52  ;;  %v3413_v55 = vrot.slane %v3412_v37, 1  ;;  %v3435_v35 = vrot.slane %v3434_v16, 4  ;;  %v7505_v36 = vadd.f32 %v7397_v56, %v7476_v33 }
 0x1f3   : > { %v3350_v59 = vpack.i.bf16 %v7493_v10, %v7493_v10  ;;  %v7509_v46 = vmax.f32 %v3386_v8, %v3387_v25  ;;  %v3425_v58 = vmax.f32 %v3423_v41, %v3424_v45  ;;  %v2471_v3 = vrot.slane %v7469_v15, %v7406_v24 }
 0x1f4   : > { %v7515_v61 = vmax.f32 %v3412_v37, %v3413_v55  ;;  %v3436_v34 = vmax.f32 %v3434_v16, %v3435_v35  ;;  %v2478_v51 = vrot.slane %v7481_v49, %v7406_v24  ;;  %v3363_v33 = vpack.i.bf16 %v7497_v7, %v7497_v7 }
 0x1f5   : > { %v3426_v17 = vrot.slane %v3425_v58, 1  ;;  %v2485_v12 = vrot.slane %v2463_v21, %v7406_v24  ;;  %v2492_v6 = vrot.slane %v2464_v20, %v7406_v24  ;;  %v3376_v29 = vpack.i.bf16 %v7501_v23, %v7501_v23 }
 0x1f6   : > { %v3437_v14 = vrot.slane %v3436_v34, 2  ;;  %v2493_v39 = vcombine.high %v2471_v3, %v2471_v3  ;;  %v2494_v27 = vcombine.high %v2478_v51, %v2478_v51  ;;  %v3235_v42 = vsel %vm3232_vm2, %v2471_v3, 4286644096 }
 0x1f7   : > { %v2495_v48 = vcombine.high %v2485_v12, %v2485_v12  ;;  %v7533_v22 = vmax.f32 %v3425_v58, %v3426_v17  ;;  %v3237_v15 = vunpack.i.l.bf16 %v3235_v42  ;;  %v3238_v21 = vunpack.i.h.bf16 %v3235_v42 }
 0x1f8   : > { %v3248_v54 = vsel %vm3232_vm2, %v2485_v12, 4286644096  ;;  %v2496_v60 = vcombine.high %v2492_v6, %v2492_v6  ;;  %v3261_v8 = vsel %vm3232_vm2, %v2493_v39, 4286644096  ;;  %v7537_v41 = vmax.f32 %v3436_v34, %v3437_v14 }
 0x1f9   : > { %v3250_v38 = vunpack.i.l.bf16 %v3248_v54  ;;  %v3251_v50 = vunpack.i.h.bf16 %v3248_v54  ;;  %v3239_v52 = vmax.f32 %v3237_v15, %v3238_v21  ;;  %v3263_v37 = vunpack.i.l.bf16 %v3261_v8 }
 0x1fa   : > { %v3264_v16 = vunpack.i.h.bf16 %v3261_v8  ;;  %v3274_v45 = vsel %vm3232_vm2, %v2495_v48, 4286644096  ;;  %v3287_v20 = vsel %vm3232_vm2, %v2478_v51, 4286644096  ;;  %v3300_v55 = vsel %vm3232_vm2, %v2492_v6, 4286644096 }
 0x1fb   : > { %v3252_v25 = vmax.f32 %v3250_v38, %v3251_v50  ;;  %v3240_v58 = vrot.slane %v3239_v52, 4  ;;  %v3276_v17 = vunpack.i.l.bf16 %v3274_v45  ;;  %v3277_v39 = vunpack.i.h.bf16 %v3274_v45 }
 0x1fc   : > { %v3265_v3 = vmax.f32 %v3263_v37, %v3264_v16  ;;  %v3289_v34 = vunpack.i.l.bf16 %v3287_v20  ;;  %v3290_v14 = vunpack.i.h.bf16 %v3287_v20  ;;  %v3302_v54 = vunpack.i.l.bf16 %v3300_v55 }
 0x1fd   : > { %v3253_v12 = vrot.slane %v3252_v25, 4  ;;  %v3241_v15 = vmax.f32 %v3239_v52, %v3240_v58  ;;  %v3278_v38 = vmax.f32 %v3276_v17, %v3277_v39  ;;  %v3303_v50 = vunpack.i.h.bf16 %v3300_v55 }
 0x1fe   : > { %v3266_v21 = vrot.slane %v3265_v3, 4  ;;  %v3291_v51 = vmax.f32 %v3289_v34, %v3290_v14  ;;  %v3313_v35 = vsel %vm3232_vm2, %v2494_v27, 4286644096  ;;  %v3326_v37 = vsel %vm3232_vm2, %v2496_v60, 4286644096 }
 0x1ff   : > { %v3254_v48 = vmax.f32 %v3252_v25, %v3253_v12  ;;  %v3242_v6 = vrot.slane %v3241_v15, 2  ;;  %v3279_v49 = vrot.slane %v3278_v38, 4  ;;  %v3304_v57 = vmax.f32 %v3302_v54, %v3303_v50 }
 0x200   : > { %v3267_v8 = vmax.f32 %v3265_v3, %v3266_v21  ;;  %v3292_v45 = vrot.slane %v3291_v51, 4  ;;  %v3315_v42 = vunpack.i.l.bf16 %v3313_v35  ;;  %v3316_v52 = vunpack.i.h.bf16 %v3313_v35 }
 0x201   : > { %v3255_v16 = vrot.slane %v3254_v48, 2  ;;  %v3243_v20 = vmax.f32 %v3241_v15, %v3242_v6  ;;  %v3280_v2 = vmax.f32 %v3278_v38, %v3279_v49  ;;  %v3305_v17 = vrot.slane %v3304_v57, 4 }
 0x202   : > { %v3268_v44 = vrot.slane %v3267_v8, 2  ;;  %v3293_v25 = vmax.f32 %v3291_v51, %v3292_v45  ;;  %v3317_v39 = vmax.f32 %v3315_v42, %v3316_v52  ;;  %v3328_v3 = vunpack.i.l.bf16 %v3326_v37 }
 0x203   : > { %v3256_v58 = vmax.f32 %v3254_v48, %v3255_v16  ;;  %v3244_v12 = vrot.slane %v3243_v20, 1  ;;  %v3281_v34 = vrot.slane %v3280_v2, 2  ;;  %v3306_v14 = vmax.f32 %v3304_v57, %v3305_v17 }
 0x204   : > { %v3269_v55 = vmax.f32 %v3267_v8, %v3268_v44  ;;  %v3294_v60 = vrot.slane %v3293_v25, 2  ;;  %v3318_v15 = vrot.slane %v3317_v39, 4  ;;  %v3329_v50 = vunpack.i.h.bf16 %v3326_v37 }
 0x205   : > { %v3257_v27 = vrot.slane %v3256_v58, 1  ;;  %v3245_v21 = vmax.f32 %v3243_v20, %v3244_v12  ;;  %v3282_v35 = vmax.f32 %v3280_v2, %v3281_v34  ;;  %v3307_v49 = vrot.slane %v3306_v14, 2 }
 0x206   : > { %v3270_v54 = vrot.slane %v3269_v55, 1  ;;  %v3295_v48 = vmax.f32 %v3293_v25, %v3294_v60  ;;  %v3319_v16 = vmax.f32 %v3317_v39, %v3318_v15  ;;  %v3330_v44 = vmax.f32 %v3328_v3, %v3329_v50 }
 0x207   : > { %v3258_v6 = vmax.f32 %v3256_v58, %v3257_v27  ;;  %v3246_v38 = vpack.i.bf16 %v3245_v21, %v3245_v21  ;;  %v3283_v8 = vrot.slane %v3282_v35, 1  ;;  %v3308_v52 = vmax.f32 %v3306_v14, %v3307_v49 }
 0x208   : > { %v3271_v51 = vmax.f32 %v3269_v55, %v3270_v54  ;;  %v3296_v45 = vrot.slane %v3295_v48, 1  ;;  %v3320_v17 = vrot.slane %v3319_v16, 2  ;;  %v3331_v20 = vrot.slane %v3330_v44, 4 }
 0x209   : > { %v3259_v42 = vpack.i.bf16 %v3258_v6, %v3258_v6  ;;  %v4898_v37 = vmax.bf16 %v3350_v59, %v3246_v38  ;;  %v3284_v2 = vmax.f32 %v3282_v35, %v3283_v8  ;;  %v3309_v25 = vrot.slane %v3308_v52, 1 }
 0x20a   : > { %v3272_v57 = vpack.i.bf16 %v3271_v51, %v3271_v51  ;;  %v3297_v58 = vmax.f32 %v3295_v48, %v3296_v45  ;;  %v3321_v55 = vmax.f32 %v3319_v16, %v3320_v17  ;;  %v3332_v39 = vmax.f32 %v3330_v44, %v3331_v20  ;;  %v2205_v16 = vpop.f32.mrf.mxu1 }
 0x20b   : > { %v4899_v12 = vmax.bf16 %v3363_v33, %v3259_v42  ;;  %v5026_v27 = vunpack.c.l.b16 %v4898_v37  ;;  %v3285_v34 = vpack.i.bf16 %v3284_v2, %v3284_v2  ;;  %v3310_v14 = vmax.f32 %v3308_v52, %v3309_v25 }
 0x20c   : > { %v4900_v3 = vmax.bf16 %v3376_v29, %v3272_v57  ;;  %v3298_v60 = vpack.i.bf16 %v3297_v58, %v3297_v58  ;;  %v3322_v59 = vrot.slane %v3321_v55, 1  ;;  %v3333_v21 = vrot.slane %v3332_v39, 2 }
 0x20d   : > { %v5027_v10 = vunpack.c.l.b16 %v4899_v12  ;;  %v2391_v15 = vmax.f32 %v7505_v36, 0.0  ;;  %v3311_v50 = vpack.i.bf16 %v3310_v14, %v3310_v14  ;;  %v8593_v7 = vpack.i.bf16 %v7509_v46, %v7509_v46 }
 0x20e   : > { %v5028_v54 = vunpack.c.l.b16 %v4900_v3  ;;  %v8594_v23 = vpack.i.bf16 %v7495_v26, %v7495_v26  ;;  %v3323_v35 = vmax.f32 %v3321_v55, %v3322_v59  ;;  %v3334_v48 = vmax.f32 %v3332_v39, %v3333_v21 }
 0x20f   : > { %v4901_v33 = vmax.bf16 %v8593_v7, %v3285_v34  ;;  %v5091_v6 = vsel %vm5090_vm8, %v5027_v10, %v5026_v27  ;;  %v8595_v38 = vmax.f32 %v7450_v62, 0.0  ;;  %v8596_v36 = vrot.slane %v7537_v41, 1 }
 0x210   : > { %v4902_v29 = vmax.bf16 %v8594_v23, %v3298_v60  ;;  %v5093_v49 = vsel %vm5092_vm9, %v5028_v54, %v5091_v6  ;;  %v8597_v46 = vpack.i.bf16 %v7515_v61, %v7515_v61  ;;  %v5628_v8 = vpack.c.bf16 %v2391_v15, %v2391_v15 }
 0x211   : > { %v2419_v51 = vpack.c.bf16 %v2391_v15, %v8595_v38  ;;  %v3440_v44 = vmax.f32 %v7537_v41, %v8596_v36  ;;  %v5029_v26 = vunpack.c.l.b16 %v4901_v33  ;;  %v3324_v45 = vpack.i.bf16 %v3323_v35, %v3323_v35 }
 0x212   : > { %v4903_v42 = vmax.bf16 %v8597_v46, %v3311_v50  ;;  %v3335_v52 = vrot.slane %v3334_v48, 1  ;;  %v5030_v57 = vunpack.c.l.b16 %v4902_v29  ;;  %v2609_v37 = vrot.slane %v5628_v8, %v7406_v24 }
 0x213   : > { %v2602_v17 = vrot.slane %v2419_v51, %v7406_v24  ;;  %v5095_v62 = vsel %vm5094_vm10, %v5029_v26, %v5093_v49  ;;  %v2206_v2 = vadd.f32 %v7412_v30, %v2205_v16  ;;  %v8598_v61 = vpack.i.bf16 %v7533_v22, %v7533_v22 }
 0x214   : > { %v5031_v20 = vunpack.c.l.b16 %v4903_v42  ;;  %v3336_v41 = vmax.f32 %v3334_v48, %v3335_v52  ;;  %v5097_v25 = vsel %vm5096_vm11, %v5030_v57, %v5095_v62  ;;  %v2611_v39 = vcombine.high %v2609_v37, %v2609_v37 }
 0x215   : > { %v4904_v58 = vmax.bf16 %v8598_v61, %v3324_v45  ;;  %v2610_v12 = vcombine.high %v2602_v17, %v2602_v17  ;;  %v2618_v3 = vrot.slane %v2602_v17, %v7406_v24  ;;  %v2625_v27 = vrot.slane %v2609_v37, %v7406_v24 }
 0x216   : > { %v5099_v55 = vsel %vm5098_vm12, %v5031_v20, %v5097_v25  ;;  %v3441_v34 = vpack.i.bf16 %v3440_v44, %v3440_v44  ;;  %v3337_v60 = vpack.i.bf16 %v3336_v41, %v3336_v41  ;;  %v7586_v10 = vrot.slane %v2611_v39, %v7406_v24 }
 0x217   : > { %v5032_v14 = vunpack.c.l.b16 %v4904_v58  ;;  %v2632_v30 = vrot.slane %v2610_v12, %v7406_v24  ;;  %v2640_v22 = vcombine.high %v2618_v3, %v2618_v3  ;;  %v3547_v59 = vsel %vm3232_vm2, %v2618_v3, 4286644096 }
 0x218   : > { %v7590_v21 = vadd.f32 %v2206_v2, %v7195_v40  ;;  %v4905_v54 = vmax.bf16 %v3441_v34, %v3337_v60  ;;  %v3549_v7 = vunpack.i.l.bf16 %v3547_v59  ;;  %v2641_v33 = vcombine.high %v2625_v27, %v2625_v27 }
 0x219   : > { %v5101_v15 = vsel %vm5100_vm13, %v5032_v14, %v5099_v55  ;;  %v2642_v50 = vcombine.high %v2632_v30, %v2632_v30  ;;  %v3550_v23 = vunpack.i.h.bf16 %v3547_v59  ;;  %v3560_v29 = vsel %vm3232_vm2, %v2632_v30, 4286644096 }
 0x21a   : > { %v3573_v6 = vsel %vm3232_vm2, %v2640_v22, 4286644096  ;;  %v5033_v35 = vunpack.c.l.b16 %v4905_v54  ;;  %v3562_v48 = vunpack.i.l.bf16 %v3560_v29  ;;  %v3563_v49 = vunpack.i.h.bf16 %v3560_v29  ;;  %v6000_v54 = vpop.f32.mrf.mxu0 }
 0x21b   : > { %v3575_v38 = vunpack.i.l.bf16 %v3573_v6  ;;  %v3551_v51 = vmax.f32 %v3549_v7, %v3550_v23  ;;  %v3576_v16 = vunpack.i.h.bf16 %v3573_v6  ;;  %v3586_v40 = vsel %vm3232_vm2, %v2642_v50, 4286644096 }
 0x21c   : > { %v3599_v36 = vsel %vm3232_vm2, %v2625_v27, 4286644096  ;;  %v5103_v44 = vsel %vm5102_vm14, %v5033_v35, %v5101_v15  ;;  %v3564_v46 = vmax.f32 %v3562_v48, %v3563_v49  ;;  %v3588_v42 = vunpack.i.l.bf16 %v3586_v40  ;;  %v6191_v49 = vpop.f32.mrf.mxu1 }
 0x21d   : > { %v3589_v26 = vunpack.i.h.bf16 %v3586_v40  ;;  %v5153_v8 = vpack.c.b16 %v5103_v44, %v5103_v44  ;;  %v3552_v45 = vrot.slane %v3551_v51, 4  ;;  %v3577_v52 = vmax.f32 %v3575_v38, %v3576_v16 }
 0x21e   : > { %v3601_v57 = vunpack.i.l.bf16 %v3599_v36  ;;  %v3565_v17 = vrot.slane %v3564_v46, 4  ;;  %v3602_v62 = vunpack.i.h.bf16 %v3599_v36  ;;  %v3612_v37 = vsel %vm3232_vm2, %v7586_v10, 4286644096 }
 0x21f   : > { %v3590_v20 = vmax.f32 %v3588_v42, %v3589_v26  ;;  %v5169_v2 = vshrl.u32 %v5153_v8, 16  ;;  %v5172_v41 = vshll.u32 %v5153_v8, 16  ;;  %v3553_v61 = vmax.f32 %v3551_v51, %v3552_v45  ;;  %v6001_v42 = vpop.f32.mrf.mxu0 }
 0x220   : > { %v3578_v58 = vrot.slane %v3577_v52, 4  ;;  %v3566_v25 = vmax.f32 %v3564_v46, %v3565_v17  ;;  %v3603_v55 = vmax.f32 %v3601_v57, %v3602_v62  ;;  %v3614_v39 = vunpack.i.l.bf16 %v3612_v37  ;;  %v2218_v62 = vpop.f32.mrf.mxu1 }
 0x221   : > { %v3591_v12 = vrot.slane %v3590_v20, 4  ;;  %v5171_v3 = vrot.slane %v5169_v2, 7  ;;  %v3554_v27 = vrot.slane %v3553_v61, 2  ;;  %v3615_v60 = vunpack.i.h.bf16 %v3612_v37 }
 0x222   : > { %v3579_v34 = vmax.f32 %v3577_v52, %v3578_v58  ;;  %v2643_v14 = vcombine.high %v7586_v10, %v7586_v10  ;;  %v3567_v30 = vrot.slane %v3566_v25, 2  ;;  %v3604_v59 = vrot.slane %v3603_v55, 4 }
 0x223   : > { %v3592_v22 = vmax.f32 %v3590_v20, %v3591_v12  ;;  %v5174_v15 = vor.u32 %v5172_v41, %v5171_v3  ;;  %v3555_v50 = vmax.f32 %v3553_v61, %v3554_v27  ;;  %v3616_v23 = vmax.f32 %v3614_v39, %v3615_v60 }
 0x224   : > { %v3580_v7 = vrot.slane %v3579_v34, 2  ;;  %v3568_v29 = vmax.f32 %v3566_v25, %v3567_v30  ;;  %v3605_v35 = vmax.f32 %v3603_v55, %v3604_v59  ;;  %v3625_v48 = vsel %vm3232_vm2, %v2641_v33, 4286644096 }
 0x225   : > { %v3593_v6 = vrot.slane %v3592_v22, 2  ;;  %v5237_v38 = vsel %vm7308_vm4, 0, %v5174_v15  ;;  %v3556_v51 = vrot.slane %v3555_v50, 1  ;;  %v3617_v10 = vrot.slane %v3616_v23, 4 }
 0x226   : > { %v3581_v16 = vmax.f32 %v3579_v34, %v3580_v7  ;;  %v5249_v40 = vsel %vm7320_vm7, %v5237_v38, 0  ;;  %v3569_v36 = vrot.slane %v3568_v29, 1  ;;  %v3606_v46 = vrot.slane %v3605_v35, 2 }
 0x227   : > { %v3594_v44 = vmax.f32 %v3592_v22, %v3593_v6  ;;  %v5643_v26 = vcombine.low %v5249_v40, %v5249_v40  ;;  %v5644_v8 = vcombine.high %v5249_v40, %v5249_v40  ;;  %v7607_v45 = vmax.f32 %v3555_v50, %v3556_v51  ;;  %v6192_v22 = vpop.f32.mrf.mxu1  ;;  %v8599_v40 = vld [vmem:[#allocation6_spill] sm:$0xff] }
 0x228   : > { %v3627_v33 = vunpack.i.l.bf16 %v3625_v48  ;;  %v7609_v52 = vmax.f32 %v3568_v29, %v3569_v36  ;;  %v3582_v57 = vrot.slane %v3581_v16, 1  ;;  %v3607_v17 = vmax.f32 %v3605_v35, %v3606_v46 }
 0x229   : > { %v3618_v20 = vmax.f32 %v3616_v23, %v3617_v10  ;;  %5322 = vst [vmem:[%s7334_s18 + $0x8] sm:$0xf] %v5643_v26  ;;  %5323 = vst [vmem:[%s7334_s18 + $0xc] sm:$0x1] %v5644_v8  ;;  %v3595_v37 = vrot.slane %v3594_v44, 1  ;;  %v3628_v2 = vunpack.i.h.bf16 %v3625_v48  ;;  %v2227_v61 = vadd.f32 %v6191_v49, %v7428_v32 }
 0x22a   : > { %v3638_v41 = vsel %vm3232_vm2, %v2643_v14, 4286644096  ;;  %v7615_v58 = vadd.f32 %v6001_v42, %v6000_v54  ;;  %v2388_v25 = vmax.f32 %v7473_v18, 0.0  ;;  %v3608_v12 = vrot.slane %v3607_v17, 1 }
 0x22b   : > { %v3619_v55 = vrot.slane %v3618_v20, 2  ;;  %v3558_v39 = vpack.i.bf16 %v7607_v45, %v7607_v45  ;;  %v3629_v3 = vmax.f32 %v3627_v33, %v3628_v2  ;;  %v3640_v27 = vunpack.i.l.bf16 %v3638_v41 }
 0x22c   : > { %v3641_v34 = vunpack.i.h.bf16 %v3638_v41  ;;  %v3571_v60 = vpack.i.bf16 %v7609_v52, %v7609_v52  ;;  %v7622_v30 = vmax.f32 %v3581_v16, %v3582_v57  ;;  %v2357_v32 = vadd.f32 %v7397_v56, %v7590_v21 }
 0x22d   : > { %v3620_v14 = vmax.f32 %v3618_v20, %v3619_v55  ;;  %v7626_v59 = vmax.f32 %v3594_v44, %v3595_v37  ;;  %v3630_v18 = vrot.slane %v3629_v3, 4  ;;  %v2323_v15 = vadd.f32 %v2227_v61, %v7230_v28  ;;  %v8600_v44 = vld [vmem:[#allocation14_spill] sm:$0xff] }
 0x22e   : > { %v3642_v54 = vmax.f32 %v3640_v27, %v3641_v34  ;;  %v7629_v50 = vmax.f32 %v3607_v17, %v3608_v12  ;;  %v2389_v23 = vmax.f32 %v2357_v32, 0.0  ;;  %v2219_v29 = vadd.f32 %v7418_v1, %v2218_v62 }
 0x22f   : > { %v3621_v7 = vrot.slane %v3620_v14, 1  ;;  %v3631_v6 = vmax.f32 %v3629_v3, %v3630_v18  ;;  %v7633_v48 = vadd.f32 %v7397_v56, %v2323_v15  ;;  %v2230_v21 = vadd.f32 %v6192_v22, %v7438_v5 }
 0x230   : > { %v3643_v35 = vrot.slane %v3642_v54, 4  ;;  %v3584_v49 = vpack.i.bf16 %v7622_v30, %v7622_v30  ;;  %v2418_v51 = vpack.c.bf16 %v2389_v23, %v2388_v25  ;;  %v5627_v28 = vpack.c.bf16 %v2389_v23, %v2389_v23 }
 0x231   : > { %v7638_v38 = vmax.f32 %v3620_v14, %v3621_v7  ;;  %v3632_v16 = vrot.slane %v3631_v6, 2  ;;  %v2321_v36 = vadd.f32 %v2219_v29, %v8599_v40  ;;  %v2324_v1 = vadd.f32 %v2230_v21, %v8600_v44 }
 0x232   : > { %v3644_v10 = vmax.f32 %v3642_v54, %v3643_v35  ;;  %v3597_v46 = vpack.i.bf16 %v7626_v59, %v7626_v59  ;;  %v3610_v42 = vpack.i.bf16 %v7629_v50, %v7629_v50  ;;  %v2553_v5 = vrot.slane %v2418_v51, %v7406_v24 }
 0x233   : > { %v2560_v26 = vrot.slane %v5627_v28, %v7406_v24  ;;  %v3633_v8 = vmax.f32 %v3631_v6, %v3632_v16  ;;  %v2394_v57 = vmax.f32 %v7633_v48, 0.0  ;;  %v2363_v17 = vadd.f32 %v7397_v56, %v2324_v1 }
 0x234   : > { %v3645_v33 = vrot.slane %v3644_v10, 2  ;;  %v2561_v20 = vcombine.high %v2553_v5, %v2553_v5  ;;  %v2569_v37 = vrot.slane %v2553_v5, %v7406_v24  ;;  %v7655_v12 = vadd.f32 %v7397_v56, %v2321_v36 }
 0x235   : > { %v2562_v62 = vcombine.high %v2560_v26, %v2560_v26  ;;  %v2576_v2 = vrot.slane %v2560_v26, %v7406_v24  ;;  %v3634_v61 = vrot.slane %v3633_v8, 1  ;;  %v7659_v34 = vmax.f32 %v2363_v17, 0.0 }
 0x236   : > { %v3646_v25 = vmax.f32 %v3644_v10, %v3645_v33  ;;  %v2583_v55 = vrot.slane %v2561_v20, %v7406_v24  ;;  %v2591_v27 = vcombine.high %v2569_v37, %v2569_v37  ;;  %v3443_v18 = vsel %vm3232_vm2, %v2569_v37, 4286644096 }
 0x237   : > { %v2590_v3 = vrot.slane %v2562_v62, %v7406_v24  ;;  %v7661_v14 = vmax.f32 %v3633_v8, %v3634_v61  ;;  %v2592_v22 = vcombine.high %v2576_v2, %v2576_v2  ;;  %v3445_v15 = vunpack.i.l.bf16 %v3443_v18 }
 0x238   : > { %v3647_v32 = vrot.slane %v3646_v25, 1  ;;  %v2593_v54 = vcombine.high %v2583_v55, %v2583_v55  ;;  %v3446_v7 = vunpack.i.h.bf16 %v3443_v18  ;;  %v3495_v23 = vsel %vm3232_vm2, %v2576_v2, 4286644096 }
 0x239   : > { %v2594_v29 = vcombine.high %v2590_v3, %v2590_v3  ;;  %v3456_v6 = vsel %vm3232_vm2, %v2583_v55, 4286644096  ;;  %v3469_v35 = vsel %vm3232_vm2, %v2591_v27, 4286644096  ;;  %v3497_v44 = vunpack.i.l.bf16 %v3495_v23 }
 0x23a   : > { %v3447_v21 = vmax.f32 %v3445_v15, %v3446_v7  ;;  %v3458_v51 = vunpack.i.l.bf16 %v3456_v6  ;;  %v3459_v28 = vunpack.i.h.bf16 %v3456_v6  ;;  %v3471_v16 = vunpack.i.l.bf16 %v3469_v35 }
 0x23b   : > { %v7669_v10 = vmax.f32 %v3646_v25, %v3647_v32  ;;  %v3472_v40 = vunpack.i.h.bf16 %v3469_v35  ;;  %v3482_v36 = vsel %vm3232_vm2, %v2593_v54, 4286644096  ;;  %v3498_v17 = vunpack.i.h.bf16 %v3495_v23 }
 0x23c   : > { %v3448_v1 = vrot.slane %v3447_v21, 4  ;;  %v3460_v5 = vmax.f32 %v3458_v51, %v3459_v28  ;;  %v3484_v26 = vunpack.i.l.bf16 %v3482_v36  ;;  %v3485_v8 = vunpack.i.h.bf16 %v3482_v36 }
 0x23d   : > { %v3473_v33 = vmax.f32 %v3471_v16, %v3472_v40  ;;  %v3508_v20 = vsel %vm3232_vm2, %v2590_v3, 4286644096  ;;  %v3521_v62 = vsel %vm3232_vm2, %v2592_v22, 4286644096  ;;  %v3499_v27 = vmax.f32 %v3497_v44, %v3498_v17 }
 0x23e   : > { %v3449_v37 = vmax.f32 %v3447_v21, %v3448_v1  ;;  %v3461_v2 = vrot.slane %v3460_v5, 4  ;;  %v3486_v61 = vmax.f32 %v3484_v26, %v3485_v8  ;;  %v3510_v55 = vunpack.i.l.bf16 %v3508_v20 }
 0x23f   : > { %v3474_v25 = vrot.slane %v3473_v33, 4  ;;  %v3511_v32 = vunpack.i.h.bf16 %v3508_v20  ;;  %v3523_v18 = vunpack.i.l.bf16 %v3521_v62  ;;  %v3524_v6 = vunpack.i.h.bf16 %v3521_v62 }
 0x240   : > { %v3450_v54 = vrot.slane %v3449_v37, 2  ;;  %v3462_v15 = vmax.f32 %v3460_v5, %v3461_v2  ;;  %v3487_v7 = vrot.slane %v3486_v61, 4  ;;  %v3500_v51 = vrot.slane %v3499_v27, 4 }
 0x241   : > { %v3475_v35 = vmax.f32 %v3473_v33, %v3474_v25  ;;  %v3512_v28 = vmax.f32 %v3510_v55, %v3511_v32  ;;  %v3534_v23 = vsel %vm3232_vm2, %v2594_v29, 4286644096  ;;  %v3525_v21 = vmax.f32 %v3523_v18, %v3524_v6 }
 0x242   : > { %v3451_v3 = vmax.f32 %v3449_v37, %v3450_v54  ;;  %v3463_v16 = vrot.slane %v3462_v15, 2  ;;  %v3488_v22 = vmax.f32 %v3486_v61, %v3487_v7  ;;  %v3501_v36 = vmax.f32 %v3499_v27, %v3500_v51 }
 0x243   : > { %v3476_v40 = vrot.slane %v3475_v35, 2  ;;  %v3513_v1 = vrot.slane %v3512_v28, 4  ;;  %v3536_v26 = vunpack.i.l.bf16 %v3534_v23  ;;  %v3526_v20 = vrot.slane %v3525_v21, 4 }
 0x244   : > { %v3452_v44 = vrot.slane %v3451_v3, 1  ;;  %v3464_v8 = vmax.f32 %v3462_v15, %v3463_v16  ;;  %v3489_v17 = vrot.slane %v3488_v22, 2  ;;  %v3502_v2 = vrot.slane %v3501_v36, 2 }
 0x245   : > { %v3477_v5 = vmax.f32 %v3475_v35, %v3476_v40  ;;  %v3514_v62 = vmax.f32 %v3512_v28, %v3513_v1  ;;  %v3537_v33 = vunpack.i.h.bf16 %v3534_v23  ;;  %v3527_v29 = vmax.f32 %v3525_v21, %v3526_v20 }
 0x246   : > { %v3453_v25 = vmax.f32 %v3451_v3, %v3452_v44  ;;  %v3465_v55 = vrot.slane %v3464_v8, 1  ;;  %v3490_v32 = vmax.f32 %v3488_v22, %v3489_v17  ;;  %v3503_v54 = vmax.f32 %v3501_v36, %v3502_v2 }
 0x247   : > { %v3478_v37 = vrot.slane %v3477_v5, 1  ;;  %v3515_v61 = vrot.slane %v3514_v62, 2  ;;  %v3538_v18 = vmax.f32 %v3536_v26, %v3537_v33  ;;  %v3528_v51 = vrot.slane %v3527_v29, 2 }
 0x248   : > { %v3454_v7 = vpack.i.bf16 %v3453_v25, %v3453_v25  ;;  %v3466_v27 = vmax.f32 %v3464_v8, %v3465_v55  ;;  %v3491_v6 = vrot.slane %v3490_v32, 1  ;;  %v3504_v15 = vrot.slane %v3503_v54, 1 }
 0x249   : > { %v3479_v56 = vmax.f32 %v3477_v5, %v3478_v37  ;;  %v3516_v16 = vmax.f32 %v3514_v62, %v3515_v61  ;;  %v3539_v41 = vrot.slane %v3538_v18, 4  ;;  %v3529_v28 = vmax.f32 %v3527_v29, %v3528_v51  ;;  %v2221_v61 = vpop.f32.mrf.mxu1 }
 0x24a   : > { %v3467_v35 = vpack.i.bf16 %v3466_v27, %v3466_v27  ;;  %v3492_v40 = vmax.f32 %v3490_v32, %v3491_v6  ;;  %v4906_v23 = vmax.bf16 %v3558_v39, %v3454_v7  ;;  %v3505_v22 = vmax.f32 %v3503_v54, %v3504_v15 }
 0x24b   : > { %v3480_v3 = vpack.i.bf16 %v3479_v56, %v3479_v56  ;;  %v3517_v21 = vrot.slane %v3516_v16, 1  ;;  %v3540_v36 = vmax.f32 %v3538_v18, %v3539_v41  ;;  %v3530_v26 = vrot.slane %v3529_v28, 1 }
 0x24c   : > { %v3493_v1 = vpack.i.bf16 %v3492_v40, %v3492_v40  ;;  %v4907_v44 = vmax.bf16 %v3571_v60, %v3467_v35  ;;  %v5034_v8 = vunpack.c.l.b16 %v4906_v23  ;;  %v3506_v17 = vpack.i.bf16 %v3505_v22, %v3505_v22 }
 0x24d   : > { %v3518_v20 = vmax.f32 %v3516_v16, %v3517_v21  ;;  %v3541_v5 = vrot.slane %v3540_v36, 2  ;;  %v4908_v2 = vmax.bf16 %v3584_v49, %v3480_v3  ;;  %v3531_v45 = vmax.f32 %v3529_v28, %v3530_v26 }
 0x24e   : > { %v4909_v39 = vmax.bf16 %v3597_v46, %v3493_v1  ;;  %v5035_v41 = vunpack.c.l.b16 %v4907_v44  ;;  %v2421_v56 = vpack.c.bf16 %v7659_v34, %v2394_v57  ;;  %v4910_v62 = vmax.bf16 %v3610_v42, %v3506_v17 }
 0x24f   : > { %v3519_v52 = vpack.i.bf16 %v3518_v20, %v3518_v20  ;;  %v3542_v60 = vmax.f32 %v3540_v36, %v3541_v5  ;;  %v5036_v33 = vunpack.c.l.b16 %v4908_v2  ;;  %v3532_v25 = vpack.i.bf16 %v3531_v45, %v3531_v45  ;;  %v6003_v45 = vpop.f32.mrf.mxu0 }
 0x250   : > { %v5037_v30 = vunpack.c.l.b16 %v4909_v39  ;;  %v5104_v49 = vsel %vm5090_vm8, %v5035_v41, %v5034_v8  ;;  %v5630_v59 = vpack.c.bf16 %v7659_v34, %v7659_v34  ;;  %v8601_v48 = vpack.i.bf16 %v7638_v38, %v7638_v38 }
 0x251   : > { %v3543_v46 = vrot.slane %v3542_v60, 1  ;;  %v5038_v57 = vunpack.c.l.b16 %v4910_v62  ;;  %v5105_v32 = vsel %vm5092_vm9, %v5036_v33, %v5104_v49  ;;  %v8602_v50 = vpack.i.bf16 %v7661_v14, %v7661_v14 }
 0x252   : > { %v4911_v55 = vmax.bf16 %v8601_v48, %v3519_v52  ;;  %v5106_v29 = vsel %vm5094_vm10, %v5037_v30, %v5105_v32  ;;  %v2700_v37 = vrot.slane %v2421_v56, %v7406_v24  ;;  %v2707_v54 = vrot.slane %v5630_v59, %v7406_v24 }
 0x253   : > { %v4912_v42 = vmax.bf16 %v8602_v50, %v3532_v25  ;;  %v3649_v34 = vpack.i.bf16 %v7669_v10, %v7669_v10  ;;  %v3544_v18 = vmax.f32 %v3542_v60, %v3543_v46  ;;  %v5107_v7 = vsel %vm5096_vm11, %v5038_v57, %v5106_v29  ;;  %v6004_v50 = vpop.f32.mrf.mxu0 }
 0x254   : > { %v5039_v38 = vunpack.c.l.b16 %v4911_v55  ;;  %v2708_v6 = vcombine.high %v2700_v37, %v2700_v37  ;;  %v2709_v51 = vcombine.high %v2707_v54, %v2707_v54  ;;  %v2716_v14 = vrot.slane %v2700_v37, %v7406_v24 }
 0x255   : > { %v5040_v27 = vunpack.c.l.b16 %v4912_v42  ;;  %v3545_v15 = vpack.i.bf16 %v3544_v18, %v3544_v18  ;;  %v2723_v35 = vrot.slane %v2707_v54, %v7406_v24  ;;  %v7713_v40 = vadd.f32 %v7424_v0, %v2221_v61 }
 0x256   : > { %v5108_v16 = vsel %vm5098_vm12, %v5039_v38, %v5107_v7  ;;  %v2730_v10 = vrot.slane %v2708_v6, %v7406_v24  ;;  %v7718_v23 = vrot.slane %v2709_v51, %v7406_v24  ;;  %v2738_v3 = vcombine.high %v2716_v14, %v2716_v14 }
 0x257   : > { %v5109_v28 = vsel %vm5100_vm13, %v5040_v27, %v5108_v16  ;;  %v4913_v22 = vmax.bf16 %v3649_v34, %v3545_v15  ;;  %v2739_v21 = vcombine.high %v2723_v35, %v2723_v35  ;;  %v3755_v36 = vsel %vm3232_vm2, %v2716_v14, 4286644096 }
 0x258   : > { %v3807_v1 = vsel %vm3232_vm2, %v2723_v35, 4286644096  ;;  %v2740_v26 = vcombine.high %v2730_v10, %v2730_v10  ;;  %v2741_v44 = vcombine.high %v7718_v23, %v7718_v23  ;;  %v3757_v0 = vunpack.i.l.bf16 %v3755_v36 }
 0x259   : > { %v3758_v8 = vunpack.i.h.bf16 %v3755_v36  ;;  %v5041_v17 = vunpack.c.l.b16 %v4913_v22  ;;  %v3768_v20 = vsel %vm3232_vm2, %v2730_v10, 4286644096  ;;  %v3781_v5 = vsel %vm3232_vm2, %v2738_v3, 4286644096 }
 0x25a   : > { %v3809_v2 = vunpack.i.l.bf16 %v3807_v1  ;;  %v3770_v41 = vunpack.i.l.bf16 %v3768_v20  ;;  %v3771_v56 = vunpack.i.h.bf16 %v3768_v20  ;;  %v3783_v52 = vunpack.i.l.bf16 %v3781_v5 }
 0x25b   : > { %v3759_v39 = vmax.f32 %v3757_v0, %v3758_v8  ;;  %v5110_v60 = vsel %vm5102_vm14, %v5041_v17, %v5109_v28  ;;  %v3784_v62 = vunpack.i.h.bf16 %v3781_v5  ;;  %v3794_v33 = vsel %vm3232_vm2, %v2740_v26, 4286644096  ;;  %v6006_v28 = vpop.f32.mrf.mxu0 }
 0x25c   : > { %v3810_v25 = vunpack.i.h.bf16 %v3807_v1  ;;  %v5154_v30 = vpack.c.b16 %v5110_v60, %v5110_v60  ;;  %v3772_v59 = vmax.f32 %v3770_v41, %v3771_v56  ;;  %v3796_v46 = vunpack.i.l.bf16 %v3794_v33 }
 0x25d   : > { %v3760_v49 = vrot.slane %v3759_v39, 4  ;;  %v3785_v48 = vmax.f32 %v3783_v52, %v3784_v62  ;;  %v3797_v55 = vunpack.i.h.bf16 %v3794_v33  ;;  %v3820_v32 = vsel %vm3232_vm2, %v7718_v23, 4286644096  ;;  %v6007_v60 = vpop.f32.mrf.mxu0 }
 0x25e   : > { %v3811_v57 = vmax.f32 %v3809_v2, %v3810_v25  ;;  %v5176_v42 = vshrl.u32 %v5154_v30, 16  ;;  %v5179_v29 = vshll.u32 %v5154_v30, 16  ;;  %v3773_v54 = vrot.slane %v3772_v59, 4 }
 0x25f   : > { %v3761_v37 = vmax.f32 %v3759_v39, %v3760_v49  ;;  %v3786_v61 = vrot.slane %v3785_v48, 4  ;;  %v3798_v34 = vmax.f32 %v3796_v46, %v3797_v55  ;;  %v3822_v38 = vunpack.i.l.bf16 %v3820_v32  ;;  %v6195_v39 = vpop.f32.mrf.mxu1 }
 0x260   : > { %v3812_v18 = vrot.slane %v3811_v57, 4  ;;  %v5178_v7 = vrot.slane %v5176_v42, 7  ;;  %v3774_v6 = vmax.f32 %v3772_v59, %v3773_v54  ;;  %v3823_v51 = vunpack.i.h.bf16 %v3820_v32  ;;  %v8603_v42 = vld [vmem:[#allocation9_spill] sm:$0xff] }
 0x261   : > { %v3762_v27 = vrot.slane %v3761_v37, 2  ;;  %v3787_v14 = vmax.f32 %v3785_v48, %v3786_v61  ;;  %v3799_v15 = vrot.slane %v3798_v34, 4  ;;  %v3833_v35 = vsel %vm3232_vm2, %v2739_v21, 4286644096 }
 0x262   : > { %v3813_v16 = vmax.f32 %v3811_v57, %v3812_v18  ;;  %v5181_v10 = vor.u32 %v5179_v29, %v5178_v7  ;;  %v3775_v22 = vrot.slane %v3774_v6, 2  ;;  %v3824_v36 = vmax.f32 %v3822_v38, %v3823_v51 }
 0x263   : > { %v3763_v3 = vmax.f32 %v3761_v37, %v3762_v27  ;;  %v3788_v1 = vrot.slane %v3787_v14, 2  ;;  %v3800_v26 = vmax.f32 %v3798_v34, %v3799_v15  ;;  %v3835_v8 = vunpack.i.l.bf16 %v3833_v35  ;;  %v2234_v37 = vpop.f32.mrf.mxu1 }
 0x264   : > { %v3814_v0 = vrot.slane %v3813_v16, 2  ;;  %v5238_v17 = vsel %vm7308_vm4, 0, %v5181_v10  ;;  %v3776_v5 = vmax.f32 %v3774_v6, %v3775_v22  ;;  %v3825_v2 = vrot.slane %v3824_v36, 4 }
 0x265   : > { %v3764_v20 = vrot.slane %v3763_v3, 1  ;;  %v5250_v21 = vsel %vm7320_vm7, %v5238_v17, 0  ;;  %v3789_v41 = vmax.f32 %v3787_v14, %v3788_v1  ;;  %v3801_v56 = vrot.slane %v3800_v26, 2  ;;  %v7761_v14 = vld [vmem:[%s8553_s2] ss:$0 sm:$0xff] }
 0x266   : > { %v3815_v52 = vmax.f32 %v3813_v16, %v3814_v0  ;;  %v5645_v62 = vcombine.low %v5250_v21, %v5250_v21  ;;  %v5646_v33 = vcombine.high %v5250_v21, %v5250_v21  ;;  %v3777_v30 = vrot.slane %v3776_v5, 1  ;;  %v6196_v16 = vpop.f32.mrf.mxu1 }
 0x267   : > { %v7735_v25 = vmax.f32 %v3763_v3, %v3764_v20  ;;  %v3790_v49 = vrot.slane %v3789_v41, 1  ;;  %v3802_v59 = vmax.f32 %v3800_v26, %v3801_v56  ;;  %v3826_v48 = vmax.f32 %v3824_v36, %v3825_v2  ;;  %v8604_v26 = vld [vmem:[#allocation23_spill] sm:$0xff] }
 0x268   : > { %v3816_v46 = vrot.slane %v3815_v52, 1  ;;  %v7737_v55 = vadd.f32 %v6004_v50, %v6003_v45  ;;  %5324 = vst [vmem:[%s7334_s18 + $0x10] sm:$0xf] %v5645_v62  ;;  %5325 = vst [vmem:[%s7334_s18 + $0x14] sm:$0x1] %v5646_v33  ;;  %v3836_v57 = vunpack.i.h.bf16 %v3833_v35  ;;  %v2322_v29 = vadd.f32 %v7713_v40, %v8603_v42  ;;  %v2237_v56 = vpop.f32.mrf.mxu1  ;;  %v8606_v62 = vld [vmem:[#allocation25_spill] sm:$0xff] }
 0x269   : > { %v3846_v32 = vsel %vm3232_vm2, %v2741_v44, 4286644096  ;;  %v7747_v54 = vadd.f32 %v6007_v60, %v6006_v28  ;;  %v7749_v61 = vmax.f32 %v3776_v5, %v3777_v30  ;;  %v3803_v34 = vrot.slane %v3802_v59, 1 }
 0x26a   : > { %v3827_v18 = vrot.slane %v3826_v48, 2  ;;  %v2392_v45 = vmax.f32 %v7655_v12, 0.0  ;;  %v3837_v50 = vmax.f32 %v3835_v8, %v3836_v57  ;;  %v3848_v38 = vunpack.i.l.bf16 %v3846_v32 }
 0x26b   : > { %v3849_v7 = vunpack.i.h.bf16 %v3846_v32  ;;  %v3766_v23 = vpack.i.bf16 %v7735_v25, %v7735_v25  ;;  %v7754_v27 = vmax.f32 %v3789_v41, %v3790_v49  ;;  %v7756_v44 = vmax.f32 %v3815_v52, %v3816_v46 }
 0x26c   : > { %v3828_v40 = vmax.f32 %v3826_v48, %v3827_v18  ;;  %v3838_v6 = vrot.slane %v3837_v50, 4  ;;  %v2361_v12 = vadd.f32 %v7761_v14, %v2322_v29  ;;  %v2243_v15 = vadd.f32 %v6195_v39, %v7447_v13  ;;  %v8605_v13 = vld [vmem:[#allocation20_spill] sm:$0xff] }
 0x26d   : > { %v3850_v51 = vmax.f32 %v3848_v38, %v3849_v7  ;;  %v3779_v35 = vpack.i.bf16 %v7749_v61, %v7749_v61  ;;  %v7767_v28 = vmax.f32 %v3802_v59, %v3803_v34  ;;  %v2235_v3 = vadd.f32 %v7442_v19, %v2234_v37 }
 0x26e   : > { %v3829_v10 = vrot.slane %v3828_v40, 1  ;;  %v3839_v22 = vmax.f32 %v3837_v50, %v3838_v6  ;;  %v2393_v1 = vmax.f32 %v2361_v12, 0.0  ;;  %v2327_v0 = vadd.f32 %v2243_v15, %v8604_v26 }
 0x26f   : > { %v3851_v36 = vrot.slane %v3850_v51, 4  ;;  %v3792_v8 = vpack.i.bf16 %v7754_v27, %v7754_v27  ;;  %v2325_v20 = vadd.f32 %v2235_v3, %v8605_v13  ;;  %v2246_v5 = vadd.f32 %v6196_v16, %v7457_v31 }
 0x270   : > { %v7773_v17 = vmax.f32 %v3828_v40, %v3829_v10  ;;  %v3840_v2 = vrot.slane %v3839_v22, 2  ;;  %v2420_v21 = vpack.c.bf16 %v2393_v1, %v2392_v45  ;;  %v5629_v41 = vpack.c.bf16 %v2393_v1, %v2393_v1 }
 0x271   : > { %v3852_v39 = vmax.f32 %v3850_v51, %v3851_v36  ;;  %v3805_v19 = vpack.i.bf16 %v7767_v28, %v7767_v28  ;;  %v3818_v52 = vpack.i.bf16 %v7756_v44, %v7756_v44  ;;  %v7782_v60 = vadd.f32 %v7761_v14, %v2327_v0 }
 0x272   : > { %v2328_v33 = vadd.f32 %v2246_v5, %v8606_v62  ;;  %v3841_v30 = vmax.f32 %v3839_v22, %v3840_v2  ;;  %v2651_v31 = vrot.slane %v2420_v21, %v7406_v24  ;;  %v2658_v59 = vrot.slane %v5629_v41, %v7406_v24 }
 0x273   : > { %v3853_v49 = vrot.slane %v3852_v39, 2  ;;  %v3831_v46 = vpack.i.bf16 %v7773_v17, %v7773_v17  ;;  %v7790_v48 = vadd.f32 %v7761_v14, %v2325_v20  ;;  %v2238_v32 = vadd.f32 %v7444_v43, %v2237_v56 }
 0x274   : > { %v2367_v57 = vadd.f32 %v7761_v14, %v2328_v33  ;;  %v3842_v42 = vrot.slane %v3841_v30, 1  ;;  %v2659_v37 = vcombine.high %v2651_v31, %v2651_v31  ;;  %v2660_v34 = vcombine.high %v2658_v59, %v2658_v59 }
 0x275   : > { %v3854_v29 = vmax.f32 %v3852_v39, %v3853_v49  ;;  %v2667_v18 = vrot.slane %v2651_v31, %v7406_v24  ;;  %v2674_v45 = vrot.slane %v2658_v59, %v7406_v24  ;;  %v2398_v50 = vmax.f32 %v7782_v60, 0.0 }
 0x276   : > { %v7797_v38 = vmax.f32 %v2367_v57, 0.0  ;;  %v7799_v7 = vmax.f32 %v3841_v30, %v3842_v42  ;;  %v2681_v6 = vrot.slane %v2659_v37, %v7406_v24  ;;  %v2688_v51 = vrot.slane %v2660_v34, %v7406_v24 }
 0x277   : > { %v3855_v40 = vrot.slane %v3854_v29, 1  ;;  %v2689_v43 = vcombine.high %v2667_v18, %v2667_v18  ;;  %v2690_v12 = vcombine.high %v2674_v45, %v2674_v45  ;;  %v3651_v15 = vsel %vm3232_vm2, %v2667_v18, 4286644096 }
 0x278   : > { %v7805_v16 = vadd.f32 %v2238_v32, %v7433_v11  ;;  %v2691_v22 = vcombine.high %v2681_v6, %v2681_v6  ;;  %v3703_v36 = vsel %vm3232_vm2, %v2674_v45, 4286644096  ;;  %v3653_v1 = vunpack.i.l.bf16 %v3651_v15 }
 0x279   : > { %v7809_v3 = vmax.f32 %v3854_v29, %v3855_v40  ;;  %v3654_v26 = vunpack.i.h.bf16 %v3651_v15  ;;  %v3664_v0 = vsel %vm3232_vm2, %v2681_v6, 4286644096  ;;  %v3677_v13 = vsel %vm3232_vm2, %v2689_v43, 4286644096 }
 0x27a   : > { %v2692_v20 = vcombine.high %v2688_v51, %v2688_v51  ;;  %v3666_v5 = vunpack.i.l.bf16 %v3664_v0  ;;  %v3667_v2 = vunpack.i.h.bf16 %v3664_v0  ;;  %v3679_v39 = vunpack.i.l.bf16 %v3677_v13 }
 0x27b   : > { %v3655_v11 = vmax.f32 %v3653_v1, %v3654_v26  ;;  %v3680_v21 = vunpack.i.h.bf16 %v3677_v13  ;;  %v3690_v41 = vsel %vm3232_vm2, %v2691_v22, 4286644096  ;;  %v3705_v56 = vunpack.i.l.bf16 %v3703_v36 }
 0x27c   : > { %v3668_v62 = vmax.f32 %v3666_v5, %v3667_v2  ;;  %v3692_v33 = vunpack.i.l.bf16 %v3690_v41  ;;  %v3693_v30 = vunpack.i.h.bf16 %v3690_v41  ;;  %v3706_v49 = vunpack.i.h.bf16 %v3703_v36 }
 0x27d   : > { %v3656_v31 = vrot.slane %v3655_v11, 4  ;;  %v3681_v59 = vmax.f32 %v3679_v39, %v3680_v21  ;;  %v3716_v57 = vsel %vm3232_vm2, %v2688_v51, 4286644096  ;;  %v3729_v32 = vsel %vm3232_vm2, %v2690_v12, 4286644096 }
 0x27e   : > { %v3669_v42 = vrot.slane %v3668_v62, 4  ;;  %v3694_v29 = vmax.f32 %v3692_v33, %v3693_v30  ;;  %v3707_v37 = vmax.f32 %v3705_v56, %v3706_v49  ;;  %v3718_v34 = vunpack.i.l.bf16 %v3716_v57 }
 0x27f   : > { %v3657_v18 = vmax.f32 %v3655_v11, %v3656_v31  ;;  %v3682_v45 = vrot.slane %v3681_v59, 4  ;;  %v3719_v40 = vunpack.i.h.bf16 %v3716_v57  ;;  %v3731_v6 = vunpack.i.l.bf16 %v3729_v32 }
 0x280   : > { %v3670_v43 = vmax.f32 %v3668_v62, %v3669_v42  ;;  %v3695_v15 = vrot.slane %v3694_v29, 4  ;;  %v3708_v22 = vrot.slane %v3707_v37, 4  ;;  %v3732_v1 = vunpack.i.h.bf16 %v3729_v32 }
 0x281   : > { %v3658_v26 = vrot.slane %v3657_v18, 2  ;;  %v3683_v36 = vmax.f32 %v3681_v59, %v3682_v45  ;;  %v3720_v0 = vmax.f32 %v3718_v34, %v3719_v40  ;;  %v3742_v13 = vsel %vm3232_vm2, %v2692_v20, 4286644096 }
 0x282   : > { %v3671_v51 = vrot.slane %v3670_v43, 2  ;;  %v3696_v5 = vmax.f32 %v3694_v29, %v3695_v15  ;;  %v3709_v12 = vmax.f32 %v3707_v37, %v3708_v22  ;;  %v3733_v2 = vmax.f32 %v3731_v6, %v3732_v1 }
 0x283   : > { %v3659_v39 = vmax.f32 %v3657_v18, %v3658_v26  ;;  %v3684_v21 = vrot.slane %v3683_v36, 2  ;;  %v3721_v41 = vrot.slane %v3720_v0, 4  ;;  %v3744_v11 = vunpack.i.l.bf16 %v3742_v13 }
 0x284   : > { %v3672_v56 = vmax.f32 %v3670_v43, %v3671_v51  ;;  %v3697_v33 = vrot.slane %v3696_v5, 2  ;;  %v3710_v30 = vrot.slane %v3709_v12, 2  ;;  %v3734_v62 = vrot.slane %v3733_v2, 4 }
 0x285   : > { %v3660_v49 = vrot.slane %v3659_v39, 1  ;;  %v3685_v31 = vmax.f32 %v3683_v36, %v3684_v21  ;;  %v3722_v57 = vmax.f32 %v3720_v0, %v3721_v41  ;;  %v3745_v32 = vunpack.i.h.bf16 %v3742_v13 }
 0x286   : > { %v3673_v59 = vrot.slane %v3672_v56, 1  ;;  %v3698_v42 = vmax.f32 %v3696_v5, %v3697_v33  ;;  %v3711_v34 = vmax.f32 %v3709_v12, %v3710_v30  ;;  %v3735_v20 = vmax.f32 %v3733_v2, %v3734_v62 }
 0x287   : > { %v3661_v45 = vmax.f32 %v3659_v39, %v3660_v49  ;;  %v3686_v29 = vrot.slane %v3685_v31, 1  ;;  %v3723_v37 = vrot.slane %v3722_v57, 2  ;;  %v3746_v40 = vmax.f32 %v3744_v11, %v3745_v32 }
 0x288   : > { %v3674_v18 = vmax.f32 %v3672_v56, %v3673_v59  ;;  %v3699_v6 = vrot.slane %v3698_v42, 1  ;;  %v3712_v15 = vrot.slane %v3711_v34, 1  ;;  %v3736_v22 = vrot.slane %v3735_v20, 2 }
 0x289   : > { %v3662_v43 = vpack.i.bf16 %v3661_v45, %v3661_v45  ;;  %v3687_v1 = vmax.f32 %v3685_v31, %v3686_v29  ;;  %v3724_v26 = vmax.f32 %v3722_v57, %v3723_v37  ;;  %v3747_v51 = vrot.slane %v3746_v40, 4 }
 0x28a   : > { %v3675_v10 = vpack.i.bf16 %v3674_v18, %v3674_v18  ;;  %v3700_v36 = vmax.f32 %v3698_v42, %v3699_v6  ;;  %v3713_v0 = vmax.f32 %v3711_v34, %v3712_v15  ;;  %v3737_v13 = vmax.f32 %v3735_v20, %v3736_v22 }
 0x28b   : > { %v3688_v21 = vpack.i.bf16 %v3687_v1, %v3687_v1  ;;  %v3725_v5 = vrot.slane %v3724_v26, 1  ;;  %v3748_v12 = vmax.f32 %v3746_v40, %v3747_v51  ;;  %v4914_v2 = vmax.bf16 %v3766_v23, %v3662_v43  ;;  %v7852_v40 = vpop.f32.mrf.mxu0 }
 0x28c   : > { %v3701_v39 = vpack.i.bf16 %v3700_v36, %v3700_v36  ;;  %v3714_v41 = vpack.i.bf16 %v3713_v0, %v3713_v0  ;;  %v3738_v11 = vrot.slane %v3737_v13, 1  ;;  %v4915_v56 = vmax.bf16 %v3779_v35, %v3675_v10 }
 0x28d   : > { %v3726_v33 = vmax.f32 %v3724_v26, %v3725_v5  ;;  %v3749_v30 = vrot.slane %v3748_v12, 2  ;;  %v4916_v62 = vmax.bf16 %v3792_v8, %v3688_v21  ;;  %v5042_v49 = vunpack.c.l.b16 %v4914_v2  ;;  %v7867_v5 = vpop.f32.mrf.mxu0 }
 0x28e   : > { %v3739_v31 = vmax.f32 %v3737_v13, %v3738_v11  ;;  %v4917_v25 = vmax.bf16 %v3805_v19, %v3701_v39  ;;  %v4918_v23 = vmax.bf16 %v3818_v52, %v3714_v41  ;;  %v5043_v57 = vunpack.c.l.b16 %v4915_v56 }
 0x28f   : > { %v3727_v32 = vpack.i.bf16 %v3726_v33, %v3726_v33  ;;  %v3750_v61 = vmax.f32 %v3748_v12, %v3749_v30  ;;  %v5044_v35 = vunpack.c.l.b16 %v4916_v62  ;;  %v2423_v10 = vpack.c.bf16 %v7797_v38, %v2398_v50 }
 0x290   : > { %v3740_v27 = vpack.i.bf16 %v3739_v31, %v3739_v31  ;;  %v5045_v8 = vunpack.c.l.b16 %v4917_v25  ;;  %v5046_v59 = vunpack.c.l.b16 %v4918_v23  ;;  %v5111_v42 = vsel %vm5090_vm8, %v5043_v57, %v5042_v49 }
 0x291   : > { %v3751_v34 = vrot.slane %v3750_v61, 1  ;;  %v4919_v28 = vmax.bf16 %v3831_v46, %v3727_v32  ;;  %v5112_v44 = vsel %vm5092_vm9, %v5044_v35, %v5111_v42  ;;  %v5632_v19 = vpack.c.bf16 %v7797_v38, %v7797_v38  ;;  %v7873_v35 = vpop.f32.mrf.mxu0 }
 0x292   : > { %v8607_v52 = vpack.i.bf16 %v7799_v7, %v7799_v7  ;;  %v5113_v50 = vsel %vm5094_vm10, %v5045_v8, %v5112_v44  ;;  %v2798_v20 = vrot.slane %v2423_v10, %v7406_v24  ;;  %v2365_v45 = vadd.f32 %v7761_v14, %v7805_v16 }
 0x293   : > { %v3752_v29 = vmax.f32 %v3750_v61, %v3751_v34  ;;  %v5047_v37 = vunpack.c.l.b16 %v4919_v28  ;;  %v5114_v17 = vsel %vm5096_vm11, %v5046_v59, %v5113_v50  ;;  %v2805_v46 = vrot.slane %v5632_v19, %v7406_v24 }
 0x294   : > { %v4920_v60 = vmax.bf16 %v8607_v52, %v3740_v27  ;;  %v3857_v38 = vpack.i.bf16 %v7809_v3, %v7809_v3  ;;  %v2806_v18 = vcombine.high %v2798_v20, %v2798_v20  ;;  %v2814_v6 = vrot.slane %v2798_v20, %v7406_v24 }
 0x295   : > { %v3753_v15 = vpack.i.bf16 %v3752_v29, %v3752_v29  ;;  %v5115_v22 = vsel %vm5098_vm12, %v5047_v37, %v5114_v17  ;;  %v2807_v43 = vcombine.high %v2805_v46, %v2805_v46  ;;  %v2821_v16 = vrot.slane %v2805_v46, %v7406_v24  ;;  %v7878_v17 = vpop.f32.mrf.mxu0 }
 0x296   : > { %v5048_v7 = vunpack.c.l.b16 %v4920_v60  ;;  %v2828_v26 = vrot.slane %v2806_v18, %v7406_v24  ;;  %v2836_v51 = vcombine.high %v2814_v6, %v2814_v6  ;;  %v3963_v36 = vsel %vm3232_vm2, %v2814_v6, 4286644096 }
 0x297   : > { %v4921_v0 = vmax.bf16 %v3857_v38, %v3753_v15  ;;  %v7863_v3 = vrot.slane %v2807_v43, %v7406_v24  ;;  %v3965_v13 = vunpack.i.l.bf16 %v3963_v36  ;;  %v7865_v21 = vmax.f32 %v2365_v45, 0.0 }
 0x298   : > { %v5116_v1 = vsel %vm5100_vm13, %v5048_v7, %v5115_v22  ;;  %v2838_v12 = vcombine.high %v2828_v26, %v2828_v26  ;;  %v3966_v2 = vunpack.i.h.bf16 %v3963_v36  ;;  %v3976_v39 = vsel %vm3232_vm2, %v2828_v26, 4286644096 }
 0x299   : > { %v3989_v41 = vsel %vm3232_vm2, %v2836_v51, 4286644096  ;;  %v5049_v11 = vunpack.c.l.b16 %v4921_v0  ;;  %v2837_v56 = vcombine.high %v2821_v16, %v2821_v16  ;;  %v3978_v33 = vunpack.i.l.bf16 %v3976_v39 }
 0x29a   : > { %v3979_v30 = vunpack.i.h.bf16 %v3976_v39  ;;  %v3967_v62 = vmax.f32 %v3965_v13, %v3966_v2  ;;  %v3991_v49 = vunpack.i.l.bf16 %v3989_v41  ;;  %v3992_v31 = vunpack.i.h.bf16 %v3989_v41  ;;  %v6015_v39 = vpop.f32.mrf.mxu0 }
 0x29b   : > { %v4002_v25 = vsel %vm3232_vm2, %v2838_v12, 4286644096  ;;  %v5117_v23 = vsel %vm5102_vm14, %v5049_v11, %v5116_v1  ;;  %v4015_v59 = vsel %vm3232_vm2, %v2821_v16, 4286644096  ;;  %v4028_v37 = vsel %vm3232_vm2, %v7863_v3, 4286644096 }
 0x29c   : > { %v3980_v57 = vmax.f32 %v3978_v33, %v3979_v30  ;;  %v4004_v32 = vunpack.i.l.bf16 %v4002_v25  ;;  %v4005_v61 = vunpack.i.h.bf16 %v4002_v25  ;;  %v5155_v10 = vpack.c.b16 %v5117_v23, %v5117_v23 }
 0x29d   : > { %v3968_v27 = vrot.slane %v3967_v62, 4  ;;  %v3993_v8 = vmax.f32 %v3991_v49, %v3992_v31  ;;  %v4017_v28 = vunpack.i.l.bf16 %v4015_v59  ;;  %v4018_v44 = vunpack.i.h.bf16 %v4015_v59 }
 0x29e   : > { %v3981_v42 = vrot.slane %v3980_v57, 4  ;;  %v4006_v34 = vmax.f32 %v4004_v32, %v4005_v61  ;;  %v5183_v19 = vshrl.u32 %v5155_v10, 16  ;;  %v5186_v52 = vshll.u32 %v5155_v10, 16 }
 0x29f   : > { %v3969_v60 = vmax.f32 %v3967_v62, %v3968_v27  ;;  %v3994_v50 = vrot.slane %v3993_v8, 4  ;;  %v4019_v29 = vmax.f32 %v4017_v28, %v4018_v44  ;;  %v4030_v18 = vunpack.i.l.bf16 %v4028_v37 }
 0x2a0   : > { %v3982_v20 = vmax.f32 %v3980_v57, %v3981_v42  ;;  %v4007_v45 = vrot.slane %v4006_v34, 4  ;;  %v5185_v46 = vrot.slane %v5183_v19, 7  ;;  %v4031_v43 = vunpack.i.h.bf16 %v4028_v37 }
 0x2a1   : > { %v3970_v38 = vrot.slane %v3969_v60, 2  ;;  %v3995_v7 = vmax.f32 %v3993_v8, %v3994_v50  ;;  %v4020_v22 = vrot.slane %v4019_v29, 4  ;;  %v4041_v51 = vsel %vm3232_vm2, %v2837_v56, 4286644096  ;;  %v6016_v8 = vpop.f32.mrf.mxu0 }
 0x2a2   : > { %v3983_v6 = vrot.slane %v3982_v20, 2  ;;  %v4008_v15 = vmax.f32 %v4006_v34, %v4007_v45  ;;  %v5188_v16 = vor.u32 %v5186_v52, %v5185_v46  ;;  %v4032_v12 = vmax.f32 %v4030_v18, %v4031_v43  ;;  %v6199_v18 = vpop.f32.mrf.mxu1 }
 0x2a3   : > { %v3971_v1 = vmax.f32 %v3969_v60, %v3970_v38  ;;  %v3996_v26 = vrot.slane %v3995_v7, 2  ;;  %v4021_v13 = vmax.f32 %v4019_v29, %v4020_v22  ;;  %v2839_v41 = vcombine.high %v7863_v3, %v7863_v3 }
 0x2a4   : > { %v3984_v36 = vmax.f32 %v3982_v20, %v3983_v6  ;;  %v4009_v0 = vrot.slane %v4008_v15, 2  ;;  %v5239_v2 = vsel %vm7308_vm4, 0, %v5188_v16  ;;  %v4043_v57 = vunpack.i.l.bf16 %v4041_v51 }
 0x2a5   : > { %v3972_v11 = vrot.slane %v3971_v1, 1  ;;  %v3997_v33 = vmax.f32 %v3995_v7, %v3996_v26  ;;  %v5251_v30 = vsel %vm7320_vm7, %v5239_v2, 0  ;;  %v4022_v49 = vrot.slane %v4021_v13, 2 }
 0x2a6   : > { %v3985_v62 = vrot.slane %v3984_v36, 1  ;;  %v4010_v56 = vmax.f32 %v4008_v15, %v4009_v0  ;;  %v5647_v31 = vcombine.low %v5251_v30, %v5251_v30  ;;  %v5648_v25 = vcombine.high %v5251_v30, %v5251_v30 }
 0x2a7   : > { %v3998_v23 = vrot.slane %v3997_v33, 1  ;;  %v7887_v32 = vmax.f32 %v3971_v1, %v3972_v11  ;;  %v4023_v10 = vmax.f32 %v4021_v13, %v4022_v49  ;;  %v4033_v27 = vrot.slane %v4032_v12, 4 }
 0x2a8   : > { %v4011_v61 = vrot.slane %v4010_v56, 1  ;;  %v7891_v3 = vadd.f32 %v7867_v5, %v7852_v40  ;;  %5326 = vst [vmem:[%s7334_s18 + $0x18] sm:$0xf] %v5647_v31  ;;  %5327 = vst [vmem:[%s7334_s18 + $0x1c] sm:$0x1] %v5648_v25  ;;  %v7895_v59 = vmax.f32 %v3984_v36, %v3985_v62  ;;  %v4044_v42 = vunpack.i.h.bf16 %v4041_v51  ;;  %v8608_v62 = vld [vmem:[#allocation22_spill] sm:$0xff] }
 0x2a9   : > { %v4054_v34 = vsel %vm3232_vm2, %v2839_v41, 4286644096  ;;  %v2396_v28 = vmax.f32 %v7790_v48, 0.0  ;;  %v7899_v44 = vmax.f32 %v3997_v33, %v3998_v23  ;;  %v4034_v52 = vmax.f32 %v4032_v12, %v4033_v27 }
 0x2aa   : > { %v7901_v19 = vmax.f32 %v4010_v56, %v4011_v61  ;;  %v4024_v60 = vrot.slane %v4023_v10, 1  ;;  %v4045_v50 = vmax.f32 %v4043_v57, %v4044_v42  ;;  %v4056_v20 = vunpack.i.l.bf16 %v4054_v34  ;;  %v8609_v56 = vld [vmem:[#allocation2_spill] sm:$0xff] }
 0x2ab   : > { %v4057_v40 = vunpack.i.h.bf16 %v4054_v34  ;;  %v7903_v5 = vadd.f32 %v6016_v8, %v6015_v39  ;;  %v3974_v45 = vpack.i.bf16 %v7887_v32, %v7887_v32  ;;  %v4035_v29 = vrot.slane %v4034_v52, 2 }
 0x2ac   : > { %v2422_v37 = vpack.c.bf16 %v7865_v21, %v2396_v28  ;;  %v3987_v48 = vpack.i.bf16 %v7895_v59, %v7895_v59  ;;  %v4046_v46 = vrot.slane %v4045_v50, 4  ;;  %v5631_v7 = vpack.c.bf16 %v7865_v21, %v7865_v21 }
 0x2ad   : > { %v4058_v38 = vmax.f32 %v4056_v20, %v4057_v40  ;;  %v4000_v6 = vpack.i.bf16 %v7899_v44, %v7899_v44  ;;  %v4013_v15 = vpack.i.bf16 %v7901_v19, %v7901_v19  ;;  %v4036_v22 = vmax.f32 %v4034_v52, %v4035_v29 }
 0x2ae   : > { %v2749_v43 = vrot.slane %v2422_v37, %v7406_v24  ;;  %v7917_v16 = vmax.f32 %v4023_v10, %v4024_v60  ;;  %v4047_v1 = vmax.f32 %v4045_v50, %v4046_v46  ;;  %v2756_v51 = vrot.slane %v5631_v7, %v7406_v24 }
 0x2af   : > { %v4059_v26 = vrot.slane %v4058_v38, 4  ;;  %v4037_v36 = vrot.slane %v4036_v22, 1  ;;  %v2259_v13 = vadd.f32 %v6199_v18, %v7737_v55  ;;  %v1599_v49 = vadd.f32 %v8609_v56, %v8608_v62 }
 0x2b0   : > { %v2757_v0 = vcombine.high %v2749_v43, %v2749_v43  ;;  %v2765_v21 = vrot.slane %v2749_v43, %v7406_v24  ;;  %v4048_v12 = vrot.slane %v4047_v1, 2  ;;  %v2758_v39 = vcombine.high %v2756_v51, %v2756_v51 }
 0x2b1   : > { %v4060_v2 = vmax.f32 %v4058_v38, %v4059_v26  ;;  %v2772_v41 = vrot.slane %v2756_v51, %v7406_v24  ;;  %v4026_v31 = vpack.i.bf16 %v7917_v16, %v7917_v16  ;;  %v7929_v25 = vmax.f32 %v4036_v22, %v4037_v36 }
 0x2b2   : > { %v2779_v11 = vrot.slane %v2757_v0, %v7406_v24  ;;  %v2787_v33 = vcombine.high %v2765_v21, %v2765_v21  ;;  %v3859_v30 = vsel %vm3232_vm2, %v2765_v21, 4286644096  ;;  %v4049_v23 = vmax.f32 %v4047_v1, %v4048_v12 }
 0x2b3   : > { %v4061_v55 = vrot.slane %v4060_v2, 2  ;;  %v3861_v61 = vunpack.i.l.bf16 %v3859_v30  ;;  %v3862_v10 = vunpack.i.h.bf16 %v3859_v30  ;;  %v7931_v27 = vadd.f32 %v2259_v13, %v1599_v49 }
 0x2b4   : > { %v2789_v57 = vcombine.high %v2779_v11, %v2779_v11  ;;  %v4050_v8 = vrot.slane %v4049_v23, 1  ;;  %v2786_v42 = vrot.slane %v2758_v39, %v7406_v24  ;;  %v2788_v34 = vcombine.high %v2772_v41, %v2772_v41 }
 0x2b5   : > { %v3872_v28 = vsel %vm3232_vm2, %v2779_v11, 4286644096  ;;  %v3863_v52 = vmax.f32 %v3861_v61, %v3862_v10  ;;  %v3885_v20 = vsel %vm3232_vm2, %v2787_v33, 4286644096  ;;  %v4039_v40 = vpack.i.bf16 %v7929_v25, %v7929_v25 }
 0x2b6   : > { %v3874_v60 = vunpack.i.l.bf16 %v3872_v28  ;;  %v3875_v50 = vunpack.i.h.bf16 %v3872_v28  ;;  %v7938_v29 = vmax.f32 %v4060_v2, %v4061_v55  ;;  %v3887_v37 = vunpack.i.l.bf16 %v3885_v20 }
 0x2b7   : > { %v3888_v46 = vunpack.i.h.bf16 %v3885_v20  ;;  %v3864_v38 = vrot.slane %v3863_v52, 4  ;;  %v3898_v18 = vsel %vm3232_vm2, %v2789_v57, 4286644096  ;;  %v3911_v22 = vsel %vm3232_vm2, %v2772_v41, 4286644096 }
 0x2b8   : > { %v3876_v7 = vmax.f32 %v3874_v60, %v3875_v50  ;;  %v7942_v43 = vmax.f32 %v4049_v23, %v4050_v8  ;;  %v2790_v1 = vcombine.high %v2786_v42, %v2786_v42  ;;  %v3900_v51 = vunpack.i.l.bf16 %v3898_v18 }
 0x2b9   : > { %v3889_v26 = vmax.f32 %v3887_v37, %v3888_v46  ;;  %v3865_v36 = vmax.f32 %v3863_v52, %v3864_v38  ;;  %v3901_v21 = vunpack.i.h.bf16 %v3898_v18  ;;  %v3913_v13 = vunpack.i.l.bf16 %v3911_v22  ;;  %v2250_v38 = vpop.f32.mrf.mxu1 }
 0x2ba   : > { %v3877_v0 = vrot.slane %v3876_v7, 4  ;;  %v4063_v12 = vrot.slane %v7938_v29, 1  ;;  %v3914_v39 = vunpack.i.h.bf16 %v3911_v22  ;;  %v3924_v11 = vsel %vm3232_vm2, %v2786_v42, 4286644096 }
 0x2bb   : > { %v3890_v2 = vrot.slane %v3889_v26, 4  ;;  %v3866_v33 = vrot.slane %v3865_v36, 2  ;;  %v3902_v62 = vmax.f32 %v3900_v51, %v3901_v21  ;;  %v3926_v56 = vunpack.i.l.bf16 %v3924_v11 }
 0x2bc   : > { %v3878_v30 = vmax.f32 %v3876_v7, %v3877_v0  ;;  %v3915_v49 = vmax.f32 %v3913_v13, %v3914_v39  ;;  %v3927_v23 = vunpack.i.h.bf16 %v3924_v11  ;;  %v3937_v55 = vsel %vm3232_vm2, %v2788_v34, 4286644096 }
 0x2bd   : > { %v3891_v41 = vmax.f32 %v3889_v26, %v3890_v2  ;;  %v3867_v57 = vmax.f32 %v3865_v36, %v3866_v33  ;;  %v3903_v10 = vrot.slane %v3902_v62, 4  ;;  %v3939_v8 = vunpack.i.l.bf16 %v3937_v55 }
 0x2be   : > { %v3879_v61 = vrot.slane %v3878_v30, 2  ;;  %v3916_v52 = vrot.slane %v3915_v49, 4  ;;  %v3928_v60 = vmax.f32 %v3926_v56, %v3927_v23  ;;  %v3940_v50 = vunpack.i.h.bf16 %v3937_v55 }
 0x2bf   : > { %v3892_v28 = vrot.slane %v3891_v41, 2  ;;  %v3868_v20 = vrot.slane %v3867_v57, 1  ;;  %v3904_v42 = vmax.f32 %v3902_v62, %v3903_v10  ;;  %v3950_v46 = vsel %vm3232_vm2, %v2790_v1, 4286644096  ;;  %v6200_v62 = vpop.f32.mrf.mxu1 }
 0x2c0   : > { %v3880_v37 = vmax.f32 %v3878_v30, %v3879_v61  ;;  %v3917_v18 = vmax.f32 %v3915_v49, %v3916_v52  ;;  %v3929_v22 = vrot.slane %v3928_v60, 4  ;;  %v3941_v26 = vmax.f32 %v3939_v8, %v3940_v50  ;;  %v6018_v50 = vpop.f32.mrf.mxu0 }
 0x2c1   : > { %v3893_v7 = vmax.f32 %v3891_v41, %v3892_v28  ;;  %v3869_v51 = vmax.f32 %v3867_v57, %v3868_v20  ;;  %v3905_v36 = vrot.slane %v3904_v42, 2  ;;  %v3952_v0 = vunpack.i.l.bf16 %v3950_v46 }
 0x2c2   : > { %v3881_v34 = vrot.slane %v3880_v37, 1  ;;  %v3918_v13 = vrot.slane %v3917_v18, 2  ;;  %v3930_v2 = vmax.f32 %v3928_v60, %v3929_v22  ;;  %v3942_v39 = vrot.slane %v3941_v26, 4 }
 0x2c3   : > { %v3894_v21 = vrot.slane %v3893_v7, 1  ;;  %v3870_v11 = vpack.i.bf16 %v3869_v51, %v3869_v51  ;;  %v3906_v56 = vmax.f32 %v3904_v42, %v3905_v36  ;;  %v3953_v30 = vunpack.i.h.bf16 %v3950_v46 }
 0x2c4   : > { %v3882_v33 = vmax.f32 %v3880_v37, %v3881_v34  ;;  %v3919_v1 = vmax.f32 %v3917_v18, %v3918_v13  ;;  %v3931_v55 = vrot.slane %v3930_v2, 2  ;;  %v3943_v41 = vmax.f32 %v3941_v26, %v3942_v39 }
 0x2c5   : > { %v3895_v23 = vmax.f32 %v3893_v7, %v3894_v21  ;;  %v3907_v61 = vrot.slane %v3906_v56, 1  ;;  %v3954_v10 = vmax.f32 %v3952_v0, %v3953_v30  ;;  %v4922_v57 = vmax.bf16 %v3974_v45, %v3870_v11  ;;  %v2253_v7 = vpop.f32.mrf.mxu1 }
 0x2c6   : > { %v3883_v49 = vpack.i.bf16 %v3882_v33, %v3882_v33  ;;  %v3920_v28 = vrot.slane %v3919_v1, 1  ;;  %v3932_v52 = vmax.f32 %v3930_v2, %v3931_v55  ;;  %v3944_v60 = vrot.slane %v3943_v41, 2 }
 0x2c7   : > { %v3896_v8 = vpack.i.bf16 %v3895_v23, %v3895_v23  ;;  %v4052_v20 = vpack.i.bf16 %v7942_v43, %v7942_v43  ;;  %v3908_v37 = vmax.f32 %v3906_v56, %v3907_v61  ;;  %v3955_v42 = vrot.slane %v3954_v10, 4 }
 0x2c8   : > { %v4923_v46 = vmax.bf16 %v3987_v48, %v3883_v49  ;;  %v3921_v18 = vmax.f32 %v3919_v1, %v3920_v28  ;;  %v3933_v22 = vrot.slane %v3932_v52, 1  ;;  %v3945_v26 = vmax.f32 %v3943_v41, %v3944_v60  ;;  %v6019_v48 = vpop.f32.mrf.mxu0  ;;  %v8610_v41 = vld [vmem:[#allocation19_spill] sm:$0xff] }
 0x2c9   : > { %v4924_v32 = vmax.bf16 %v4000_v6, %v3896_v8  ;;  %v3909_v45 = vpack.i.bf16 %v3908_v37, %v3908_v37  ;;  %v3956_v51 = vmax.f32 %v3954_v10, %v3955_v42  ;;  %v5050_v34 = vunpack.c.l.b16 %v4922_v57  ;;  %v6203_v6 = vpop.f32.mrf.mxu1  ;;  %v8611_v49 = vld [vmem:[#allocation3_spill] sm:$0xff]  ;;  %v8612_v57 = vld [vmem:[#allocation24_spill] sm:$0xff] }
 0x2ca   : > { %v5051_v36 = vunpack.c.l.b16 %v4923_v46  ;;  %v3922_v0 = vpack.i.bf16 %v3921_v18, %v3921_v18  ;;  %v3934_v43 = vmax.f32 %v3932_v52, %v3933_v22  ;;  %v3946_v21 = vrot.slane %v3945_v26, 1  ;;  %v6021_v10 = vpop.f32.mrf.mxu0  ;;  %v8613_v8 = vld [vmem:[#allocation4_spill] sm:$0xff] }
 0x2cb   : > { %v5052_v13 = vunpack.c.l.b16 %v4924_v32  ;;  %v4064_v59 = vmax.f32 %v7938_v29, %v4063_v12  ;;  %v3957_v2 = vrot.slane %v3956_v51, 2  ;;  %v4925_v39 = vmax.bf16 %v4013_v15, %v3909_v45  ;;  %v2266_v52 = vpop.f32.mrf.mxu1  ;;  %v8615_v32 = vld [vmem:[#allocation5_spill] sm:$0xff] }
 0x2cc   : > { %v5118_v44 = vsel %vm5090_vm8, %v5051_v36, %v5050_v34  ;;  %v3935_v11 = vpack.i.bf16 %v3934_v43, %v3934_v43  ;;  %v3947_v33 = vmax.f32 %v3945_v26, %v3946_v21  ;;  %v4926_v56 = vmax.bf16 %v4026_v31, %v3922_v0  ;;  %v8614_v26 = vld [vmem:[#allocation21_spill] sm:$0xff]  ;;  %v8617_v36 = vld [vmem:[#allocation7_spill] sm:$0xff] }
 0x2cd   : > { %v5119_v30 = vsel %vm5092_vm9, %v5052_v13, %v5118_v44  ;;  %v3958_v23 = vmax.f32 %v3956_v51, %v3957_v2  ;;  %v5053_v1 = vunpack.c.l.b16 %v4925_v39  ;;  %v2370_v29 = vadd.f32 %v7761_v14, %v7931_v27 }
 0x2ce   : > { %v2251_v12 = vadd.f32 %v7464_v47, %v2250_v38  ;;  %v3948_v19 = vpack.i.bf16 %v3947_v33, %v3947_v33  ;;  %v4927_v15 = vmax.bf16 %v4039_v40, %v3935_v11  ;;  %v5054_v55 = vunpack.c.l.b16 %v4926_v56 }
 0x2cf   : > { %v1591_v61 = vadd.f32 %v8611_v49, %v8610_v41  ;;  %v3959_v16 = vrot.slane %v3958_v23, 1  ;;  %v5120_v31 = vsel %vm5094_vm10, %v5053_v1, %v5119_v30  ;;  %v1602_v28 = vadd.f32 %v8613_v8, %v8612_v57  ;;  %v8619_v1 = vld [vmem:[#allocation8_spill] sm:$0xff]  ;;  %v8622_v57 = vld [vmem:[#allocation27_spill] sm:$0xff] }
 0x2d0   : > { %v2262_v27 = vadd.f32 %v6200_v62, %v7747_v54  ;;  %v4928_v47 = vmax.bf16 %v4052_v20, %v3948_v19  ;;  %v5055_v38 = vunpack.c.l.b16 %v4927_v15  ;;  %v5121_v60 = vsel %vm5096_vm11, %v5054_v55, %v5120_v31  ;;  %v6022_v54 = vpop.f32.mrf.mxu0  ;;  %v8616_v20 = vld [vmem:[#allocation28_spill] sm:$0xff]  ;;  %v8620_v15 = vld [vmem:[#allocation29_spill] sm:$0xff]  ;;  %v8623_v8 = vld [vmem:[#allocation11_spill] sm:$0xff] }
 0x2d1   : > { %v2329_v25 = vadd.f32 %v2251_v12, %v1591_v61  ;;  %v4065_v40 = vpack.i.bf16 %v4064_v59, %v4064_v59  ;;  %v6020_v37 = vadd.f32 %v6019_v48, %v6018_v50  ;;  %v3960_v42 = vmax.f32 %v3958_v23, %v3959_v16  ;;  %v6204_v50 = vpop.f32.mrf.mxu1  ;;  %v8618_v23 = vld [vmem:[#allocation26_spill] sm:$0xff] }
 0x2d2   : > { %v2332_v46 = vadd.f32 %v2262_v27, %v1602_v28  ;;  %v5056_v18 = vunpack.c.l.b16 %v4928_v47  ;;  %v5122_v22 = vsel %vm5098_vm12, %v5055_v38, %v5121_v60  ;;  %v1594_v45 = vadd.f32 %v8615_v32, %v8614_v26 }
 0x2d3   : > { %v2254_v51 = vadd.f32 %v7615_v58, %v2253_v7  ;;  %v3961_v34 = vpack.i.bf16 %v3960_v42, %v3960_v42  ;;  %v1615_v0 = vadd.f32 %v8617_v36, %v8616_v20  ;;  %v2275_v43 = vadd.f32 %v6203_v6, %v7903_v5 }
 0x2d4   : > { %v2371_v62 = vadd.f32 %v7761_v14, %v2332_v46  ;;  %v5123_v21 = vsel %vm5100_vm13, %v5056_v18, %v5122_v22  ;;  %v2402_v13 = vmax.f32 %v2370_v29, 0.0  ;;  %v2368_v59 = vadd.f32 %v7761_v14, %v2329_v25 }
 0x2d5   : > { %v2330_v48 = vadd.f32 %v2254_v51, %v1594_v45  ;;  %v4929_v2 = vmax.bf16 %v4065_v40, %v3961_v34  ;;  %v2335_v44 = vadd.f32 %v2275_v43, %v1615_v0  ;;  %v2267_v58 = vadd.f32 %v7891_v3, %v2266_v52 }
 0x2d6   : > { %v2403_v39 = vmax.f32 %v2371_v62, 0.0  ;;  %v7996_v7 = vadd.f32 %v7878_v17, %v7873_v35  ;;  %v7998_v11 = vadd.f32 %v6022_v54, %v6021_v10  ;;  %v2278_v6 = vadd.f32 %v6204_v50, %v6020_v37  ;;  %v8621_v35 = vld [vmem:[#allocation10_spill] sm:$0xff] }
 0x2d7   : > { %v2369_v5 = vadd.f32 %v7761_v14, %v2330_v48  ;;  %v5057_v33 = vunpack.c.l.b16 %v4929_v2  ;;  %v1607_v29 = vadd.f32 %v8619_v1, %v8618_v23  ;;  %v2400_v12 = vmax.f32 %v2368_v59, 0.0 }
 0x2d8   : > { %v2425_v56 = vpack.c.bf16 %v2403_v39, %v2402_v13  ;;  %v5634_v30 = vpack.c.bf16 %v2403_v39, %v2403_v39  ;;  %v8006_v3 = vadd.f32 %v7761_v14, %v2335_v44  ;;  %v1618_v17 = vadd.f32 %v8621_v35, %v8620_v15 }
 0x2d9   : > { %v8003_v19 = vmax.f32 %v2369_v5, 0.0  ;;  %v5124_v55 = vsel %vm5102_vm14, %v5057_v33, %v5123_v21  ;;  %v8013_v61 = vadd.f32 %v2267_v58, %v1607_v29  ;;  %v8020_v14 = vadd.f32 %v8623_v8, %v8622_v57 }
 0x2da   : > { %v2896_v41 = vrot.slane %v2425_v56, %v7406_v24  ;;  %v2903_v49 = vrot.slane %v5634_v30, %v7406_v24  ;;  %v5156_v16 = vpack.c.b16 %v5124_v55, %v5124_v55  ;;  %v8016_v10 = vadd.f32 %v2278_v6, %v1618_v17 }
 0x2db   : > { %v2424_v31 = vpack.c.bf16 %v8003_v19, %v2400_v12  ;;  %v5633_v25 = vpack.c.bf16 %v8003_v19, %v8003_v19  ;;  %v2406_v40 = vmax.f32 %v8006_v3, 0.0 }
 0x2dc   : > { %v2904_v28 = vcombine.high %v2896_v41, %v2896_v41  ;;  %v2905_v27 = vcombine.high %v2903_v49, %v2903_v49  ;;  %v2912_v52 = vrot.slane %v2896_v41, %v7406_v24  ;;  %v2919_v47 = vrot.slane %v2903_v49, %v7406_v24 }
 0x2dd   : > { %v5190_v38 = vshrl.u32 %v5156_v16, 16  ;;  %v5193_v60 = vshll.u32 %v5156_v16, 16  ;;  %v8030_v18 = vrot.slane %v2424_v31, %v7406_v24 }
 0x2de   : > { %v2926_v37 = vrot.slane %v2904_v28, %v7406_v24  ;;  %v2933_v42 = vrot.slane %v2905_v27, %v7406_v24  ;;  %v2934_v46 = vcombine.high %v2912_v52, %v2912_v52  ;;  %v2935_v26 = vcombine.high %v2919_v47, %v2919_v47 }
 0x2df   : > { %v5192_v22 = vrot.slane %v5190_v38, 7  ;;  %v4171_v32 = vsel %vm3232_vm2, %v2912_v52, 4286644096  ;;  %v4223_v45 = vsel %vm3232_vm2, %v2919_v47, 4286644096 }
 0x2e0   : > { %v2936_v51 = vcombine.high %v2926_v37, %v2926_v37  ;;  %v2937_v34 = vcombine.high %v2933_v42, %v2933_v42  ;;  %v4173_v54 = vunpack.i.l.bf16 %v4171_v32  ;;  %v4174_v62 = vunpack.i.h.bf16 %v4171_v32 }
 0x2e1   : > { %v5195_v20 = vor.u32 %v5193_v60, %v5192_v22  ;;  %v4184_v36 = vsel %vm3232_vm2, %v2926_v37, 4286644096  ;;  %v4197_v0 = vsel %vm3232_vm2, %v2934_v46, 4286644096  ;;  %v4225_v43 = vunpack.i.l.bf16 %v4223_v45 }
 0x2e2   : > { %v4175_v50 = vmax.f32 %v4173_v54, %v4174_v62  ;;  %v4186_v21 = vunpack.i.l.bf16 %v4184_v36  ;;  %v4187_v13 = vunpack.i.h.bf16 %v4184_v36  ;;  %v4199_v59 = vunpack.i.l.bf16 %v4197_v0 }
 0x2e3   : > { %v5240_v48 = vsel %vm7308_vm4, 0, %v5195_v20  ;;  %v4200_v2 = vunpack.i.h.bf16 %v4197_v0  ;;  %v4210_v39 = vsel %vm3232_vm2, %v2936_v51, 4286644096  ;;  %v4226_v44 = vunpack.i.h.bf16 %v4223_v45 }
 0x2e4   : > { %v5252_v58 = vsel %vm7320_vm7, %v5240_v48, 0  ;;  %v4176_v5 = vrot.slane %v4175_v50, 4  ;;  %v4188_v6 = vmax.f32 %v4186_v21, %v4187_v13  ;;  %v4212_v33 = vunpack.i.l.bf16 %v4210_v39 }
 0x2e5   : > { %v5649_v56 = vcombine.low %v5252_v58, %v5252_v58  ;;  %v5650_v30 = vcombine.high %v5252_v58, %v5252_v58  ;;  %v4201_v23 = vmax.f32 %v4199_v59, %v4200_v2  ;;  %v4213_v1 = vunpack.i.h.bf16 %v4210_v39 }
 0x2e6   : > { %v4177_v29 = vmax.f32 %v4175_v50, %v4176_v5  ;;  %v4189_v12 = vrot.slane %v4188_v6, 4  ;;  %v4227_v15 = vmax.f32 %v4225_v43, %v4226_v44  ;;  %v4236_v35 = vsel %vm3232_vm2, %v2933_v42, 4286644096 }
 0x2e7   : > { %5328 = vst [vmem:[%s7334_s18 + $0x20] sm:$0xf] %v5649_v56  ;;  %5329 = vst [vmem:[%s7334_s18 + $0x24] sm:$0x1] %v5650_v30  ;;  %v4202_v17 = vrot.slane %v4201_v23, 4  ;;  %v4214_v55 = vmax.f32 %v4212_v33, %v4213_v1  ;;  %v4238_v41 = vunpack.i.l.bf16 %v4236_v35  ;;  %v4239_v49 = vunpack.i.h.bf16 %v4236_v35 }
 0x2e8   : > { %v4178_v16 = vrot.slane %v4177_v29, 2  ;;  %v4190_v31 = vmax.f32 %v4188_v6, %v4189_v12  ;;  %v4228_v57 = vrot.slane %v4227_v15, 4  ;;  %v4249_v8 = vsel %vm3232_vm2, %v2935_v26, 4286644096 }
 0x2e9   : > { %v4203_v28 = vmax.f32 %v4201_v23, %v4202_v17  ;;  %v4215_v27 = vrot.slane %v4214_v55, 4  ;;  %v4240_v52 = vmax.f32 %v4238_v41, %v4239_v49  ;;  %v4251_v47 = vunpack.i.l.bf16 %v4249_v8 }
 0x2ea   : > { %v4179_v38 = vmax.f32 %v4177_v29, %v4178_v16  ;;  %v4191_v60 = vrot.slane %v4190_v31, 2  ;;  %v4229_v37 = vmax.f32 %v4227_v15, %v4228_v57  ;;  %v4252_v46 = vunpack.i.h.bf16 %v4249_v8  ;;  %v8063_v15 = vld [vmem:[%s8553_s2] ss:$0 sm:$0xff] }
 0x2eb   : > { %v4204_v42 = vrot.slane %v4203_v28, 2  ;;  %v4216_v22 = vmax.f32 %v4214_v55, %v4215_v27  ;;  %v4241_v32 = vrot.slane %v4240_v52, 4  ;;  %v4262_v45 = vsel %vm3232_vm2, %v2937_v34, 4286644096 }
 0x2ec   : > { %v4180_v51 = vrot.slane %v4179_v38, 1  ;;  %v4192_v54 = vmax.f32 %v4190_v31, %v4191_v60  ;;  %v4230_v62 = vrot.slane %v4229_v37, 2  ;;  %v4253_v20 = vmax.f32 %v4251_v47, %v4252_v46 }
 0x2ed   : > { %v4205_v36 = vmax.f32 %v4203_v28, %v4204_v42  ;;  %v4217_v0 = vrot.slane %v4216_v22, 2  ;;  %v4242_v26 = vmax.f32 %v4240_v52, %v4241_v32  ;;  %v4264_v43 = vunpack.i.l.bf16 %v4262_v45 }
 0x2ee   : > { %v8046_v50 = vmax.f32 %v4179_v38, %v4180_v51  ;;  %v4193_v21 = vrot.slane %v4192_v54, 1  ;;  %v4231_v13 = vmax.f32 %v4229_v37, %v4230_v62  ;;  %v4254_v59 = vrot.slane %v4253_v20, 4 }
 0x2ef   : > { %v4206_v48 = vrot.slane %v4205_v36, 1  ;;  %v4218_v2 = vmax.f32 %v4216_v22, %v4217_v0  ;;  %v4243_v39 = vrot.slane %v4242_v26, 2  ;;  %v4265_v44 = vunpack.i.h.bf16 %v4262_v45 }
 0x2f0   : > { %v4232_v58 = vrot.slane %v4231_v13, 1  ;;  %v4255_v5 = vmax.f32 %v4253_v20, %v4254_v59  ;;  %v2854_v34 = vrot.slane %v5633_v25, %v7406_v24  ;;  %v2855_v6 = vcombine.high %v8030_v18, %v8030_v18 }
 0x2f1   : > { %v8054_v33 = vmax.f32 %v4192_v54, %v4193_v21  ;;  %v4219_v56 = vrot.slane %v4218_v2, 1  ;;  %v4244_v30 = vmax.f32 %v4242_v26, %v4243_v39  ;;  %v4266_v23 = vmax.f32 %v4264_v43, %v4265_v44 }
 0x2f2   : > { %v8056_v1 = vmax.f32 %v4205_v36, %v4206_v48  ;;  %v8058_v29 = vmax.f32 %v4231_v13, %v4232_v58  ;;  %v4256_v12 = vrot.slane %v4255_v5, 2  ;;  %v8067_v19 = vadd.f32 %v8063_v15, %v8013_v61 }
 0x2f3   : > { %v4182_v25 = vpack.i.bf16 %v8046_v50, %v8046_v50  ;;  %v8071_v35 = vmax.f32 %v4218_v2, %v4219_v56  ;;  %v4245_v17 = vrot.slane %v4244_v30, 1  ;;  %v4267_v55 = vrot.slane %v4266_v23, 4 }
 0x2f4   : > { %v4257_v41 = vmax.f32 %v4255_v5, %v4256_v12  ;;  %v2856_v49 = vcombine.high %v2854_v34, %v2854_v34  ;;  %v2863_v16 = vrot.slane %v8030_v18, %v7406_v24  ;;  %v2870_v31 = vrot.slane %v2854_v34, %v7406_v24 }
 0x2f5   : > { %v4195_v57 = vpack.i.bf16 %v8054_v33, %v8054_v33  ;;  %v8078_v8 = vmax.f32 %v4244_v30, %v4245_v17  ;;  %v4268_v61 = vmax.f32 %v4266_v23, %v4267_v55  ;;  %v2877_v28 = vrot.slane %v2855_v6, %v7406_v24 }
 0x2f6   : > { %v4208_v27 = vpack.i.bf16 %v8056_v1, %v8056_v1  ;;  %v4234_v52 = vpack.i.bf16 %v8058_v29, %v8058_v29  ;;  %v4258_v47 = vrot.slane %v4257_v41, 1  ;;  %v2885_v38 = vcombine.high %v2863_v16, %v2863_v16 }
 0x2f7   : > { %v4221_v18 = vpack.i.bf16 %v8071_v35, %v8071_v35  ;;  %v4269_v60 = vrot.slane %v4268_v61, 2  ;;  %v2887_v37 = vcombine.high %v2877_v28, %v2877_v28  ;;  %v4067_v46 = vsel %vm3232_vm2, %v2863_v16, 4286644096 }
 0x2f8   : > { %v2884_v42 = vrot.slane %v2856_v49, %v7406_v24  ;;  %v2886_v22 = vcombine.high %v2870_v31, %v2870_v31  ;;  %v4069_v32 = vunpack.i.l.bf16 %v4067_v46  ;;  %v4070_v45 = vunpack.i.h.bf16 %v4067_v46 }
 0x2f9   : > { %v4247_v51 = vpack.i.bf16 %v8078_v8, %v8078_v8  ;;  %v4080_v54 = vsel %vm3232_vm2, %v2877_v28, 4286644096  ;;  %v4093_v62 = vsel %vm3232_vm2, %v2885_v38, 4286644096  ;;  %v4106_v20 = vsel %vm3232_vm2, %v2887_v37, 4286644096 }
 0x2fa   : > { %v8094_v36 = vmax.f32 %v4257_v41, %v4258_v47  ;;  %v4071_v0 = vmax.f32 %v4069_v32, %v4070_v45  ;;  %v4082_v26 = vunpack.i.l.bf16 %v4080_v54  ;;  %v4083_v43 = vunpack.i.h.bf16 %v4080_v54 }
 0x2fb   : > { %v8096_v21 = vmax.f32 %v4268_v61, %v4269_v60  ;;  %v4095_v13 = vunpack.i.l.bf16 %v4093_v62  ;;  %v4096_v59 = vunpack.i.h.bf16 %v4093_v62  ;;  %v4108_v48 = vunpack.i.l.bf16 %v4106_v20 }
 0x2fc   : > { %v4072_v2 = vrot.slane %v4071_v0, 4  ;;  %v4084_v39 = vmax.f32 %v4082_v26, %v4083_v43  ;;  %v4109_v44 = vunpack.i.h.bf16 %v4106_v20  ;;  %v4119_v58 = vsel %vm3232_vm2, %v2870_v31, 4286644096 }
 0x2fd   : > { %v2888_v5 = vcombine.high %v2884_v42, %v2884_v42  ;;  %v4097_v34 = vmax.f32 %v4095_v13, %v4096_v59  ;;  %v4121_v6 = vunpack.i.l.bf16 %v4119_v58  ;;  %v4122_v56 = vunpack.i.h.bf16 %v4119_v58 }
 0x2fe   : > { %v4073_v30 = vmax.f32 %v4071_v0, %v4072_v2  ;;  %v4085_v23 = vrot.slane %v4084_v39, 4  ;;  %v4110_v12 = vmax.f32 %v4108_v48, %v4109_v44  ;;  %v4132_v17 = vsel %vm3232_vm2, %v2884_v42, 4286644096 }
 0x2ff   : > { %v4271_v55 = vrot.slane %v8096_v21, 1  ;;  %v4098_v41 = vrot.slane %v4097_v34, 4  ;;  %v4123_v49 = vmax.f32 %v4121_v6, %v4122_v56  ;;  %v4134_v16 = vunpack.i.l.bf16 %v4132_v17 }
 0x300   : > { %v4074_v61 = vrot.slane %v4073_v30, 2  ;;  %v4086_v28 = vmax.f32 %v4084_v39, %v4085_v23  ;;  %v4111_v47 = vrot.slane %v4110_v12, 4  ;;  %v4135_v38 = vunpack.i.h.bf16 %v4132_v17 }
 0x301   : > { %v4099_v60 = vmax.f32 %v4097_v34, %v4098_v41  ;;  %v4124_v31 = vrot.slane %v4123_v49, 4  ;;  %v4145_v37 = vsel %vm3232_vm2, %v2886_v22, 4286644096  ;;  %v4158_v46 = vsel %vm3232_vm2, %v2888_v5, 4286644096  ;;  %v8103_v34 = vpop.f32.mrf.mxu0 }
 0x302   : > { %v4075_v32 = vmax.f32 %v4073_v30, %v4074_v61  ;;  %v4087_v45 = vrot.slane %v4086_v28, 2  ;;  %v4112_v54 = vmax.f32 %v4110_v12, %v4111_v47  ;;  %v4136_v62 = vmax.f32 %v4134_v16, %v4135_v38 }
 0x303   : > { %v4100_v42 = vrot.slane %v4099_v60, 2  ;;  %v4125_v20 = vmax.f32 %v4123_v49, %v4124_v31  ;;  %v4147_v0 = vunpack.i.l.bf16 %v4145_v37  ;;  %v4148_v26 = vunpack.i.h.bf16 %v4145_v37  ;;  %v8105_v31 = vpop.f32.mrf.mxu0 }
 0x304   : > { %v4076_v43 = vrot.slane %v4075_v32, 1  ;;  %v4088_v13 = vmax.f32 %v4086_v28, %v4087_v45  ;;  %v4113_v59 = vrot.slane %v4112_v54, 2  ;;  %v4137_v48 = vrot.slane %v4136_v62, 4 }
 0x305   : > { %v4101_v2 = vmax.f32 %v4099_v60, %v4100_v42  ;;  %v4126_v39 = vrot.slane %v4125_v20, 2  ;;  %v4149_v44 = vmax.f32 %v4147_v0, %v4148_v26  ;;  %v4160_v58 = vunpack.i.l.bf16 %v4158_v46 }
 0x306   : > { %v4077_v22 = vmax.f32 %v4075_v32, %v4076_v43  ;;  %v4089_v5 = vrot.slane %v4088_v13, 1  ;;  %v4114_v6 = vmax.f32 %v4112_v54, %v4113_v59  ;;  %v4138_v56 = vmax.f32 %v4136_v62, %v4137_v48 }
 0x307   : > { %v4102_v30 = vrot.slane %v4101_v2, 1  ;;  %v4127_v23 = vmax.f32 %v4125_v20, %v4126_v39  ;;  %v4150_v12 = vrot.slane %v4149_v44, 4  ;;  %v4161_v17 = vunpack.i.h.bf16 %v4158_v46 }
 0x308   : > { %v4078_v41 = vpack.i.bf16 %v4077_v22, %v4077_v22  ;;  %v4090_v49 = vmax.f32 %v4088_v13, %v4089_v5  ;;  %v4115_v16 = vrot.slane %v4114_v6, 1  ;;  %v4139_v61 = vrot.slane %v4138_v56, 2  ;;  %v2269_v5 = vpop.f32.mrf.mxu1 }
 0x309   : > { %v4103_v28 = vmax.f32 %v4101_v2, %v4102_v30  ;;  %v4128_v47 = vrot.slane %v4127_v23, 1  ;;  %v4151_v38 = vmax.f32 %v4149_v44, %v4150_v12  ;;  %v4162_v60 = vmax.f32 %v4160_v58, %v4161_v17 }
 0x30a   : > { %v4091_v37 = vpack.i.bf16 %v4090_v49, %v4090_v49  ;;  %v4116_v45 = vmax.f32 %v4114_v6, %v4115_v16  ;;  %v4140_v32 = vmax.f32 %v4138_v56, %v4139_v61  ;;  %v4930_v54 = vmax.bf16 %v4182_v25, %v4078_v41 }
 0x30b   : > { %v4104_v62 = vpack.i.bf16 %v4103_v28, %v4103_v28  ;;  %v4129_v42 = vmax.f32 %v4127_v23, %v4128_v47  ;;  %v4152_v46 = vrot.slane %v4151_v38, 2  ;;  %v4163_v20 = vrot.slane %v4162_v60, 4 }
 0x30c   : > { %v4272_v0 = vmax.f32 %v8096_v21, %v4271_v55  ;;  %v4117_v26 = vpack.i.bf16 %v4116_v45, %v4116_v45  ;;  %v4141_v43 = vrot.slane %v4140_v32, 1  ;;  %v4931_v13 = vmax.bf16 %v4195_v57, %v4091_v37  ;;  %v6027_v55 = vpop.f32.mrf.mxu0 }
 0x30d   : > { %v4130_v59 = vpack.i.bf16 %v4129_v42, %v4129_v42  ;;  %v4153_v48 = vmax.f32 %v4151_v38, %v4152_v46  ;;  %v4164_v2 = vmax.f32 %v4162_v60, %v4163_v20  ;;  %v4932_v50 = vmax.bf16 %v4208_v27, %v4104_v62  ;;  %v6207_v62 = vpop.f32.mrf.mxu1  ;;  %v8625_v20 = vld [vmem:[#allocation12_spill] sm:$0xff] }
 0x30e   : > { %v4142_v25 = vmax.f32 %v4140_v32, %v4141_v43  ;;  %v4933_v39 = vmax.bf16 %v4221_v18, %v4117_v26  ;;  %v5058_v44 = vunpack.c.l.b16 %v4930_v54  ;;  %v5059_v21 = vunpack.c.l.b16 %v4931_v13 }
 0x30f   : > { %v4154_v58 = vrot.slane %v4153_v48, 1  ;;  %v4165_v22 = vrot.slane %v4164_v2, 2  ;;  %v4934_v33 = vmax.bf16 %v4234_v52, %v4130_v59  ;;  %v5060_v57 = vunpack.c.l.b16 %v4932_v50  ;;  %v6028_v52 = vpop.f32.mrf.mxu0 }
 0x310   : > { %v4143_v6 = vpack.i.bf16 %v4142_v25, %v4142_v25  ;;  %v5061_v56 = vunpack.c.l.b16 %v4933_v39  ;;  %v5125_v1 = vsel %vm5090_vm8, %v5059_v21, %v5058_v44  ;;  %v2375_v27 = vadd.f32 %v8063_v15, %v8016_v10 }
 0x311   : > { %v4155_v35 = vmax.f32 %v4153_v48, %v4154_v58  ;;  %v4166_v18 = vmax.f32 %v4164_v2, %v4165_v22  ;;  %v5062_v30 = vunpack.c.l.b16 %v4934_v33  ;;  %v5126_v23 = vsel %vm5092_vm9, %v5060_v57, %v5125_v1 }
 0x312   : > { %v4935_v12 = vmax.bf16 %v4247_v51, %v4143_v6  ;;  %v5127_v29 = vsel %vm5094_vm10, %v5061_v56, %v5126_v23  ;;  %v2407_v17 = vmax.f32 %v2375_v27, 0.0  ;;  %v2270_v41 = vadd.f32 %v7996_v7, %v2269_v5 }
 0x313   : > { %v4260_v49 = vpack.i.bf16 %v8094_v36, %v8094_v36  ;;  %v4156_v16 = vpack.i.bf16 %v4155_v35, %v4155_v35  ;;  %v4167_v10 = vrot.slane %v4166_v18, 1  ;;  %v5128_v61 = vsel %vm5096_vm11, %v5062_v30, %v5127_v29 }
 0x314   : > { %v5063_v28 = vunpack.c.l.b16 %v4935_v12  ;;  %v2427_v47 = vpack.c.bf16 %v2407_v17, %v2406_v40  ;;  %v5636_v38 = vpack.c.bf16 %v2407_v17, %v2407_v17  ;;  %v2334_v8 = vadd.f32 %v2270_v41, %v8020_v14  ;;  %v8624_v40 = vld [vmem:[#allocation32_spill] sm:$0xff] }
 0x315   : > { %v4273_v51 = vpack.i.bf16 %v4272_v0, %v4272_v0  ;;  %v4168_v60 = vmax.f32 %v4166_v18, %v4167_v10  ;;  %v4936_v37 = vmax.bf16 %v4260_v49, %v4156_v16  ;;  %v6029_v45 = vadd.f32 %v6028_v52, %v6027_v55 }
 0x316   : > { %v5129_v7 = vsel %vm5098_vm12, %v5063_v28, %v5128_v61  ;;  %v2994_v32 = vrot.slane %v2427_v47, %v7406_v24  ;;  %v3001_v36 = vrot.slane %v5636_v38, %v7406_v24  ;;  %v2373_v54 = vadd.f32 %v8063_v15, %v2334_v8 }
 0x317   : > { %v4169_v42 = vpack.i.bf16 %v4168_v60, %v4168_v60  ;;  %v5064_v46 = vunpack.c.l.b16 %v4936_v37  ;;  %v2404_v3 = vmax.f32 %v8067_v19, 0.0  ;;  %v8145_v14 = vadd.f32 %v8625_v20, %v8624_v40  ;;  %v6030_v40 = vpop.f32.mrf.mxu0 }
 0x318   : > { %v3002_v0 = vcombine.high %v2994_v32, %v2994_v32  ;;  %v3003_v26 = vcombine.high %v3001_v36, %v3001_v36  ;;  %v3010_v43 = vrot.slane %v2994_v32, %v7406_v24  ;;  %v3017_v13 = vrot.slane %v3001_v36, %v7406_v24 }
 0x319   : > { %v4937_v59 = vmax.bf16 %v4273_v51, %v4169_v42  ;;  %v5130_v48 = vsel %vm5100_vm13, %v5064_v46, %v5129_v7  ;;  %v8150_v2 = vmax.f32 %v2373_v54, 0.0  ;;  %v8152_v50 = vadd.f32 %v6207_v62, %v6029_v45 }
 0x31a   : > { %v3024_v25 = vrot.slane %v3002_v0, %v7406_v24  ;;  %v8156_v19 = vrot.slane %v3003_v26, %v7406_v24  ;;  %v3032_v39 = vcombine.high %v3010_v43, %v3010_v43  ;;  %v3033_v44 = vcombine.high %v3017_v13, %v3017_v13 }
 0x31b   : > { %v5065_v21 = vunpack.c.l.b16 %v4937_v59  ;;  %v4379_v55 = vsel %vm3232_vm2, %v3010_v43, 4286644096  ;;  %v4431_v58 = vsel %vm3232_vm2, %v3017_v13, 4286644096  ;;  %v8161_v22 = vpack.c.bf16 %v8150_v2, %v2404_v3 }
 0x31c   : > { %v3034_v33 = vcombine.high %v3024_v25, %v3024_v25  ;;  %v3035_v57 = vcombine.high %v8156_v19, %v8156_v19  ;;  %v4381_v5 = vunpack.i.l.bf16 %v4379_v55  ;;  %v4382_v6 = vunpack.i.h.bf16 %v4379_v55 }
 0x31d   : > { %v5131_v56 = vsel %vm5102_vm14, %v5065_v21, %v5130_v48  ;;  %v4392_v1 = vsel %vm3232_vm2, %v3024_v25, 4286644096  ;;  %v4405_v27 = vsel %vm3232_vm2, %v3032_v39, 4286644096  ;;  %v4433_v35 = vunpack.i.l.bf16 %v4431_v58 }
 0x31e   : > { %v5157_v18 = vpack.c.b16 %v5131_v56, %v5131_v56  ;;  %v4383_v30 = vmax.f32 %v4381_v5, %v4382_v6  ;;  %v4394_v23 = vunpack.i.l.bf16 %v4392_v1  ;;  %v4395_v12 = vunpack.i.h.bf16 %v4392_v1 }
 0x31f   : > { %v4407_v29 = vunpack.i.l.bf16 %v4405_v27  ;;  %v4408_v52 = vunpack.i.h.bf16 %v4405_v27  ;;  %v4418_v17 = vsel %vm3232_vm2, %v3034_v33, 4286644096  ;;  %v4434_v41 = vunpack.i.h.bf16 %v4431_v58 }
 0x320   : > { %v5197_v49 = vshrl.u32 %v5157_v18, 16  ;;  %v5200_v16 = vshll.u32 %v5157_v18, 16  ;;  %v4384_v10 = vrot.slane %v4383_v30, 4  ;;  %v4396_v61 = vmax.f32 %v4394_v23, %v4395_v12  ;;  %v6031_v18 = vpop.f32.mrf.mxu0 }
 0x321   : > { %v4409_v28 = vmax.f32 %v4407_v29, %v4408_v52  ;;  %v4420_v47 = vunpack.i.l.bf16 %v4418_v17  ;;  %v4421_v38 = vunpack.i.h.bf16 %v4418_v17  ;;  %v4435_v8 = vmax.f32 %v4433_v35, %v4434_v41 }
 0x322   : > { %v5199_v51 = vrot.slane %v5197_v49, 7  ;;  %v4385_v60 = vmax.f32 %v4383_v30, %v4384_v10  ;;  %v4397_v37 = vrot.slane %v4396_v61, 4  ;;  %v4444_v45 = vsel %vm3232_vm2, %v8156_v19, 4286644096 }
 0x323   : > { %v4410_v7 = vrot.slane %v4409_v28, 4  ;;  %v4422_v32 = vmax.f32 %v4420_v47, %v4421_v38  ;;  %v4436_v36 = vrot.slane %v4435_v8, 4  ;;  %v4446_v54 = vunpack.i.l.bf16 %v4444_v45 }
 0x324   : > { %v5202_v62 = vor.u32 %v5200_v16, %v5199_v51  ;;  %v4386_v42 = vrot.slane %v4385_v60, 2  ;;  %v4398_v46 = vmax.f32 %v4396_v61, %v4397_v37  ;;  %v4447_v3 = vunpack.i.h.bf16 %v4444_v45 }
 0x325   : > { %v4411_v20 = vmax.f32 %v4409_v28, %v4410_v7  ;;  %v4423_v0 = vrot.slane %v4422_v32, 4  ;;  %v4437_v26 = vmax.f32 %v4435_v8, %v4436_v36  ;;  %v4457_v43 = vsel %vm3232_vm2, %v3033_v44, 4286644096  ;;  %v8627_v8 = vld [vmem:[#allocation13_spill] sm:$0xff] }
 0x326   : > { %v5241_v13 = vsel %vm7308_vm4, 0, %v5202_v62  ;;  %v4387_v59 = vmax.f32 %v4385_v60, %v4386_v42  ;;  %v4399_v48 = vrot.slane %v4398_v46, 2  ;;  %v4448_v25 = vmax.f32 %v4446_v54, %v4447_v3 }
 0x327   : > { %v5253_v39 = vsel %vm7320_vm7, %v5241_v13, 0  ;;  %v4412_v21 = vrot.slane %v4411_v20, 2  ;;  %v4424_v55 = vmax.f32 %v4422_v32, %v4423_v0  ;;  %v4438_v58 = vrot.slane %v4437_v26, 2 }
 0x328   : > { %v5651_v33 = vcombine.low %v5253_v39, %v5253_v39  ;;  %v5652_v5 = vcombine.high %v5253_v39, %v5253_v39  ;;  %v4388_v6 = vrot.slane %v4387_v59, 1  ;;  %v4400_v56 = vmax.f32 %v4398_v46, %v4399_v48 }
 0x329   : > { %v4413_v1 = vmax.f32 %v4411_v20, %v4412_v21  ;;  %v4425_v44 = vrot.slane %v4424_v55, 2  ;;  %v4439_v27 = vmax.f32 %v4437_v26, %v4438_v58  ;;  %v4449_v35 = vrot.slane %v4448_v25, 4 }
 0x32a   : > { %5330 = vst [vmem:[%s7334_s18 + $0x28] sm:$0xf] %v5651_v33  ;;  %5331 = vst [vmem:[%s7334_s18 + $0x2c] sm:$0x1] %v5652_v5  ;;  %v4401_v30 = vrot.slane %v4400_v56, 1  ;;  %v4459_v23 = vunpack.i.l.bf16 %v4457_v43  ;;  %v4460_v12 = vunpack.i.h.bf16 %v4457_v43  ;;  %v2339_v29 = vadd.f32 %v8152_v50, %v8145_v14  ;;  %v8626_v50 = vld [vmem:[#allocation30_spill] sm:$0xff] }
 0x32b   : > { %v4414_v52 = vrot.slane %v4413_v1, 1  ;;  %v4426_v17 = vmax.f32 %v4424_v55, %v4425_v44  ;;  %v4440_v41 = vrot.slane %v4439_v27, 1  ;;  %v4450_v49 = vmax.f32 %v4448_v25, %v4449_v35  ;;  %v8628_v44 = vld [vmem:[#allocation33_spill] sm:$0xff] }
 0x32c   : > { %v8182_v16 = vadd.f32 %v8105_v31, %v8103_v34  ;;  %v4461_v10 = vmax.f32 %v4459_v23, %v4460_v12  ;;  %v4470_v61 = vsel %vm3232_vm2, %v3035_v57, 4286644096  ;;  %v8188_v28 = vadd.f32 %v6031_v18, %v6030_v40  ;;  %v2282_v31 = vpop.f32.mrf.mxu1 }
 0x32d   : > { %v8190_v47 = vmax.f32 %v4387_v59, %v4388_v6  ;;  %v4427_v38 = vrot.slane %v4426_v17, 1  ;;  %v4451_v14 = vrot.slane %v4450_v49, 2  ;;  %v1623_v51 = vadd.f32 %v8627_v8, %v8626_v50 }
 0x32e   : > { %v4462_v60 = vrot.slane %v4461_v10, 4  ;;  %v4472_v37 = vunpack.i.l.bf16 %v4470_v61  ;;  %v4473_v45 = vunpack.i.h.bf16 %v4470_v61  ;;  %v8195_v34 = vadd.f32 %v8063_v15, %v2339_v29  ;;  %v8234_v29 = vpop.f32.mrf.mxu0 }
 0x32f   : > { %v8197_v7 = vmax.f32 %v4400_v56, %v4401_v30  ;;  %v8199_v19 = vmax.f32 %v4413_v1, %v4414_v52  ;;  %v8201_v57 = vmax.f32 %v4439_v27, %v4440_v41  ;;  %v4452_v32 = vmax.f32 %v4450_v49, %v4451_v14  ;;  %v8629_v27 = vld [vmem:[#allocation15_spill] sm:$0xff] }
 0x330   : > { %v4463_v36 = vmax.f32 %v4461_v10, %v4462_v60  ;;  %v4474_v54 = vmax.f32 %v4472_v37, %v4473_v45  ;;  %v5635_v62 = vpack.c.bf16 %v8150_v2, %v8150_v2  ;;  %v2945_v42 = vrot.slane %v8161_v22, %v7406_v24 }
 0x331   : > { %v4390_v46 = vpack.i.bf16 %v8190_v47, %v8190_v47  ;;  %v8209_v3 = vmax.f32 %v4426_v17, %v4427_v38  ;;  %v4453_v40 = vrot.slane %v4452_v32, 1  ;;  %v2283_v20 = vadd.f32 %v7998_v11, %v2282_v31 }
 0x332   : > { %v4464_v0 = vrot.slane %v4463_v36, 2  ;;  %v4475_v26 = vrot.slane %v4474_v54, 4  ;;  %v2952_v43 = vrot.slane %v5635_v62, %v7406_v24  ;;  %v2953_v13 = vcombine.high %v2945_v42, %v2945_v42 }
 0x333   : > { %v4403_v59 = vpack.i.bf16 %v8197_v7, %v8197_v7  ;;  %v4416_v2 = vpack.i.bf16 %v8199_v19, %v8199_v19  ;;  %v4442_v22 = vpack.i.bf16 %v8201_v57, %v8201_v57  ;;  %v2961_v48 = vrot.slane %v2945_v42, %v7406_v24 }
 0x334   : > { %v8220_v25 = vmax.f32 %v4452_v32, %v4453_v40  ;;  %v4465_v39 = vmax.f32 %v4463_v36, %v4464_v0  ;;  %v4476_v11 = vmax.f32 %v4474_v54, %v4475_v26  ;;  %v2954_v21 = vcombine.high %v2952_v43, %v2952_v43  ;;  %v8243_v36 = vpop.f32.mrf.mxu0 }
 0x335   : > { %v4429_v55 = vpack.i.bf16 %v8209_v3, %v8209_v3  ;;  %v2975_v58 = vrot.slane %v2953_v13, %v7406_v24  ;;  %v2983_v33 = vcombine.high %v2961_v48, %v2961_v48  ;;  %v4275_v5 = vsel %vm3232_vm2, %v2961_v48, 4286644096 }
 0x336   : > { %v4466_v6 = vrot.slane %v4465_v39, 1  ;;  %v2968_v56 = vrot.slane %v2952_v43, %v7406_v24  ;;  %v8227_v1 = vadd.f32 %v2283_v20, %v1623_v51  ;;  %v8231_v35 = vadd.f32 %v8629_v27, %v8628_v44  ;;  %v8249_v44 = vpop.f32.mrf.mxu0 }
 0x337   : > { %v2985_v18 = vcombine.high %v2975_v58, %v2975_v58  ;;  %v4277_v30 = vunpack.i.l.bf16 %v4275_v5  ;;  %v4278_v23 = vunpack.i.h.bf16 %v4275_v5  ;;  %v4288_v12 = vsel %vm3232_vm2, %v2975_v58, 4286644096 }
 0x338   : > { %v4455_v52 = vpack.i.bf16 %v8220_v25, %v8220_v25  ;;  %v4477_v17 = vrot.slane %v4476_v11, 2  ;;  %v2982_v41 = vrot.slane %v2954_v21, %v7406_v24  ;;  %v4290_v49 = vunpack.i.l.bf16 %v4288_v12 }
 0x339   : > { %v4279_v10 = vmax.f32 %v4277_v30, %v4278_v23  ;;  %v4291_v61 = vunpack.i.h.bf16 %v4288_v12  ;;  %v4301_v38 = vsel %vm3232_vm2, %v2983_v33, 4286644096  ;;  %v4314_v14 = vsel %vm3232_vm2, %v2985_v18, 4286644096 }
 0x33a   : > { %v8241_v50 = vmax.f32 %v4465_v39, %v4466_v6  ;;  %v2984_v8 = vcombine.high %v2968_v56, %v2968_v56  ;;  %v4303_v51 = vunpack.i.l.bf16 %v4301_v38  ;;  %v4304_v60 = vunpack.i.h.bf16 %v4301_v38 }
 0x33b   : > { %v4280_v37 = vrot.slane %v4279_v10, 4  ;;  %v4292_v45 = vmax.f32 %v4290_v49, %v4291_v61  ;;  %v4316_v31 = vunpack.i.l.bf16 %v4314_v14  ;;  %v4317_v32 = vunpack.i.h.bf16 %v4314_v14 }
 0x33c   : > { %v2986_v54 = vcombine.high %v2982_v41, %v2982_v41  ;;  %v4305_v62 = vmax.f32 %v4303_v51, %v4304_v60  ;;  %v4327_v42 = vsel %vm3232_vm2, %v2968_v56, 4286644096  ;;  %v4340_v40 = vsel %vm3232_vm2, %v2982_v41, 4286644096 }
 0x33d   : > { %v4281_v20 = vmax.f32 %v4279_v10, %v4280_v37  ;;  %v4293_v0 = vrot.slane %v4292_v45, 4  ;;  %v4318_v26 = vmax.f32 %v4316_v31, %v4317_v32  ;;  %v4329_v43 = vunpack.i.l.bf16 %v4327_v42  ;;  %v8253_v37 = vpop.f32.mrf.mxu0 }
 0x33e   : > { %v8247_v13 = vmax.f32 %v4476_v11, %v4477_v17  ;;  %v4306_v48 = vrot.slane %v4305_v62, 4  ;;  %v4330_v39 = vunpack.i.h.bf16 %v4327_v42  ;;  %v4342_v21 = vunpack.i.l.bf16 %v4340_v40 }
 0x33f   : > { %v4282_v58 = vrot.slane %v4281_v20, 2  ;;  %v4294_v33 = vmax.f32 %v4292_v45, %v4293_v0  ;;  %v4319_v5 = vrot.slane %v4318_v26, 4  ;;  %v4343_v6 = vunpack.i.h.bf16 %v4340_v40 }
 0x340   : > { %v4307_v27 = vmax.f32 %v4305_v62, %v4306_v48  ;;  %v4331_v18 = vmax.f32 %v4329_v43, %v4330_v39  ;;  %v4353_v56 = vsel %vm3232_vm2, %v2984_v8, 4286644096  ;;  %v4366_v30 = vsel %vm3232_vm2, %v2986_v54, 4286644096 }
 0x341   : > { %v4283_v23 = vmax.f32 %v4281_v20, %v4282_v58  ;;  %v4295_v12 = vrot.slane %v4294_v33, 2  ;;  %v4320_v41 = vmax.f32 %v4318_v26, %v4319_v5  ;;  %v4344_v11 = vmax.f32 %v4342_v21, %v4343_v6  ;;  %v6039_v5 = vpop.f32.mrf.mxu0 }
 0x342   : > { %v4308_v17 = vrot.slane %v4307_v27, 2  ;;  %v4332_v49 = vrot.slane %v4331_v18, 4  ;;  %v4355_v10 = vunpack.i.l.bf16 %v4353_v56  ;;  %v4356_v61 = vunpack.i.h.bf16 %v4353_v56 }
 0x343   : > { %v4284_v38 = vrot.slane %v4283_v23, 1  ;;  %v4296_v14 = vmax.f32 %v4294_v33, %v4295_v12  ;;  %v4321_v51 = vrot.slane %v4320_v41, 2  ;;  %v4345_v60 = vrot.slane %v4344_v11, 4  ;;  %v6208_v33 = vpop.f32.mrf.mxu1 }
 0x344   : > { %v4309_v45 = vmax.f32 %v4307_v27, %v4308_v17  ;;  %v4333_v31 = vmax.f32 %v4331_v18, %v4332_v49  ;;  %v4357_v32 = vmax.f32 %v4355_v10, %v4356_v61  ;;  %v4368_v8 = vunpack.i.l.bf16 %v4366_v30 }
 0x345   : > { %v4285_v62 = vmax.f32 %v4283_v23, %v4284_v38  ;;  %v4297_v54 = vrot.slane %v4296_v14, 1  ;;  %v4322_v42 = vmax.f32 %v4320_v41, %v4321_v51  ;;  %v4346_v40 = vmax.f32 %v4344_v11, %v4345_v60  ;;  %v2285_v60 = vpop.f32.mrf.mxu1 }
 0x346   : > { %v4310_v20 = vrot.slane %v4309_v45, 1  ;;  %v4334_v0 = vrot.slane %v4333_v31, 2  ;;  %v4358_v26 = vrot.slane %v4357_v32, 4  ;;  %v4369_v43 = vunpack.i.h.bf16 %v4366_v30 }
 0x347   : > { %v4286_v48 = vpack.i.bf16 %v4285_v62, %v4285_v62  ;;  %v4298_v39 = vmax.f32 %v4296_v14, %v4297_v54  ;;  %v4323_v21 = vrot.slane %v4322_v42, 1  ;;  %v4347_v58 = vrot.slane %v4346_v40, 2  ;;  %v6211_v19 = vpop.f32.mrf.mxu1 }
 0x348   : > { %v4311_v6 = vmax.f32 %v4309_v45, %v4310_v20  ;;  %v4335_v56 = vmax.f32 %v4333_v31, %v4334_v0  ;;  %v4359_v27 = vmax.f32 %v4357_v32, %v4358_v26  ;;  %v4370_v18 = vmax.f32 %v4368_v8, %v4369_v43  ;;  %v6040_v45 = vpop.f32.mrf.mxu0 }
 0x349   : > { %v4299_v12 = vpack.i.bf16 %v4298_v39, %v4298_v39  ;;  %v4324_v17 = vmax.f32 %v4322_v42, %v4323_v21  ;;  %v4348_v23 = vmax.f32 %v4346_v40, %v4347_v58  ;;  %v4938_v41 = vmax.bf16 %v4390_v46, %v4286_v48 }
 0x34a   : > { %v4312_v11 = vpack.i.bf16 %v4311_v6, %v4311_v6  ;;  %v4336_v49 = vrot.slane %v4335_v56, 1  ;;  %v4360_v30 = vrot.slane %v4359_v27, 2  ;;  %v4371_v10 = vrot.slane %v4370_v18, 4 }
 0x34b   : > { %v4479_v61 = vrot.slane %v8247_v13, 1  ;;  %v4325_v38 = vpack.i.bf16 %v4324_v17, %v4324_v17  ;;  %v4349_v14 = vrot.slane %v4348_v23, 1  ;;  %v4939_v51 = vmax.bf16 %v4403_v59, %v4299_v12  ;;  %v8630_v17 = vld [vmem:[#allocation31_spill] sm:$0xff] }
 0x34c   : > { %v4337_v31 = vmax.f32 %v4335_v56, %v4336_v49  ;;  %v4361_v32 = vmax.f32 %v4359_v27, %v4360_v30  ;;  %v4372_v8 = vmax.f32 %v4370_v18, %v4371_v10  ;;  %v4940_v47 = vmax.bf16 %v4416_v2, %v4312_v11  ;;  %v6042_v2 = vpop.f32.mrf.mxu0  ;;  %v8285_v49 = vpop.f32.mrf.mxu1 }
 0x34d   : > { %v4350_v46 = vmax.f32 %v4348_v23, %v4349_v14  ;;  %v4941_v62 = vmax.bf16 %v4429_v55, %v4325_v38  ;;  %v5066_v54 = vunpack.c.l.b16 %v4938_v41  ;;  %v5067_v42 = vunpack.c.l.b16 %v4939_v51  ;;  %v8631_v23 = vld [vmem:[#allocation16_spill] sm:$0xff] }
 0x34e   : > { %v4338_v40 = vpack.i.bf16 %v4337_v31, %v4337_v31  ;;  %v4362_v20 = vrot.slane %v4361_v32, 1  ;;  %v4373_v7 = vrot.slane %v4372_v8, 2  ;;  %v5068_v59 = vunpack.c.l.b16 %v4940_v47  ;;  %v6043_v25 = vpop.f32.mrf.mxu0 }
 0x34f   : > { %v4468_v0 = vpack.i.bf16 %v8241_v50, %v8241_v50  ;;  %v4351_v26 = vpack.i.bf16 %v4350_v46, %v4350_v46  ;;  %v5069_v43 = vunpack.c.l.b16 %v4941_v62  ;;  %v5132_v48 = vsel %vm5090_vm8, %v5067_v42, %v5066_v54 }
 0x350   : > { %v4363_v39 = vmax.f32 %v4361_v32, %v4362_v20  ;;  %v4374_v21 = vmax.f32 %v4372_v8, %v4373_v7  ;;  %v4942_v3 = vmax.bf16 %v4442_v22, %v4338_v40  ;;  %v5133_v55 = vsel %vm5092_vm9, %v5068_v59, %v5132_v48  ;;  %v6212_v8 = vpop.f32.mrf.mxu1 }
 0x351   : > { %v4480_v58 = vmax.f32 %v8247_v13, %v4479_v61  ;;  %v4943_v50 = vmax.bf16 %v4455_v52, %v4351_v26  ;;  %v5134_v6 = vsel %vm5094_vm10, %v5069_v43, %v5133_v55  ;;  %v2294_v56 = vadd.f32 %v6208_v33, %v8188_v28 }
 0x352   : > { %v4364_v27 = vpack.i.bf16 %v4363_v39, %v4363_v39  ;;  %v4375_v18 = vrot.slane %v4374_v21, 1  ;;  %v5070_v12 = vunpack.c.l.b16 %v4942_v3  ;;  %v1626_v41 = vadd.f32 %v8631_v23, %v8630_v17  ;;  %v8632_v39 = vld [vmem:[#allocation34_spill] sm:$0xff] }
 0x353   : > { %v5071_v57 = vunpack.c.l.b16 %v4943_v50  ;;  %v2340_v22 = vadd.f32 %v2294_v56, %v8231_v35  ;;  %v2286_v11 = vadd.f32 %v8182_v16, %v2285_v60  ;;  %v6041_v13 = vadd.f32 %v6040_v45, %v6039_v5 }
 0x354   : > { %v4376_v52 = vmax.f32 %v4374_v21, %v4375_v18  ;;  %v4944_v30 = vmax.bf16 %v4468_v0, %v4364_v27  ;;  %v5135_v10 = vsel %vm5096_vm11, %v5070_v12, %v5134_v6  ;;  %v2376_v28 = vadd.f32 %v8063_v15, %v8227_v1  ;;  %v8633_v21 = vld [vmem:[#allocation17_spill] sm:$0xff] }
 0x355   : > { %v5136_v33 = vsel %vm5098_vm12, %v5071_v57, %v5135_v10  ;;  %v2379_v61 = vadd.f32 %v8063_v15, %v2340_v22  ;;  %v2338_v38 = vadd.f32 %v2286_v11, %v1626_v41  ;;  %v2307_v14 = vadd.f32 %v6211_v19, %v6041_v13 }
 0x356   : > { %v4481_v35 = vpack.i.bf16 %v4480_v58, %v4480_v58  ;;  %v4377_v51 = vpack.i.bf16 %v4376_v52, %v4376_v52  ;;  %v5072_v16 = vunpack.c.l.b16 %v4944_v30  ;;  %v6044_v5 = vadd.f32 %v6043_v25, %v6042_v2 }
 0x357   : > { %v2410_v60 = vmax.f32 %v8195_v34, 0.0  ;;  %v2411_v45 = vmax.f32 %v2379_v61, 0.0  ;;  %v2377_v31 = vadd.f32 %v8063_v15, %v2338_v38  ;;  %v2343_v32 = vadd.f32 %v2307_v14, %v7455_v63 }
 0x358   : > { %v4945_v47 = vmax.bf16 %v4481_v35, %v4377_v51  ;;  %v5137_v1 = vsel %vm5100_vm13, %v5072_v16, %v5136_v33  ;;  %v2408_v46 = vmax.f32 %v2376_v28, 0.0  ;;  %v2310_v62 = vadd.f32 %v6212_v8, %v6044_v5 }
 0x359   : > { %v2429_v54 = vpack.c.bf16 %v2411_v45, %v2410_v60  ;;  %v5638_v42 = vpack.c.bf16 %v2411_v45, %v2411_v45  ;;  %v2409_v40 = vmax.f32 %v2377_v31, 0.0  ;;  %v8297_v20 = vadd.f32 %v8063_v15, %v2343_v32 }
 0x35a   : > { %v5073_v7 = vunpack.c.l.b16 %v4945_v47  ;;  %v8301_v34 = vadd.f32 %v8243_v36, %v8234_v29  ;;  %v2344_v59 = vadd.f32 %v2310_v62, %v7462_v53  ;;  %v8309_v19 = vadd.f32 %v8253_v37, %v8249_v44 }
 0x35b   : > { %v3092_v63 = vrot.slane %v2429_v54, %v7406_v24  ;;  %v3099_v0 = vrot.slane %v5638_v42, %v7406_v24  ;;  %v2428_v26 = vpack.c.bf16 %v2409_v40, %v2408_v46  ;;  %v5637_v43 = vpack.c.bf16 %v2409_v40, %v2409_v40 }
 0x35c   : > { %v5138_v48 = vsel %vm5102_vm14, %v5073_v7, %v5137_v1  ;;  %v2414_v2 = vmax.f32 %v8297_v20, 0.0  ;;  %v8314_v29 = vadd.f32 %v8633_v21, %v8632_v39  ;;  %v8325_v44 = vadd.f32 %v8063_v15, %v2344_v59 }
 0x35d   : > { %v5158_v36 = vpack.c.b16 %v5138_v48, %v5138_v48  ;;  %v3100_v53 = vcombine.high %v3092_v63, %v3092_v63  ;;  %v3101_v3 = vcombine.high %v3099_v0, %v3099_v0  ;;  %v3108_v55 = vrot.slane %v3092_v63, %v7406_v24 }
 0x35e   : > { %v3115_v58 = vrot.slane %v3099_v0, %v7406_v24  ;;  %v8319_v50 = vrot.slane %v2428_v26, %v7406_v24  ;;  %v8322_v6 = vrot.slane %v5637_v43, %v7406_v24 }
 0x35f   : > { %v5204_v37 = vshrl.u32 %v5158_v36, 16  ;;  %v5207_v56 = vshll.u32 %v5158_v36, 16  ;;  %v3122_v27 = vrot.slane %v3100_v53, %v7406_v24  ;;  %v3129_v18 = vrot.slane %v3101_v3, %v7406_v24 }
 0x360   : > { %v3130_v12 = vcombine.high %v3108_v55, %v3108_v55  ;;  %v3131_v17 = vcombine.high %v3115_v58, %v3115_v58  ;;  %v4587_v23 = vsel %vm3232_vm2, %v3108_v55, 4286644096  ;;  %v4639_v41 = vsel %vm3232_vm2, %v3115_v58, 4286644096 }
 0x361   : > { %v5206_v57 = vrot.slane %v5204_v37, 7  ;;  %v3132_v22 = vcombine.high %v3122_v27, %v3122_v27  ;;  %v3133_v11 = vcombine.high %v3129_v18, %v3129_v18  ;;  %v4589_v13 = vunpack.i.l.bf16 %v4587_v23 }
 0x362   : > { %v4590_v25 = vunpack.i.h.bf16 %v4587_v23  ;;  %v4600_v15 = vsel %vm3232_vm2, %v3122_v27, 4286644096  ;;  %v4613_v52 = vsel %vm3232_vm2, %v3130_v12, 4286644096  ;;  %v4641_v30 = vunpack.i.l.bf16 %v4639_v41 }
 0x363   : > { %v5209_v10 = vor.u32 %v5207_v56, %v5206_v57  ;;  %v4602_v28 = vunpack.i.l.bf16 %v4600_v15  ;;  %v4603_v33 = vunpack.i.h.bf16 %v4600_v15  ;;  %v4615_v61 = vunpack.i.l.bf16 %v4613_v52 }
 0x364   : > { %v4591_v38 = vmax.f32 %v4589_v13, %v4590_v25  ;;  %v4616_v14 = vunpack.i.h.bf16 %v4613_v52  ;;  %v4626_v35 = vsel %vm3232_vm2, %v3132_v22, 4286644096  ;;  %v4642_v51 = vunpack.i.h.bf16 %v4639_v41 }
 0x365   : > { %v5242_v16 = vsel %vm7308_vm4, 0, %v5209_v10  ;;  %v4604_v5 = vmax.f32 %v4602_v28, %v4603_v33  ;;  %v4628_v60 = vunpack.i.l.bf16 %v4626_v35  ;;  %v4629_v45 = vunpack.i.h.bf16 %v4626_v35 }
 0x366   : > { %v5254_v31 = vsel %vm7320_vm7, %v5242_v16, 0  ;;  %v4592_v32 = vrot.slane %v4591_v38, 4  ;;  %v4617_v8 = vmax.f32 %v4615_v61, %v4616_v14  ;;  %v4643_v47 = vmax.f32 %v4641_v30, %v4642_v51 }
 0x367   : > { %v5653_v1 = vcombine.low %v5254_v31, %v5254_v31  ;;  %v5654_v46 = vcombine.high %v5254_v31, %v5254_v31  ;;  %v4605_v62 = vrot.slane %v4604_v5, 4  ;;  %v4630_v54 = vmax.f32 %v4628_v60, %v4629_v45 }
 0x368   : > { %v4593_v42 = vmax.f32 %v4591_v38, %v4592_v32  ;;  %v4618_v40 = vrot.slane %v4617_v8, 4  ;;  %v4644_v7 = vrot.slane %v4643_v47, 4  ;;  %v4652_v59 = vsel %vm3232_vm2, %v3129_v18, 4286644096 }
 0x369   : > { %5332 = vst [vmem:[%s7334_s18 + $0x30] sm:$0xf] %v5653_v1  ;;  %5333 = vst [vmem:[%s7334_s18 + $0x34] sm:$0x1] %v5654_v46  ;;  %v4606_v63 = vmax.f32 %v4604_v5, %v4605_v62  ;;  %v4631_v0 = vrot.slane %v4630_v54, 4  ;;  %v4654_v26 = vunpack.i.l.bf16 %v4652_v59  ;;  %v4655_v43 = vunpack.i.h.bf16 %v4652_v59 }
 0x36a   : > { %v4594_v48 = vrot.slane %v4593_v42, 2  ;;  %v4619_v39 = vmax.f32 %v4617_v8, %v4618_v40  ;;  %v4645_v21 = vmax.f32 %v4643_v47, %v4644_v7  ;;  %v4665_v36 = vsel %vm3232_vm2, %v3131_v17, 4286644096 }
 0x36b   : > { %v4607_v53 = vrot.slane %v4606_v63, 2  ;;  %v4632_v3 = vmax.f32 %v4630_v54, %v4631_v0  ;;  %v4656_v55 = vmax.f32 %v4654_v26, %v4655_v43  ;;  %v4667_v58 = vunpack.i.l.bf16 %v4665_v36 }
 0x36c   : > { %v4595_v37 = vmax.f32 %v4593_v42, %v4594_v48  ;;  %v4620_v56 = vrot.slane %v4619_v39, 2  ;;  %v4646_v27 = vrot.slane %v4645_v21, 2  ;;  %v4668_v12 = vunpack.i.h.bf16 %v4665_v36 }
 0x36d   : > { %v4608_v18 = vmax.f32 %v4606_v63, %v4607_v53  ;;  %v4633_v23 = vrot.slane %v4632_v3, 2  ;;  %v4657_v41 = vrot.slane %v4656_v55, 4  ;;  %v4678_v57 = vsel %vm3232_vm2, %v3133_v11, 4286644096 }
 0x36e   : > { %v4596_v22 = vrot.slane %v4595_v37, 1  ;;  %v4621_v13 = vmax.f32 %v4619_v39, %v4620_v56  ;;  %v4647_v25 = vmax.f32 %v4645_v21, %v4646_v27  ;;  %v4669_v15 = vmax.f32 %v4667_v58, %v4668_v12 }
 0x36f   : > { %v4609_v52 = vrot.slane %v4608_v18, 1  ;;  %v4634_v30 = vmax.f32 %v4632_v3, %v4633_v23  ;;  %v4658_v17 = vmax.f32 %v4656_v55, %v4657_v41  ;;  %v4680_v10 = vunpack.i.l.bf16 %v4678_v57 }
 0x370   : > { %v8343_v28 = vmax.f32 %v4595_v37, %v4596_v22  ;;  %v4622_v33 = vrot.slane %v4621_v13, 1  ;;  %v4648_v61 = vrot.slane %v4647_v25, 1  ;;  %v4670_v38 = vrot.slane %v4669_v15, 4 }
 0x371   : > { %v8345_v14 = vmax.f32 %v4608_v18, %v4609_v52  ;;  %v4635_v35 = vrot.slane %v4634_v30, 1  ;;  %v4659_v51 = vrot.slane %v4658_v17, 2  ;;  %v4681_v16 = vunpack.i.h.bf16 %v4678_v57 }
 0x372   : > { %v8347_v5 = vmax.f32 %v4621_v13, %v4622_v33  ;;  %v8349_v11 = vmax.f32 %v4647_v25, %v4648_v61  ;;  %v4671_v60 = vmax.f32 %v4669_v15, %v4670_v38  ;;  %v8352_v45 = vmax.f32 %v8325_v44, 0.0 }
 0x373   : > { %v4598_v31 = vpack.i.bf16 %v8343_v28, %v8343_v28  ;;  %v8356_v32 = vmax.f32 %v4634_v30, %v4635_v35  ;;  %v4660_v8 = vmax.f32 %v4658_v17, %v4659_v51  ;;  %v4682_v47 = vmax.f32 %v4680_v10, %v4681_v16 }
 0x374   : > { %v4611_v1 = vpack.i.bf16 %v8345_v14, %v8345_v14  ;;  %v4624_v46 = vpack.i.bf16 %v8347_v5, %v8347_v5  ;;  %v4672_v62 = vrot.slane %v4671_v60, 2  ;;  %v3051_v54 = vcombine.high %v8319_v50, %v8319_v50 }
 0x375   : > { %v4650_v44 = vpack.i.bf16 %v8349_v11, %v8349_v11  ;;  %v4661_v42 = vrot.slane %v4660_v8, 1  ;;  %v4683_v40 = vrot.slane %v4682_v47, 4  ;;  %v3052_v7 = vcombine.high %v8322_v6, %v8322_v6 }
 0x376   : > { %v4673_v59 = vmax.f32 %v4671_v60, %v4672_v62  ;;  %v3059_v63 = vrot.slane %v8319_v50, %v7406_v24  ;;  %v3066_v0 = vrot.slane %v8322_v6, %v7406_v24  ;;  %v3073_v26 = vrot.slane %v3051_v54, %v7406_v24 }
 0x377   : > { %v4637_v43 = vpack.i.bf16 %v8356_v32, %v8356_v32  ;;  %v8375_v48 = vmax.f32 %v4660_v8, %v4661_v42  ;;  %v4684_v39 = vmax.f32 %v4682_v47, %v4683_v40  ;;  %v8380_v21 = vpack.c.bf16 %v8352_v45, %v2414_v2 }
 0x378   : > { %v4674_v36 = vrot.slane %v4673_v59, 1  ;;  %v3080_v53 = vrot.slane %v3052_v7, %v7406_v24  ;;  %v3081_v50 = vcombine.high %v3059_v63, %v3059_v63  ;;  %v3082_v3 = vcombine.high %v3066_v0, %v3066_v0 }
 0x379   : > { %v4663_v6 = vpack.i.bf16 %v8375_v48, %v8375_v48  ;;  %v4685_v55 = vrot.slane %v4684_v39, 2  ;;  %v3083_v58 = vcombine.high %v3073_v26, %v3073_v26  ;;  %v4483_v37 = vsel %vm3232_vm2, %v3059_v63, 4286644096 }
 0x37a   : > { %v8386_v56 = vmax.f32 %v4673_v59, %v4674_v36  ;;  %v4485_v27 = vunpack.i.l.bf16 %v4483_v37  ;;  %v4486_v12 = vunpack.i.h.bf16 %v4483_v37  ;;  %v4496_v20 = vsel %vm3232_vm2, %v3073_v26, 4286644096 }
 0x37b   : > { %v4686_v2 = vmax.f32 %v4684_v39, %v4685_v55  ;;  %v4498_v18 = vunpack.i.l.bf16 %v4496_v20  ;;  %v4499_v23 = vunpack.i.h.bf16 %v4496_v20  ;;  %v4509_v41 = vsel %vm3232_vm2, %v3081_v50, 4286644096 }
 0x37c   : > { %v3084_v57 = vcombine.high %v3080_v53, %v3080_v53  ;;  %v4487_v22 = vmax.f32 %v4485_v27, %v4486_v12  ;;  %v4511_v13 = vunpack.i.l.bf16 %v4509_v41  ;;  %v4512_v25 = vunpack.i.h.bf16 %v4509_v41 }
 0x37d   : > { %v4687_v15 = vrot.slane %v4686_v2, 1  ;;  %v4500_v52 = vmax.f32 %v4498_v18, %v4499_v23  ;;  %v4522_v30 = vsel %vm3232_vm2, %v3083_v58, 4286644096  ;;  %v4535_v17 = vsel %vm3232_vm2, %v3066_v0, 4286644096 }
 0x37e   : > { %v4488_v10 = vrot.slane %v4487_v22, 4  ;;  %v4513_v33 = vmax.f32 %v4511_v13, %v4512_v25  ;;  %v4524_v61 = vunpack.i.l.bf16 %v4522_v30  ;;  %v4525_v38 = vunpack.i.h.bf16 %v4522_v30 }
 0x37f   : > { %v4676_v35 = vpack.i.bf16 %v8386_v56, %v8386_v56  ;;  %v4501_v51 = vrot.slane %v4500_v52, 4  ;;  %v4537_v16 = vunpack.i.l.bf16 %v4535_v17  ;;  %v4538_v60 = vunpack.i.h.bf16 %v4535_v17 }
 0x380   : > { %v4489_v8 = vmax.f32 %v4487_v22, %v4488_v10  ;;  %v4514_v47 = vrot.slane %v4513_v33, 4  ;;  %v4526_v62 = vmax.f32 %v4524_v61, %v4525_v38  ;;  %v4548_v54 = vsel %vm3232_vm2, %v3080_v53, 4286644096 }
 0x381   : > { %v8395_v42 = vmax.f32 %v4686_v2, %v4687_v15  ;;  %v4502_v40 = vmax.f32 %v4500_v52, %v4501_v51  ;;  %v4539_v7 = vmax.f32 %v4537_v16, %v4538_v60  ;;  %v4550_v59 = vunpack.i.l.bf16 %v4548_v54 }
 0x382   : > { %v4490_v63 = vrot.slane %v4489_v8, 2  ;;  %v4515_v0 = vmax.f32 %v4513_v33, %v4514_v47  ;;  %v4527_v26 = vrot.slane %v4526_v62, 4  ;;  %v4551_v39 = vunpack.i.h.bf16 %v4548_v54 }
 0x383   : > { %v4503_v36 = vrot.slane %v4502_v40, 2  ;;  %v4540_v50 = vrot.slane %v4539_v7, 4  ;;  %v4561_v55 = vsel %vm3232_vm2, %v3082_v3, 4286644096  ;;  %v4574_v58 = vsel %vm3232_vm2, %v3084_v57, 4286644096 }
 0x384   : > { %v4491_v37 = vmax.f32 %v4489_v8, %v4490_v63  ;;  %v4516_v27 = vrot.slane %v4515_v0, 2  ;;  %v4528_v12 = vmax.f32 %v4526_v62, %v4527_v26  ;;  %v4552_v20 = vmax.f32 %v4550_v59, %v4551_v39 }
 0x385   : > { %v4504_v53 = vmax.f32 %v4502_v40, %v4503_v36  ;;  %v4541_v2 = vmax.f32 %v4539_v7, %v4540_v50  ;;  %v4563_v18 = vunpack.i.l.bf16 %v4561_v55  ;;  %v4564_v23 = vunpack.i.h.bf16 %v4561_v55 }
 0x386   : > { %v4492_v41 = vrot.slane %v4491_v37, 1  ;;  %v4517_v22 = vmax.f32 %v4515_v0, %v4516_v27  ;;  %v4529_v13 = vrot.slane %v4528_v12, 2  ;;  %v4553_v25 = vrot.slane %v4552_v20, 4 }
 0x387   : > { %v4505_v15 = vrot.slane %v4504_v53, 1  ;;  %v4542_v52 = vrot.slane %v4541_v2, 2  ;;  %v4565_v30 = vmax.f32 %v4563_v18, %v4564_v23  ;;  %v4576_v17 = vunpack.i.l.bf16 %v4574_v58 }
 0x388   : > { %v4493_v10 = vmax.f32 %v4491_v37, %v4492_v41  ;;  %v4518_v3 = vrot.slane %v4517_v22, 1  ;;  %v4530_v33 = vmax.f32 %v4528_v12, %v4529_v13  ;;  %v4554_v57 = vmax.f32 %v4552_v20, %v4553_v25 }
 0x389   : > { %v4506_v61 = vmax.f32 %v4504_v53, %v4505_v15  ;;  %v4543_v38 = vmax.f32 %v4541_v2, %v4542_v52  ;;  %v4566_v51 = vrot.slane %v4565_v30, 4  ;;  %v4577_v16 = vunpack.i.h.bf16 %v4574_v58 }
 0x38a   : > { %v4494_v60 = vpack.i.bf16 %v4493_v10, %v4493_v10  ;;  %v4519_v8 = vmax.f32 %v4517_v22, %v4518_v3  ;;  %v4531_v47 = vrot.slane %v4530_v33, 1  ;;  %v4555_v62 = vrot.slane %v4554_v57, 2 }
 0x38b   : > { %v4507_v54 = vpack.i.bf16 %v4506_v61, %v4506_v61  ;;  %v4544_v40 = vrot.slane %v4543_v38, 1  ;;  %v4567_v7 = vmax.f32 %v4565_v30, %v4566_v51  ;;  %v4578_v59 = vmax.f32 %v4576_v17, %v4577_v16 }
 0x38c   : > { %v4520_v63 = vpack.i.bf16 %v4519_v8, %v4519_v8  ;;  %v4532_v0 = vmax.f32 %v4530_v33, %v4531_v47  ;;  %v4556_v26 = vmax.f32 %v4554_v57, %v4555_v62  ;;  %v4946_v39 = vmax.bf16 %v4598_v31, %v4494_v60 }
 0x38d   : > { %v4545_v36 = vmax.f32 %v4543_v38, %v4544_v40  ;;  %v4568_v50 = vrot.slane %v4567_v7, 2  ;;  %v4579_v55 = vrot.slane %v4578_v59, 4  ;;  %v4947_v58 = vmax.bf16 %v4611_v1, %v4507_v54 }
 0x38e   : > { %v4533_v37 = vpack.i.bf16 %v4532_v0, %v4532_v0  ;;  %v4557_v27 = vrot.slane %v4556_v26, 1  ;;  %v4948_v12 = vmax.bf16 %v4624_v46, %v4520_v63  ;;  %v5074_v20 = vunpack.c.l.b16 %v4946_v39 }
 0x38f   : > { %v4546_v53 = vpack.i.bf16 %v4545_v36, %v4545_v36  ;;  %v4569_v2 = vmax.f32 %v4567_v7, %v4568_v50  ;;  %v4580_v18 = vmax.f32 %v4578_v59, %v4579_v55  ;;  %v5075_v23 = vunpack.c.l.b16 %v4947_v58 }
 0x390   : > { %v4558_v28 = vmax.f32 %v4556_v26, %v4557_v27  ;;  %v4949_v31 = vmax.bf16 %v4637_v43, %v4533_v37  ;;  %v5076_v41 = vunpack.c.l.b16 %v4948_v12  ;;  %v5640_v14 = vpack.c.bf16 %v8352_v45, %v8352_v45 }
 0x391   : > { %v4570_v1 = vrot.slane %v4569_v2, 1  ;;  %v4581_v22 = vrot.slane %v4580_v18, 2  ;;  %v4950_v5 = vmax.bf16 %v4650_v44, %v4546_v53  ;;  %v5139_v46 = vsel %vm5090_vm8, %v5075_v23, %v5074_v20 }
 0x392   : > { %v4559_v13 = vpack.i.bf16 %v4558_v28, %v4558_v28  ;;  %v5077_v25 = vunpack.c.l.b16 %v4949_v31  ;;  %v5140_v15 = vsel %vm5092_vm9, %v5076_v41, %v5139_v46  ;;  %v3190_v32 = vrot.slane %v8380_v21, %v7406_v24 }
 0x393   : > { %v4571_v43 = vmax.f32 %v4569_v2, %v4570_v1  ;;  %v4582_v52 = vmax.f32 %v4580_v18, %v4581_v22  ;;  %v5078_v30 = vunpack.c.l.b16 %v4950_v5  ;;  %v3197_v45 = vrot.slane %v5640_v14, %v7406_v24 }
 0x394   : > { %v4951_v17 = vmax.bf16 %v4663_v6, %v4559_v13  ;;  %v5141_v11 = vsel %vm5094_vm10, %v5077_v25, %v5140_v15  ;;  %v3198_v44 = vcombine.high %v3190_v32, %v3190_v32  ;;  %v3206_v10 = vrot.slane %v3190_v32, %v7406_v24  ;;  %v2301_v25 = vpop.f32.mrf.mxu1 }
 0x395   : > { %v4572_v3 = vpack.i.bf16 %v4571_v43, %v4571_v43  ;;  %v4583_v33 = vrot.slane %v4582_v52, 1  ;;  %v5142_v57 = vsel %vm5096_vm11, %v5078_v30, %v5141_v11  ;;  %v3199_v61 = vcombine.high %v3197_v45, %v3197_v45 }
 0x396   : > { %v5079_v21 = vunpack.c.l.b16 %v4951_v17  ;;  %v3213_v38 = vrot.slane %v3197_v45, %v7406_v24  ;;  %v3220_v51 = vrot.slane %v3198_v44, %v7406_v24  ;;  %v3228_v16 = vcombine.high %v3206_v10, %v3206_v10 }
 0x397   : > { %v4584_v60 = vmax.f32 %v4582_v52, %v4583_v33  ;;  %v4952_v48 = vmax.bf16 %v4676_v35, %v4572_v3  ;;  %v2299_v6 = vadd.f32 %v8301_v34, %v8285_v49  ;;  %v4795_v8 = vsel %vm3232_vm2, %v3206_v10, 4286644096 }
 0x398   : > { %v4689_v47 = vpack.i.bf16 %v8395_v42, %v8395_v42  ;;  %v5143_v62 = vsel %vm5098_vm12, %v5079_v21, %v5142_v57  ;;  %v3230_v54 = vcombine.high %v3220_v51, %v3220_v51  ;;  %v4797_v40 = vunpack.i.l.bf16 %v4795_v8 }
 0x399   : > { %v4585_v7 = vpack.i.bf16 %v4584_v60, %v4584_v60  ;;  %v5080_v59 = vunpack.c.l.b16 %v4952_v48  ;;  %v8439_v63 = vrot.slane %v3199_v61, %v7406_v24  ;;  %v4798_v0 = vunpack.i.h.bf16 %v4795_v8 }
 0x39a   : > { %v3229_v56 = vcombine.high %v3213_v38, %v3213_v38  ;;  %v4808_v35 = vsel %vm3232_vm2, %v3220_v51, 4286644096  ;;  %v4821_v49 = vsel %vm3232_vm2, %v3228_v16, 4286644096  ;;  %v4834_v34 = vsel %vm3232_vm2, %v3230_v54, 4286644096 }
 0x39b   : > { %v4953_v26 = vmax.bf16 %v4689_v47, %v4585_v7  ;;  %v5144_v42 = vsel %vm5100_vm13, %v5080_v59, %v5143_v62  ;;  %v4799_v39 = vmax.f32 %v4797_v40, %v4798_v0  ;;  %v4810_v36 = vunpack.i.l.bf16 %v4808_v35  ;;  %v8634_v62 = vld [vmem:[#allocation35_spill] sm:$0xff]  ;;  %v8635_v54 = vld [vmem:[#allocation18_spill] sm:$0xff] }
 0x39c   : > { %v4811_v50 = vunpack.i.h.bf16 %v4808_v35  ;;  %v4823_v55 = vunpack.i.l.bf16 %v4821_v49  ;;  %v4824_v58 = vunpack.i.h.bf16 %v4821_v49  ;;  %v4836_v37 = vunpack.i.l.bf16 %v4834_v34 }
 0x39d   : > { %v5081_v27 = vunpack.c.l.b16 %v4953_v26  ;;  %v4800_v12 = vrot.slane %v4799_v39, 4  ;;  %v4837_v20 = vunpack.i.h.bf16 %v4834_v34  ;;  %v4847_v53 = vsel %vm3232_vm2, %v3213_v38, 4286644096 }
 0x39e   : > { %v4812_v2 = vmax.f32 %v4810_v36, %v4811_v50  ;;  %v4825_v18 = vmax.f32 %v4823_v55, %v4824_v58  ;;  %v4849_v23 = vunpack.i.l.bf16 %v4847_v53  ;;  %v4850_v28 = vunpack.i.h.bf16 %v4847_v53 }
 0x39f   : > { %v5145_v31 = vsel %vm5102_vm14, %v5081_v27, %v5144_v42  ;;  %v4801_v41 = vmax.f32 %v4799_v39, %v4800_v12  ;;  %v4838_v14 = vmax.f32 %v4836_v37, %v4837_v20  ;;  %v4860_v1 = vsel %vm3232_vm2, %v8439_v63, 4286644096 }
 0x3a0   : > { %v5159_v22 = vpack.c.b16 %v5145_v31, %v5145_v31  ;;  %v4813_v5 = vrot.slane %v4812_v2, 4  ;;  %v4826_v46 = vrot.slane %v4825_v18, 4  ;;  %v4851_v13 = vmax.f32 %v4849_v23, %v4850_v28 }
 0x3a1   : > { %v2341_v15 = vadd.f32 %v2299_v6, %v8314_v29  ;;  %v4839_v32 = vrot.slane %v4838_v14, 4  ;;  %v4862_v43 = vunpack.i.l.bf16 %v4860_v1  ;;  %v4863_v52 = vunpack.i.h.bf16 %v4860_v1  ;;  %v6385_v6 = vld [vmem:[%s8553_s2] ss:$0 sm:$0xff] }
 0x3a2   : > { %v5211_v30 = vshrl.u32 %v5159_v22, 16  ;;  %v4802_v45 = vrot.slane %v4801_v41, 2  ;;  %v4814_v17 = vmax.f32 %v4812_v2, %v4813_v5  ;;  %v4827_v11 = vmax.f32 %v4825_v18, %v4826_v46 }
 0x3a3   : > { %v4840_v44 = vmax.f32 %v4838_v14, %v4839_v32  ;;  %v4852_v10 = vrot.slane %v4851_v13, 4  ;;  %v4864_v3 = vmax.f32 %v4862_v43, %v4863_v52  ;;  %v2302_v33 = vadd.f32 %v8309_v19, %v2301_v25 }
 0x3a4   : > { %v5213_v57 = vrot.slane %v5211_v30, 7  ;;  %v5214_v61 = vshll.u32 %v5159_v22, 16  ;;  %v4815_v21 = vrot.slane %v4814_v17, 2  ;;  %v4873_v38 = vsel %vm3232_vm2, %v3229_v56, 4286644096 }
 0x3a5   : > { %v4828_v51 = vrot.slane %v4827_v11, 2  ;;  %v4841_v16 = vrot.slane %v4840_v44, 2  ;;  %v4853_v29 = vmax.f32 %v4851_v13, %v4852_v10  ;;  %v4865_v60 = vrot.slane %v4864_v3, 4 }
 0x3a6   : > { %v5216_v48 = vor.u32 %v5214_v61, %v5213_v57  ;;  %v2380_v8 = vadd.f32 %v6385_v6, %v2341_v15  ;;  %v4803_v47 = vmax.f32 %v4801_v41, %v4802_v45  ;;  %v1642_v40 = vadd.f32 %v8635_v54, %v8634_v62 }
 0x3a7   : > { %v4816_v19 = vmax.f32 %v4814_v17, %v4815_v21  ;;  %v4854_v7 = vrot.slane %v4853_v29, 2  ;;  %v4866_v59 = vmax.f32 %v4864_v3, %v4865_v60  ;;  %v4875_v0 = vunpack.i.l.bf16 %v4873_v38 }
 0x3a8   : > { %v5243_v56 = vsel %vm7308_vm4, 0, %v5216_v48  ;;  %v3231_v35 = vcombine.high %v8439_v63, %v8439_v63  ;;  %v4876_v49 = vunpack.i.h.bf16 %v4873_v38  ;;  %v2342_v34 = vadd.f32 %v2302_v33, %v1642_v40 }
 0x3a9   : > { %v5255_v26 = vsel %vm7320_vm7, %v5243_v56, 0  ;;  %v4829_v42 = vmax.f32 %v4827_v11, %v4828_v51  ;;  %v4842_v39 = vmax.f32 %v4840_v44, %v4841_v16  ;;  %v4804_v55 = vrot.slane %v4803_v47, 1 }
 0x3aa   : > { %v5655_v36 = vcombine.low %v5255_v26, %v5255_v26  ;;  %v5656_v50 = vcombine.high %v5255_v26, %v5255_v26  ;;  %v4817_v58 = vrot.slane %v4816_v19, 1  ;;  %v4855_v37 = vmax.f32 %v4853_v29, %v4854_v7 }
 0x3ab   : > { %v4867_v27 = vrot.slane %v4866_v59, 2  ;;  %v4877_v12 = vmax.f32 %v4875_v0, %v4876_v49  ;;  %v2412_v20 = vmax.f32 %v2380_v8, 0.0  ;;  %v4886_v53 = vsel %vm3232_vm2, %v3231_v35, 4286644096 }
 0x3ac   : > { %5334 = vst [vmem:[%s7334_s18 + $0x38] sm:$0xf] %v5655_v36  ;;  %5335 = vst [vmem:[%s7334_s18 + $0x3c] sm:$0x1] %v5656_v50  ;;  %v2381_v63 = vadd.f32 %v6385_v6, %v2342_v34  ;;  %v4830_v2 = vrot.slane %v4829_v42, 1  ;;  %v4843_v18 = vrot.slane %v4842_v39, 1  ;;  %v8466_v31 = vmax.f32 %v4803_v47, %v4804_v55 }
 0x3ad   : > { %v4868_v23 = vmax.f32 %v4866_v59, %v4867_v27  ;;  %v4878_v28 = vrot.slane %v4877_v12, 4  ;;  %v4888_v41 = vunpack.i.l.bf16 %v4886_v53  ;;  %v4889_v14 = vunpack.i.h.bf16 %v4886_v53 }
 0x3ae   : > { %v2413_v1 = vmax.f32 %v2381_v63, 0.0  ;;  %v8468_v22 = vmax.f32 %v4816_v19, %v4817_v58  ;;  %v4856_v5 = vrot.slane %v4855_v37, 1  ;;  %v8470_v43 = vmax.f32 %v4829_v42, %v4830_v2 }
 0x3af   : > { %v4869_v46 = vrot.slane %v4868_v23, 1  ;;  %v4879_v13 = vmax.f32 %v4877_v12, %v4878_v28  ;;  %v4890_v25 = vmax.f32 %v4888_v41, %v4889_v14  ;;  %v8472_v52 = vmax.f32 %v4842_v39, %v4843_v18 }
 0x3b0   : > { %v2430_v15 = vpack.c.bf16 %v2413_v1, %v2412_v20  ;;  %v5639_v32 = vpack.c.bf16 %v2413_v1, %v2413_v1  ;;  %v4806_v45 = vpack.i.bf16 %v8466_v31, %v8466_v31  ;;  %v4819_v10 = vpack.i.bf16 %v8468_v22, %v8468_v22 }
 0x3b1   : > { %v4880_v30 = vrot.slane %v4879_v13, 2  ;;  %v4891_v17 = vrot.slane %v4890_v25, 4  ;;  %v8480_v3 = vmax.f32 %v4855_v37, %v4856_v5  ;;  %v8482_v33 = vmax.f32 %v4868_v23, %v4869_v46 }
 0x3b2   : > { %v3141_v11 = vrot.slane %v2430_v15, %v7406_v24  ;;  %v3148_v44 = vrot.slane %v5639_v32, %v7406_v24  ;;  %v4832_v16 = vpack.i.bf16 %v8470_v43, %v8470_v43  ;;  %v4845_v29 = vpack.i.bf16 %v8472_v52, %v8472_v52 }
 0x3b3   : > { %v4881_v57 = vmax.f32 %v4879_v13, %v4880_v30  ;;  %v4892_v61 = vmax.f32 %v4890_v25, %v4891_v17  ;;  %v4858_v54 = vpack.i.bf16 %v8480_v3, %v8480_v3  ;;  %v4871_v40 = vpack.i.bf16 %v8482_v33, %v8482_v33 }
 0x3b4   : > { %v3149_v21 = vcombine.high %v3141_v11, %v3141_v11  ;;  %v3150_v38 = vcombine.high %v3148_v44, %v3148_v44  ;;  %v3157_v51 = vrot.slane %v3141_v11, %v7406_v24  ;;  %v3164_v48 = vrot.slane %v3148_v44, %v7406_v24 }
 0x3b5   : > { %v4882_v60 = vrot.slane %v4881_v57, 1  ;;  %v4893_v6 = vrot.slane %v4892_v61, 2 }
 0x3b6   : > { %v3171_v8 = vrot.slane %v3149_v21, %v7406_v24  ;;  %v3178_v47 = vrot.slane %v3150_v38, %v7406_v24  ;;  %v3179_v62 = vcombine.high %v3157_v51, %v3157_v51  ;;  %v4691_v7 = vsel %vm3232_vm2, %v3157_v51, 4286644096 }
 0x3b7   : > { %v8496_v19 = vmax.f32 %v4881_v57, %v4882_v60  ;;  %v3180_v59 = vcombine.high %v3164_v48, %v3164_v48  ;;  %v4693_v56 = vunpack.i.l.bf16 %v4691_v7  ;;  %v4743_v35 = vsel %vm3232_vm2, %v3164_v48, 4286644096 }
 0x3b8   : > { %v3181_v0 = vcombine.high %v3171_v8, %v3171_v8  ;;  %v8500_v49 = vmax.f32 %v4892_v61, %v4893_v6  ;;  %v4694_v34 = vunpack.i.h.bf16 %v4691_v7  ;;  %v4704_v24 = vsel %vm3232_vm2, %v3171_v8, 4286644096 }
 0x3b9   : > { %v4717_v26 = vsel %vm3232_vm2, %v3179_v62, 4286644096  ;;  %v3182_v42 = vcombine.high %v3178_v47, %v3178_v47  ;;  %v4706_v39 = vunpack.i.l.bf16 %v4704_v24  ;;  %v4707_v36 = vunpack.i.h.bf16 %v4704_v24 }
 0x3ba   : > { %v4719_v50 = vunpack.i.l.bf16 %v4717_v26  ;;  %v4695_v55 = vmax.f32 %v4693_v56, %v4694_v34  ;;  %v4720_v58 = vunpack.i.h.bf16 %v4717_v26  ;;  %v4730_v37 = vsel %vm3232_vm2, %v3181_v0, 4286644096 }
 0x3bb   : > { %v4745_v27 = vunpack.i.l.bf16 %v4743_v35  ;;  %v4884_v12 = vpack.i.bf16 %v8496_v19, %v8496_v19  ;;  %v4708_v20 = vmax.f32 %v4706_v39, %v4707_v36  ;;  %v4732_v53 = vunpack.i.l.bf16 %v4730_v37 }
 0x3bc   : > { %v4733_v63 = vunpack.i.h.bf16 %v4730_v37  ;;  %v4696_v2 = vrot.slane %v4695_v55, 4  ;;  %v4721_v18 = vmax.f32 %v4719_v50, %v4720_v58  ;;  %v4746_v23 = vunpack.i.h.bf16 %v4743_v35 }
 0x3bd   : > { %v4756_v28 = vsel %vm3232_vm2, %v3178_v47, 4286644096  ;;  %v4895_v41 = vrot.slane %v8500_v49, 1  ;;  %v4709_v14 = vrot.slane %v4708_v20, 4  ;;  %v4769_v17 = vsel %vm3232_vm2, %v3180_v59, 4286644096 }
 0x3be   : > { %v4734_v1 = vmax.f32 %v4732_v53, %v4733_v63  ;;  %v4758_v5 = vunpack.i.l.bf16 %v4756_v28  ;;  %v4697_v46 = vmax.f32 %v4695_v55, %v4696_v2  ;;  %v4722_v13 = vrot.slane %v4721_v18, 4 }
 0x3bf   : > { %v4747_v25 = vmax.f32 %v4745_v27, %v4746_v23  ;;  %v4759_v15 = vunpack.i.h.bf16 %v4756_v28  ;;  %v4710_v32 = vmax.f32 %v4708_v20, %v4709_v14  ;;  %v4782_v11 = vsel %vm3232_vm2, %v3182_v42, 4286644096 }
 0x3c0   : > { %v4735_v30 = vrot.slane %v4734_v1, 4  ;;  %v4698_v44 = vrot.slane %v4697_v46, 2  ;;  %v4723_v57 = vmax.f32 %v4721_v18, %v4722_v13  ;;  %v4771_v60 = vunpack.i.l.bf16 %v4769_v17 }
 0x3c1   : > { %v4748_v61 = vrot.slane %v4747_v25, 4  ;;  %v4760_v21 = vmax.f32 %v4758_v5, %v4759_v15  ;;  %v4711_v38 = vrot.slane %v4710_v32, 2  ;;  %v4772_v48 = vunpack.i.h.bf16 %v4769_v17 }
 0x3c2   : > { %v4736_v51 = vmax.f32 %v4734_v1, %v4735_v30  ;;  %v4699_v6 = vmax.f32 %v4697_v46, %v4698_v44  ;;  %v4724_v8 = vrot.slane %v4723_v57, 2  ;;  %v4784_v35 = vunpack.i.l.bf16 %v4782_v11 }
 0x3c3   : > { %v4749_v47 = vmax.f32 %v4747_v25, %v4748_v61  ;;  %v4761_v62 = vrot.slane %v4760_v21, 4  ;;  %v4712_v7 = vmax.f32 %v4710_v32, %v4711_v38  ;;  %v4773_v56 = vmax.f32 %v4771_v60, %v4772_v48 }
 0x3c4   : > { %v4737_v0 = vrot.slane %v4736_v51, 2  ;;  %v4700_v34 = vrot.slane %v4699_v6, 1  ;;  %v4725_v59 = vmax.f32 %v4723_v57, %v4724_v8  ;;  %v4785_v50 = vunpack.i.h.bf16 %v4782_v11 }
 0x3c5   : > { %v4750_v24 = vrot.slane %v4749_v47, 2  ;;  %v4762_v26 = vmax.f32 %v4760_v21, %v4761_v62  ;;  %v4713_v42 = vrot.slane %v4712_v7, 1  ;;  %v4774_v36 = vrot.slane %v4773_v56, 4 }
 0x3c6   : > { %v4738_v39 = vmax.f32 %v4736_v51, %v4737_v0  ;;  %v4701_v55 = vmax.f32 %v4699_v6, %v4700_v34  ;;  %v4726_v58 = vrot.slane %v4725_v59, 1  ;;  %v4786_v2 = vmax.f32 %v4784_v35, %v4785_v50 }
 0x3c7   : > { %v4751_v37 = vmax.f32 %v4749_v47, %v4750_v24  ;;  %v4763_v27 = vrot.slane %v4762_v26, 2  ;;  %v4714_v20 = vmax.f32 %v4712_v7, %v4713_v42  ;;  %v4775_v63 = vmax.f32 %v4773_v56, %v4774_v36 }
 0x3c8   : > { %v4739_v53 = vrot.slane %v4738_v39, 1  ;;  %v4702_v18 = vpack.i.bf16 %v4701_v55, %v4701_v55  ;;  %v4727_v23 = vmax.f32 %v4725_v59, %v4726_v58  ;;  %v4787_v13 = vrot.slane %v4786_v2, 4 }
 0x3c9   : > { %v4752_v28 = vrot.slane %v4751_v37, 1  ;;  %v4764_v14 = vmax.f32 %v4762_v26, %v4763_v27  ;;  %v4715_v1 = vpack.i.bf16 %v4714_v20, %v4714_v20  ;;  %v4776_v46 = vrot.slane %v4775_v63, 2 }
 0x3ca   : > { %v4740_v5 = vmax.f32 %v4738_v39, %v4739_v53  ;;  %v4728_v25 = vpack.i.bf16 %v4727_v23, %v4727_v23  ;;  %v4954_v30 = vmax.bf16 %v4806_v45, %v4702_v18  ;;  %v4788_v44 = vmax.f32 %v4786_v2, %v4787_v13 }
 0x3cb   : > { %v4753_v15 = vmax.f32 %v4751_v37, %v4752_v28  ;;  %v4765_v32 = vrot.slane %v4764_v14, 1  ;;  %v4777_v11 = vmax.f32 %v4775_v63, %v4776_v46  ;;  %v4955_v57 = vmax.bf16 %v4819_v10, %v4715_v1 }
 0x3cc   : > { %v4741_v17 = vpack.i.bf16 %v4740_v5, %v4740_v5  ;;  %v4956_v38 = vmax.bf16 %v4832_v16, %v4728_v25  ;;  %v5082_v51 = vunpack.c.l.b16 %v4954_v30  ;;  %v4789_v48 = vrot.slane %v4788_v44, 2 }
 0x3cd   : > { %v4754_v61 = vpack.i.bf16 %v4753_v15, %v4753_v15  ;;  %v4766_v21 = vmax.f32 %v4764_v14, %v4765_v32  ;;  %v4778_v60 = vrot.slane %v4777_v11, 1  ;;  %v5083_v45 = vunpack.c.l.b16 %v4955_v57 }
 0x3ce   : > { %v4957_v31 = vmax.bf16 %v4845_v29, %v4741_v17  ;;  %v4896_v6 = vmax.f32 %v8500_v49, %v4895_v41  ;;  %v5084_v8 = vunpack.c.l.b16 %v4956_v38  ;;  %v4790_v16 = vmax.f32 %v4788_v44, %v4789_v48 }
 0x3cf   : > { %v4767_v22 = vpack.i.bf16 %v4766_v21, %v4766_v21  ;;  %v4958_v10 = vmax.bf16 %v4858_v54, %v4754_v61  ;;  %v4779_v43 = vmax.f32 %v4777_v11, %v4778_v60  ;;  %v5146_v62 = vsel %vm5090_vm8, %v5083_v45, %v5082_v51 }
 0x3d0   : > { %v5085_v47 = vunpack.c.l.b16 %v4957_v31  ;;  %v5147_v7 = vsel %vm5092_vm9, %v5084_v8, %v5146_v62  ;;  %v4791_v49 = vrot.slane %v4790_v16, 1  ;;  %v4897_v54 = vpack.i.bf16 %v4896_v6, %v4896_v6 }
 0x3d1   : > { %v4959_v52 = vmax.bf16 %v4871_v40, %v4767_v22  ;;  %v5086_v29 = vunpack.c.l.b16 %v4958_v10  ;;  %v4780_v0 = vpack.i.bf16 %v4779_v43, %v4779_v43 }
 0x3d2   : > { %v5148_v41 = vsel %vm5094_vm10, %v5085_v47, %v5147_v7  ;;  %v4792_v35 = vmax.f32 %v4790_v16, %v4791_v49 }
 0x3d3   : > { %v5087_v56 = vunpack.c.l.b16 %v4959_v52  ;;  %v5149_v3 = vsel %vm5096_vm11, %v5086_v29, %v5148_v41  ;;  %v4960_v34 = vmax.bf16 %v4884_v12, %v4780_v0 }
 0x3d4   : > { %v4793_v33 = vpack.i.bf16 %v4792_v35, %v4792_v35 }
 0x3d5   : > { %v5150_v59 = vsel %vm5098_vm12, %v5087_v56, %v5149_v3  ;;  %v5088_v40 = vunpack.c.l.b16 %v4960_v34 }
 0x3d6   : > { %v4961_v24 = vmax.bf16 %v4897_v54, %v4793_v33 }
 0x3d7   : > { %v5151_v26 = vsel %vm5100_vm13, %v5088_v40, %v5150_v59 }
 0x3d8   : > { %v5089_v42 = vunpack.c.l.b16 %v4961_v24 }
 0x3da   : > { %v5152_v39 = vsel %vm5102_vm14, %v5089_v42, %v5151_v26 }
 0x3db   : > { %v5160_v36 = vpack.c.b16 %v5152_v39, %v5152_v39 }
 0x3dd   : > { %v5218_v50 = vshrl.u32 %v5160_v36, 16  ;;  %v5221_v58 = vshll.u32 %v5160_v36, 16 }
 0x3df   : > { %v5220_v55 = vrot.slane %v5218_v50, 7 }
 0x3e1   : > { %v5223_v37 = vor.u32 %v5221_v58, %v5220_v55 }
 0x3e3   : > { %v5244_v19 = vsel %vm7308_vm4, 0, %v5223_v37 }
 0x3e4   : > { %v5256_v12 = vsel %vm7320_vm7, %v5244_v19, 0 }
 0x3e5   : > { %v5657_v27 = vcombine.low %v5256_v12, %v5256_v12  ;;  %v5658_v20 = vcombine.high %v5256_v12, %v5256_v12 }
 0x3e7   : > { %5336 = vst [vmem:[%s7334_s18 + $0x40] sm:$0xf] %v5657_v27  ;;  %5337 = vst [vmem:[%s7334_s18 + $0x44] sm:$0x1] %v5658_v20 }
 0x3e8 PF: > { %s13_s12 = sadd.s32 1, %s6392_s12  }
 0x3e9   : > { %p10_p4 = scmp.ge.s32.totalorder %s13_s12, 4  }
 0x3eb   :  { %12 = sbr.rel (!%p10_p4) target bundleno = 1 (0x1), region = 64 }

</bundles_post_ra>
